<compile_context>
chip_gen: v5e
topology: v5e:2x2
jax: 0.10.0
libtpu: 0.0.40
codegen_flags: <defaults>
</compile_context>

<pallas_src>
import math

import jax
import jax.numpy as jnp
from jax.experimental import pallas as pl
from jax.experimental.pallas import tpu as pltpu

# ---------------- configuration (cfg.model_parameters.*, small & consistent) ----------------
BATCH    = 4                     # episode / batch size
CHANNELS = 8                     # eeg_channel
SEQ_LEN  = 16                    # seq_len
D_MODEL  = 32                    # d_model
N_HEAD   = 4                     # num_heads
D_HEAD   = D_MODEL // N_HEAD
D_HID    = 64                    # d_hidden (FFN width)
N_LAYERS = 2                     # n_layers
ROWS     = BATCH * SEQ_LEN       # 64 rows -> multiple of 8 sublanes, d_model on the lane axis
LN_EPS   = 1e-5
NEG_INF  = -1e9                  # additive mask value (every row always attends to its own block)

WCOLS = max(D_MODEL, D_HID)            # lane width of the packed bf16 weight buffer  (64)
PCOLS = max(D_MODEL, D_HID, ROWS)      # lane width of the packed f32 param buffer    (64)


# ---------------- packed-buffer layouts (static Python ints, shared by packer & kernel) -------
def _build_weight_layout():
    """bf16 weight slab: blocks stacked on the sublane axis, 16-row aligned (bf16 packing)."""
    off, rows = {}, 0

    def alloc(key, nrows, align=16):
        nonlocal rows
        off[key] = rows
        rows += -(-nrows // align) * align

    alloc("emb", CHANNELS)                             # [C, D]
    for l in range(N_LAYERS):
        for hh in range(N_HEAD):                       # per-head, lane-0-aligned blocks
            alloc(("wq", l, hh), D_MODEL)              # [D, Dh]
            alloc(("wk", l, hh), D_MODEL)              # [D, Dh]
            alloc(("wv", l, hh), D_MODEL)              # [D, Dh]
        for hh in range(N_HEAD):
            alloc(("wo", l, hh), D_HEAD)               # [Dh, D]
        alloc(("ff1", l), D_MODEL)                     # [D, H]
        alloc(("ff2", l), D_HID)                       # [H, D]
    return off, rows


def _build_param_layout():
    """f32 small-param slab (PE, mask bias, biases, LayerNorm params), 8-row aligned."""
    off, rows = {}, 0

    def alloc(key, nrows, align=8):
        nonlocal rows
        off[key] = rows
        rows += -(-nrows // align) * align

    alloc("pe", SEQ_LEN)                               # [S, D]
    alloc("mask", ROWS)                                # [ROWS, ROWS] additive bias
    alloc("b_emb", 1)                                  # [1, D]
    for l in range(N_LAYERS):
        alloc(("bqkv", l), 3 * N_HEAD)                 # rows: bq_h (0..3), bk_h (4..7), bv_h (8..11)
        alloc(("b_o", l), 1)                           # [1, D]
        alloc(("ln1", l), 2)                           # row 0 = gamma, row 1 = beta
        alloc(("b_ff1", l), 1)                         # [1, H]
        alloc(("b_ff2", l), 1)                         # [1, D]
        alloc(("ln2", l), 2)
    return off, rows


W_OFF, W_ROWS = _build_weight_layout()
P_OFF, P_ROWS = _build_param_layout()


def _layer_norm(x, w, b):
    """LayerNorm over the last (d_model) axis, f32."""
    mu = jnp.mean(x, axis=-1, keepdims=True)
    xc = x - mu
    var = jnp.mean(xc * xc, axis=-1, keepdims=True)
    return xc * jax.lax.rsqrt(var + LN_EPS) * w + b


# ------------------------------------ fused Pallas kernel ------------------------------------
def transformer_kernel(x_ref, w_ref, p_ref, out_ref):
    """Entire AttentionTransformer forward in one launch on a [ROWS, D_MODEL] slab."""
    f32, bf16 = jnp.float32, jnp.bfloat16

    def wslice(key, nrows, ncols):                         # bf16 weight block (static slice)
        r = W_OFF[key]
        return w_ref[r:r + nrows, 0:ncols]

    def pslice(key, nrows, ncols, row_extra=0):            # f32 small-param block (static slice)
        r = P_OFF[key] + row_extra
        return p_ref[r:r + nrows, 0:ncols]

    # ---- input embedding: contract the channel axis in-kernel (trans_a dot), add PE ----
    w_emb = wslice("emb", CHANNELS, D_MODEL)               # [C, D] bf16
    b_emb = pslice("b_emb", 1, D_MODEL)                    # [1, D] f32
    pe    = pslice("pe", SEQ_LEN, D_MODEL)                 # [S, D] f32
    emb_scale = math.sqrt(D_MODEL)
    blocks = []
    for b in range(BATCH):                                 # static unroll over samples
        xb = x_ref[b].astype(bf16)                         # [C, S]
        hb = jax.lax.dot_general(xb, w_emb, (((0,), (0,)), ((), ())),
                                 preferred_element_type=f32)   # [S, D]
        blocks.append((hb + b_emb) * emb_scale + pe)
    h = jnp.concatenate(blocks, axis=0)                    # [ROWS, D] f32 (sublane concat, aligned)

    # block-diagonal additive mask bias (precomputed on host, DMA'd with the param slab)
    mask_bias = pslice("mask", ROWS, ROWS)                 # [ROWS, ROWS] f32 (0 / -1e9)

    inv_sqrt_dh = 1.0 / math.sqrt(D_HEAD)
    for l in range(N_LAYERS):                              # static unroll over encoder layers
        # ---- multi-head self attention: per-head matmuls, no lane relayouts ----
        h_bf = h.astype(bf16)
        attn = None
        for hh in range(N_HEAD):                           # static unroll over heads (vregs only)
            wq = wslice(("wq", l, hh), D_MODEL, D_HEAD)    # [D, Dh] bf16, lane-0 aligned
            wk = wslice(("wk", l, hh), D_MODEL, D_HEAD)
            wv = wslice(("wv", l, hh), D_MODEL, D_HEAD)
            wo = wslice(("wo", l, hh), D_HEAD, D_MODEL)    # [Dh, D] bf16
            bq = pslice(("bqkv", l), 1, D_HEAD, row_extra=hh)
            bk = pslice(("bqkv", l), 1, D_HEAD, row_extra=N_HEAD + hh)
            bv = pslice(("bqkv", l), 1, D_HEAD, row_extra=2 * N_HEAD + hh)

            q = jnp.dot(h_bf, wq, preferred_element_type=f32) + bq      # [ROWS, Dh] f32
            k = jnp.dot(h_bf, wk, preferred_element_type=f32) + bk
            v = jnp.dot(h_bf, wv, preferred_element_type=f32) + bv

            s = jax.lax.dot_general(q.astype(bf16), k.astype(bf16),
                                    (((1,), (1,)), ((), ())),
                                    preferred_element_type=f32)          # [ROWS, ROWS]
            s = s * inv_sqrt_dh + mask_bias
            m = jnp.max(s, axis=-1, keepdims=True)
            e = jnp.exp(s - m)
            probs = e * pl.reciprocal(jnp.sum(e, axis=-1, keepdims=True), approx=True)

            ctx = jnp.dot(probs.astype(bf16), v.astype(bf16),
                          preferred_element_type=f32)                    # [ROWS, Dh]
            o = jnp.dot(ctx.astype(bf16), wo, preferred_element_type=f32)  # [ROWS, D]
            attn = o if attn is None else attn + o                       # per-head accumulation
        attn = attn + pslice(("b_o", l), 1, D_MODEL)
        h = _layer_norm(h + attn,
                        pslice(("ln1", l), 1, D_MODEL),
                        pslice(("ln1", l), 1, D_MODEL, row_extra=1))

        # ---- feed forward (ReLU) ----
        ff = jnp.dot(h.astype(bf16), wslice(("ff1", l), D_MODEL, D_HID),
                     preferred_element_type=f32) + pslice(("b_ff1", l), 1, D_HID)
        ff = jnp.maximum(ff, 0.0)
        ff = jnp.dot(ff.astype(bf16), wslice(("ff2", l), D_HID, D_MODEL),
                     preferred_element_type=f32) + pslice(("b_ff2", l), 1, D_MODEL)
        h = _layer_norm(h + ff,
                        pslice(("ln2", l), 1, D_MODEL),
                        pslice(("ln2", l), 1, D_MODEL, row_extra=1))

    out_ref[...] = h


# ------------------------------------ wrapper ------------------------------------
def sfa_feature_extractor_forward(wbuf, pbuf, x):
    """x: [BATCH, CHANNELS, SEQ_LEN] raw EEG -> features [BATCH, SEQ_LEN, D_MODEL]."""
    out = pl.pallas_call(
        transformer_kernel,
        out_shape=jax.ShapeDtypeStruct((ROWS, D_MODEL), jnp.float32),
        grid=(1,),
        in_specs=[
            pl.BlockSpec((BATCH, CHANNELS, SEQ_LEN), lambda i: (0, 0, 0)),
            pl.BlockSpec((W_ROWS, WCOLS), lambda i: (0, 0)),
            pl.BlockSpec((P_ROWS, PCOLS), lambda i: (0, 0)),
        ],
        out_specs=pl.BlockSpec((ROWS, D_MODEL), lambda i: (0, 0)),
        compiler_params=pltpu.CompilerParams(dimension_semantics=("arbitrary",)),
    )(x, wbuf, pbuf)
    return out.reshape(BATCH, SEQ_LEN, D_MODEL)   # no-copy leading-dim split


# ------------------------------------ host-side packing (once, weights are frozen) -----------
def pack_params(params):
    """Pack all frozen parameters into two contiguous HBM buffers (bf16 weights + f32 params)."""
    wbuf = jnp.zeros((W_ROWS, WCOLS), jnp.float32)

    def put_w(buf, key, mat):
        r = W_OFF[key]
        return buf.at[r:r + mat.shape[0], 0:mat.shape[1]].set(mat)

    wbuf = put_w(wbuf, "emb", params["w_emb"])
    for l in range(N_LAYERS):
        for hh in range(N_HEAD):
            sl = slice(hh * D_HEAD, (hh + 1) * D_HEAD)
            wbuf = put_w(wbuf, ("wq", l, hh), params["w_q"][l][:, sl])
            wbuf = put_w(wbuf, ("wk", l, hh), params["w_k"][l][:, sl])
            wbuf = put_w(wbuf, ("wv", l, hh), params["w_v"][l][:, sl])
            wbuf = put_w(wbuf, ("wo", l, hh), params["w_o"][l][sl, :])
        wbuf = put_w(wbuf, ("ff1", l), params["w_ff1"][l])
        wbuf = put_w(wbuf, ("ff2", l), params["w_ff2"][l])

    pbuf = jnp.zeros((P_ROWS, PCOLS), jnp.float32)

    def put_p(buf, key, mat):
        r = P_OFF[key]
        return buf.at[r:r + mat.shape[0], 0:mat.shape[1]].set(mat)

    sample = jnp.arange(ROWS, dtype=jnp.int32) // SEQ_LEN
    mask_bias = jnp.where(sample[:, None] == sample[None, :], 0.0, NEG_INF).astype(jnp.float32)

    pbuf = put_p(pbuf, "pe", params["pe"])
    pbuf = put_p(pbuf, "mask", mask_bias)
    pbuf = put_p(pbuf, "b_emb", params["b_emb"][None, :])
    for l in range(N_LAYERS):
        bqkv = jnp.concatenate([params["b_q"][l].reshape(N_HEAD, D_HEAD),
                                params["b_k"][l].reshape(N_HEAD, D_HEAD),
                                params["b_v"][l].reshape(N_HEAD, D_HEAD)], axis=0)
        pbuf = put_p(pbuf, ("bqkv", l), bqkv)
        pbuf = put_p(pbuf, ("b_o", l), params["b_o"][l][None, :])
        pbuf = put_p(pbuf, ("ln1", l), jnp.stack([params["ln1_w"][l], params["ln1_b"][l]]))
        pbuf = put_p(pbuf, ("b_ff1", l), params["b_ff1"][l][None, :])
        pbuf = put_p(pbuf, ("b_ff2", l), params["b_ff2"][l][None, :])
        pbuf = put_p(pbuf, ("ln2", l), jnp.stack([params["ln2_w"][l], params["ln2_b"][l]]))

    return wbuf.astype(jnp.bfloat16), pbuf


# ------------------------------------ plain-JAX glue ------------------------------------
def sinusoidal_pe(seq_len, d_model):
    pos = jnp.arange(seq_len, dtype=jnp.float32)[:, None]
    i = jnp.arange(0, d_model, 2, dtype=jnp.float32)[None, :]
    ang = pos * jnp.exp(-math.log(10000.0) * i / d_model)
    pe = jnp.zeros((seq_len, d_model), jnp.float32)
    pe = pe.at[:, 0::2].set(jnp.sin(ang))
    pe = pe.at[:, 1::2].set(jnp.cos(ang))
    return pe


def init_params(key):
    ks = jax.random.split(key, 14)
    nrm = lambda k, shp, s=0.1: jax.random.normal(k, shp, jnp.float32) * s
    L, D, H, C = N_LAYERS, D_MODEL, D_HID, CHANNELS
    return {
        "pe": sinusoidal_pe(SEQ_LEN, D),
        "w_emb": nrm(ks[0], (C, D)), "b_emb": nrm(ks[1], (D,)),
        "w_q": nrm(ks[2], (L, D, D)), "b_q": nrm(ks[3], (L, D)),
        "w_k": nrm(ks[4], (L, D, D)), "b_k": nrm(ks[5], (L, D)),
        "w_v": nrm(ks[6], (L, D, D)), "b_v": nrm(ks[7], (L, D)),
        "w_o": nrm(ks[8], (L, D, D)), "b_o": nrm(ks[9], (L, D)),
        "ln1_w": jnp.ones((L, D), jnp.float32), "ln1_b": jnp.zeros((L, D), jnp.float32),
        "w_ff1": nrm(ks[10], (L, D, H)), "b_ff1": nrm(ks[11], (L, H)),
        "w_ff2": nrm(ks[12], (L, H, D)), "b_ff2": nrm(ks[13], (L, D)),
        "ln2_w": jnp.ones((L, D), jnp.float32), "ln2_b": jnp.zeros((L, D), jnp.float32),
    }


def reference_forward(params, x):
    """Pure-JAX reference of the same forward (f32 weights, HIGHEST matmul precision)."""
    hp = jax.lax.Precision.HIGHEST
    h = jnp.transpose(x, (0, 2, 1)).reshape(ROWS, CHANNELS)
    h = (jnp.dot(h, params["w_emb"], precision=hp) + params["b_emb"]) * math.sqrt(D_MODEL)
    h = h.reshape(BATCH, SEQ_LEN, D_MODEL) + params["pe"][None]
    for l in range(N_LAYERS):
        def proj(w, b):
            return jnp.einsum('bsd,df->bsf', h, w[l], precision=hp) + b[l]
        q, k, v = proj(params["w_q"], params["b_q"]), proj(params["w_k"], params["b_k"]), \
                  proj(params["w_v"], params["b_v"])
        heads = lambda t: t.reshape(BATCH, SEQ_LEN, N_HEAD, D_HEAD).transpose(0, 2, 1, 3)
        qh, kh, vh = heads(q), heads(k), heads(v)
        s = jnp.einsum('bhqd,bhkd->bhqk', qh, kh, precision=hp) / math.sqrt(D_HEAD)
        probs = jax.nn.softmax(s, axis=-1)
        ctx = jnp.einsum('bhqk,bhkd->bhqd', probs, vh, precision=hp)
        ctx = ctx.transpose(0, 2, 1, 3).reshape(BATCH, SEQ_LEN, D_MODEL)
        attn = jnp.einsum('bsd,df->bsf', ctx, params["w_o"][l], precision=hp) + params["b_o"][l]
        h = _layer_norm(h + attn, params["ln1_w"][l], params["ln1_b"][l])
        ff = jnp.einsum('bsd,df->bsf', h, params["w_ff1"][l], precision=hp) + params["b_ff1"][l]
        ff = jnp.maximum(ff, 0.0)
        ff = jnp.einsum('bsd,df->bsf', ff, params["w_ff2"][l], precision=hp) + params["b_ff2"][l]
        h = _layer_norm(h + ff, params["ln2_w"][l], params["ln2_b"][l])
    return h


# ------------------------------------------ main ------------------------------------------
if __name__ == "__main__":
    key = jax.random.PRNGKey(0)
    k_params, k_x = jax.random.split(key)
    params = init_params(k_params)
    x = jax.random.normal(k_x, (BATCH, CHANNELS, SEQ_LEN), jnp.float32)

    # frozen weights -> two packed HBM buffers (done once, amortized across all forward calls)
    wbuf, pbuf = pack_params(params)
    jax.block_until_ready((wbuf, pbuf))

    feats = sfa_feature_extractor_forward(wbuf, pbuf, x)
    jax.block_until_ready(feats)

    assert feats.shape == (BATCH, SEQ_LEN, D_MODEL)
    assert bool(jnp.all(jnp.isfinite(feats)))

    ref = reference_forward(params, x)
    max_err = float(jnp.max(jnp.abs(feats - ref)))
    assert max_err < 1e-1, f"mismatch vs pure-JAX reference: {max_err}"

    print("KERNEL_OK")
</pallas_src>

<mosaic_0001>
module attributes {stable_mosaic.version = 11 : i64} {
  func.func @transformer_kernel(%arg0: i32, %arg1: memref<4x8x16xf32, #tpu.memory_space<vmem>>, %arg2: memref<1104x64xbf16, #tpu.memory_space<vmem>>, %arg3: memref<200x64xf32, #tpu.memory_space<vmem>>, %arg4: memref<64x32xf32, #tpu.memory_space<vmem>>) attributes {dimension_semantics = [#tpu.dimension_semantics<arbitrary>], iteration_bounds = array<i64: 1>, scalar_prefetch = 0 : i64, scratch_operands = 0 : i64, tpu.core_type = #tpu.core_type<tc>, window_params = [{pipeline_mode = #tpu.pipeline_mode<synchronous>, transform_indices = @transform_0, window_bounds = array<i64: 4, 8, 16>}, {pipeline_mode = #tpu.pipeline_mode<synchronous>, transform_indices = @transform_1, window_bounds = array<i64: 1104, 64>}, {pipeline_mode = #tpu.pipeline_mode<synchronous>, transform_indices = @transform_2, window_bounds = array<i64: 200, 64>}, {pipeline_mode = #tpu.pipeline_mode<synchronous>, transform_indices = @transform_3, window_bounds = array<i64: 64, 32>}]} {
    %c0 = arith.constant 0 : index
    %c0_0 = arith.constant 0 : index
    %0 = vector.load %arg2[%c0, %c0_0] : memref<1104x64xbf16, #tpu.memory_space<vmem>>, vector<8x32xbf16>
    %c80 = arith.constant 80 : index
    %c0_1 = arith.constant 0 : index
    %1 = vector.load %arg3[%c80, %c0_1] : memref<200x64xf32, #tpu.memory_space<vmem>>, vector<1x32xf32>
    %c0_2 = arith.constant 0 : index
    %c0_3 = arith.constant 0 : index
    %2 = vector.load %arg3[%c0_2, %c0_3] : memref<200x64xf32, #tpu.memory_space<vmem>>, vector<16x32xf32>
    %c0_4 = arith.constant 0 : index
    %c0_5 = arith.constant 0 : index
    %c0_6 = arith.constant 0 : index
    %3 = vector.load %arg1[%c0_4, %c0_5, %c0_6] : memref<4x8x16xf32, #tpu.memory_space<vmem>>, vector<1x8x16xf32>
    %4 = vector.shape_cast %3 : vector<1x8x16xf32> to vector<8x16xf32>
    %5 = arith.truncf %4 : vector<8x16xf32> to vector<8x16xbf16>
    %cst = arith.constant dense<0.000000e+00> : vector<16x32xf32>
    %6 = tpu.matmul %5, %0, %cst {dimension_numbers = #tpu.dot_dimension_numbers<[0], [0], [1], [1], [0, 1, 1, 1], [], []>} : vector<8x16xbf16>, vector<8x32xbf16>, vector<16x32xf32> -> vector<16x32xf32>
    %7 = vector.broadcast %1 : vector<1x32xf32> to vector<16x32xf32>
    %8 = arith.addf %6, %7 : vector<16x32xf32>
    %cst_7 = arith.constant 5.65685415 : f32
    %9 = vector.broadcast %cst_7 : f32 to vector<16x32xf32>
    %10 = arith.mulf %8, %9 : vector<16x32xf32>
    %11 = arith.addf %10, %2 : vector<16x32xf32>
    %c1 = arith.constant 1 : index
    %c0_8 = arith.constant 0 : index
    %c0_9 = arith.constant 0 : index
    %12 = vector.load %arg1[%c1, %c0_8, %c0_9] : memref<4x8x16xf32, #tpu.memory_space<vmem>>, vector<1x8x16xf32>
    %13 = vector.shape_cast %12 : vector<1x8x16xf32> to vector<8x16xf32>
    %14 = arith.truncf %13 : vector<8x16xf32> to vector<8x16xbf16>
    %cst_10 = arith.constant dense<0.000000e+00> : vector<16x32xf32>
    %15 = tpu.matmul %14, %0, %cst_10 {dimension_numbers = #tpu.dot_dimension_numbers<[0], [0], [1], [1], [0, 1, 1, 1], [], []>} : vector<8x16xbf16>, vector<8x32xbf16>, vector<16x32xf32> -> vector<16x32xf32>
    %16 = vector.broadcast %1 : vector<1x32xf32> to vector<16x32xf32>
    %17 = arith.addf %15, %16 : vector<16x32xf32>
    %cst_11 = arith.constant 5.65685415 : f32
    %18 = vector.broadcast %cst_11 : f32 to vector<16x32xf32>
    %19 = arith.mulf %17, %18 : vector<16x32xf32>
    %20 = arith.addf %19, %2 : vector<16x32xf32>
    %c2 = arith.constant 2 : index
    %c0_12 = arith.constant 0 : index
    %c0_13 = arith.constant 0 : index
    %21 = vector.load %arg1[%c2, %c0_12, %c0_13] : memref<4x8x16xf32, #tpu.memory_space<vmem>>, vector<1x8x16xf32>
    %22 = vector.shape_cast %21 : vector<1x8x16xf32> to vector<8x16xf32>
    %23 = arith.truncf %22 : vector<8x16xf32> to vector<8x16xbf16>
    %cst_14 = arith.constant dense<0.000000e+00> : vector<16x32xf32>
    %24 = tpu.matmul %23, %0, %cst_14 {dimension_numbers = #tpu.dot_dimension_numbers<[0], [0], [1], [1], [0, 1, 1, 1], [], []>} : vector<8x16xbf16>, vector<8x32xbf16>, vector<16x32xf32> -> vector<16x32xf32>
    %25 = vector.broadcast %1 : vector<1x32xf32> to vector<16x32xf32>
    %26 = arith.addf %24, %25 : vector<16x32xf32>
    %cst_15 = arith.constant 5.65685415 : f32
    %27 = vector.broadcast %cst_15 : f32 to vector<16x32xf32>
    %28 = arith.mulf %26, %27 : vector<16x32xf32>
    %29 = arith.addf %28, %2 : vector<16x32xf32>
    %c3 = arith.constant 3 : index
    %c0_16 = arith.constant 0 : index
    %c0_17 = arith.constant 0 : index
    %30 = vector.load %arg1[%c3, %c0_16, %c0_17] : memref<4x8x16xf32, #tpu.memory_space<vmem>>, vector<1x8x16xf32>
    %31 = vector.shape_cast %30 : vector<1x8x16xf32> to vector<8x16xf32>
    %32 = arith.truncf %31 : vector<8x16xf32> to vector<8x16xbf16>
    %cst_18 = arith.constant dense<0.000000e+00> : vector<16x32xf32>
    %33 = tpu.matmul %32, %0, %cst_18 {dimension_numbers = #tpu.dot_dimension_numbers<[0], [0], [1], [1], [0, 1, 1, 1], [], []>} : vector<8x16xbf16>, vector<8x32xbf16>, vector<16x32xf32> -> vector<16x32xf32>
    %34 = vector.broadcast %1 : vector<1x32xf32> to vector<16x32xf32>
    %35 = arith.addf %33, %34 : vector<16x32xf32>
    %cst_19 = arith.constant 5.65685415 : f32
    %36 = vector.broadcast %cst_19 : f32 to vector<16x32xf32>
    %37 = arith.mulf %35, %36 : vector<16x32xf32>
    %38 = arith.addf %37, %2 : vector<16x32xf32>
    %39 = tpu.concatenate %11, %20, %29, %38 in 0 : vector<16x32xf32>, vector<16x32xf32>, vector<16x32xf32>, vector<16x32xf32> -> vector<64x32xf32>
    %c16 = arith.constant 16 : index
    %c0_20 = arith.constant 0 : index
    %40 = vector.load %arg3[%c16, %c0_20] : memref<200x64xf32, #tpu.memory_space<vmem>>, vector<64x64xf32>
    %41 = arith.truncf %39 : vector<64x32xf32> to vector<64x32xbf16>
    %c16_21 = arith.constant 16 : index
    %c0_22 = arith.constant 0 : index
    %42 = vector.load %arg2[%c16_21, %c0_22] : memref<1104x64xbf16, #tpu.memory_space<vmem>>, vector<32x8xbf16>
    %c48 = arith.constant 48 : index
    %c0_23 = arith.constant 0 : index
    %43 = vector.load %arg2[%c48, %c0_23] : memref<1104x64xbf16, #tpu.memory_space<vmem>>, vector<32x8xbf16>
    %c80_24 = arith.constant 80 : index
    %c0_25 = arith.constant 0 : index
    %44 = vector.load %arg2[%c80_24, %c0_25] : memref<1104x64xbf16, #tpu.memory_space<vmem>>, vector<32x8xbf16>
    %c400 = arith.constant 400 : index
    %c0_26 = arith.constant 0 : index
    %45 = vector.load %arg2[%c400, %c0_26] : memref<1104x64xbf16, #tpu.memory_space<vmem>>, vector<8x32xbf16>
    %c88 = arith.constant 88 : index
    %c0_27 = arith.constant 0 : index
    %46 = vector.load %arg3[%c88, %c0_27] : memref<200x64xf32, #tpu.memory_space<vmem>>, vector<1x8xf32>
    %c92 = arith.constant 92 : index
    %c0_28 = arith.constant 0 : index
    %47 = vector.load %arg3[%c92, %c0_28] : memref<200x64xf32, #tpu.memory_space<vmem>>, vector<1x8xf32>
    %c96 = arith.constant 96 : index
    %c0_29 = arith.constant 0 : index
    %48 = vector.load %arg3[%c96, %c0_29] : memref<200x64xf32, #tpu.memory_space<vmem>>, vector<1x8xf32>
    %cst_30 = arith.constant dense<0.000000e+00> : vector<64x8xf32>
    %49 = tpu.matmul %41, %42, %cst_30 {dimension_numbers = #tpu.dot_dimension_numbers<[1], [0], [0], [1], [0, 0, 1, 1], [], []>} : vector<64x32xbf16>, vector<32x8xbf16>, vector<64x8xf32> -> vector<64x8xf32>
    %50 = vector.broadcast %46 : vector<1x8xf32> to vector<64x8xf32>
    %51 = arith.addf %49, %50 : vector<64x8xf32>
    %cst_31 = arith.constant dense<0.000000e+00> : vector<64x8xf32>
    %52 = tpu.matmul %41, %43, %cst_31 {dimension_numbers = #tpu.dot_dimension_numbers<[1], [0], [0], [1], [0, 0, 1, 1], [], []>} : vector<64x32xbf16>, vector<32x8xbf16>, vector<64x8xf32> -> vector<64x8xf32>
    %53 = vector.broadcast %47 : vector<1x8xf32> to vector<64x8xf32>
    %54 = arith.addf %52, %53 : vector<64x8xf32>
    %cst_32 = arith.constant dense<0.000000e+00> : vector<64x8xf32>
    %55 = tpu.matmul %41, %44, %cst_32 {dimension_numbers = #tpu.dot_dimension_numbers<[1], [0], [0], [1], [0, 0, 1, 1], [], []>} : vector<64x32xbf16>, vector<32x8xbf16>, vector<64x8xf32> -> vector<64x8xf32>
    %56 = vector.broadcast %48 : vector<1x8xf32> to vector<64x8xf32>
    %57 = arith.addf %55, %56 : vector<64x8xf32>
    %58 = arith.truncf %51 : vector<64x8xf32> to vector<64x8xbf16>
    %59 = arith.truncf %54 : vector<64x8xf32> to vector<64x8xbf16>
    %cst_33 = arith.constant dense<0.000000e+00> : vector<64x64xf32>
    %60 = tpu.matmul %58, %59, %cst_33 {dimension_numbers = #tpu.dot_dimension_numbers<[1], [1], [0], [0], [0, 0, 1, 0], [], []>} : vector<64x8xbf16>, vector<64x8xbf16>, vector<64x64xf32> -> vector<64x64xf32>
    %cst_34 = arith.constant 0.353553385 : f32
    %61 = vector.broadcast %cst_34 : f32 to vector<64x64xf32>
    %62 = arith.mulf %60, %61 : vector<64x64xf32>
    %63 = arith.addf %62, %40 : vector<64x64xf32>
    %cst_35 = arith.constant dense<0xFF800000> : vector<64xf32>
    %64 = vector.multi_reduction <maximumf>, %63, %cst_35 [1] : vector<64x64xf32> to vector<64xf32>
    %65 = vector.shape_cast %64 : vector<64xf32> to vector<64x1xf32>
    %66 = vector.broadcast %65 : vector<64x1xf32> to vector<64x64xf32>
    %67 = arith.subf %63, %66 : vector<64x64xf32>
    %68 = math.exp %67 : vector<64x64xf32>
    %cst_36 = arith.constant dense<0.000000e+00> : vector<64xf32>
    %69 = vector.multi_reduction <add>, %68, %cst_36 [1] : vector<64x64xf32> to vector<64xf32>
    %70 = vector.shape_cast %69 : vector<64xf32> to vector<64x1xf32>
    %71 = tpu.reciprocal %70 {approx = true} : vector<64x1xf32> -> vector<64x1xf32>
    %72 = vector.broadcast %71 : vector<64x1xf32> to vector<64x64xf32>
    %73 = arith.mulf %68, %72 : vector<64x64xf32>
    %74 = arith.truncf %73 : vector<64x64xf32> to vector<64x64xbf16>
    %75 = arith.truncf %57 : vector<64x8xf32> to vector<64x8xbf16>
    %cst_37 = arith.constant dense<0.000000e+00> : vector<64x8xf32>
    %76 = tpu.matmul %74, %75, %cst_37 {dimension_numbers = #tpu.dot_dimension_numbers<[1], [0], [0], [1], [0, 0, 1, 1], [], []>} : vector<64x64xbf16>, vector<64x8xbf16>, vector<64x8xf32> -> vector<64x8xf32>
    %77 = arith.truncf %76 : vector<64x8xf32> to vector<64x8xbf16>
    %cst_38 = arith.constant dense<0.000000e+00> : vector<64x32xf32>
    %78 = tpu.matmul %77, %45, %cst_38 {dimension_numbers = #tpu.dot_dimension_numbers<[1], [0], [0], [1], [0, 0, 1, 1], [], []>} : vector<64x8xbf16>, vector<8x32xbf16>, vector<64x32xf32> -> vector<64x32xf32>
    %c112 = arith.constant 112 : index
    %c0_39 = arith.constant 0 : index
    %79 = vector.load %arg2[%c112, %c0_39] : memref<1104x64xbf16, #tpu.memory_space<vmem>>, vector<32x8xbf16>
    %c144 = arith.constant 144 : index
    %c0_40 = arith.constant 0 : index
    %80 = vector.load %arg2[%c144, %c0_40] : memref<1104x64xbf16, #tpu.memory_space<vmem>>, vector<32x8xbf16>
    %c176 = arith.constant 176 : index
    %c0_41 = arith.constant 0 : index
    %81 = vector.load %arg2[%c176, %c0_41] : memref<1104x64xbf16, #tpu.memory_space<vmem>>, vector<32x8xbf16>
    %c416 = arith.constant 416 : index
    %c0_42 = arith.constant 0 : index
    %82 = vector.load %arg2[%c416, %c0_42] : memref<1104x64xbf16, #tpu.memory_space<vmem>>, vector<8x32xbf16>
    %c89 = arith.constant 89 : index
    %c0_43 = arith.constant 0 : index
    %83 = vector.load %arg3[%c89, %c0_43] : memref<200x64xf32, #tpu.memory_space<vmem>>, vector<1x8xf32>
    %c93 = arith.constant 93 : index
    %c0_44 = arith.constant 0 : index
    %84 = vector.load %arg3[%c93, %c0_44] : memref<200x64xf32, #tpu.memory_space<vmem>>, vector<1x8xf32>
    %c97 = arith.constant 97 : index
    %c0_45 = arith.constant 0 : index
    %85 = vector.load %arg3[%c97, %c0_45] : memref<200x64xf32, #tpu.memory_space<vmem>>, vector<1x8xf32>
    %cst_46 = arith.constant dense<0.000000e+00> : vector<64x8xf32>
    %86 = tpu.matmul %41, %79, %cst_46 {dimension_numbers = #tpu.dot_dimension_numbers<[1], [0], [0], [1], [0, 0, 1, 1], [], []>} : vector<64x32xbf16>, vector<32x8xbf16>, vector<64x8xf32> -> vector<64x8xf32>
    %87 = vector.broadcast %83 : vector<1x8xf32> to vector<64x8xf32>
    %88 = arith.addf %86, %87 : vector<64x8xf32>
    %cst_47 = arith.constant dense<0.000000e+00> : vector<64x8xf32>
    %89 = tpu.matmul %41, %80, %cst_47 {dimension_numbers = #tpu.dot_dimension_numbers<[1], [0], [0], [1], [0, 0, 1, 1], [], []>} : vector<64x32xbf16>, vector<32x8xbf16>, vector<64x8xf32> -> vector<64x8xf32>
    %90 = vector.broadcast %84 : vector<1x8xf32> to vector<64x8xf32>
    %91 = arith.addf %89, %90 : vector<64x8xf32>
    %cst_48 = arith.constant dense<0.000000e+00> : vector<64x8xf32>
    %92 = tpu.matmul %41, %81, %cst_48 {dimension_numbers = #tpu.dot_dimension_numbers<[1], [0], [0], [1], [0, 0, 1, 1], [], []>} : vector<64x32xbf16>, vector<32x8xbf16>, vector<64x8xf32> -> vector<64x8xf32>
    %93 = vector.broadcast %85 : vector<1x8xf32> to vector<64x8xf32>
    %94 = arith.addf %92, %93 : vector<64x8xf32>
    %95 = arith.truncf %88 : vector<64x8xf32> to vector<64x8xbf16>
    %96 = arith.truncf %91 : vector<64x8xf32> to vector<64x8xbf16>
    %cst_49 = arith.constant dense<0.000000e+00> : vector<64x64xf32>
    %97 = tpu.matmul %95, %96, %cst_49 {dimension_numbers = #tpu.dot_dimension_numbers<[1], [1], [0], [0], [0, 0, 1, 0], [], []>} : vector<64x8xbf16>, vector<64x8xbf16>, vector<64x64xf32> -> vector<64x64xf32>
    %cst_50 = arith.constant 0.353553385 : f32
    %98 = vector.broadcast %cst_50 : f32 to vector<64x64xf32>
    %99 = arith.mulf %97, %98 : vector<64x64xf32>
    %100 = arith.addf %99, %40 : vector<64x64xf32>
    %cst_51 = arith.constant dense<0xFF800000> : vector<64xf32>
    %101 = vector.multi_reduction <maximumf>, %100, %cst_51 [1] : vector<64x64xf32> to vector<64xf32>
    %102 = vector.shape_cast %101 : vector<64xf32> to vector<64x1xf32>
    %103 = vector.broadcast %102 : vector<64x1xf32> to vector<64x64xf32>
    %104 = arith.subf %100, %103 : vector<64x64xf32>
    %105 = math.exp %104 : vector<64x64xf32>
    %cst_52 = arith.constant dense<0.000000e+00> : vector<64xf32>
    %106 = vector.multi_reduction <add>, %105, %cst_52 [1] : vector<64x64xf32> to vector<64xf32>
    %107 = vector.shape_cast %106 : vector<64xf32> to vector<64x1xf32>
    %108 = tpu.reciprocal %107 {approx = true} : vector<64x1xf32> -> vector<64x1xf32>
    %109 = vector.broadcast %108 : vector<64x1xf32> to vector<64x64xf32>
    %110 = arith.mulf %105, %109 : vector<64x64xf32>
    %111 = arith.truncf %110 : vector<64x64xf32> to vector<64x64xbf16>
    %112 = arith.truncf %94 : vector<64x8xf32> to vector<64x8xbf16>
    %cst_53 = arith.constant dense<0.000000e+00> : vector<64x8xf32>
    %113 = tpu.matmul %111, %112, %cst_53 {dimension_numbers = #tpu.dot_dimension_numbers<[1], [0], [0], [1], [0, 0, 1, 1], [], []>} : vector<64x64xbf16>, vector<64x8xbf16>, vector<64x8xf32> -> vector<64x8xf32>
    %114 = arith.truncf %113 : vector<64x8xf32> to vector<64x8xbf16>
    %cst_54 = arith.constant dense<0.000000e+00> : vector<64x32xf32>
    %115 = tpu.matmul %114, %82, %cst_54 {dimension_numbers = #tpu.dot_dimension_numbers<[1], [0], [0], [1], [0, 0, 1, 1], [], []>} : vector<64x8xbf16>, vector<8x32xbf16>, vector<64x32xf32> -> vector<64x32xf32>
    %116 = arith.addf %78, %115 : vector<64x32xf32>
    %c208 = arith.constant 208 : index
    %c0_55 = arith.constant 0 : index
    %117 = vector.load %arg2[%c208, %c0_55] : memref<1104x64xbf16, #tpu.memory_space<vmem>>, vector<32x8xbf16>
    %c240 = arith.constant 240 : index
    %c0_56 = arith.constant 0 : index
    %118 = vector.load %arg2[%c240, %c0_56] : memref<1104x64xbf16, #tpu.memory_space<vmem>>, vector<32x8xbf16>
    %c272 = arith.constant 272 : index
    %c0_57 = arith.constant 0 : index
    %119 = vector.load %arg2[%c272, %c0_57] : memref<1104x64xbf16, #tpu.memory_space<vmem>>, vector<32x8xbf16>
    %c432 = arith.constant 432 : index
    %c0_58 = arith.constant 0 : index
    %120 = vector.load %arg2[%c432, %c0_58] : memref<1104x64xbf16, #tpu.memory_space<vmem>>, vector<8x32xbf16>
    %c90 = arith.constant 90 : index
    %c0_59 = arith.constant 0 : index
    %121 = vector.load %arg3[%c90, %c0_59] : memref<200x64xf32, #tpu.memory_space<vmem>>, vector<1x8xf32>
    %c94 = arith.constant 94 : index
    %c0_60 = arith.constant 0 : index
    %122 = vector.load %arg3[%c94, %c0_60] : memref<200x64xf32, #tpu.memory_space<vmem>>, vector<1x8xf32>
    %c98 = arith.constant 98 : index
    %c0_61 = arith.constant 0 : index
    %123 = vector.load %arg3[%c98, %c0_61] : memref<200x64xf32, #tpu.memory_space<vmem>>, vector<1x8xf32>
    %cst_62 = arith.constant dense<0.000000e+00> : vector<64x8xf32>
    %124 = tpu.matmul %41, %117, %cst_62 {dimension_numbers = #tpu.dot_dimension_numbers<[1], [0], [0], [1], [0, 0, 1, 1], [], []>} : vector<64x32xbf16>, vector<32x8xbf16>, vector<64x8xf32> -> vector<64x8xf32>
    %125 = vector.broadcast %121 : vector<1x8xf32> to vector<64x8xf32>
    %126 = arith.addf %124, %125 : vector<64x8xf32>
    %cst_63 = arith.constant dense<0.000000e+00> : vector<64x8xf32>
    %127 = tpu.matmul %41, %118, %cst_63 {dimension_numbers = #tpu.dot_dimension_numbers<[1], [0], [0], [1], [0, 0, 1, 1], [], []>} : vector<64x32xbf16>, vector<32x8xbf16>, vector<64x8xf32> -> vector<64x8xf32>
    %128 = vector.broadcast %122 : vector<1x8xf32> to vector<64x8xf32>
    %129 = arith.addf %127, %128 : vector<64x8xf32>
    %cst_64 = arith.constant dense<0.000000e+00> : vector<64x8xf32>
    %130 = tpu.matmul %41, %119, %cst_64 {dimension_numbers = #tpu.dot_dimension_numbers<[1], [0], [0], [1], [0, 0, 1, 1], [], []>} : vector<64x32xbf16>, vector<32x8xbf16>, vector<64x8xf32> -> vector<64x8xf32>
    %131 = vector.broadcast %123 : vector<1x8xf32> to vector<64x8xf32>
    %132 = arith.addf %130, %131 : vector<64x8xf32>
    %133 = arith.truncf %126 : vector<64x8xf32> to vector<64x8xbf16>
    %134 = arith.truncf %129 : vector<64x8xf32> to vector<64x8xbf16>
    %cst_65 = arith.constant dense<0.000000e+00> : vector<64x64xf32>
    %135 = tpu.matmul %133, %134, %cst_65 {dimension_numbers = #tpu.dot_dimension_numbers<[1], [1], [0], [0], [0, 0, 1, 0], [], []>} : vector<64x8xbf16>, vector<64x8xbf16>, vector<64x64xf32> -> vector<64x64xf32>
    %cst_66 = arith.constant 0.353553385 : f32
    %136 = vector.broadcast %cst_66 : f32 to vector<64x64xf32>
    %137 = arith.mulf %135, %136 : vector<64x64xf32>
    %138 = arith.addf %137, %40 : vector<64x64xf32>
    %cst_67 = arith.constant dense<0xFF800000> : vector<64xf32>
    %139 = vector.multi_reduction <maximumf>, %138, %cst_67 [1] : vector<64x64xf32> to vector<64xf32>
    %140 = vector.shape_cast %139 : vector<64xf32> to vector<64x1xf32>
    %141 = vector.broadcast %140 : vector<64x1xf32> to vector<64x64xf32>
    %142 = arith.subf %138, %141 : vector<64x64xf32>
    %143 = math.exp %142 : vector<64x64xf32>
    %cst_68 = arith.constant dense<0.000000e+00> : vector<64xf32>
    %144 = vector.multi_reduction <add>, %143, %cst_68 [1] : vector<64x64xf32> to vector<64xf32>
    %145 = vector.shape_cast %144 : vector<64xf32> to vector<64x1xf32>
    %146 = tpu.reciprocal %145 {approx = true} : vector<64x1xf32> -> vector<64x1xf32>
    %147 = vector.broadcast %146 : vector<64x1xf32> to vector<64x64xf32>
    %148 = arith.mulf %143, %147 : vector<64x64xf32>
    %149 = arith.truncf %148 : vector<64x64xf32> to vector<64x64xbf16>
    %150 = arith.truncf %132 : vector<64x8xf32> to vector<64x8xbf16>
    %cst_69 = arith.constant dense<0.000000e+00> : vector<64x8xf32>
    %151 = tpu.matmul %149, %150, %cst_69 {dimension_numbers = #tpu.dot_dimension_numbers<[1], [0], [0], [1], [0, 0, 1, 1], [], []>} : vector<64x64xbf16>, vector<64x8xbf16>, vector<64x8xf32> -> vector<64x8xf32>
    %152 = arith.truncf %151 : vector<64x8xf32> to vector<64x8xbf16>
    %cst_70 = arith.constant dense<0.000000e+00> : vector<64x32xf32>
    %153 = tpu.matmul %152, %120, %cst_70 {dimension_numbers = #tpu.dot_dimension_numbers<[1], [0], [0], [1], [0, 0, 1, 1], [], []>} : vector<64x8xbf16>, vector<8x32xbf16>, vector<64x32xf32> -> vector<64x32xf32>
    %154 = arith.addf %116, %153 : vector<64x32xf32>
    %c304 = arith.constant 304 : index
    %c0_71 = arith.constant 0 : index
    %155 = vector.load %arg2[%c304, %c0_71] : memref<1104x64xbf16, #tpu.memory_space<vmem>>, vector<32x8xbf16>
    %c336 = arith.constant 336 : index
    %c0_72 = arith.constant 0 : index
    %156 = vector.load %arg2[%c336, %c0_72] : memref<1104x64xbf16, #tpu.memory_space<vmem>>, vector<32x8xbf16>
    %c368 = arith.constant 368 : index
    %c0_73 = arith.constant 0 : index
    %157 = vector.load %arg2[%c368, %c0_73] : memref<1104x64xbf16, #tpu.memory_space<vmem>>, vector<32x8xbf16>
    %c448 = arith.constant 448 : index
    %c0_74 = arith.constant 0 : index
    %158 = vector.load %arg2[%c448, %c0_74] : memref<1104x64xbf16, #tpu.memory_space<vmem>>, vector<8x32xbf16>
    %c91 = arith.constant 91 : index
    %c0_75 = arith.constant 0 : index
    %159 = vector.load %arg3[%c91, %c0_75] : memref<200x64xf32, #tpu.memory_space<vmem>>, vector<1x8xf32>
    %c95 = arith.constant 95 : index
    %c0_76 = arith.constant 0 : index
    %160 = vector.load %arg3[%c95, %c0_76] : memref<200x64xf32, #tpu.memory_space<vmem>>, vector<1x8xf32>
    %c99 = arith.constant 99 : index
    %c0_77 = arith.constant 0 : index
    %161 = vector.load %arg3[%c99, %c0_77] : memref<200x64xf32, #tpu.memory_space<vmem>>, vector<1x8xf32>
    %cst_78 = arith.constant dense<0.000000e+00> : vector<64x8xf32>
    %162 = tpu.matmul %41, %155, %cst_78 {dimension_numbers = #tpu.dot_dimension_numbers<[1], [0], [0], [1], [0, 0, 1, 1], [], []>} : vector<64x32xbf16>, vector<32x8xbf16>, vector<64x8xf32> -> vector<64x8xf32>
    %163 = vector.broadcast %159 : vector<1x8xf32> to vector<64x8xf32>
    %164 = arith.addf %162, %163 : vector<64x8xf32>
    %cst_79 = arith.constant dense<0.000000e+00> : vector<64x8xf32>
    %165 = tpu.matmul %41, %156, %cst_79 {dimension_numbers = #tpu.dot_dimension_numbers<[1], [0], [0], [1], [0, 0, 1, 1], [], []>} : vector<64x32xbf16>, vector<32x8xbf16>, vector<64x8xf32> -> vector<64x8xf32>
    %166 = vector.broadcast %160 : vector<1x8xf32> to vector<64x8xf32>
    %167 = arith.addf %165, %166 : vector<64x8xf32>
    %cst_80 = arith.constant dense<0.000000e+00> : vector<64x8xf32>
    %168 = tpu.matmul %41, %157, %cst_80 {dimension_numbers = #tpu.dot_dimension_numbers<[1], [0], [0], [1], [0, 0, 1, 1], [], []>} : vector<64x32xbf16>, vector<32x8xbf16>, vector<64x8xf32> -> vector<64x8xf32>
    %169 = vector.broadcast %161 : vector<1x8xf32> to vector<64x8xf32>
    %170 = arith.addf %168, %169 : vector<64x8xf32>
    %171 = arith.truncf %164 : vector<64x8xf32> to vector<64x8xbf16>
    %172 = arith.truncf %167 : vector<64x8xf32> to vector<64x8xbf16>
    %cst_81 = arith.constant dense<0.000000e+00> : vector<64x64xf32>
    %173 = tpu.matmul %171, %172, %cst_81 {dimension_numbers = #tpu.dot_dimension_numbers<[1], [1], [0], [0], [0, 0, 1, 0], [], []>} : vector<64x8xbf16>, vector<64x8xbf16>, vector<64x64xf32> -> vector<64x64xf32>
    %cst_82 = arith.constant 0.353553385 : f32
    %174 = vector.broadcast %cst_82 : f32 to vector<64x64xf32>
    %175 = arith.mulf %173, %174 : vector<64x64xf32>
    %176 = arith.addf %175, %40 : vector<64x64xf32>
    %cst_83 = arith.constant dense<0xFF800000> : vector<64xf32>
    %177 = vector.multi_reduction <maximumf>, %176, %cst_83 [1] : vector<64x64xf32> to vector<64xf32>
    %178 = vector.shape_cast %177 : vector<64xf32> to vector<64x1xf32>
    %179 = vector.broadcast %178 : vector<64x1xf32> to vector<64x64xf32>
    %180 = arith.subf %176, %179 : vector<64x64xf32>
    %181 = math.exp %180 : vector<64x64xf32>
    %cst_84 = arith.constant dense<0.000000e+00> : vector<64xf32>
    %182 = vector.multi_reduction <add>, %181, %cst_84 [1] : vector<64x64xf32> to vector<64xf32>
    %183 = vector.shape_cast %182 : vector<64xf32> to vector<64x1xf32>
    %184 = tpu.reciprocal %183 {approx = true} : vector<64x1xf32> -> vector<64x1xf32>
    %185 = vector.broadcast %184 : vector<64x1xf32> to vector<64x64xf32>
    %186 = arith.mulf %181, %185 : vector<64x64xf32>
    %187 = arith.truncf %186 : vector<64x64xf32> to vector<64x64xbf16>
    %188 = arith.truncf %170 : vector<64x8xf32> to vector<64x8xbf16>
    %cst_85 = arith.constant dense<0.000000e+00> : vector<64x8xf32>
    %189 = tpu.matmul %187, %188, %cst_85 {dimension_numbers = #tpu.dot_dimension_numbers<[1], [0], [0], [1], [0, 0, 1, 1], [], []>} : vector<64x64xbf16>, vector<64x8xbf16>, vector<64x8xf32> -> vector<64x8xf32>
    %190 = arith.truncf %189 : vector<64x8xf32> to vector<64x8xbf16>
    %cst_86 = arith.constant dense<0.000000e+00> : vector<64x32xf32>
    %191 = tpu.matmul %190, %158, %cst_86 {dimension_numbers = #tpu.dot_dimension_numbers<[1], [0], [0], [1], [0, 0, 1, 1], [], []>} : vector<64x8xbf16>, vector<8x32xbf16>, vector<64x32xf32> -> vector<64x32xf32>
    %192 = arith.addf %154, %191 : vector<64x32xf32>
    %c104 = arith.constant 104 : index
    %c0_87 = arith.constant 0 : index
    %193 = vector.load %arg3[%c104, %c0_87] : memref<200x64xf32, #tpu.memory_space<vmem>>, vector<1x32xf32>
    %194 = vector.broadcast %193 : vector<1x32xf32> to vector<64x32xf32>
    %195 = arith.addf %192, %194 : vector<64x32xf32>
    %196 = arith.addf %39, %195 : vector<64x32xf32>
    %c112_88 = arith.constant 112 : index
    %c0_89 = arith.constant 0 : index
    %197 = vector.load %arg3[%c112_88, %c0_89] : memref<200x64xf32, #tpu.memory_space<vmem>>, vector<1x32xf32>
    %c113 = arith.constant 113 : index
    %c0_90 = arith.constant 0 : index
    %198 = vector.load %arg3[%c113, %c0_90] : memref<200x64xf32, #tpu.memory_space<vmem>>, vector<1x32xf32>
    %cst_91 = arith.constant dense<0.000000e+00> : vector<64xf32>
    %199 = vector.multi_reduction <add>, %196, %cst_91 [1] : vector<64x32xf32> to vector<64xf32>
    %200 = vector.shape_cast %199 : vector<64xf32> to vector<64x1xf32>
    %cst_92 = arith.constant 3.200000e+01 : f32
    %201 = vector.broadcast %cst_92 : f32 to vector<64x1xf32>
    %202 = arith.divf %200, %201 : vector<64x1xf32>
    %203 = vector.broadcast %202 : vector<64x1xf32> to vector<64x32xf32>
    %204 = arith.subf %196, %203 : vector<64x32xf32>
    %205 = arith.mulf %204, %204 : vector<64x32xf32>
    %cst_93 = arith.constant dense<0.000000e+00> : vector<64xf32>
    %206 = vector.multi_reduction <add>, %205, %cst_93 [1] : vector<64x32xf32> to vector<64xf32>
    %207 = vector.shape_cast %206 : vector<64xf32> to vector<64x1xf32>
    %cst_94 = arith.constant 3.200000e+01 : f32
    %208 = vector.broadcast %cst_94 : f32 to vector<64x1xf32>
    %209 = arith.divf %207, %208 : vector<64x1xf32>
    %cst_95 = arith.constant 9.99999974E-6 : f32
    %210 = vector.broadcast %cst_95 : f32 to vector<64x1xf32>
    %211 = arith.addf %209, %210 : vector<64x1xf32>
    %212 = math.rsqrt %211 : vector<64x1xf32>
    %213 = vector.broadcast %212 : vector<64x1xf32> to vector<64x32xf32>
    %214 = arith.mulf %204, %213 : vector<64x32xf32>
    %215 = vector.broadcast %197 : vector<1x32xf32> to vector<64x32xf32>
    %216 = arith.mulf %214, %215 : vector<64x32xf32>
    %217 = vector.broadcast %198 : vector<1x32xf32> to vector<64x32xf32>
    %218 = arith.addf %216, %217 : vector<64x32xf32>
    %219 = arith.truncf %218 : vector<64x32xf32> to vector<64x32xbf16>
    %c464 = arith.constant 464 : index
    %c0_96 = arith.constant 0 : index
    %220 = vector.load %arg2[%c464, %c0_96] : memref<1104x64xbf16, #tpu.memory_space<vmem>>, vector<32x64xbf16>
    %cst_97 = arith.constant dense<0.000000e+00> : vector<64x64xf32>
    %221 = tpu.matmul %219, %220, %cst_97 {dimension_numbers = #tpu.dot_dimension_numbers<[1], [0], [0], [1], [0, 0, 1, 1], [], []>} : vector<64x32xbf16>, vector<32x64xbf16>, vector<64x64xf32> -> vector<64x64xf32>
    %c120 = arith.constant 120 : index
    %c0_98 = arith.constant 0 : index
    %222 = vector.load %arg3[%c120, %c0_98] : memref<200x64xf32, #tpu.memory_space<vmem>>, vector<1x64xf32>
    %223 = vector.broadcast %222 : vector<1x64xf32> to vector<64x64xf32>
    %224 = arith.addf %221, %223 : vector<64x64xf32>
    %cst_99 = arith.constant 0.000000e+00 : f32
    %225 = vector.broadcast %cst_99 : f32 to vector<64x64xf32>
    %226 = arith.maximumf %224, %225 : vector<64x64xf32>
    %227 = arith.truncf %226 : vector<64x64xf32> to vector<64x64xbf16>
    %c496 = arith.constant 496 : index
    %c0_100 = arith.constant 0 : index
    %228 = vector.load %arg2[%c496, %c0_100] : memref<1104x64xbf16, #tpu.memory_space<vmem>>, vector<64x32xbf16>
    %cst_101 = arith.constant dense<0.000000e+00> : vector<64x32xf32>
    %229 = tpu.matmul %227, %228, %cst_101 {dimension_numbers = #tpu.dot_dimension_numbers<[1], [0], [0], [1], [0, 0, 1, 1], [], []>} : vector<64x64xbf16>, vector<64x32xbf16>, vector<64x32xf32> -> vector<64x32xf32>
    %c128 = arith.constant 128 : index
    %c0_102 = arith.constant 0 : index
    %230 = vector.load %arg3[%c128, %c0_102] : memref<200x64xf32, #tpu.memory_space<vmem>>, vector<1x32xf32>
    %231 = vector.broadcast %230 : vector<1x32xf32> to vector<64x32xf32>
    %232 = arith.addf %229, %231 : vector<64x32xf32>
    %233 = arith.addf %218, %232 : vector<64x32xf32>
    %c136 = arith.constant 136 : index
    %c0_103 = arith.constant 0 : index
    %234 = vector.load %arg3[%c136, %c0_103] : memref<200x64xf32, #tpu.memory_space<vmem>>, vector<1x32xf32>
    %c137 = arith.constant 137 : index
    %c0_104 = arith.constant 0 : index
    %235 = vector.load %arg3[%c137, %c0_104] : memref<200x64xf32, #tpu.memory_space<vmem>>, vector<1x32xf32>
    %cst_105 = arith.constant dense<0.000000e+00> : vector<64xf32>
    %236 = vector.multi_reduction <add>, %233, %cst_105 [1] : vector<64x32xf32> to vector<64xf32>
    %237 = vector.shape_cast %236 : vector<64xf32> to vector<64x1xf32>
    %cst_106 = arith.constant 3.200000e+01 : f32
    %238 = vector.broadcast %cst_106 : f32 to vector<64x1xf32>
    %239 = arith.divf %237, %238 : vector<64x1xf32>
    %240 = vector.broadcast %239 : vector<64x1xf32> to vector<64x32xf32>
    %241 = arith.subf %233, %240 : vector<64x32xf32>
    %242 = arith.mulf %241, %241 : vector<64x32xf32>
    %cst_107 = arith.constant dense<0.000000e+00> : vector<64xf32>
    %243 = vector.multi_reduction <add>, %242, %cst_107 [1] : vector<64x32xf32> to vector<64xf32>
    %244 = vector.shape_cast %243 : vector<64xf32> to vector<64x1xf32>
    %cst_108 = arith.constant 3.200000e+01 : f32
    %245 = vector.broadcast %cst_108 : f32 to vector<64x1xf32>
    %246 = arith.divf %244, %245 : vector<64x1xf32>
    %cst_109 = arith.constant 9.99999974E-6 : f32
    %247 = vector.broadcast %cst_109 : f32 to vector<64x1xf32>
    %248 = arith.addf %246, %247 : vector<64x1xf32>
    %249 = math.rsqrt %248 : vector<64x1xf32>
    %250 = vector.broadcast %249 : vector<64x1xf32> to vector<64x32xf32>
    %251 = arith.mulf %241, %250 : vector<64x32xf32>
    %252 = vector.broadcast %234 : vector<1x32xf32> to vector<64x32xf32>
    %253 = arith.mulf %251, %252 : vector<64x32xf32>
    %254 = vector.broadcast %235 : vector<1x32xf32> to vector<64x32xf32>
    %255 = arith.addf %253, %254 : vector<64x32xf32>
    %256 = arith.truncf %255 : vector<64x32xf32> to vector<64x32xbf16>
    %c560 = arith.constant 560 : index
    %c0_110 = arith.constant 0 : index
    %257 = vector.load %arg2[%c560, %c0_110] : memref<1104x64xbf16, #tpu.memory_space<vmem>>, vector<32x8xbf16>
    %c592 = arith.constant 592 : index
    %c0_111 = arith.constant 0 : index
    %258 = vector.load %arg2[%c592, %c0_111] : memref<1104x64xbf16, #tpu.memory_space<vmem>>, vector<32x8xbf16>
    %c624 = arith.constant 624 : index
    %c0_112 = arith.constant 0 : index
    %259 = vector.load %arg2[%c624, %c0_112] : memref<1104x64xbf16, #tpu.memory_space<vmem>>, vector<32x8xbf16>
    %c944 = arith.constant 944 : index
    %c0_113 = arith.constant 0 : index
    %260 = vector.load %arg2[%c944, %c0_113] : memref<1104x64xbf16, #tpu.memory_space<vmem>>, vector<8x32xbf16>
    %c144_114 = arith.constant 144 : index
    %c0_115 = arith.constant 0 : index
    %261 = vector.load %arg3[%c144_114, %c0_115] : memref<200x64xf32, #tpu.memory_space<vmem>>, vector<1x8xf32>
    %c148 = arith.constant 148 : index
    %c0_116 = arith.constant 0 : index
    %262 = vector.load %arg3[%c148, %c0_116] : memref<200x64xf32, #tpu.memory_space<vmem>>, vector<1x8xf32>
    %c152 = arith.constant 152 : index
    %c0_117 = arith.constant 0 : index
    %263 = vector.load %arg3[%c152, %c0_117] : memref<200x64xf32, #tpu.memory_space<vmem>>, vector<1x8xf32>
    %cst_118 = arith.constant dense<0.000000e+00> : vector<64x8xf32>
    %264 = tpu.matmul %256, %257, %cst_118 {dimension_numbers = #tpu.dot_dimension_numbers<[1], [0], [0], [1], [0, 0, 1, 1], [], []>} : vector<64x32xbf16>, vector<32x8xbf16>, vector<64x8xf32> -> vector<64x8xf32>
    %265 = vector.broadcast %261 : vector<1x8xf32> to vector<64x8xf32>
    %266 = arith.addf %264, %265 : vector<64x8xf32>
    %cst_119 = arith.constant dense<0.000000e+00> : vector<64x8xf32>
    %267 = tpu.matmul %256, %258, %cst_119 {dimension_numbers = #tpu.dot_dimension_numbers<[1], [0], [0], [1], [0, 0, 1, 1], [], []>} : vector<64x32xbf16>, vector<32x8xbf16>, vector<64x8xf32> -> vector<64x8xf32>
    %268 = vector.broadcast %262 : vector<1x8xf32> to vector<64x8xf32>
    %269 = arith.addf %267, %268 : vector<64x8xf32>
    %cst_120 = arith.constant dense<0.000000e+00> : vector<64x8xf32>
    %270 = tpu.matmul %256, %259, %cst_120 {dimension_numbers = #tpu.dot_dimension_numbers<[1], [0], [0], [1], [0, 0, 1, 1], [], []>} : vector<64x32xbf16>, vector<32x8xbf16>, vector<64x8xf32> -> vector<64x8xf32>
    %271 = vector.broadcast %263 : vector<1x8xf32> to vector<64x8xf32>
    %272 = arith.addf %270, %271 : vector<64x8xf32>
    %273 = arith.truncf %266 : vector<64x8xf32> to vector<64x8xbf16>
    %274 = arith.truncf %269 : vector<64x8xf32> to vector<64x8xbf16>
    %cst_121 = arith.constant dense<0.000000e+00> : vector<64x64xf32>
    %275 = tpu.matmul %273, %274, %cst_121 {dimension_numbers = #tpu.dot_dimension_numbers<[1], [1], [0], [0], [0, 0, 1, 0], [], []>} : vector<64x8xbf16>, vector<64x8xbf16>, vector<64x64xf32> -> vector<64x64xf32>
    %cst_122 = arith.constant 0.353553385 : f32
    %276 = vector.broadcast %cst_122 : f32 to vector<64x64xf32>
    %277 = arith.mulf %275, %276 : vector<64x64xf32>
    %278 = arith.addf %277, %40 : vector<64x64xf32>
    %cst_123 = arith.constant dense<0xFF800000> : vector<64xf32>
    %279 = vector.multi_reduction <maximumf>, %278, %cst_123 [1] : vector<64x64xf32> to vector<64xf32>
    %280 = vector.shape_cast %279 : vector<64xf32> to vector<64x1xf32>
    %281 = vector.broadcast %280 : vector<64x1xf32> to vector<64x64xf32>
    %282 = arith.subf %278, %281 : vector<64x64xf32>
    %283 = math.exp %282 : vector<64x64xf32>
    %cst_124 = arith.constant dense<0.000000e+00> : vector<64xf32>
    %284 = vector.multi_reduction <add>, %283, %cst_124 [1] : vector<64x64xf32> to vector<64xf32>
    %285 = vector.shape_cast %284 : vector<64xf32> to vector<64x1xf32>
    %286 = tpu.reciprocal %285 {approx = true} : vector<64x1xf32> -> vector<64x1xf32>
    %287 = vector.broadcast %286 : vector<64x1xf32> to vector<64x64xf32>
    %288 = arith.mulf %283, %287 : vector<64x64xf32>
    %289 = arith.truncf %288 : vector<64x64xf32> to vector<64x64xbf16>
    %290 = arith.truncf %272 : vector<64x8xf32> to vector<64x8xbf16>
    %cst_125 = arith.constant dense<0.000000e+00> : vector<64x8xf32>
    %291 = tpu.matmul %289, %290, %cst_125 {dimension_numbers = #tpu.dot_dimension_numbers<[1], [0], [0], [1], [0, 0, 1, 1], [], []>} : vector<64x64xbf16>, vector<64x8xbf16>, vector<64x8xf32> -> vector<64x8xf32>
    %292 = arith.truncf %291 : vector<64x8xf32> to vector<64x8xbf16>
    %cst_126 = arith.constant dense<0.000000e+00> : vector<64x32xf32>
    %293 = tpu.matmul %292, %260, %cst_126 {dimension_numbers = #tpu.dot_dimension_numbers<[1], [0], [0], [1], [0, 0, 1, 1], [], []>} : vector<64x8xbf16>, vector<8x32xbf16>, vector<64x32xf32> -> vector<64x32xf32>
    %c656 = arith.constant 656 : index
    %c0_127 = arith.constant 0 : index
    %294 = vector.load %arg2[%c656, %c0_127] : memref<1104x64xbf16, #tpu.memory_space<vmem>>, vector<32x8xbf16>
    %c688 = arith.constant 688 : index
    %c0_128 = arith.constant 0 : index
    %295 = vector.load %arg2[%c688, %c0_128] : memref<1104x64xbf16, #tpu.memory_space<vmem>>, vector<32x8xbf16>
    %c720 = arith.constant 720 : index
    %c0_129 = arith.constant 0 : index
    %296 = vector.load %arg2[%c720, %c0_129] : memref<1104x64xbf16, #tpu.memory_space<vmem>>, vector<32x8xbf16>
    %c960 = arith.constant 960 : index
    %c0_130 = arith.constant 0 : index
    %297 = vector.load %arg2[%c960, %c0_130] : memref<1104x64xbf16, #tpu.memory_space<vmem>>, vector<8x32xbf16>
    %c145 = arith.constant 145 : index
    %c0_131 = arith.constant 0 : index
    %298 = vector.load %arg3[%c145, %c0_131] : memref<200x64xf32, #tpu.memory_space<vmem>>, vector<1x8xf32>
    %c149 = arith.constant 149 : index
    %c0_132 = arith.constant 0 : index
    %299 = vector.load %arg3[%c149, %c0_132] : memref<200x64xf32, #tpu.memory_space<vmem>>, vector<1x8xf32>
    %c153 = arith.constant 153 : index
    %c0_133 = arith.constant 0 : index
    %300 = vector.load %arg3[%c153, %c0_133] : memref<200x64xf32, #tpu.memory_space<vmem>>, vector<1x8xf32>
    %cst_134 = arith.constant dense<0.000000e+00> : vector<64x8xf32>
    %301 = tpu.matmul %256, %294, %cst_134 {dimension_numbers = #tpu.dot_dimension_numbers<[1], [0], [0], [1], [0, 0, 1, 1], [], []>} : vector<64x32xbf16>, vector<32x8xbf16>, vector<64x8xf32> -> vector<64x8xf32>
    %302 = vector.broadcast %298 : vector<1x8xf32> to vector<64x8xf32>
    %303 = arith.addf %301, %302 : vector<64x8xf32>
    %cst_135 = arith.constant dense<0.000000e+00> : vector<64x8xf32>
    %304 = tpu.matmul %256, %295, %cst_135 {dimension_numbers = #tpu.dot_dimension_numbers<[1], [0], [0], [1], [0, 0, 1, 1], [], []>} : vector<64x32xbf16>, vector<32x8xbf16>, vector<64x8xf32> -> vector<64x8xf32>
    %305 = vector.broadcast %299 : vector<1x8xf32> to vector<64x8xf32>
    %306 = arith.addf %304, %305 : vector<64x8xf32>
    %cst_136 = arith.constant dense<0.000000e+00> : vector<64x8xf32>
    %307 = tpu.matmul %256, %296, %cst_136 {dimension_numbers = #tpu.dot_dimension_numbers<[1], [0], [0], [1], [0, 0, 1, 1], [], []>} : vector<64x32xbf16>, vector<32x8xbf16>, vector<64x8xf32> -> vector<64x8xf32>
    %308 = vector.broadcast %300 : vector<1x8xf32> to vector<64x8xf32>
    %309 = arith.addf %307, %308 : vector<64x8xf32>
    %310 = arith.truncf %303 : vector<64x8xf32> to vector<64x8xbf16>
    %311 = arith.truncf %306 : vector<64x8xf32> to vector<64x8xbf16>
    %cst_137 = arith.constant dense<0.000000e+00> : vector<64x64xf32>
    %312 = tpu.matmul %310, %311, %cst_137 {dimension_numbers = #tpu.dot_dimension_numbers<[1], [1], [0], [0], [0, 0, 1, 0], [], []>} : vector<64x8xbf16>, vector<64x8xbf16>, vector<64x64xf32> -> vector<64x64xf32>
    %cst_138 = arith.constant 0.353553385 : f32
    %313 = vector.broadcast %cst_138 : f32 to vector<64x64xf32>
    %314 = arith.mulf %312, %313 : vector<64x64xf32>
    %315 = arith.addf %314, %40 : vector<64x64xf32>
    %cst_139 = arith.constant dense<0xFF800000> : vector<64xf32>
    %316 = vector.multi_reduction <maximumf>, %315, %cst_139 [1] : vector<64x64xf32> to vector<64xf32>
    %317 = vector.shape_cast %316 : vector<64xf32> to vector<64x1xf32>
    %318 = vector.broadcast %317 : vector<64x1xf32> to vector<64x64xf32>
    %319 = arith.subf %315, %318 : vector<64x64xf32>
    %320 = math.exp %319 : vector<64x64xf32>
    %cst_140 = arith.constant dense<0.000000e+00> : vector<64xf32>
    %321 = vector.multi_reduction <add>, %320, %cst_140 [1] : vector<64x64xf32> to vector<64xf32>
    %322 = vector.shape_cast %321 : vector<64xf32> to vector<64x1xf32>
    %323 = tpu.reciprocal %322 {approx = true} : vector<64x1xf32> -> vector<64x1xf32>
    %324 = vector.broadcast %323 : vector<64x1xf32> to vector<64x64xf32>
    %325 = arith.mulf %320, %324 : vector<64x64xf32>
    %326 = arith.truncf %325 : vector<64x64xf32> to vector<64x64xbf16>
    %327 = arith.truncf %309 : vector<64x8xf32> to vector<64x8xbf16>
    %cst_141 = arith.constant dense<0.000000e+00> : vector<64x8xf32>
    %328 = tpu.matmul %326, %327, %cst_141 {dimension_numbers = #tpu.dot_dimension_numbers<[1], [0], [0], [1], [0, 0, 1, 1], [], []>} : vector<64x64xbf16>, vector<64x8xbf16>, vector<64x8xf32> -> vector<64x8xf32>
    %329 = arith.truncf %328 : vector<64x8xf32> to vector<64x8xbf16>
    %cst_142 = arith.constant dense<0.000000e+00> : vector<64x32xf32>
    %330 = tpu.matmul %329, %297, %cst_142 {dimension_numbers = #tpu.dot_dimension_numbers<[1], [0], [0], [1], [0, 0, 1, 1], [], []>} : vector<64x8xbf16>, vector<8x32xbf16>, vector<64x32xf32> -> vector<64x32xf32>
    %331 = arith.addf %293, %330 : vector<64x32xf32>
    %c752 = arith.constant 752 : index
    %c0_143 = arith.constant 0 : index
    %332 = vector.load %arg2[%c752, %c0_143] : memref<1104x64xbf16, #tpu.memory_space<vmem>>, vector<32x8xbf16>
    %c784 = arith.constant 784 : index
    %c0_144 = arith.constant 0 : index
    %333 = vector.load %arg2[%c784, %c0_144] : memref<1104x64xbf16, #tpu.memory_space<vmem>>, vector<32x8xbf16>
    %c816 = arith.constant 816 : index
    %c0_145 = arith.constant 0 : index
    %334 = vector.load %arg2[%c816, %c0_145] : memref<1104x64xbf16, #tpu.memory_space<vmem>>, vector<32x8xbf16>
    %c976 = arith.constant 976 : index
    %c0_146 = arith.constant 0 : index
    %335 = vector.load %arg2[%c976, %c0_146] : memref<1104x64xbf16, #tpu.memory_space<vmem>>, vector<8x32xbf16>
    %c146 = arith.constant 146 : index
    %c0_147 = arith.constant 0 : index
    %336 = vector.load %arg3[%c146, %c0_147] : memref<200x64xf32, #tpu.memory_space<vmem>>, vector<1x8xf32>
    %c150 = arith.constant 150 : index
    %c0_148 = arith.constant 0 : index
    %337 = vector.load %arg3[%c150, %c0_148] : memref<200x64xf32, #tpu.memory_space<vmem>>, vector<1x8xf32>
    %c154 = arith.constant 154 : index
    %c0_149 = arith.constant 0 : index
    %338 = vector.load %arg3[%c154, %c0_149] : memref<200x64xf32, #tpu.memory_space<vmem>>, vector<1x8xf32>
    %cst_150 = arith.constant dense<0.000000e+00> : vector<64x8xf32>
    %339 = tpu.matmul %256, %332, %cst_150 {dimension_numbers = #tpu.dot_dimension_numbers<[1], [0], [0], [1], [0, 0, 1, 1], [], []>} : vector<64x32xbf16>, vector<32x8xbf16>, vector<64x8xf32> -> vector<64x8xf32>
    %340 = vector.broadcast %336 : vector<1x8xf32> to vector<64x8xf32>
    %341 = arith.addf %339, %340 : vector<64x8xf32>
    %cst_151 = arith.constant dense<0.000000e+00> : vector<64x8xf32>
    %342 = tpu.matmul %256, %333, %cst_151 {dimension_numbers = #tpu.dot_dimension_numbers<[1], [0], [0], [1], [0, 0, 1, 1], [], []>} : vector<64x32xbf16>, vector<32x8xbf16>, vector<64x8xf32> -> vector<64x8xf32>
    %343 = vector.broadcast %337 : vector<1x8xf32> to vector<64x8xf32>
    %344 = arith.addf %342, %343 : vector<64x8xf32>
    %cst_152 = arith.constant dense<0.000000e+00> : vector<64x8xf32>
    %345 = tpu.matmul %256, %334, %cst_152 {dimension_numbers = #tpu.dot_dimension_numbers<[1], [0], [0], [1], [0, 0, 1, 1], [], []>} : vector<64x32xbf16>, vector<32x8xbf16>, vector<64x8xf32> -> vector<64x8xf32>
    %346 = vector.broadcast %338 : vector<1x8xf32> to vector<64x8xf32>
    %347 = arith.addf %345, %346 : vector<64x8xf32>
    %348 = arith.truncf %341 : vector<64x8xf32> to vector<64x8xbf16>
    %349 = arith.truncf %344 : vector<64x8xf32> to vector<64x8xbf16>
    %cst_153 = arith.constant dense<0.000000e+00> : vector<64x64xf32>
    %350 = tpu.matmul %348, %349, %cst_153 {dimension_numbers = #tpu.dot_dimension_numbers<[1], [1], [0], [0], [0, 0, 1, 0], [], []>} : vector<64x8xbf16>, vector<64x8xbf16>, vector<64x64xf32> -> vector<64x64xf32>
    %cst_154 = arith.constant 0.353553385 : f32
    %351 = vector.broadcast %cst_154 : f32 to vector<64x64xf32>
    %352 = arith.mulf %350, %351 : vector<64x64xf32>
    %353 = arith.addf %352, %40 : vector<64x64xf32>
    %cst_155 = arith.constant dense<0xFF800000> : vector<64xf32>
    %354 = vector.multi_reduction <maximumf>, %353, %cst_155 [1] : vector<64x64xf32> to vector<64xf32>
    %355 = vector.shape_cast %354 : vector<64xf32> to vector<64x1xf32>
    %356 = vector.broadcast %355 : vector<64x1xf32> to vector<64x64xf32>
    %357 = arith.subf %353, %356 : vector<64x64xf32>
    %358 = math.exp %357 : vector<64x64xf32>
    %cst_156 = arith.constant dense<0.000000e+00> : vector<64xf32>
    %359 = vector.multi_reduction <add>, %358, %cst_156 [1] : vector<64x64xf32> to vector<64xf32>
    %360 = vector.shape_cast %359 : vector<64xf32> to vector<64x1xf32>
    %361 = tpu.reciprocal %360 {approx = true} : vector<64x1xf32> -> vector<64x1xf32>
    %362 = vector.broadcast %361 : vector<64x1xf32> to vector<64x64xf32>
    %363 = arith.mulf %358, %362 : vector<64x64xf32>
    %364 = arith.truncf %363 : vector<64x64xf32> to vector<64x64xbf16>
    %365 = arith.truncf %347 : vector<64x8xf32> to vector<64x8xbf16>
    %cst_157 = arith.constant dense<0.000000e+00> : vector<64x8xf32>
    %366 = tpu.matmul %364, %365, %cst_157 {dimension_numbers = #tpu.dot_dimension_numbers<[1], [0], [0], [1], [0, 0, 1, 1], [], []>} : vector<64x64xbf16>, vector<64x8xbf16>, vector<64x8xf32> -> vector<64x8xf32>
    %367 = arith.truncf %366 : vector<64x8xf32> to vector<64x8xbf16>
    %cst_158 = arith.constant dense<0.000000e+00> : vector<64x32xf32>
    %368 = tpu.matmul %367, %335, %cst_158 {dimension_numbers = #tpu.dot_dimension_numbers<[1], [0], [0], [1], [0, 0, 1, 1], [], []>} : vector<64x8xbf16>, vector<8x32xbf16>, vector<64x32xf32> -> vector<64x32xf32>
    %369 = arith.addf %331, %368 : vector<64x32xf32>
    %c848 = arith.constant 848 : index
    %c0_159 = arith.constant 0 : index
    %370 = vector.load %arg2[%c848, %c0_159] : memref<1104x64xbf16, #tpu.memory_space<vmem>>, vector<32x8xbf16>
    %c880 = arith.constant 880 : index
    %c0_160 = arith.constant 0 : index
    %371 = vector.load %arg2[%c880, %c0_160] : memref<1104x64xbf16, #tpu.memory_space<vmem>>, vector<32x8xbf16>
    %c912 = arith.constant 912 : index
    %c0_161 = arith.constant 0 : index
    %372 = vector.load %arg2[%c912, %c0_161] : memref<1104x64xbf16, #tpu.memory_space<vmem>>, vector<32x8xbf16>
    %c992 = arith.constant 992 : index
    %c0_162 = arith.constant 0 : index
    %373 = vector.load %arg2[%c992, %c0_162] : memref<1104x64xbf16, #tpu.memory_space<vmem>>, vector<8x32xbf16>
    %c147 = arith.constant 147 : index
    %c0_163 = arith.constant 0 : index
    %374 = vector.load %arg3[%c147, %c0_163] : memref<200x64xf32, #tpu.memory_space<vmem>>, vector<1x8xf32>
    %c151 = arith.constant 151 : index
    %c0_164 = arith.constant 0 : index
    %375 = vector.load %arg3[%c151, %c0_164] : memref<200x64xf32, #tpu.memory_space<vmem>>, vector<1x8xf32>
    %c155 = arith.constant 155 : index
    %c0_165 = arith.constant 0 : index
    %376 = vector.load %arg3[%c155, %c0_165] : memref<200x64xf32, #tpu.memory_space<vmem>>, vector<1x8xf32>
    %cst_166 = arith.constant dense<0.000000e+00> : vector<64x8xf32>
    %377 = tpu.matmul %256, %370, %cst_166 {dimension_numbers = #tpu.dot_dimension_numbers<[1], [0], [0], [1], [0, 0, 1, 1], [], []>} : vector<64x32xbf16>, vector<32x8xbf16>, vector<64x8xf32> -> vector<64x8xf32>
    %378 = vector.broadcast %374 : vector<1x8xf32> to vector<64x8xf32>
    %379 = arith.addf %377, %378 : vector<64x8xf32>
    %cst_167 = arith.constant dense<0.000000e+00> : vector<64x8xf32>
    %380 = tpu.matmul %256, %371, %cst_167 {dimension_numbers = #tpu.dot_dimension_numbers<[1], [0], [0], [1], [0, 0, 1, 1], [], []>} : vector<64x32xbf16>, vector<32x8xbf16>, vector<64x8xf32> -> vector<64x8xf32>
    %381 = vector.broadcast %375 : vector<1x8xf32> to vector<64x8xf32>
    %382 = arith.addf %380, %381 : vector<64x8xf32>
    %cst_168 = arith.constant dense<0.000000e+00> : vector<64x8xf32>
    %383 = tpu.matmul %256, %372, %cst_168 {dimension_numbers = #tpu.dot_dimension_numbers<[1], [0], [0], [1], [0, 0, 1, 1], [], []>} : vector<64x32xbf16>, vector<32x8xbf16>, vector<64x8xf32> -> vector<64x8xf32>
    %384 = vector.broadcast %376 : vector<1x8xf32> to vector<64x8xf32>
    %385 = arith.addf %383, %384 : vector<64x8xf32>
    %386 = arith.truncf %379 : vector<64x8xf32> to vector<64x8xbf16>
    %387 = arith.truncf %382 : vector<64x8xf32> to vector<64x8xbf16>
    %cst_169 = arith.constant dense<0.000000e+00> : vector<64x64xf32>
    %388 = tpu.matmul %386, %387, %cst_169 {dimension_numbers = #tpu.dot_dimension_numbers<[1], [1], [0], [0], [0, 0, 1, 0], [], []>} : vector<64x8xbf16>, vector<64x8xbf16>, vector<64x64xf32> -> vector<64x64xf32>
    %cst_170 = arith.constant 0.353553385 : f32
    %389 = vector.broadcast %cst_170 : f32 to vector<64x64xf32>
    %390 = arith.mulf %388, %389 : vector<64x64xf32>
    %391 = arith.addf %390, %40 : vector<64x64xf32>
    %cst_171 = arith.constant dense<0xFF800000> : vector<64xf32>
    %392 = vector.multi_reduction <maximumf>, %391, %cst_171 [1] : vector<64x64xf32> to vector<64xf32>
    %393 = vector.shape_cast %392 : vector<64xf32> to vector<64x1xf32>
    %394 = vector.broadcast %393 : vector<64x1xf32> to vector<64x64xf32>
    %395 = arith.subf %391, %394 : vector<64x64xf32>
    %396 = math.exp %395 : vector<64x64xf32>
    %cst_172 = arith.constant dense<0.000000e+00> : vector<64xf32>
    %397 = vector.multi_reduction <add>, %396, %cst_172 [1] : vector<64x64xf32> to vector<64xf32>
    %398 = vector.shape_cast %397 : vector<64xf32> to vector<64x1xf32>
    %399 = tpu.reciprocal %398 {approx = true} : vector<64x1xf32> -> vector<64x1xf32>
    %400 = vector.broadcast %399 : vector<64x1xf32> to vector<64x64xf32>
    %401 = arith.mulf %396, %400 : vector<64x64xf32>
    %402 = arith.truncf %401 : vector<64x64xf32> to vector<64x64xbf16>
    %403 = arith.truncf %385 : vector<64x8xf32> to vector<64x8xbf16>
    %cst_173 = arith.constant dense<0.000000e+00> : vector<64x8xf32>
    %404 = tpu.matmul %402, %403, %cst_173 {dimension_numbers = #tpu.dot_dimension_numbers<[1], [0], [0], [1], [0, 0, 1, 1], [], []>} : vector<64x64xbf16>, vector<64x8xbf16>, vector<64x8xf32> -> vector<64x8xf32>
    %405 = arith.truncf %404 : vector<64x8xf32> to vector<64x8xbf16>
    %cst_174 = arith.constant dense<0.000000e+00> : vector<64x32xf32>
    %406 = tpu.matmul %405, %373, %cst_174 {dimension_numbers = #tpu.dot_dimension_numbers<[1], [0], [0], [1], [0, 0, 1, 1], [], []>} : vector<64x8xbf16>, vector<8x32xbf16>, vector<64x32xf32> -> vector<64x32xf32>
    %407 = arith.addf %369, %406 : vector<64x32xf32>
    %c160 = arith.constant 160 : index
    %c0_175 = arith.constant 0 : index
    %408 = vector.load %arg3[%c160, %c0_175] : memref<200x64xf32, #tpu.memory_space<vmem>>, vector<1x32xf32>
    %409 = vector.broadcast %408 : vector<1x32xf32> to vector<64x32xf32>
    %410 = arith.addf %407, %409 : vector<64x32xf32>
    %411 = arith.addf %255, %410 : vector<64x32xf32>
    %c168 = arith.constant 168 : index
    %c0_176 = arith.constant 0 : index
    %412 = vector.load %arg3[%c168, %c0_176] : memref<200x64xf32, #tpu.memory_space<vmem>>, vector<1x32xf32>
    %c169 = arith.constant 169 : index
    %c0_177 = arith.constant 0 : index
    %413 = vector.load %arg3[%c169, %c0_177] : memref<200x64xf32, #tpu.memory_space<vmem>>, vector<1x32xf32>
    %cst_178 = arith.constant dense<0.000000e+00> : vector<64xf32>
    %414 = vector.multi_reduction <add>, %411, %cst_178 [1] : vector<64x32xf32> to vector<64xf32>
    %415 = vector.shape_cast %414 : vector<64xf32> to vector<64x1xf32>
    %cst_179 = arith.constant 3.200000e+01 : f32
    %416 = vector.broadcast %cst_179 : f32 to vector<64x1xf32>
    %417 = arith.divf %415, %416 : vector<64x1xf32>
    %418 = vector.broadcast %417 : vector<64x1xf32> to vector<64x32xf32>
    %419 = arith.subf %411, %418 : vector<64x32xf32>
    %420 = arith.mulf %419, %419 : vector<64x32xf32>
    %cst_180 = arith.constant dense<0.000000e+00> : vector<64xf32>
    %421 = vector.multi_reduction <add>, %420, %cst_180 [1] : vector<64x32xf32> to vector<64xf32>
    %422 = vector.shape_cast %421 : vector<64xf32> to vector<64x1xf32>
    %cst_181 = arith.constant 3.200000e+01 : f32
    %423 = vector.broadcast %cst_181 : f32 to vector<64x1xf32>
    %424 = arith.divf %422, %423 : vector<64x1xf32>
    %cst_182 = arith.constant 9.99999974E-6 : f32
    %425 = vector.broadcast %cst_182 : f32 to vector<64x1xf32>
    %426 = arith.addf %424, %425 : vector<64x1xf32>
    %427 = math.rsqrt %426 : vector<64x1xf32>
    %428 = vector.broadcast %427 : vector<64x1xf32> to vector<64x32xf32>
    %429 = arith.mulf %419, %428 : vector<64x32xf32>
    %430 = vector.broadcast %412 : vector<1x32xf32> to vector<64x32xf32>
    %431 = arith.mulf %429, %430 : vector<64x32xf32>
    %432 = vector.broadcast %413 : vector<1x32xf32> to vector<64x32xf32>
    %433 = arith.addf %431, %432 : vector<64x32xf32>
    %434 = arith.truncf %433 : vector<64x32xf32> to vector<64x32xbf16>
    %c1008 = arith.constant 1008 : index
    %c0_183 = arith.constant 0 : index
    %435 = vector.load %arg2[%c1008, %c0_183] : memref<1104x64xbf16, #tpu.memory_space<vmem>>, vector<32x64xbf16>
    %cst_184 = arith.constant dense<0.000000e+00> : vector<64x64xf32>
    %436 = tpu.matmul %434, %435, %cst_184 {dimension_numbers = #tpu.dot_dimension_numbers<[1], [0], [0], [1], [0, 0, 1, 1], [], []>} : vector<64x32xbf16>, vector<32x64xbf16>, vector<64x64xf32> -> vector<64x64xf32>
    %c176_185 = arith.constant 176 : index
    %c0_186 = arith.constant 0 : index
    %437 = vector.load %arg3[%c176_185, %c0_186] : memref<200x64xf32, #tpu.memory_space<vmem>>, vector<1x64xf32>
    %438 = vector.broadcast %437 : vector<1x64xf32> to vector<64x64xf32>
    %439 = arith.addf %436, %438 : vector<64x64xf32>
    %cst_187 = arith.constant 0.000000e+00 : f32
    %440 = vector.broadcast %cst_187 : f32 to vector<64x64xf32>
    %441 = arith.maximumf %439, %440 : vector<64x64xf32>
    %442 = arith.truncf %441 : vector<64x64xf32> to vector<64x64xbf16>
    %c1040 = arith.constant 1040 : index
    %c0_188 = arith.constant 0 : index
    %443 = vector.load %arg2[%c1040, %c0_188] : memref<1104x64xbf16, #tpu.memory_space<vmem>>, vector<64x32xbf16>
    %cst_189 = arith.constant dense<0.000000e+00> : vector<64x32xf32>
    %444 = tpu.matmul %442, %443, %cst_189 {dimension_numbers = #tpu.dot_dimension_numbers<[1], [0], [0], [1], [0, 0, 1, 1], [], []>} : vector<64x64xbf16>, vector<64x32xbf16>, vector<64x32xf32> -> vector<64x32xf32>
    %c184 = arith.constant 184 : index
    %c0_190 = arith.constant 0 : index
    %445 = vector.load %arg3[%c184, %c0_190] : memref<200x64xf32, #tpu.memory_space<vmem>>, vector<1x32xf32>
    %446 = vector.broadcast %445 : vector<1x32xf32> to vector<64x32xf32>
    %447 = arith.addf %444, %446 : vector<64x32xf32>
    %448 = arith.addf %433, %447 : vector<64x32xf32>
    %c192 = arith.constant 192 : index
    %c0_191 = arith.constant 0 : index
    %449 = vector.load %arg3[%c192, %c0_191] : memref<200x64xf32, #tpu.memory_space<vmem>>, vector<1x32xf32>
    %c193 = arith.constant 193 : index
    %c0_192 = arith.constant 0 : index
    %450 = vector.load %arg3[%c193, %c0_192] : memref<200x64xf32, #tpu.memory_space<vmem>>, vector<1x32xf32>
    %cst_193 = arith.constant dense<0.000000e+00> : vector<64xf32>
    %451 = vector.multi_reduction <add>, %448, %cst_193 [1] : vector<64x32xf32> to vector<64xf32>
    %452 = vector.shape_cast %451 : vector<64xf32> to vector<64x1xf32>
    %cst_194 = arith.constant 3.200000e+01 : f32
    %453 = vector.broadcast %cst_194 : f32 to vector<64x1xf32>
    %454 = arith.divf %452, %453 : vector<64x1xf32>
    %455 = vector.broadcast %454 : vector<64x1xf32> to vector<64x32xf32>
    %456 = arith.subf %448, %455 : vector<64x32xf32>
    %457 = arith.mulf %456, %456 : vector<64x32xf32>
    %cst_195 = arith.constant dense<0.000000e+00> : vector<64xf32>
    %458 = vector.multi_reduction <add>, %457, %cst_195 [1] : vector<64x32xf32> to vector<64xf32>
    %459 = vector.shape_cast %458 : vector<64xf32> to vector<64x1xf32>
    %cst_196 = arith.constant 3.200000e+01 : f32
    %460 = vector.broadcast %cst_196 : f32 to vector<64x1xf32>
    %461 = arith.divf %459, %460 : vector<64x1xf32>
    %cst_197 = arith.constant 9.99999974E-6 : f32
    %462 = vector.broadcast %cst_197 : f32 to vector<64x1xf32>
    %463 = arith.addf %461, %462 : vector<64x1xf32>
    %464 = math.rsqrt %463 : vector<64x1xf32>
    %465 = vector.broadcast %464 : vector<64x1xf32> to vector<64x32xf32>
    %466 = arith.mulf %456, %465 : vector<64x32xf32>
    %467 = vector.broadcast %449 : vector<1x32xf32> to vector<64x32xf32>
    %468 = arith.mulf %466, %467 : vector<64x32xf32>
    %469 = vector.broadcast %450 : vector<1x32xf32> to vector<64x32xf32>
    %470 = arith.addf %468, %469 : vector<64x32xf32>
    %c0_198 = arith.constant 0 : index
    %c0_199 = arith.constant 0 : index
    %471 = vector.load %arg4[%c0_198, %c0_199] : memref<64x32xf32, #tpu.memory_space<vmem>>, vector<64x32xf32>
    tpu.vector_store %arg4[%c0_198, %c0_199], %470 {strides = array<i32>} : memref<64x32xf32, #tpu.memory_space<vmem>>, vector<64x32xf32>,
    return
  }
  func.func @transform_0(%arg0: i32) -> (i32, i32, i32) {
    %c0_i32 = arith.constant 0 : i32
    %c0_i32_0 = arith.constant 0 : i32
    %c0_i32_1 = arith.constant 0 : i32
    %c0_i32_2 = arith.constant 0 : i32
    return %c0_i32, %c0_i32_0, %c0_i32_1 : i32, i32, i32
  }
  func.func @transform_1(%arg0: i32) -> (i32, i32) {
    %c0_i32 = arith.constant 0 : i32
    %c0_i32_0 = arith.constant 0 : i32
    %c0_i32_1 = arith.constant 0 : i32
    return %c0_i32, %c0_i32_0 : i32, i32
  }
  func.func @transform_2(%arg0: i32) -> (i32, i32) {
    %c0_i32 = arith.constant 0 : i32
    %c0_i32_0 = arith.constant 0 : i32
    %c0_i32_1 = arith.constant 0 : i32
    return %c0_i32, %c0_i32_0 : i32, i32
  }
  func.func @transform_3(%arg0: i32) -> (i32, i32) {
    %c0_i32 = arith.constant 0 : i32
    %c0_i32_0 = arith.constant 0 : i32
    %c0_i32_1 = arith.constant 0 : i32
    return %c0_i32, %c0_i32_0 : i32, i32
  }
}

</mosaic_0001>

<bundles_post_ra>
// kernel: tpu_custom_call.1
= control target key start
LH: loop header
LB: loop body
LE: loop exit
PB: predicated region body
PF: predicated region fallthrough
CT: control target
= control target key end

     0   :  { %vm42_vm0 = vcmask 1043456   ;;  %vm38_vm1 = vcmask 64512   ;;  %vm225_vm2 = vcmask 261120   ;;  %vm428_vm3 = vcmask 523264   ;;  %s7385_s0 = inlined_call_operand.vmem [shape: f32[4,8,16], index: 0, kind: input, shape index: {}]   ;;  %s7386_s1 = inlined_call_operand.vmem [shape: bf16[1104,64], index: 1, kind: input, shape index: {}]   ;;  %s7387_s2 = inlined_call_operand.vmem [shape: f32[200,64], index: 2, kind: input, shape index: {}]   ;;  %s7388_s3 = inlined_call_operand.vmem [shape: f32[64,32], index: 3, kind: output, shape index: {}]  }
   0x1   :  { %v19_v0 = vld [vmem:[%s7385_s0] sm:$0xff]  ;;  %v4648_v1 = vld [vmem:[%s7385_s0 + $0x10] sm:$0xff]  ;;  %v4646_v6 = vld [vmem:[%s7385_s0 + $0x8] sm:$0xff] }
   0x2   :  { %v20_v2 = vpack.c.bf16 %v19_v0, %v19_v0  ;;  %v106_v3 = vpack.c.bf16 %v4648_v1, %v4648_v1  ;;  %v15_v4 = vld [vmem:[%s7386_s1] sm:$0xf]  ;;  %v4650_v7 = vld [vmem:[%s7385_s0 + $0x18] sm:$0xff]  ;;  %v66_v8 = vpack.c.bf16 %v4646_v6, %v4646_v6  ;;  %v5101_v14 = vld [vmem:[%s7386_s1 + $0x10] sm:$0xff] }
   0x3   :  { %v44_v5 = vsel %vm42_vm0, %v15_v4, 0  ;;  %v146_v9 = vpack.c.bf16 %v4650_v7, %v4650_v7  ;;  %v5103_v15 = vld [vmem:[%s7386_s1 + $0x20] sm:$0xff]  ;;  %v5105_v16 = vld [vmem:[%s7386_s1 + $0x30] sm:$0xff]  ;;  %v5100_v17 = vld [vmem:[%s7386_s1 + $0x8] sm:$0xff] }
   0x4   :  { %22 = vxpose.xlu0.c.b16.start.end [1/1] (short) (narrow) %v20_v2, 16  ;;  %107 = vxpose.xlu1.c.b16.start.end [1/1] (short) (narrow) %v106_v3, 16  ;;  %v5102_v18 = vld [vmem:[%s7386_s1 + $0x18] sm:$0xff]  ;;  %v5104_v19 = vld [vmem:[%s7386_s1 + $0x28] sm:$0xff]  ;;  %v5162_v21 = vld [vmem:[%s7387_s2 + $0x50] ss:$0 sm:$0xff] }
   0x5   :  { %53 = vmatpush.bf16.msra.mxu0 %v44_v5  ;;  %93 = vmatpush.bf16.msra.mxu1 %v44_v5  ;;  %v17_v26 = vld [vmem:[%s7387_s2] sm:$0xff]  ;;  %v18_v27 = vld [vmem:[%s7387_s2 + $0x8] sm:$0xff]  ;;  %v5109_v44 = vld [vmem:[%s7386_s1 + $0x50] sm:$0xff] }
   0x6   :  { %133 = vmatpush.bf16.msra.mxu2 %v44_v5  ;;  %173 = vmatpush.bf16.msra.mxu3 %v44_v5  ;;  %v5107_v43 = vld [vmem:[%s7386_s1 + $0x40] sm:$0xff]  ;;  %v5106_v47 = vld [vmem:[%s7386_s1 + $0x38] sm:$0xff]  ;;  %v5108_v48 = vld [vmem:[%s7386_s1 + $0x48] sm:$0xff] }
   0x9   :  { %244 = vmatpush.bf16.msrb.mxu0 %v5101_v14  ;;  %286 = vmatpush.bf16.msrb.mxu1 %v5103_v15 }
   0xa   :  { %328 = vmatpush.bf16.msrb.mxu2 %v5105_v16 }
   0xd   :  { %245 = vmatpush.bf16.msrb.mxu0 %v5100_v17  ;;  %287 = vmatpush.bf16.msrb.mxu1 %v5102_v18 }
   0xe   :  { %329 = vmatpush.bf16.msrb.mxu2 %v5104_v19 }
  0x14   :  { %67 = vxpose.xlu0.c.b16.start.end [1/1] (short) (narrow) %v66_v8, 16  ;;  %147 = vxpose.xlu1.c.b16.start.end [1/1] (short) (narrow) %v146_v9, 16 }
  0xb0   :  { %v30_v10 = vpop.trf.xlu0  ;;  %v115_v11 = vpop.trf.xlu1 }
  0xb1   :  { %4645 = vmatmul.msk.bf16.vlgmr.msra.gmra.mxu0 %vm38_vm1, %v30_v10  ;;  %4649 = vmatmul.msk.bf16.vlgmr.msra.gmra.mxu2 %vm38_vm1, %v115_v11 }
  0xb2   :  { %647 = vmatpush.bf16.msra.mxu2 %v5109_v44 }
  0xb6   :  { %648 = vmatpush.bf16.msra.mxu2 %v5108_v48 }
  0xc0   :  { %v75_v12 = vpop.trf.xlu0  ;;  %v155_v13 = vpop.trf.xlu1 }
  0xc1   :  { %4647 = vmatmul.msk.bf16.vlgmr.msra.gmra.mxu1 %vm38_vm1, %v75_v12  ;;  %4651 = vmatmul.msk.bf16.vlgmr.msra.gmra.mxu3 %vm38_vm1, %v155_v13  ;;  %v5164_v12 = vld [vmem:[%s7387_s2 + $0x5c] ss:$0 sm:$0xff] }
  0xc2   :  { %605 = vmatpush.bf16.msra.mxu1 %v5107_v43 }
  0xc6   :  { %606 = vmatpush.bf16.msra.mxu1 %v5106_v47 }
 0x12e   :  { %v55_v20 = vpop.f32.mrf.mxu0 }
 0x12f   :  { %v56_v22 = vadd.f32 %v5162_v21, %v55_v20 }
 0x131   :  { %v60_v24 = vmul.f32 5.656854, %v56_v22 }
 0x133   :  { %v5615_v29 = vadd.f32 %v60_v24, %v17_v26 }
 0x134   :  { %v135_v34 = vpop.f32.mrf.mxu2 }
 0x135   :  { %v136_v45 = vadd.f32 %v5162_v21, %v135_v34 }
 0x136   :  { %v57_v23 = vpop.f32.mrf.mxu0 }
 0x137   :  { %v58_v25 = vadd.f32 %v5162_v21, %v57_v23  ;;  %v140_v50 = vmul.f32 5.656854, %v136_v45 }
 0x139   :  { %v61_v28 = vmul.f32 5.656854, %v58_v25  ;;  %v5655_v52 = vadd.f32 %v140_v50, %v17_v26 }
 0x13b   :  { %v5617_v30 = vadd.f32 %v61_v28, %v18_v27 }
 0x13c   :  { %v137_v42 = vpop.f32.mrf.mxu2 }
 0x13d   :  { %v5621_v31 = vpack.c.bf16 %v5617_v30, %v5615_v29  ;;  %v138_v46 = vadd.f32 %v5162_v21, %v137_v42 }
 0x13e   :  { %v95_v32 = vpop.f32.mrf.mxu1 }
 0x13f   :  { %4660 = vmatmul.msk.bf16.vlgmr.msrb.gmra.mxu0 %vm225_vm2, %v5621_v31  ;;  %4672 = vmatmul.msk.bf16.vlgmr.msrb.gmra.mxu1 %vm225_vm2, %v5621_v31  ;;  %v96_v33 = vadd.f32 %v5162_v21, %v95_v32  ;;  %v141_v51 = vmul.f32 5.656854, %v138_v46 }
 0x140   :  { %4684 = vmatmul.msk.bf16.vlgmr.msrb.gmra.mxu2 %vm225_vm2, %v5621_v31 }
 0x141   :  { %v100_v36 = vmul.f32 5.656854, %v96_v33  ;;  %v5657_v53 = vadd.f32 %v141_v51, %v18_v27 }
 0x143   :  { %v5629_v39 = vadd.f32 %v100_v36, %v17_v26  ;;  %v5661_v54 = vpack.c.bf16 %v5657_v53, %v5655_v52 }
 0x144   :  { %v175_v49 = vpop.f32.mrf.mxu3 }
 0x145   :  { %v176_v56 = vadd.f32 %v5162_v21, %v175_v49 }
 0x146   :  { %v97_v35 = vpop.f32.mrf.mxu1 }
 0x147   :  { %v98_v37 = vadd.f32 %v5162_v21, %v97_v35  ;;  %v180_v58 = vmul.f32 5.656854, %v176_v56 }
 0x149   :  { %v101_v38 = vmul.f32 5.656854, %v98_v37  ;;  %v5669_v60 = vadd.f32 %v180_v58, %v17_v26  ;;  %v5163_v58 = vld [vmem:[%s7387_s2 + $0x58] ss:$0 sm:$0xff] }
 0x14b   :  { %v5631_v40 = vadd.f32 %v101_v38, %v18_v27 }
 0x14c   :  { %v177_v55 = vpop.f32.mrf.mxu3 }
 0x14d   :  { %v5635_v41 = vpack.c.bf16 %v5631_v40, %v5629_v39  ;;  %v178_v57 = vadd.f32 %v5162_v21, %v177_v55  ;;  %v5165_v21 = vld [vmem:[%s7387_s2 + $0x60] ss:$0 sm:$0xff] }
 0x14f   :  { %4661 = vmatmul.msk.bf16.gmra.mxu0 %vm225_vm2, %v5635_v41  ;;  %4673 = vmatmul.msk.bf16.gmra.mxu1 %vm225_vm2, %v5635_v41  ;;  %v181_v59 = vmul.f32 5.656854, %v178_v57 }
 0x150   :  { %4685 = vmatmul.msk.bf16.gmra.mxu2 %vm225_vm2, %v5635_v41 }
 0x151   :  { %v5671_v61 = vadd.f32 %v181_v59, %v18_v27 }
 0x153   :  { %v5675_v62 = vpack.c.bf16 %v5671_v61, %v5669_v60 }
 0x15f   :  { %4662 = vmatmul.msk.bf16.gmra.mxu0 %vm225_vm2, %v5661_v54  ;;  %4674 = vmatmul.msk.bf16.gmra.mxu1 %vm225_vm2, %v5661_v54 }
 0x160   :  { %4686 = vmatmul.msk.bf16.gmra.mxu2 %vm225_vm2, %v5661_v54 }
 0x16f   :  { %4663 = vmatmul.msk.bf16.gmra.mxu0 %vm225_vm2, %v5675_v62  ;;  %4675 = vmatmul.msk.bf16.gmra.mxu1 %vm225_vm2, %v5675_v62 }
 0x170   :  { %4687 = vmatmul.msk.bf16.gmra.mxu2 %vm225_vm2, %v5675_v62 }
 0x17f   :  { %4704 = vmatmul.msk.bf16.vlgmr.msra.gmra.mxu1 %vm225_vm2, %v5621_v31 }
 0x180   :  { %4716 = vmatmul.msk.bf16.vlgmr.msra.gmra.mxu2 %vm225_vm2, %v5621_v31 }
 0x18f   :  { %4705 = vmatmul.msk.bf16.gmra.mxu1 %vm225_vm2, %v5635_v41 }
 0x190   :  { %4717 = vmatmul.msk.bf16.gmra.mxu2 %vm225_vm2, %v5635_v41 }
 0x19f   :  { %4706 = vmatmul.msk.bf16.gmra.mxu1 %vm225_vm2, %v5661_v54 }
 0x1a0   :  { %4718 = vmatmul.msk.bf16.gmra.mxu2 %vm225_vm2, %v5661_v54 }
 0x1af   :  { %4707 = vmatmul.msk.bf16.gmra.mxu1 %vm225_vm2, %v5675_v62 }
 0x1b0   :  { %4719 = vmatmul.msk.bf16.gmra.mxu2 %vm225_vm2, %v5675_v62 }
 0x1bc   :  { %v289_v63 = vpop.f32.mrf.mxu1  ;;  %v247_v20 = vpop.f32.mrf.mxu0 }
 0x1bd   :  { %v290_v51 = vadd.f32 %v5164_v12, %v289_v63 }
 0x1c3   :  { %v331_v0 = vpop.f32.mrf.mxu2 }
 0x1c4   :  { %v291_v1 = vpop.f32.mrf.mxu1  ;;  %v249_v42 = vpop.f32.mrf.mxu0  ;;  %v332_v47 = vadd.f32 %v5165_v21, %v331_v0 }
 0x1c5   :  { %v292_v48 = vadd.f32 %v5164_v12, %v291_v1 }
 0x1c7   :  { %v355_v56 = vpack.c.bf16 %v292_v48, %v290_v51 }
 0x1c9   :  { %v372_v59 = vsel %vm38_vm1, %v355_v56, 0  ;;  %v5750_v56 = vld [vmem:[%s7387_s2 + $0x18] sm:$0xff] }
 0x1cb   :  { %v333_v2 = vpop.f32.mrf.mxu2 }
 0x1cc   :  { %v294_v3 = vpop.f32.mrf.mxu1  ;;  %v334_v45 = vadd.f32 %v5165_v21, %v333_v2  ;;  %v252_v57 = vpop.f32.mrf.mxu0  ;;  %v250_v2 = vadd.f32 %v5163_v58, %v249_v42 }
 0x1cd   :  { %v295_v37 = vadd.f32 %v5164_v12, %v294_v3  ;;  %v248_v3 = vadd.f32 %v5163_v58, %v247_v20 }
 0x1ce   :  { %v521_v50 = vpack.c.bf16 %v334_v45, %v332_v47 }
 0x1cf   :  { %v351_v1 = vpack.c.bf16 %v250_v2, %v248_v3 }
 0x1d3   :  { %v336_v4 = vpop.f32.mrf.mxu2 }
 0x1d4   :  { %v296_v5 = vpop.f32.mrf.mxu1  ;;  %v337_v43 = vadd.f32 %v5165_v21, %v336_v4  ;;  %v254_v4 = vpop.f32.mrf.mxu0 }
 0x1d5   :  { %v297_v33 = vadd.f32 %v5164_v12, %v296_v5 }
 0x1d7   :  { %v356_v44 = vpack.c.bf16 %v297_v33, %v295_v37 }
 0x1d9   :  { %v375_v49 = vsel %vm38_vm1, %v356_v44, 0 }
 0x1db   :  { %v338_v6 = vpop.f32.mrf.mxu2 }
 0x1dc   :  { %v299_v7 = vpop.f32.mrf.mxu1  ;;  %v339_v35 = vadd.f32 %v5165_v21, %v338_v6  ;;  %v257_v63 = vpop.f32.mrf.mxu0  ;;  %v255_v6 = vadd.f32 %v5163_v58, %v254_v4 }
 0x1dd   :  { %v300_v22 = vadd.f32 %v5164_v12, %v299_v7 }
 0x1de   :  { %v522_v46 = vpack.c.bf16 %v339_v35, %v337_v43 }
 0x1e3   :  { %v341_v8 = vpop.f32.mrf.mxu2 }
 0x1e4   :  { %v301_v9 = vpop.f32.mrf.mxu1  ;;  %v342_v32 = vadd.f32 %v5165_v21, %v341_v8  ;;  %v253_v8 = vadd.f32 %v5163_v58, %v252_v57 }
 0x1e5   :  { %v302_v18 = vadd.f32 %v5164_v12, %v301_v9 }
 0x1e6   :  { %v352_v9 = vpack.c.bf16 %v255_v6, %v253_v8 }
 0x1e7   :  { %v357_v26 = vpack.c.bf16 %v302_v18, %v300_v22 }
 0x1e9   :  { %v378_v34 = vsel %vm38_vm1, %v357_v26, 0 }
 0x1eb   :  { %v343_v10 = vpop.f32.mrf.mxu2 }
 0x1ec   :  { %v304_v11 = vpop.f32.mrf.mxu1  ;;  %v344_v27 = vadd.f32 %v5165_v21, %v343_v10 }
 0x1ed   :  { %v305_v15 = vadd.f32 %v5164_v12, %v304_v11  ;;  %v259_v11 = vpop.f32.mrf.mxu0 }
 0x1ee   :  { %v523_v36 = vpack.c.bf16 %v344_v27, %v342_v32 }
 0x1f3   :  { %v346_v13 = vpop.f32.mrf.mxu2 }
 0x1f4   :  { %v306_v14 = vpop.f32.mrf.mxu1  ;;  %v347_v24 = vadd.f32 %v5165_v21, %v346_v13  ;;  %v260_v13 = vadd.f32 %v5163_v58, %v259_v11 }
 0x1f5   :  { %v307_v16 = vadd.f32 %v5164_v12, %v306_v14  ;;  %v5111_v12 = vld [vmem:[%s7386_s1 + $0x60] sm:$0xff] }
 0x1f7   :  { %v358_v17 = vpack.c.bf16 %v307_v16, %v305_v15  ;;  %v5110_v15 = vld [vmem:[%s7386_s1 + $0x58] sm:$0xff]  ;;  %v258_v16 = vadd.f32 %v5163_v58, %v257_v63  ;;  %v5770_v63 = vld [vmem:[%s7387_s2 + $0x28] sm:$0xff] }
 0x1f9   :  { %v381_v19 = vsel %vm38_vm1, %v358_v17, 0  ;;  %v262_v17 = vpop.f32.mrf.mxu0  ;;  %v353_v18 = vpack.c.bf16 %v260_v13, %v258_v16 }
 0x1fa   :  { %387 = vmatpush.bf16.xpose.msrb.mxu3 %v381_v19  ;;  %v5167_v19 = vld [vmem:[%s7387_s2 + $0x5d] ss:$0 sm:$0xff]  ;;  %v263_v33 = vadd.f32 %v5163_v58, %v262_v17 }
 0x1fb   :  { %v348_v23 = vpop.f32.mrf.mxu2 }
 0x1fc   :  { %v349_v25 = vadd.f32 %v5165_v21, %v348_v23 }
 0x1fe   :  { %v524_v28 = vpack.c.bf16 %v349_v25, %v347_v24 }
 0x200   :  { %541 = vmatpush.bf16.msra.mxu0 %v524_v28 }
 0x201   :  { %v264_v24 = vpop.f32.mrf.mxu0 }
 0x202   :  { %388 = vmatpush.bf16.xpose.msrb.mxu3 %v378_v34  ;;  %v265_v28 = vadd.f32 %v5163_v58, %v264_v24 }
 0x203   :  { %v5707_v38 = vpop.f32.mrf.mxu2 }
 0x204   :  { %542 = vmatpush.bf16.msra.mxu0 %v523_v36  ;;  %v354_v34 = vpack.c.bf16 %v265_v28, %v263_v33  ;;  %v651_v45 = vadd.f32 %v5167_v19, %v5707_v38  ;;  %v5743_v38 = vld [vmem:[%s7387_s2 + $0x10] sm:$0xff] }
 0x208   :  { %543 = vmatpush.bf16.msra.mxu0 %v522_v46 }
 0x20a   :  { %389 = vmatpush.bf16.xpose.msrb.mxu3 %v375_v49 }
 0x20b   :  { %v652_v55 = vpop.f32.mrf.mxu2 }
 0x20c   :  { %544 = vmatpush.bf16.msra.mxu0 %v521_v50  ;;  %v653_v43 = vadd.f32 %v5167_v19, %v652_v55 }
 0x20e   :  { %v716_v46 = vpack.c.bf16 %v653_v43, %v651_v45  ;;  %v5168_v43 = vld [vmem:[%s7387_s2 + $0x61] ss:$0 sm:$0xff] }
 0x210   :  { %v733_v47 = vsel %vm38_vm1, %v716_v46, 0 }
 0x212   :  { %390 = vmatpush.bf16.xpose.msrb.mxu3 %v372_v59 }
 0x213   :  { %v655_v0 = vpop.f32.mrf.mxu2 }
 0x214   :  { %v656_v37 = vadd.f32 %v5167_v19, %v655_v0  ;;  %v5760_v0 = vld [vmem:[%s7387_s2 + $0x20] sm:$0xff] }
 0x219   :  { %4688 = vmatmul.msk.bf16.vlgmr.msrb.gmra.mxu3 %vm38_vm1, %v351_v1 }
 0x21a   :  { %689 = vmatpush.bf16.msra.mxu3 %v5111_v12 }
 0x21b   :  { %v657_v5 = vpop.f32.mrf.mxu2 }
 0x21c   :  { %v658_v35 = vadd.f32 %v5167_v19, %v657_v5 }
 0x21e   :  { %690 = vmatpush.bf16.msra.mxu3 %v5110_v15  ;;  %v717_v42 = vpack.c.bf16 %v658_v35, %v656_v37  ;;  %v5790_v15 = vld [vmem:[%s7387_s2 + $0x38] sm:$0xff] }
 0x220   :  { %v736_v44 = vsel %vm38_vm1, %v717_v42, 0 }
 0x223   :  { %v660_v7 = vpop.f32.mrf.mxu2 }
 0x224   :  { %v661_v27 = vadd.f32 %v5167_v19, %v660_v7 }
 0x229   :  { %4689 = vmatmul.msk.bf16.gmra.mxu3 %vm38_vm1, %v352_v9 }
 0x22b   :  { %v662_v10 = vpop.f32.mrf.mxu2 }
 0x22c   :  { %v663_v25 = vadd.f32 %v5167_v19, %v662_v10  ;;  %v5780_v10 = vld [vmem:[%s7387_s2 + $0x30] sm:$0xff] }
 0x22e   :  { %v718_v32 = vpack.c.bf16 %v663_v25, %v661_v27  ;;  %v5810_v25 = vld [vmem:[%s7387_s2 + $0x48] sm:$0xff] }
 0x230   :  { %v739_v36 = vsel %vm38_vm1, %v718_v32, 0 }
 0x233   :  { %v665_v14 = vpop.f32.mrf.mxu2 }
 0x234   :  { %v666_v21 = vadd.f32 %v5167_v19, %v665_v14 }
 0x239   :  { %4690 = vmatmul.msk.bf16.gmra.mxu3 %vm38_vm1, %v353_v18 }
 0x23b   :  { %v667_v20 = vpop.f32.mrf.mxu2 }
 0x23c   :  { %v668_v22 = vadd.f32 %v5167_v19, %v667_v20  ;;  %v5800_v20 = vld [vmem:[%s7387_s2 + $0x40] sm:$0xff] }
 0x23e   :  { %v719_v23 = vpack.c.bf16 %v668_v22, %v666_v21 }
 0x240   :  { %v742_v26 = vsel %vm38_vm1, %v719_v23, 0 }
 0x241   :  { %748 = vmatpush.bf16.xpose.msrb.mxu0 %v742_v26 }
 0x249   :  { %749 = vmatpush.bf16.xpose.msrb.mxu0 %v739_v36  ;;  %4691 = vmatmul.msk.bf16.gmra.mxu3 %vm38_vm1, %v354_v34 }
 0x251   :  { %750 = vmatpush.bf16.xpose.msrb.mxu0 %v736_v44 }
 0x259   :  { %751 = vmatpush.bf16.xpose.msrb.mxu0 %v733_v47  ;;  %4728 = vmatmul.msk.bf16.vlgmr.msra.gmra.mxu3 %vm225_vm2, %v5621_v31 }
 0x269   :  { %4729 = vmatmul.msk.bf16.gmra.mxu3 %vm225_vm2, %v5635_v41 }
 0x279   :  { %4730 = vmatmul.msk.bf16.gmra.mxu3 %vm225_vm2, %v5661_v54 }
 0x289   :  { %4731 = vmatmul.msk.bf16.gmra.mxu3 %vm225_vm2, %v5675_v62 }
 0x29c   :  { %v392_v48 = vpop.f32.mrf.mxu3 }
 0x29d   :  { %v412_v49 = vmul.f32 0.35355338, %v392_v48 }
 0x29f   :  { %v420_v50 = vadd.f32 %v412_v49, %v5743_v38 }
 0x2a1   :  { %v429_v51 = vsel %vm428_vm3, %v420_v50, -inf }
 0x2a2   :  { %430 = vmax.xlane.f32.xlu2 %v429_v51 }
 0x2a4   :  { %v394_v55 = vpop.f32.mrf.mxu3 }
 0x2a5   :  { %v413_v57 = vmul.f32 0.35355338, %v394_v55 }
 0x2a7   :  { %v5753_v58 = vadd.f32 %v413_v57, %v5750_v56 }
 0x2a9   :  { %v432_v59 = vsel %vm428_vm3, %v5753_v58, -inf }
 0x2aa   :  { %433 = vmax.xlane.f32.xlu2 %v432_v59 }
 0x2ac   :  { %v397_v2 = vpop.f32.mrf.mxu3 }
 0x2ad   :  { %v414_v3 = vmul.f32 0.35355338, %v397_v2 }
 0x2af   :  { %v5763_v1 = vadd.f32 %v414_v3, %v5760_v0 }
 0x2b1   :  { %v435_v4 = vsel %vm428_vm3, %v5763_v1, -inf }
 0x2b2   :  { %436 = vmax.xlane.f32.xlu2 %v435_v4 }
 0x2b4   :  { %v399_v5 = vpop.f32.mrf.mxu3 }
 0x2b5   :  { %v415_v6 = vmul.f32 0.35355338, %v399_v5 }
 0x2b7   :  { %v5773_v7 = vadd.f32 %v415_v6, %v5770_v63 }
 0x2b9   :  { %v438_v8 = vsel %vm428_vm3, %v5773_v7, -inf }
 0x2ba   :  { %439 = vmax.xlane.f32.xlu0 %v438_v8 }
 0x2bc   :  { %v402_v9 = vpop.f32.mrf.mxu3 }
 0x2bd   :  { %v416_v11 = vmul.f32 0.35355338, %v402_v9 }
 0x2bf   :  { %v5783_v12 = vadd.f32 %v416_v11, %v5780_v10 }
 0x2c1   :  { %v441_v13 = vsel %vm428_vm3, %v5783_v12, -inf }
 0x2c2   :  { %442 = vmax.xlane.f32.xlu1 %v441_v13 }
 0x2c4   :  { %v404_v14 = vpop.f32.mrf.mxu3 }
 0x2c5   :  { %v417_v16 = vmul.f32 0.35355338, %v404_v14 }
 0x2c7   :  { %v5793_v17 = vadd.f32 %v417_v16, %v5790_v15 }
 0x2c9   :  { %v444_v18 = vsel %vm428_vm3, %v5793_v17, -inf }
 0x2ca   :  { %445 = vmax.xlane.f32.xlu2 %v444_v18 }
 0x2cc   :  { %v407_v19 = vpop.f32.mrf.mxu3 }
 0x2cd   :  { %v418_v21 = vmul.f32 0.35355338, %v407_v19 }
 0x2cf   :  { %v5803_v22 = vadd.f32 %v418_v21, %v5800_v20 }
 0x2d1   :  { %v447_v23 = vsel %vm428_vm3, %v5803_v22, -inf }
 0x2d2   :  { %448 = vmax.xlane.f32.xlu2 %v447_v23 }
 0x2d4   :  { %v409_v24 = vpop.f32.mrf.mxu3 }
 0x2d5   :  { %v419_v26 = vmul.f32 0.35355338, %v409_v24 }
 0x2d7   :  { %v5813_v27 = vadd.f32 %v419_v26, %v5810_v25 }
 0x2d9   :  { %v450_v28 = vsel %vm428_vm3, %v5813_v27, -inf }
 0x2da   :  { %451 = vmax.xlane.f32.xlu2 %v450_v28 }
 0x2dc   :  { %v692_v32 = vpop.f32.mrf.mxu3 }
 0x2dd   :  { %v693_v13 = vadd.f32 %v5168_v43, %v692_v32 }
 0x2e4   :  { %v694_v33 = vpop.f32.mrf.mxu3 }
 0x2e5   :  { %v695_v6 = vadd.f32 %v5168_v43, %v694_v33 }
 0x2e7   :  { %v881_v14 = vpack.c.bf16 %v695_v6, %v693_v13 }
 0x2ec   :  { %v697_v34 = vpop.f32.mrf.mxu3 }
 0x2ed   :  { %v698_v3 = vadd.f32 %v5168_v43, %v697_v34 }
 0x2f4   :  { %v699_v35 = vpop.f32.mrf.mxu3 }
 0x2f5   :  { %v700_v59 = vadd.f32 %v5168_v43, %v699_v35 }
 0x2f7   :  { %v882_v8 = vpack.c.bf16 %v700_v59, %v698_v3 }
 0x2fc   :  { %v702_v36 = vpop.f32.mrf.mxu3 }
 0x2fd   :  { %v703_v57 = vadd.f32 %v5168_v43, %v702_v36 }
 0x304   :  { %v704_v37 = vpop.f32.mrf.mxu3 }
 0x305   :  { %v705_v49 = vadd.f32 %v5168_v43, %v704_v37 }
 0x307   :  { %v883_v2 = vpack.c.bf16 %v705_v49, %v703_v57 }
 0x30c   :  { %v707_v42 = vpop.f32.mrf.mxu3 }
 0x30d   :  { %v708_v45 = vadd.f32 %v5168_v43, %v707_v42 }
 0x314   :  { %v709_v44 = vpop.f32.mrf.mxu3 }
 0x315   :  { %v710_v46 = vadd.f32 %v5168_v43, %v709_v44  ;;  %v431_v47 = vpop.xlane.xlu2 %430 }
 0x316   :  { %v453_v48 = vsub.f32 %v420_v50, %v431_v47 }
 0x317   :  { %v884_v51 = vpack.c.bf16 %v710_v46, %v708_v45 }
 0x318   :  { %v461_v55 = vmul.f32 1.442695, %v453_v48 }
 0x319   :  { %901 = vmatpush.bf16.msrb.mxu1 %v884_v51 }
 0x31a   :  { %5201 = vpow2.f32 %v461_v55 }
 0x31d   :  { %v434_v4 = vpop.xlane.xlu2 %433  ;;  %902 = vmatpush.bf16.msrb.mxu1 %v883_v2 }
 0x31e   :  { %v454_v5 = vsub.f32 %v5753_v58, %v434_v4 }
 0x320   :  { %v5202_v9 = vpop.eup %5201  ;;  %v463_v11 = vmul.f32 1.442695, %v454_v5 }
 0x321   :  { %903 = vmatpush.bf16.msrb.mxu1 %v882_v8  ;;  %v477_v50 = vsel %vm428_vm3, %v5202_v9, 0.0 }
 0x322   :  { %5203 = vpow2.f32 %v463_v11  ;;  %478 = vadd.xlane.f32.xlu2 %v477_v50 }
 0x325   :  { %v437_v16 = vpop.xlane.xlu2 %436  ;;  %904 = vmatpush.bf16.msrb.mxu1 %v881_v14 }
 0x326   :  { %v455_v18 = vsub.f32 %v5763_v1, %v437_v16 }
 0x328   :  { %v5204_v19 = vpop.eup %5203  ;;  %v465_v21 = vmul.f32 1.442695, %v455_v18 }
 0x329   :  { %v480_v23 = vsel %vm428_vm3, %v5204_v19, 0.0 }
 0x32a   :  { %5205 = vpow2.f32 %v465_v21  ;;  %481 = vadd.xlane.f32.xlu2 %v480_v23 }
 0x32d   :  { %v440_v58 = vpop.xlane.xlu0 %439 }
 0x32e   :  { %v456_v24 = vsub.f32 %v5773_v7, %v440_v58 }
 0x330   :  { %v5206_v26 = vpop.eup %5205  ;;  %v467_v28 = vmul.f32 1.442695, %v456_v24 }
 0x331   :  { %v483_v32 = vsel %vm428_vm3, %v5206_v26, 0.0 }
 0x332   :  { %5207 = vpow2.f32 %v467_v28  ;;  %484 = vadd.xlane.f32.xlu2 %v483_v32 }
 0x335   :  { %v443_v33 = vpop.xlane.xlu1 %442 }
 0x336   :  { %v457_v34 = vsub.f32 %v5783_v12, %v443_v33 }
 0x338   :  { %v5208_v35 = vpop.eup %5207  ;;  %v469_v1 = vmul.f32 1.442695, %v457_v34  ;;  %v608_v34 = vpop.f32.mrf.mxu1 }
 0x339   :  { %v486_v36 = vsel %vm428_vm3, %v5208_v35, 0.0 }
 0x33a   :  { %5209 = vpow2.f32 %v469_v1  ;;  %487 = vadd.xlane.f32.xlu2 %v486_v36 }
 0x33d   :  { %v446_v37 = vpop.xlane.xlu2 %445 }
 0x33e   :  { %v458_v42 = vsub.f32 %v5793_v17, %v446_v37 }
 0x340   :  { %v5210_v43 = vpop.eup %5209  ;;  %v471_v7 = vmul.f32 1.442695, %v458_v42  ;;  %v610_v36 = vpop.f32.mrf.mxu1 }
 0x341   :  { %v489_v44 = vsel %vm428_vm3, %v5210_v43, 0.0 }
 0x342   :  { %5211 = vpow2.f32 %v471_v7  ;;  %490 = vadd.xlane.f32.xlu2 %v489_v44 }
 0x345   :  { %v449_v45 = vpop.xlane.xlu2 %448 }
 0x346   :  { %v459_v46 = vsub.f32 %v5803_v22, %v449_v45 }
 0x348   :  { %v5212_v47 = vpop.eup %5211  ;;  %v473_v12 = vmul.f32 1.442695, %v459_v46  ;;  %v613_v44 = vpop.f32.mrf.mxu1 }
 0x349   :  { %v492_v48 = vsel %vm428_vm3, %v5212_v47, 0.0 }
 0x34a   :  { %5213 = vpow2.f32 %v473_v12  ;;  %493 = vadd.xlane.f32.xlu2 %v492_v48 }
 0x34d   :  { %v452_v49 = vpop.xlane.xlu2 %451 }
 0x34e   :  { %v460_v51 = vsub.f32 %v5813_v27, %v452_v49 }
 0x350   :  { %v5214_v55 = vpop.eup %5213  ;;  %v475_v17 = vmul.f32 1.442695, %v460_v51  ;;  %v615_v12 = vpop.f32.mrf.mxu1 }
 0x351   :  { %v495_v57 = vsel %vm428_vm3, %v5214_v55, 0.0 }
 0x352   :  { %5215 = vpow2.f32 %v475_v17  ;;  %496 = vadd.xlane.f32.xlu2 %v495_v57 }
 0x358   :  { %v5216_v59 = vpop.eup %5215  ;;  %v618_v48 = vpop.f32.mrf.mxu1 }
 0x359   :  { %v498_v2 = vsel %vm428_vm3, %v5216_v59, 0.0 }
 0x35a   :  { %499 = vadd.xlane.f32.xlu2 %v498_v2 }
 0x360   :  { %v620_v57 = vpop.f32.mrf.mxu1 }
 0x395   :  { %v479_v22 = vpop.xlane.xlu2 %478 }
 0x396   :  { %5217 = vrcp.f32 %v479_v22  ;;  %v5112_v22 = vld [vmem:[%s7386_s1 + $0x68] sm:$0xff] }
 0x39c   :  { %v5218_v4 = vpop.eup %5217 }
 0x39d   :  { %v482_v3 = vpop.xlane.xlu2 %481  ;;  %v509_v6 = vmul.f32 %v5218_v4, %v5202_v9 }
 0x39e   :  { %5219 = vrcp.f32 %v482_v3  ;;  %v623_v3 = vpop.f32.mrf.mxu1 }
 0x3a4   :  { %v5220_v5 = vpop.eup %5219 }
 0x3a5   :  { %v510_v8 = vmul.f32 %v5220_v5, %v5204_v19  ;;  %v485_v11 = vpop.xlane.xlu2 %484  ;;  %v208_v5 = vld [vmem:[%s7386_s1 + $0xc8] sm:$0xf] }
 0x3a6   :  { %5221 = vrcp.f32 %v485_v11 }
 0x3a7   :  { %v517_v27 = vpack.c.bf16 %v510_v8, %v509_v6  ;;  %v987_v6 = vsel %vm42_vm0, %v208_v5, 0  ;;  %v625_v8 = vpop.f32.mrf.mxu1 }
 0x3a8   :  { %996 = vmatpush.bf16.msrb.mxu3 %v987_v6 }
 0x3a9   :  { %4692 = vmatmul.msk.bf16.vlgmr.msra.gmra.mxu0 %vm428_vm3, %v517_v27 }
 0x3ac   :  { %v5222_v50 = vpop.eup %5221 }
 0x3ad   :  { %v488_v13 = vpop.xlane.xlu2 %487  ;;  %v511_v18 = vmul.f32 %v5222_v50, %v5206_v26 }
 0x3ae   :  { %5223 = vrcp.f32 %v488_v13 }
 0x3b4   :  { %v5224_v14 = vpop.eup %5223 }
 0x3b5   :  { %v491_v16 = vpop.xlane.xlu2 %490  ;;  %v512_v21 = vmul.f32 %v5224_v14, %v5208_v35 }
 0x3b6   :  { %5225 = vrcp.f32 %v491_v16 }
 0x3b7   :  { %v518_v23 = vpack.c.bf16 %v512_v21, %v511_v18 }
 0x3b9   :  { %4693 = vmatmul.msk.bf16.gmra.mxu0 %vm428_vm3, %v518_v23 }
 0x3bc   :  { %v5226_v9 = vpop.eup %5225 }
 0x3bd   :  { %v494_v58 = vpop.xlane.xlu2 %493  ;;  %v513_v28 = vmul.f32 %v5226_v9, %v5210_v43  ;;  %v5166_v43 = vld [vmem:[%s7387_s2 + $0x59] ss:$0 sm:$0xff] }
 0x3be   :  { %5227 = vrcp.f32 %v494_v58  ;;  %v611_v45 = vadd.f32 %v5166_v43, %v610_v36  ;;  %v609_v46 = vadd.f32 %v5166_v43, %v608_v34  ;;  %v616_v49 = vadd.f32 %v5166_v43, %v615_v12 }
 0x3bf   :  { %v614_v51 = vadd.f32 %v5166_v43, %v613_v44  ;;  %v619_v2 = vadd.f32 %v5166_v43, %v618_v48  ;;  %v626_v11 = vadd.f32 %v5166_v43, %v625_v8  ;;  %v624_v27 = vadd.f32 %v5166_v43, %v623_v3 }
 0x3c1   :  { %v713_v17 = vpack.c.bf16 %v616_v49, %v614_v51  ;;  %v715_v13 = vpack.c.bf16 %v626_v11, %v624_v27 }
 0x3c4   :  { %v5228_v19 = vpop.eup %5227 }
 0x3c5   :  { %v497_v24 = vpop.xlane.xlu2 %496  ;;  %v514_v32 = vmul.f32 %v5228_v19, %v5212_v47  ;;  %v712_v47 = vpack.c.bf16 %v611_v45, %v609_v46 }
 0x3c6   :  { %5229 = vrcp.f32 %v497_v24 }
 0x3c7   :  { %v519_v33 = vpack.c.bf16 %v514_v32, %v513_v28 }
 0x3c9   :  { %4694 = vmatmul.msk.bf16.gmra.mxu0 %vm428_vm3, %v519_v33 }
 0x3cc   :  { %v5230_v26 = vpop.eup %5229 }
 0x3cd   :  { %v500_v1 = vpop.xlane.xlu2 %499  ;;  %v515_v37 = vmul.f32 %v5230_v26, %v5214_v55  ;;  %v5113_v55 = vld [vmem:[%s7386_s1 + $0x70] sm:$0xff] }
 0x3ce   :  { %5231 = vrcp.f32 %v500_v1  ;;  %1053 = vmatpush.bf16.msra.mxu0 %v5113_v55 }
 0x3d2   :  { %1054 = vmatpush.bf16.msra.mxu0 %v5112_v22 }
 0x3d4   :  { %v5232_v35 = vpop.eup %5231 }
 0x3d5   :  { %v516_v42 = vmul.f32 %v5232_v35, %v5216_v59  ;;  %v621_v59 = vadd.f32 %v5166_v43, %v620_v57 }
 0x3d7   :  { %v520_v7 = vpack.c.bf16 %v516_v42, %v515_v37  ;;  %v714_v4 = vpack.c.bf16 %v621_v59, %v619_v2 }
 0x3d9   :  { %4695 = vmatmul.msk.bf16.gmra.mxu0 %vm428_vm3, %v520_v7 }
 0x3e9   :  { %4732 = vmatmul.msk.bf16.vlgmr.msrb.gmra.mxu0 %vm38_vm1, %v712_v47 }
 0x3f9   :  { %4733 = vmatmul.msk.bf16.gmra.mxu0 %vm38_vm1, %v713_v17 }
 0x409   :  { %4734 = vmatmul.msk.bf16.gmra.mxu0 %vm38_vm1, %v714_v4 }
 0x419   :  { %4735 = vmatmul.msk.bf16.gmra.mxu0 %vm38_vm1, %v715_v13 }
 0x426   :  { %v546_v50 = vpop.f32.mrf.mxu0 }
 0x429   :  { %4756 = vmatmul.msk.bf16.vlgmr.msra.gmra.mxu0 %vm225_vm2, %v5621_v31 }
 0x42e   :  { %v548_v14 = vpop.f32.mrf.mxu0 }
 0x42f   :  { %v566_v16 = vpack.c.bf16 %v548_v14, %v546_v50 }
 0x431   :  { %4744 = vmatmul.msk.bf16.vlgmr.msrb.gmra.mxu3 %vm38_vm1, %v566_v16 }
 0x436   :  { %v551_v18 = vpop.f32.mrf.mxu0 }
 0x439   :  { %4757 = vmatmul.msk.bf16.gmra.mxu0 %vm225_vm2, %v5635_v41 }
 0x43e   :  { %v553_v21 = vpop.f32.mrf.mxu0 }
 0x43f   :  { %v567_v23 = vpack.c.bf16 %v553_v21, %v551_v18 }
 0x441   :  { %4745 = vmatmul.msk.bf16.gmra.mxu3 %vm38_vm1, %v567_v23 }
 0x446   :  { %v556_v58 = vpop.f32.mrf.mxu0 }
 0x449   :  { %4758 = vmatmul.msk.bf16.gmra.mxu0 %vm225_vm2, %v5661_v54 }
 0x44e   :  { %v558_v9 = vpop.f32.mrf.mxu0 }
 0x44f   :  { %v568_v19 = vpack.c.bf16 %v558_v9, %v556_v58 }
 0x451   :  { %4746 = vmatmul.msk.bf16.gmra.mxu3 %vm38_vm1, %v568_v19 }
 0x456   :  { %v561_v24 = vpop.f32.mrf.mxu0 }
 0x459   :  { %4759 = vmatmul.msk.bf16.gmra.mxu0 %vm225_vm2, %v5675_v62 }
 0x45e   :  { %v563_v28 = vpop.f32.mrf.mxu0 }
 0x45f   :  { %v569_v32 = vpack.c.bf16 %v563_v28, %v561_v24 }
 0x461   :  { %4747 = vmatmul.msk.bf16.gmra.mxu3 %vm38_vm1, %v569_v32 }
 0x466   :  { %v753_v33 = vpop.f32.mrf.mxu0 }
 0x467   :  { %v773_v34 = vmul.f32 0.35355338, %v753_v33 }
 0x469   :  { %v781_v1 = vadd.f32 %v773_v34, %v5743_v38 }
 0x46b   :  { %v789_v26 = vsel %vm428_vm3, %v781_v1, -inf }
 0x46c   :  { %790 = vmax.xlane.f32.xlu2 %v789_v26 }
 0x46e   :  { %v755_v35 = vpop.f32.mrf.mxu0 }
 0x46f   :  { %v774_v36 = vmul.f32 0.35355338, %v755_v35 }
 0x471   :  { %v782_v37 = vadd.f32 %v774_v36, %v5750_v56 }
 0x473   :  { %v792_v42 = vsel %vm428_vm3, %v782_v37, -inf }
 0x474   :  { %793 = vmax.xlane.f32.xlu1 %v792_v42 }
 0x476   :  { %v758_v7 = vpop.f32.mrf.mxu0 }
 0x477   :  { %v775_v44 = vmul.f32 0.35355338, %v758_v7 }
 0x479   :  { %v783_v43 = vadd.f32 %v775_v44, %v5760_v0 }
 0x47b   :  { %v795_v45 = vsel %vm428_vm3, %v783_v43, -inf }
 0x47c   :  { %796 = vmax.xlane.f32.xlu2 %v795_v45 }
 0x47e   :  { %v760_v46 = vpop.f32.mrf.mxu0 }
 0x47f   :  { %v776_v47 = vmul.f32 0.35355338, %v760_v46 }
 0x481   :  { %v784_v12 = vadd.f32 %v776_v47, %v5770_v63 }
 0x483   :  { %v798_v48 = vsel %vm428_vm3, %v784_v12, -inf }
 0x484   :  { %799 = vmax.xlane.f32.xlu1 %v798_v48 }
 0x486   :  { %v763_v49 = vpop.f32.mrf.mxu0 }
 0x487   :  { %v777_v51 = vmul.f32 0.35355338, %v763_v49 }
 0x489   :  { %v785_v17 = vadd.f32 %v777_v51, %v5780_v10 }
 0x48b   :  { %v801_v55 = vsel %vm428_vm3, %v785_v17, -inf }
 0x48c   :  { %802 = vmax.xlane.f32.xlu2 %v801_v55 }
 0x48e   :  { %v765_v57 = vpop.f32.mrf.mxu0 }
 0x48f   :  { %v778_v59 = vmul.f32 0.35355338, %v765_v57 }
 0x491   :  { %v786_v2 = vadd.f32 %v778_v59, %v5790_v15 }
 0x493   :  { %v804_v22 = vsel %vm428_vm3, %v786_v2, -inf }
 0x494   :  { %805 = vmax.xlane.f32.xlu1 %v804_v22 }
 0x496   :  { %v768_v3 = vpop.f32.mrf.mxu0 }
 0x497   :  { %v779_v4 = vmul.f32 0.35355338, %v768_v3 }
 0x499   :  { %v787_v5 = vadd.f32 %v779_v4, %v5800_v20 }
 0x49b   :  { %v807_v6 = vsel %vm428_vm3, %v787_v5, -inf }
 0x49c   :  { %808 = vmax.xlane.f32.xlu2 %v807_v6 }
 0x49e   :  { %v770_v8 = vpop.f32.mrf.mxu0 }
 0x49f   :  { %v780_v11 = vmul.f32 0.35355338, %v770_v8 }
 0x4a1   :  { %v788_v27 = vadd.f32 %v780_v11, %v5810_v25 }
 0x4a3   :  { %v810_v13 = vsel %vm428_vm3, %v788_v27, -inf }
 0x4a4   :  { %811 = vmax.xlane.f32.xlu0 %v810_v13 }
 0x4df   :  { %v791_v50 = vpop.xlane.xlu2 %790 }
 0x4e0   :  { %v813_v14 = vsub.f32 %v781_v1, %v791_v50 }
 0x4e2   :  { %v821_v16 = vmul.f32 1.442695, %v813_v14 }
 0x4e4   :  { %5233 = vpow2.f32 %v821_v16 }
 0x4e7   :  { %v794_v18 = vpop.xlane.xlu1 %793 }
 0x4e8   :  { %v814_v21 = vsub.f32 %v782_v37, %v794_v18 }
 0x4ea   :  { %v5234_v23 = vpop.eup %5233  ;;  %v823_v58 = vmul.f32 1.442695, %v814_v21 }
 0x4eb   :  { %v837_v9 = vsel %vm428_vm3, %v5234_v23, 0.0 }
 0x4ec   :  { %5235 = vpow2.f32 %v823_v58  ;;  %838 = vadd.xlane.f32.xlu1 %v837_v9  ;;  %v5115_v58 = vld [vmem:[%s7386_s1 + $0x80] sm:$0xff] }
 0x4ed   :  { %1095 = vmatpush.bf16.msra.mxu1 %v5115_v58 }
 0x4ef   :  { %v797_v19 = vpop.xlane.xlu2 %796 }
 0x4f0   :  { %v815_v24 = vsub.f32 %v783_v43, %v797_v19 }
 0x4f2   :  { %v5236_v28 = vpop.eup %5235  ;;  %v825_v32 = vmul.f32 1.442695, %v815_v24 }
 0x4f3   :  { %v840_v33 = vsel %vm428_vm3, %v5236_v28, 0.0 }
 0x4f4   :  { %5237 = vpow2.f32 %v825_v32  ;;  %841 = vadd.xlane.f32.xlu2 %v840_v33 }
 0x4f7   :  { %v800_v34 = vpop.xlane.xlu1 %799 }
 0x4f8   :  { %v816_v1 = vsub.f32 %v784_v12, %v800_v34 }
 0x4fa   :  { %v5238_v26 = vpop.eup %5237  ;;  %v827_v35 = vmul.f32 1.442695, %v816_v1 }
 0x4fb   :  { %v843_v36 = vsel %vm428_vm3, %v5238_v26, 0.0 }
 0x4fc   :  { %5239 = vpow2.f32 %v827_v35  ;;  %844 = vadd.xlane.f32.xlu0 %v843_v36 }
 0x4ff   :  { %v803_v37 = vpop.xlane.xlu2 %802 }
 0x500   :  { %v817_v42 = vsub.f32 %v785_v17, %v803_v37 }
 0x502   :  { %v5240_v7 = vpop.eup %5239  ;;  %v829_v44 = vmul.f32 1.442695, %v817_v42 }
 0x503   :  { %v846_v43 = vsel %vm428_vm3, %v5240_v7, 0.0 }
 0x504   :  { %5241 = vpow2.f32 %v829_v44  ;;  %847 = vadd.xlane.f32.xlu1 %v846_v43 }
 0x507   :  { %v806_v45 = vpop.xlane.xlu1 %805 }
 0x508   :  { %v818_v46 = vsub.f32 %v786_v2, %v806_v45 }
 0x50a   :  { %v5242_v47 = vpop.eup %5241  ;;  %v831_v48 = vmul.f32 1.442695, %v818_v46 }
 0x50b   :  { %v849_v12 = vsel %vm428_vm3, %v5242_v47, 0.0 }
 0x50c   :  { %5243 = vpow2.f32 %v831_v48  ;;  %850 = vadd.xlane.f32.xlu2 %v849_v12 }
 0x50f   :  { %v809_v49 = vpop.xlane.xlu2 %808 }
 0x510   :  { %v819_v51 = vsub.f32 %v787_v5, %v809_v49 }
 0x512   :  { %v5244_v55 = vpop.eup %5243  ;;  %v833_v57 = vmul.f32 1.442695, %v819_v51 }
 0x513   :  { %v852_v17 = vsel %vm428_vm3, %v5244_v55, 0.0 }
 0x514   :  { %5245 = vpow2.f32 %v833_v57  ;;  %853 = vadd.xlane.f32.xlu0 %v852_v17 }
 0x517   :  { %v812_v59 = vpop.xlane.xlu0 %811 }
 0x518   :  { %v820_v22 = vsub.f32 %v788_v27, %v812_v59 }
 0x51a   :  { %v5246_v3 = vpop.eup %5245  ;;  %v835_v4 = vmul.f32 1.442695, %v820_v22 }
 0x51b   :  { %v855_v2 = vsel %vm428_vm3, %v5246_v3, 0.0 }
 0x51c   :  { %5247 = vpow2.f32 %v835_v4  ;;  %856 = vadd.xlane.f32.xlu1 %v855_v2  ;;  %v5116_v4 = vld [vmem:[%s7386_s1 + $0x88] sm:$0xff] }
 0x522   :  { %v5248_v6 = vpop.eup %5247 }
 0x523   :  { %v858_v8 = vsel %vm428_vm3, %v5248_v6, 0.0 }
 0x524   :  { %859 = vadd.xlane.f32.xlu2 %v858_v8 }
 0x55f   :  { %v839_v11 = vpop.xlane.xlu1 %838 }
 0x560   :  { %5249 = vrcp.f32 %v839_v11 }
 0x566   :  { %v5250_v13 = vpop.eup %5249 }
 0x567   :  { %v842_v5 = vpop.xlane.xlu2 %841  ;;  %v869_v14 = vmul.f32 %v5250_v13, %v5234_v23  ;;  %v5114_v23 = vld [vmem:[%s7386_s1 + $0x78] sm:$0xff] }
 0x568   :  { %5251 = vrcp.f32 %v842_v5  ;;  %1096 = vmatpush.bf16.msra.mxu1 %v5114_v23 }
 0x56e   :  { %v5252_v50 = vpop.eup %5251 }
 0x56f   :  { %v870_v16 = vmul.f32 %v5252_v50, %v5236_v28  ;;  %v845_v27 = vpop.xlane.xlu0 %844 }
 0x570   :  { %5253 = vrcp.f32 %v845_v27 }
 0x571   :  { %v877_v18 = vpack.c.bf16 %v870_v16, %v869_v14 }
 0x573   :  { %4736 = vmatmul.msk.bf16.vlgmr.msrb.gmra.mxu1 %vm428_vm3, %v877_v18  ;;  %v5119_v18 = vld [vmem:[%s7386_s1 + $0xa0] sm:$0xff] }
 0x576   :  { %v5254_v9 = vpop.eup %5253 }
 0x577   :  { %v848_v21 = vpop.xlane.xlu1 %847  ;;  %v871_v24 = vmul.f32 %v5254_v9, %v5238_v26 }
 0x578   :  { %5255 = vrcp.f32 %v848_v21  ;;  %v5118_v21 = vld [vmem:[%s7386_s1 + $0x98] sm:$0xff] }
 0x57e   :  { %v5256_v19 = vpop.eup %5255 }
 0x57f   :  { %v872_v32 = vmul.f32 %v5256_v19, %v5240_v7  ;;  %v851_v34 = vpop.xlane.xlu2 %850  ;;  %v5170_v19 = vld [vmem:[%s7387_s2 + $0x5e] ss:$0 sm:$0xff] }
 0x580   :  { %5257 = vrcp.f32 %v851_v34 }
 0x581   :  { %v878_v33 = vpack.c.bf16 %v872_v32, %v871_v24 }
 0x583   :  { %4737 = vmatmul.msk.bf16.gmra.mxu1 %vm428_vm3, %v878_v33 }
 0x586   :  { %v5258_v1 = vpop.eup %5257 }
 0x587   :  { %v854_v28 = vpop.xlane.xlu0 %853  ;;  %v873_v36 = vmul.f32 %v5258_v1, %v5242_v47  ;;  %v582_v47 = vld [vmem:[%s7386_s1 + $0xd0] sm:$0xf]  ;;  %v1056_v1 = vpop.f32.mrf.mxu0 }
 0x588   :  { %5259 = vrcp.f32 %v854_v28  ;;  %v943_v12 = vsel %vm42_vm0, %v582_v47, 0 }
 0x589   :  { %952 = vmatpush.bf16.msrb.mxu2 %v943_v12 }
 0x58e   :  { %v5260_v35 = vpop.eup %5259 }
 0x58f   :  { %v874_v37 = vmul.f32 %v5260_v35, %v5244_v55  ;;  %v857_v44 = vpop.xlane.xlu1 %856 }
 0x590   :  { %5261 = vrcp.f32 %v857_v44 }
 0x591   :  { %v879_v42 = vpack.c.bf16 %v874_v37, %v873_v36 }
 0x593   :  { %4738 = vmatmul.msk.bf16.gmra.mxu1 %vm428_vm3, %v879_v42 }
 0x596   :  { %v5262_v7 = vpop.eup %5261 }
 0x597   :  { %v860_v26 = vpop.xlane.xlu2 %859  ;;  %v875_v45 = vmul.f32 %v5262_v7, %v5246_v3  ;;  %v5117_v3 = vld [vmem:[%s7386_s1 + $0x90] sm:$0xff] }
 0x598   :  { %5263 = vrcp.f32 %v860_v26  ;;  %1137 = vmatpush.bf16.msra.mxu2 %v5117_v3  ;;  %v1058_v26 = vpop.f32.mrf.mxu0 }
 0x59c   :  { %1138 = vmatpush.bf16.msra.mxu2 %v5116_v4 }
 0x59e   :  { %v5264_v43 = vpop.eup %5263 }
 0x59f   :  { %v876_v46 = vmul.f32 %v5264_v43, %v5248_v6 }
 0x5a0   :  { %v1061_v12 = vpop.f32.mrf.mxu0 }
 0x5a1   :  { %v880_v48 = vpack.c.bf16 %v876_v46, %v875_v45 }
 0x5a3   :  { %4739 = vmatmul.msk.bf16.gmra.mxu1 %vm428_vm3, %v880_v48 }
 0x5b3   :  { %4768 = vmatmul.msk.bf16.vlgmr.msra.gmra.mxu1 %vm225_vm2, %v5621_v31 }
 0x5c3   :  { %4769 = vmatmul.msk.bf16.gmra.mxu1 %vm225_vm2, %v5635_v41 }
 0x5d3   :  { %4770 = vmatmul.msk.bf16.gmra.mxu1 %vm225_vm2, %v5661_v54 }
 0x5e3   :  { %4771 = vmatmul.msk.bf16.gmra.mxu1 %vm225_vm2, %v5675_v62 }
 0x5f0   :  { %v906_v49 = vpop.f32.mrf.mxu1 }
 0x5f8   :  { %v908_v51 = vpop.f32.mrf.mxu1 }
 0x5f9   :  { %v926_v55 = vpack.c.bf16 %v908_v51, %v906_v49  ;;  %v5169_v49 = vld [vmem:[%s7387_s2 + $0x5a] ss:$0 sm:$0xff] }
 0x5fb   :  { %4740 = vmatmul.msk.bf16.vlgmr.msrb.gmra.mxu2 %vm38_vm1, %v926_v55 }
 0x5fc   :  { %1465 = vmatpush.bf16.msrb.mxu2 %v5119_v18 }
 0x600   :  { %v911_v57 = vpop.f32.mrf.mxu1  ;;  %1466 = vmatpush.bf16.msrb.mxu2 %v5118_v21 }
 0x608   :  { %v913_v17 = vpop.f32.mrf.mxu1 }
 0x609   :  { %v927_v59 = vpack.c.bf16 %v913_v17, %v911_v57  ;;  %v1059_v57 = vadd.f32 %v5169_v49, %v1058_v26  ;;  %v1057_v17 = vadd.f32 %v5169_v49, %v1056_v1 }
 0x60b   :  { %4741 = vmatmul.msk.bf16.gmra.mxu2 %vm38_vm1, %v927_v59  ;;  %v1160_v59 = vpack.c.bf16 %v1059_v57, %v1057_v17 }
 0x610   :  { %v916_v22 = vpop.f32.mrf.mxu1 }
 0x618   :  { %v918_v2 = vpop.f32.mrf.mxu1 }
 0x619   :  { %v928_v6 = vpack.c.bf16 %v918_v2, %v916_v22  ;;  %v1063_v22 = vpop.f32.mrf.mxu0 }
 0x61b   :  { %4742 = vmatmul.msk.bf16.gmra.mxu2 %vm38_vm1, %v928_v6  ;;  %v1064_v6 = vadd.f32 %v5169_v49, %v1063_v22 }
 0x620   :  { %v921_v8 = vpop.f32.mrf.mxu1 }
 0x621   :  { %v1066_v4 = vpop.f32.mrf.mxu0 }
 0x622   :  { %v1067_v18 = vadd.f32 %v5169_v49, %v1066_v4 }
 0x628   :  { %v923_v11 = vpop.f32.mrf.mxu1 }
 0x629   :  { %v929_v5 = vpack.c.bf16 %v923_v11, %v921_v8  ;;  %v1062_v8 = vadd.f32 %v5169_v49, %v1061_v12 }
 0x62b   :  { %4743 = vmatmul.msk.bf16.gmra.mxu2 %vm38_vm1, %v929_v5  ;;  %v1161_v11 = vpack.c.bf16 %v1064_v6, %v1062_v8 }
 0x630   :  { %v1098_v13 = vpop.f32.mrf.mxu1 }
 0x631   :  { %v1099_v48 = vadd.f32 %v5170_v19, %v1098_v13  ;;  %v1068_v13 = vpop.f32.mrf.mxu0 }
 0x638   :  { %v1100_v50 = vpop.f32.mrf.mxu1 }
 0x639   :  { %v1101_v43 = vadd.f32 %v5170_v19, %v1100_v50  ;;  %v5121_v50 = vld [vmem:[%s7386_s1 + $0xb0] sm:$0xff]  ;;  %v1071_v21 = vpop.f32.mrf.mxu0 }
 0x63b   :  { %4780 = vmatmul.msk.bf16.vlgmr.msra.gmra.mxu2 %vm225_vm2, %v5621_v31  ;;  %v1164_v47 = vpack.c.bf16 %v1101_v43, %v1099_v48 }
 0x63d   :  { %v1181_v51 = vsel %vm38_vm1, %v1164_v47, 0  ;;  %v5171_v47 = vld [vmem:[%s7387_s2 + $0x62] ss:$0 sm:$0xff] }
 0x640   :  { %v1103_v14 = vpop.f32.mrf.mxu1 }
 0x641   :  { %v1104_v44 = vadd.f32 %v5170_v19, %v1103_v14 }
 0x648   :  { %v1105_v16 = vpop.f32.mrf.mxu1 }
 0x649   :  { %v1106_v37 = vadd.f32 %v5170_v19, %v1105_v16  ;;  %v1069_v16 = vadd.f32 %v5169_v49, %v1068_v13 }
 0x64b   :  { %4781 = vmatmul.msk.bf16.gmra.mxu2 %vm225_vm2, %v5635_v41  ;;  %v1165_v7 = vpack.c.bf16 %v1106_v37, %v1104_v44 }
 0x64d   :  { %v1184_v45 = vsel %vm38_vm1, %v1165_v7, 0 }
 0x650   :  { %v1108_v27 = vpop.f32.mrf.mxu1 }
 0x651   :  { %v1109_v35 = vadd.f32 %v5170_v19, %v1108_v27  ;;  %v5120_v27 = vld [vmem:[%s7386_s1 + $0xa8] sm:$0xff] }
 0x658   :  { %v1110_v58 = vpop.f32.mrf.mxu1 }
 0x659   :  { %v1111_v23 = vadd.f32 %v5170_v19, %v1110_v58  ;;  %v1162_v58 = vpack.c.bf16 %v1069_v16, %v1067_v18 }
 0x65b   :  { %4782 = vmatmul.msk.bf16.gmra.mxu2 %vm225_vm2, %v5661_v54  ;;  %v1166_v36 = vpack.c.bf16 %v1111_v23, %v1109_v35 }
 0x65d   :  { %v1187_v42 = vsel %vm38_vm1, %v1166_v36, 0 }
 0x660   :  { %v1113_v9 = vpop.f32.mrf.mxu1 }
 0x661   :  { %v1114_v32 = vadd.f32 %v5170_v19, %v1113_v9 }
 0x668   :  { %v1115_v24 = vpop.f32.mrf.mxu1 }
 0x669   :  { %v1116_v33 = vadd.f32 %v5170_v19, %v1115_v24  ;;  %v1073_v19 = vpop.f32.mrf.mxu0 }
 0x66b   :  { %v1167_v34 = vpack.c.bf16 %v1116_v33, %v1114_v32  ;;  %4783 = vmatmul.msk.bf16.gmra.mxu2 %vm225_vm2, %v5675_v62  ;;  %v1074_v32 = vadd.f32 %v5169_v49, %v1073_v19  ;;  %v1072_v33 = vadd.f32 %v5169_v49, %v1071_v21 }
 0x66d   :  { %v1190_v28 = vsel %vm38_vm1, %v1167_v34, 0  ;;  %v1163_v34 = vpack.c.bf16 %v1074_v32, %v1072_v33 }
 0x66e   :  { %1196 = vmatpush.bf16.xpose.msra.mxu3 %v1190_v28  ;;  %v5982_v28 = vpop.f32.mrf.mxu3 }
 0x676   :  { %1197 = vmatpush.bf16.xpose.msra.mxu3 %v1187_v42  ;;  %v5984_v35 = vpop.f32.mrf.mxu3 }
 0x67b   :  { %4804 = vmatmul.msk.bf16.vlgmr.msrb.gmra.mxu2 %vm225_vm2, %v5621_v31 }
 0x67e   :  { %v5946_v46 = vpop.f32.mrf.mxu2  ;;  %1198 = vmatpush.bf16.xpose.msra.mxu3 %v1184_v45  ;;  %v5988_v37 = vpop.f32.mrf.mxu3 }
 0x686   :  { %v5952_v55 = vpop.f32.mrf.mxu2  ;;  %1199 = vmatpush.bf16.xpose.msra.mxu3 %v1181_v51  ;;  %v5992_v26 = vpop.f32.mrf.mxu3 }
 0x68b   :  { %4805 = vmatmul.msk.bf16.gmra.mxu2 %vm225_vm2, %v5635_v41 }
 0x68d   :  { %4784 = vmatmul.msk.bf16.vlgmr.msra.gmra.mxu3 %vm38_vm1, %v1160_v59 }
 0x68e   :  { %v5957_v3 = vpop.f32.mrf.mxu2  ;;  %1507 = vmatpush.bf16.msrb.mxu3 %v5121_v50  ;;  %v5994_v43 = vpop.f32.mrf.mxu3 }
 0x692   :  { %1508 = vmatpush.bf16.msrb.mxu3 %v5120_v27 }
 0x696   :  { %v5959_v2 = vpop.f32.mrf.mxu2  ;;  %v5998_v48 = vpop.f32.mrf.mxu3 }
 0x69b   :  { %4806 = vmatmul.msk.bf16.gmra.mxu2 %vm225_vm2, %v5661_v54 }
 0x69d   :  { %4785 = vmatmul.msk.bf16.gmra.mxu3 %vm38_vm1, %v1161_v11 }
 0x69e   :  { %v5964_v5 = vpop.f32.mrf.mxu2  ;;  %v6005_v6 = vpop.f32.mrf.mxu3 }
 0x6a6   :  { %v5969_v14 = vpop.f32.mrf.mxu2  ;;  %v6007_v18 = vpop.f32.mrf.mxu3 }
 0x6ab   :  { %4807 = vmatmul.msk.bf16.gmra.mxu2 %vm225_vm2, %v5675_v62 }
 0x6ad   :  { %4786 = vmatmul.msk.bf16.gmra.mxu3 %vm38_vm1, %v1162_v58 }
 0x6ae   :  { %v5977_v9 = vpop.f32.mrf.mxu2 }
 0x6b6   :  { %v5979_v24 = vpop.f32.mrf.mxu2 }
 0x6bd   :  { %4787 = vmatmul.msk.bf16.gmra.mxu3 %vm38_vm1, %v1163_v34 }
 0x6be   :  { %v1140_v23 = vpop.f32.mrf.mxu2 }
 0x6bf   :  { %v1141_v50 = vadd.f32 %v5171_v47, %v1140_v23 }
 0x6c6   :  { %v1142_v1 = vpop.f32.mrf.mxu2 }
 0x6c7   :  { %v1143_v11 = vadd.f32 %v5171_v47, %v1142_v1 }
 0x6c9   :  { %v1329_v16 = vpack.c.bf16 %v1143_v11, %v1141_v50 }
 0x6cd   :  { %4816 = vmatmul.msk.bf16.vlgmr.msrb.gmra.mxu3 %vm225_vm2, %v5621_v31 }
 0x6ce   :  { %v1145_v36 = vpop.f32.mrf.mxu2 }
 0x6cf   :  { %v1146_v8 = vadd.f32 %v5171_v47, %v1145_v36 }
 0x6d6   :  { %v1147_v42 = vpop.f32.mrf.mxu2 }
 0x6d7   :  { %v1148_v22 = vadd.f32 %v5171_v47, %v1147_v42 }
 0x6d9   :  { %v1330_v13 = vpack.c.bf16 %v1148_v22, %v1146_v8 }
 0x6dd   :  { %4817 = vmatmul.msk.bf16.gmra.mxu3 %vm225_vm2, %v5635_v41 }
 0x6de   :  { %v1150_v44 = vpop.f32.mrf.mxu2 }
 0x6df   :  { %v1151_v59 = vadd.f32 %v5171_v47, %v1150_v44 }
 0x6e6   :  { %v1152_v7 = vpop.f32.mrf.mxu2 }
 0x6e7   :  { %v1153_v57 = vadd.f32 %v5171_v47, %v1152_v7 }
 0x6e9   :  { %v1331_v4 = vpack.c.bf16 %v1153_v57, %v1151_v59 }
 0x6ed   :  { %4818 = vmatmul.msk.bf16.gmra.mxu3 %vm225_vm2, %v5661_v54 }
 0x6ee   :  { %v1155_v45 = vpop.f32.mrf.mxu2 }
 0x6ef   :  { %v1156_v49 = vadd.f32 %v5171_v47, %v1155_v45 }
 0x6f6   :  { %v1157_v12 = vpop.f32.mrf.mxu2 }
 0x6f7   :  { %v1158_v51 = vadd.f32 %v5171_v47, %v1157_v12 }
 0x6f9   :  { %v1332_v17 = vpack.c.bf16 %v1158_v51, %v1156_v49 }
 0x6fb   :  { %1349 = vmatpush.bf16.msrb.mxu0 %v1332_v17 }
 0x6fd   :  { %4819 = vmatmul.msk.bf16.gmra.mxu3 %vm225_vm2, %v5675_v62 }
 0x6ff   :  { %1350 = vmatpush.bf16.msrb.mxu0 %v1331_v4 }
 0x703   :  { %1351 = vmatpush.bf16.msrb.mxu0 %v1330_v13 }
 0x707   :  { %1352 = vmatpush.bf16.msrb.mxu0 %v1329_v16 }
 0x710   :  { %v1201_v27 = vpop.f32.mrf.mxu3 }
 0x711   :  { %v1221_v21 = vmul.f32 0.35355338, %v1201_v27 }
 0x713   :  { %v1229_v58 = vadd.f32 %v1221_v21, %v5743_v38 }
 0x715   :  { %v1237_v19 = vsel %vm428_vm3, %v1229_v58, -inf }
 0x716   :  { %1238 = vmax.xlane.f32.xlu0 %v1237_v19 }
 0x718   :  { %v1203_v32 = vpop.f32.mrf.mxu3 }
 0x719   :  { %v1222_v33 = vmul.f32 0.35355338, %v1203_v32 }
 0x71b   :  { %v1230_v34 = vadd.f32 %v1222_v33, %v5750_v56 }
 0x71d   :  { %v1240_v1 = vsel %vm428_vm3, %v1230_v34, -inf }
 0x71e   :  { %1241 = vmax.xlane.f32.xlu1 %v1240_v1 }
 0x720   :  { %v1206_v23 = vpop.f32.mrf.mxu3 }
 0x721   :  { %v1223_v36 = vmul.f32 0.35355338, %v1206_v23 }
 0x723   :  { %v6014_v42 = vadd.f32 %v1223_v36, %v5760_v0 }
 0x725   :  { %v1243_v44 = vsel %vm428_vm3, %v6014_v42, -inf }
 0x726   :  { %1244 = vmax.xlane.f32.xlu2 %v1243_v44 }
 0x728   :  { %v1208_v38 = vpop.f32.mrf.mxu3 }
 0x729   :  { %v1224_v7 = vmul.f32 0.35355338, %v1208_v38 }
 0x72b   :  { %v6019_v45 = vadd.f32 %v1224_v7, %v5770_v63 }
 0x72d   :  { %v1246_v56 = vsel %vm428_vm3, %v6019_v45, -inf }
 0x72e   :  { %1247 = vmax.xlane.f32.xlu0 %v1246_v56 }
 0x730   :  { %v1211_v47 = vpop.f32.mrf.mxu3 }
 0x731   :  { %v1225_v12 = vmul.f32 0.35355338, %v1211_v47 }
 0x733   :  { %v6024_v49 = vadd.f32 %v1225_v12, %v5780_v10 }
 0x735   :  { %v1249_v0 = vsel %vm428_vm3, %v6024_v49, -inf }
 0x736   :  { %1250 = vmax.xlane.f32.xlu1 %v1249_v0 }
 0x738   :  { %v1213_v51 = vpop.f32.mrf.mxu3 }
 0x739   :  { %v1226_v57 = vmul.f32 0.35355338, %v1213_v51 }
 0x73b   :  { %v6029_v17 = vadd.f32 %v1226_v57, %v5790_v15 }
 0x73d   :  { %v1252_v63 = vsel %vm428_vm3, %v6029_v17, -inf }
 0x73e   :  { %1253 = vmax.xlane.f32.xlu2 %v1252_v63 }
 0x740   :  { %v1216_v59 = vpop.f32.mrf.mxu3 }
 0x741   :  { %v1227_v22 = vmul.f32 0.35355338, %v1216_v59 }
 0x743   :  { %v6034_v4 = vadd.f32 %v1227_v22, %v5800_v20  ;;  %v1030_v20 = vld [vmem:[%s7386_s1 + $0xd8] sm:$0xf] }
 0x744   :  { %v1391_v19 = vsel %vm42_vm0, %v1030_v20, 0 }
 0x745   :  { %v1255_v10 = vsel %vm428_vm3, %v6034_v4, -inf  ;;  %1400 = vmatpush.bf16.msrb.mxu1 %v1391_v19 }
 0x746   :  { %1256 = vmax.xlane.f32.xlu0 %v1255_v10 }
 0x748   :  { %v1218_v8 = vpop.f32.mrf.mxu3 }
 0x749   :  { %v1228_v11 = vmul.f32 0.35355338, %v1218_v8 }
 0x74b   :  { %v6039_v13 = vadd.f32 %v1228_v11, %v5810_v25  ;;  %v5173_v25 = vld [vmem:[%s7387_s2 + $0x5f] ss:$0 sm:$0xff] }
 0x74d   :  { %v1258_v15 = vsel %vm428_vm3, %v6039_v13, -inf }
 0x74e   :  { %1259 = vmax.xlane.f32.xlu1 %v1258_v15 }
 0x750   :  { %v1510_v50 = vpop.f32.mrf.mxu3 }
 0x758   :  { %v1512_v16 = vpop.f32.mrf.mxu3 }
 0x760   :  { %v1515_v27 = vpop.f32.mrf.mxu3 }
 0x761   :  { %v1516_v15 = vadd.f32 %v5173_v25, %v1515_v27 }
 0x768   :  { %v1517_v21 = vpop.f32.mrf.mxu3 }
 0x769   :  { %v1518_v8 = vadd.f32 %v5173_v25, %v1517_v21 }
 0x76b   :  { %v1577_v19 = vpack.c.bf16 %v1518_v8, %v1516_v15 }
 0x76d   :  { %v1596_v21 = vsel %vm38_vm1, %v1577_v19, 0 }
 0x770   :  { %v1520_v32 = vpop.f32.mrf.mxu3 }
 0x771   :  { %v1521_v51 = vadd.f32 %v5173_v25, %v1520_v32 }
 0x778   :  { %v1522_v33 = vpop.f32.mrf.mxu3 }
 0x779   :  { %v1523_v12 = vadd.f32 %v5173_v25, %v1522_v33 }
 0x77b   :  { %v1578_v63 = vpack.c.bf16 %v1523_v12, %v1521_v51 }
 0x780   :  { %v1525_v1 = vpop.f32.mrf.mxu3 }
 0x781   :  { %v1526_v36 = vadd.f32 %v5173_v25, %v1525_v1 }
 0x788   :  { %v1527_v23 = vpop.f32.mrf.mxu3 }
 0x789   :  { %v1528_v44 = vadd.f32 %v5173_v25, %v1527_v23  ;;  %v1239_v38 = vpop.xlane.xlu0 %1238 }
 0x78a   :  { %v1261_v7 = vsub.f32 %v1229_v58, %v1239_v38  ;;  %v1599_v58 = vsel %vm38_vm1, %v1578_v63, 0 }
 0x78b   :  { %v1579_v56 = vpack.c.bf16 %v1528_v44, %v1526_v36  ;;  %v1511_v36 = vadd.f32 %v5173_v25, %v1510_v50 }
 0x78c   :  { %v1269_v47 = vmul.f32 1.442695, %v1261_v7 }
 0x78d   :  { %v1602_v0 = vsel %vm38_vm1, %v1579_v56, 0 }
 0x78e   :  { %5265 = vpow2.f32 %v1269_v47  ;;  %1608 = vmatpush.bf16.xpose.msra.mxu1 %v1602_v0 }
 0x791   :  { %v1242_v57 = vpop.xlane.xlu1 %1241 }
 0x792   :  { %v1262_v59 = vsub.f32 %v1230_v34, %v1242_v57  ;;  %v1513_v34 = vadd.f32 %v5173_v25, %v1512_v16 }
 0x794   :  { %v6051_v22 = vpop.eup %5265  ;;  %v1271_v10 = vmul.f32 1.442695, %v1262_v59  ;;  %v1576_v38 = vpack.c.bf16 %v1513_v34, %v1511_v36 }
 0x795   :  { %v1285_v11 = vsel %vm428_vm3, %v6051_v22, 0.0 }
 0x796   :  { %5267 = vpow2.f32 %v1271_v10  ;;  %1286 = vadd.xlane.f32.xlu2 %v1285_v11  ;;  %1609 = vmatpush.bf16.xpose.msra.mxu1 %v1599_v58  ;;  %v1593_v47 = vsel %vm38_vm1, %v1576_v38, 0 }
 0x799   :  { %v1245_v20 = vpop.xlane.xlu2 %1244 }
 0x79a   :  { %v1263_v32 = vsub.f32 %v6014_v42, %v1245_v20 }
 0x79c   :  { %v5268_v33 = vpop.eup %5267  ;;  %v1273_v1 = vmul.f32 1.442695, %v1263_v32 }
 0x79d   :  { %v1288_v23 = vsel %vm428_vm3, %v5268_v33, 0.0 }
 0x79e   :  { %5269 = vpow2.f32 %v1273_v1  ;;  %1289 = vadd.xlane.f32.xlu0 %v1288_v23  ;;  %1610 = vmatpush.bf16.xpose.msra.mxu1 %v1596_v21 }
 0x7a1   :  { %v1248_v44 = vpop.xlane.xlu0 %1247 }
 0x7a2   :  { %v1264_v7 = vsub.f32 %v6019_v45, %v1248_v44 }
 0x7a4   :  { %v5270_v27 = vpop.eup %5269  ;;  %v1275_v56 = vmul.f32 1.442695, %v1264_v7 }
 0x7a5   :  { %v1291_v42 = vsel %vm428_vm3, %v5270_v27, 0.0 }
 0x7a6   :  { %5271 = vpow2.f32 %v1275_v56  ;;  %1611 = vmatpush.bf16.xpose.msra.mxu1 %v1593_v47  ;;  %1292 = vadd.xlane.f32.xlu1 %v1291_v42 }
 0x7a9   :  { %v1251_v16 = vpop.xlane.xlu1 %1250 }
 0x7aa   :  { %v1265_v12 = vsub.f32 %v6024_v49, %v1251_v16 }
 0x7ac   :  { %v5272_v0 = vpop.eup %5271  ;;  %v1277_v51 = vmul.f32 1.442695, %v1265_v12 }
 0x7ad   :  { %v1294_v50 = vsel %vm428_vm3, %v5272_v0, 0.0 }
 0x7ae   :  { %5273 = vpow2.f32 %v1277_v51  ;;  %1295 = vadd.xlane.f32.xlu2 %v1294_v50 }
 0x7b1   :  { %v1254_v25 = vpop.xlane.xlu2 %1253 }
 0x7b2   :  { %v1266_v45 = vsub.f32 %v6029_v17, %v1254_v25 }
 0x7b4   :  { %v5274_v57 = vpop.eup %5273  ;;  %v1279_v63 = vmul.f32 1.442695, %v1266_v45 }
 0x7b5   :  { %v1297_v59 = vsel %vm428_vm3, %v5274_v57, 0.0 }
 0x7b6   :  { %5275 = vpow2.f32 %v1279_v63  ;;  %1298 = vadd.xlane.f32.xlu0 %v1297_v59 }
 0x7b9   :  { %v1257_v10 = vpop.xlane.xlu0 %1256 }
 0x7ba   :  { %v1267_v8 = vsub.f32 %v6034_v4, %v1257_v10 }
 0x7bc   :  { %v5276_v11 = vpop.eup %5275  ;;  %v1281_v49 = vmul.f32 1.442695, %v1267_v8 }
 0x7bd   :  { %v1300_v58 = vsel %vm428_vm3, %v5276_v11, 0.0 }
 0x7be   :  { %5277 = vpow2.f32 %v1281_v49  ;;  %1301 = vadd.xlane.f32.xlu1 %v1300_v58 }
 0x7c1   :  { %v1260_v15 = vpop.xlane.xlu1 %1259 }
 0x7c2   :  { %v1268_v20 = vsub.f32 %v6039_v13, %v1260_v15 }
 0x7c4   :  { %v5278_v19 = vpop.eup %5277  ;;  %v1283_v17 = vmul.f32 1.442695, %v1268_v20 }
 0x7c5   :  { %v1303_v32 = vsel %vm428_vm3, %v5278_v19, 0.0 }
 0x7c6   :  { %5279 = vpow2.f32 %v1283_v17  ;;  %1304 = vadd.xlane.f32.xlu2 %v1303_v32 }
 0x7cc   :  { %v5280_v1 = vpop.eup %5279 }
 0x7cd   :  { %v1306_v34 = vsel %vm428_vm3, %v5280_v1, 0.0 }
 0x7ce   :  { %1307 = vadd.xlane.f32.xlu0 %v1306_v34 }
 0x809   :  { %v1287_v4 = vpop.xlane.xlu2 %1286 }
 0x80a   :  { %5281 = vrcp.f32 %v1287_v4 }
 0x810   :  { %v5282_v21 = vpop.eup %5281 }
 0x811   :  { %v1290_v23 = vpop.xlane.xlu0 %1289  ;;  %v1317_v44 = vmul.f32 %v5282_v21, %v6051_v22  ;;  %v5123_v22 = vld [vmem:[%s7386_s1 + $0xc0] sm:$0xff] }
 0x812   :  { %5283 = vrcp.f32 %v1290_v23  ;;  %1549 = vmatpush.bf16.msra.mxu0 %v5123_v22 }
 0x818   :  { %v5284_v36 = vpop.eup %5283 }
 0x819   :  { %v1318_v38 = vmul.f32 %v5284_v36, %v5268_v33  ;;  %v1293_v7 = vpop.xlane.xlu1 %1292  ;;  %v5122_v33 = vld [vmem:[%s7386_s1 + $0xb8] sm:$0xff] }
 0x81a   :  { %5285 = vrcp.f32 %v1293_v7  ;;  %1550 = vmatpush.bf16.msra.mxu0 %v5122_v33 }
 0x81b   :  { %v1325_v13 = vpack.c.bf16 %v1318_v38, %v1317_v44 }
 0x81d   :  { %4788 = vmatmul.msk.bf16.vlgmr.msrb.gmra.mxu0 %vm428_vm3, %v1325_v13  ;;  %v5172_v13 = vld [vmem:[%s7387_s2 + $0x5b] ss:$0 sm:$0xff] }
 0x820   :  { %v5286_v47 = vpop.eup %5285 }
 0x821   :  { %v1296_v56 = vpop.xlane.xlu2 %1295  ;;  %v1319_v16 = vmul.f32 %v5286_v47, %v5270_v27 }
 0x822   :  { %5287 = vrcp.f32 %v1296_v56 }
 0x828   :  { %v5288_v42 = vpop.eup %5287 }
 0x829   :  { %v1320_v12 = vmul.f32 %v5288_v42, %v5272_v0  ;;  %v1299_v50 = vpop.xlane.xlu0 %1298 }
 0x82a   :  { %5289 = vrcp.f32 %v1299_v50 }
 0x82b   :  { %v1326_v51 = vpack.c.bf16 %v1320_v12, %v1319_v16 }
 0x82d   :  { %4789 = vmatmul.msk.bf16.gmra.mxu0 %vm428_vm3, %v1326_v51 }
 0x830   :  { %v5290_v45 = vpop.eup %5289 }
 0x831   :  { %v1302_v25 = vpop.xlane.xlu1 %1301  ;;  %v1321_v0 = vmul.f32 %v5290_v45, %v5274_v57 }
 0x832   :  { %5291 = vrcp.f32 %v1302_v25 }
 0x838   :  { %v5292_v27 = vpop.eup %5291 }
 0x839   :  { %v1322_v63 = vmul.f32 %v5292_v27, %v5276_v11  ;;  %v1305_v10 = vpop.xlane.xlu2 %1304 }
 0x83a   :  { %5293 = vrcp.f32 %v1305_v10 }
 0x83b   :  { %v1327_v59 = vpack.c.bf16 %v1322_v63, %v1321_v0 }
 0x83d   :  { %4790 = vmatmul.msk.bf16.gmra.mxu0 %vm428_vm3, %v1327_v59 }
 0x840   :  { %v5294_v49 = vpop.eup %5293 }
 0x841   :  { %v1308_v8 = vpop.xlane.xlu0 %1307  ;;  %v1323_v15 = vmul.f32 %v5294_v49, %v5278_v19 }
 0x842   :  { %5295 = vrcp.f32 %v1308_v8 }
 0x848   :  { %v5296_v58 = vpop.eup %5295 }
 0x849   :  { %v1324_v20 = vmul.f32 %v5296_v58, %v5280_v1 }
 0x84b   :  { %v1328_v17 = vpack.c.bf16 %v1324_v20, %v1323_v15 }
 0x84d   :  { %4791 = vmatmul.msk.bf16.gmra.mxu0 %vm428_vm3, %v1328_v17  ;;  %v5174_v17 = vld [vmem:[%s7387_s2 + $0x63] ss:$0 sm:$0xff] }
 0x85d   :  { %4828 = vmatmul.msk.bf16.vlgmr.msra.gmra.mxu0 %vm225_vm2, %v5621_v31 }
 0x86d   :  { %4829 = vmatmul.msk.bf16.gmra.mxu0 %vm225_vm2, %v5635_v41  ;;  %v1468_v41 = vpop.f32.mrf.mxu2 }
 0x86e   :  { %v1469_v56 = vadd.f32 %v5172_v13, %v1468_v41 }
 0x875   :  { %v1470_v21 = vpop.f32.mrf.mxu2 }
 0x876   :  { %v1471_v7 = vadd.f32 %v5172_v13, %v1470_v21 }
 0x878   :  { %v1572_v42 = vpack.c.bf16 %v1471_v7, %v1469_v56 }
 0x87d   :  { %4830 = vmatmul.msk.bf16.gmra.mxu0 %vm225_vm2, %v5661_v54  ;;  %v1473_v44 = vpop.f32.mrf.mxu2 }
 0x87e   :  { %v1474_v22 = vadd.f32 %v5172_v13, %v1473_v44 }
 0x885   :  { %v1475_v16 = vpop.f32.mrf.mxu2 }
 0x886   :  { %v1476_v50 = vadd.f32 %v5172_v13, %v1475_v16 }
 0x888   :  { %v1573_v25 = vpack.c.bf16 %v1476_v50, %v1474_v22  ;;  %v1014_v50 = vadd.f32 %v6005_v6, %v5977_v9  ;;  %v5524_v9 = vld [vmem:[%s7387_s2 + $0x18] sm:$0xff] }
 0x88d   :  { %4831 = vmatmul.msk.bf16.gmra.mxu0 %vm225_vm2, %v5675_v62  ;;  %v1478_v51 = vpop.f32.mrf.mxu2 }
 0x88e   :  { %v1479_v63 = vadd.f32 %v5172_v13, %v1478_v51 }
 0x895   :  { %v1480_v45 = vpop.f32.mrf.mxu2 }
 0x896   :  { %v1481_v0 = vadd.f32 %v5172_v13, %v1480_v45  ;;  %v5523_v45 = vld [vmem:[%s7387_s2 + $0x10] sm:$0xff] }
 0x898   :  { %v1574_v8 = vpack.c.bf16 %v1481_v0, %v1479_v63 }
 0x89a   :  { %v1354_v57 = vpop.f32.mrf.mxu0 }
 0x89d   :  { %v1483_v59 = vpop.f32.mrf.mxu2 }
 0x89e   :  { %v1484_v20 = vadd.f32 %v5172_v13, %v1483_v59 }
 0x8a2   :  { %v1356_v11 = vpop.f32.mrf.mxu0 }
 0x8a3   :  { %v1374_v32 = vpack.c.bf16 %v1356_v11, %v1354_v57 }
 0x8a5   :  { %4792 = vmatmul.msk.bf16.vlgmr.msrb.gmra.mxu1 %vm38_vm1, %v1374_v32  ;;  %v1485_v58 = vpop.f32.mrf.mxu2 }
 0x8a6   :  { %v1486_v15 = vadd.f32 %v5172_v13, %v1485_v58 }
 0x8a8   :  { %v1575_v11 = vpack.c.bf16 %v1486_v15, %v1484_v20 }
 0x8aa   :  { %v1359_v19 = vpop.f32.mrf.mxu0 }
 0x8b2   :  { %v1361_v1 = vpop.f32.mrf.mxu0 }
 0x8b3   :  { %v1375_v34 = vpack.c.bf16 %v1361_v1, %v1359_v19 }
 0x8b5   :  { %4793 = vmatmul.msk.bf16.gmra.mxu1 %vm38_vm1, %v1375_v34 }
 0x8ba   :  { %v1364_v31 = vpop.f32.mrf.mxu0 }
 0x8c2   :  { %v1366_v4 = vpop.f32.mrf.mxu0 }
 0x8c3   :  { %v1376_v23 = vpack.c.bf16 %v1366_v4, %v1364_v31 }
 0x8c5   :  { %4794 = vmatmul.msk.bf16.gmra.mxu1 %vm38_vm1, %v1376_v23 }
 0x8ca   :  { %v1369_v54 = vpop.f32.mrf.mxu0 }
 0x8d2   :  { %v1371_v36 = vpop.f32.mrf.mxu0 }
 0x8d3   :  { %v1377_v62 = vpack.c.bf16 %v1371_v36, %v1369_v54 }
 0x8d5   :  { %4795 = vmatmul.msk.bf16.gmra.mxu1 %vm38_vm1, %v1377_v62  ;;  %v999_v62 = vadd.f32 %v5982_v28, %v5946_v46 }
 0x8da   :  { %v1552_v38 = vpop.f32.mrf.mxu0 }
 0x8db   :  { %v1553_v36 = vadd.f32 %v5174_v17, %v1552_v38  ;;  %v1009_v38 = vadd.f32 %v5994_v43, %v5964_v5 }
 0x8e2   :  { %v1554_v47 = vpop.f32.mrf.mxu0 }
 0x8e3   :  { %v1555_v54 = vadd.f32 %v5174_v17, %v1554_v47 }
 0x8e5   :  { %4832 = vmatmul.msk.bf16.vlgmr.msra.gmra.mxu1 %vm38_vm1, %v1572_v42  ;;  %v1741_v44 = vpack.c.bf16 %v1555_v54, %v1553_v36  ;;  %v1004_v42 = vadd.f32 %v5988_v37, %v5957_v3 }
 0x8ea   :  { %v1557_v12 = vpop.f32.mrf.mxu0 }
 0x8eb   :  { %v1558_v41 = vadd.f32 %v5174_v17, %v1557_v12 }
 0x8f2   :  { %v1559_v33 = vpop.f32.mrf.mxu0 }
 0x8f3   :  { %v1560_v4 = vadd.f32 %v5174_v17, %v1559_v33 }
 0x8f5   :  { %4833 = vmatmul.msk.bf16.gmra.mxu1 %vm38_vm1, %v1573_v25  ;;  %v1742_v21 = vpack.c.bf16 %v1560_v4, %v1558_v41  ;;  %v5528_v41 = vld [vmem:[%s7387_s2 + $0x38] sm:$0xff] }
 0x8fa   :  { %v1562_v27 = vpop.f32.mrf.mxu0 }
 0x8fb   :  { %v1563_v31 = vadd.f32 %v5174_v17, %v1562_v27 }
 0x902   :  { %v1564_v10 = vpop.f32.mrf.mxu0 }
 0x903   :  { %v1565_v1 = vadd.f32 %v5174_v17, %v1564_v10 }
 0x905   :  { %4834 = vmatmul.msk.bf16.gmra.mxu1 %vm38_vm1, %v1574_v8  ;;  %v1743_v23 = vpack.c.bf16 %v1565_v1, %v1563_v31  ;;  %v5525_v8 = vld [vmem:[%s7387_s2 + $0x20] sm:$0xff]  ;;  %v5527_v1 = vld [vmem:[%s7387_s2 + $0x30] sm:$0xff] }
 0x90a   :  { %v1567_v49 = vpop.f32.mrf.mxu0 }
 0x90b   :  { %v1568_v32 = vadd.f32 %v5174_v17, %v1567_v49 }
 0x912   :  { %v1569_v57 = vpop.f32.mrf.mxu0 }
 0x913   :  { %v1570_v19 = vadd.f32 %v5174_v17, %v1569_v57  ;;  %v5526_v17 = vld [vmem:[%s7387_s2 + $0x28] sm:$0xff] }
 0x915   :  { %v1744_v34 = vpack.c.bf16 %v1570_v19, %v1568_v32  ;;  %4835 = vmatmul.msk.bf16.gmra.mxu1 %vm38_vm1, %v1575_v11 }
 0x917   :  { %1761 = vmatpush.bf16.msra.mxu2 %v1744_v34 }
 0x91b   :  { %1762 = vmatpush.bf16.msra.mxu2 %v1743_v23 }
 0x91f   :  { %1763 = vmatpush.bf16.msra.mxu2 %v1742_v21 }
 0x922   :  { %v1402_v13 = vpop.f32.mrf.mxu1 }
 0x923   :  { %v6106_v7 = vadd.f32 %v1402_v13, %v999_v62  ;;  %1764 = vmatpush.bf16.msra.mxu2 %v1741_v44  ;;  %v5529_v44 = vld [vmem:[%s7387_s2 + $0x40] sm:$0xff] }
 0x92a   :  { %v6108_v56 = vpop.f32.mrf.mxu1 }
 0x932   :  { %v1407_v16 = vpop.f32.mrf.mxu1 }
 0x933   :  { %v6112_v12 = vadd.f32 %v1407_v16, %v1004_v42 }
 0x93a   :  { %v6114_v47 = vpop.f32.mrf.mxu1 }
 0x942   :  { %v1412_v51 = vpop.f32.mrf.mxu1 }
 0x943   :  { %v6118_v46 = vadd.f32 %v1412_v51, %v1009_v38  ;;  %v5530_v51 = vld [vmem:[%s7387_s2 + $0x48] sm:$0xff] }
 0x94a   :  { %v6120_v28 = vpop.f32.mrf.mxu1 }
 0x952   :  { %v1417_v22 = vpop.f32.mrf.mxu1 }
 0x953   :  { %v6124_v33 = vadd.f32 %v1417_v22, %v1014_v50 }
 0x95a   :  { %v6126_v3 = vpop.f32.mrf.mxu1 }
 0x962   :  { %v1613_v37 = vpop.f32.mrf.mxu1 }
 0x963   :  { %v1633_v25 = vmul.f32 0.35355338, %v1613_v37 }
 0x965   :  { %v1641_v5 = vadd.f32 %v5523_v45, %v1633_v25 }
 0x967   :  { %v1649_v43 = vsel %vm428_vm3, %v1641_v5, -inf }
 0x968   :  { %1650 = vmax.xlane.f32.xlu1 %v1649_v43 }
 0x96a   :  { %v1615_v27 = vpop.f32.mrf.mxu1 }
 0x96b   :  { %v1634_v0 = vmul.f32 0.35355338, %v1615_v27 }
 0x96d   :  { %v1642_v6 = vadd.f32 %v5524_v9, %v1634_v0 }
 0x96f   :  { %v1652_v63 = vsel %vm428_vm3, %v1642_v6, -inf }
 0x970   :  { %1653 = vmax.xlane.f32.xlu2 %v1652_v63 }
 0x972   :  { %v1618_v59 = vpop.f32.mrf.mxu1 }
 0x973   :  { %v1635_v10 = vmul.f32 0.35355338, %v1618_v59 }
 0x975   :  { %v1643_v49 = vadd.f32 %v5525_v8, %v1635_v10 }
 0x977   :  { %v1655_v58 = vsel %vm428_vm3, %v1643_v49, -inf }
 0x978   :  { %1656 = vmax.xlane.f32.xlu0 %v1655_v58 }
 0x97a   :  { %v1620_v15 = vpop.f32.mrf.mxu1 }
 0x97b   :  { %v1636_v20 = vmul.f32 0.35355338, %v1620_v15 }
 0x97d   :  { %v1644_v57 = vadd.f32 %v5526_v17, %v1636_v20 }
 0x97f   :  { %v1658_v11 = vsel %vm428_vm3, %v1644_v57, -inf }
 0x980   :  { %1659 = vmax.xlane.f32.xlu1 %v1658_v11 }
 0x982   :  { %v1623_v32 = vpop.f32.mrf.mxu1 }
 0x983   :  { %v1637_v19 = vmul.f32 0.35355338, %v1623_v32 }
 0x985   :  { %v1645_v34 = vadd.f32 %v5527_v1, %v1637_v19 }
 0x987   :  { %v1661_v31 = vsel %vm428_vm3, %v1645_v34, -inf }
 0x988   :  { %1662 = vmax.xlane.f32.xlu2 %v1661_v31 }
 0x98a   :  { %v1625_v4 = vpop.f32.mrf.mxu1 }
 0x98b   :  { %v1638_v23 = vmul.f32 0.35355338, %v1625_v4 }
 0x98d   :  { %v1646_v54 = vadd.f32 %v5528_v41, %v1638_v23 }
 0x98f   :  { %v1664_v21 = vsel %vm428_vm3, %v1646_v54, -inf }
 0x990   :  { %1665 = vmax.xlane.f32.xlu0 %v1664_v21 }
 0x992   :  { %v1628_v36 = vpop.f32.mrf.mxu1 }
 0x993   :  { %v1639_v62 = vmul.f32 0.35355338, %v1628_v36 }
 0x995   :  { %v1647_v13 = vadd.f32 %v5529_v44, %v1639_v62 }
 0x997   :  { %v1667_v42 = vsel %vm428_vm3, %v1647_v13, -inf }
 0x998   :  { %1668 = vmax.xlane.f32.xlu1 %v1667_v42 }
 0x99a   :  { %v1630_v16 = vpop.f32.mrf.mxu1 }
 0x99b   :  { %v1640_v38 = vmul.f32 0.35355338, %v1630_v16 }
 0x99d   :  { %v1648_v50 = vadd.f32 %v5530_v51, %v1640_v38 }
 0x99f   :  { %v1670_v22 = vsel %vm428_vm3, %v1648_v50, -inf }
 0x9a0   :  { %1671 = vmax.xlane.f32.xlu2 %v1670_v22 }
 0x9db   :  { %v1651_v37 = vpop.xlane.xlu1 %1650 }
 0x9dc   :  { %v1673_v25 = vsub.f32 %v1641_v5, %v1651_v37 }
 0x9de   :  { %v1681_v45 = vmul.f32 1.442695, %v1673_v25 }
 0x9e0   :  { %5297 = vpow2.f32 %v1681_v45 }
 0x9e3   :  { %v1654_v43 = vpop.xlane.xlu2 %1653 }
 0x9e4   :  { %v1674_v27 = vsub.f32 %v1642_v6, %v1654_v43 }
 0x9e6   :  { %v5298_v0 = vpop.eup %5297  ;;  %v1683_v9 = vmul.f32 1.442695, %v1674_v27 }
 0x9e7   :  { %v1697_v63 = vsel %vm428_vm3, %v5298_v0, 0.0 }
 0x9e8   :  { %5299 = vpow2.f32 %v1683_v9  ;;  %1698 = vadd.xlane.f32.xlu0 %v1697_v63 }
 0x9eb   :  { %v1657_v59 = vpop.xlane.xlu0 %1656 }
 0x9ec   :  { %v1675_v10 = vsub.f32 %v1643_v49, %v1657_v59 }
 0x9ee   :  { %v5300_v8 = vpop.eup %5299  ;;  %v1685_v58 = vmul.f32 1.442695, %v1675_v10 }
 0x9ef   :  { %v1700_v15 = vsel %vm428_vm3, %v5300_v8, 0.0 }
 0x9f0   :  { %5301 = vpow2.f32 %v1685_v58  ;;  %1701 = vadd.xlane.f32.xlu1 %v1700_v15 }
 0x9f3   :  { %v1660_v20 = vpop.xlane.xlu1 %1659 }
 0x9f4   :  { %v1676_v5 = vsub.f32 %v1644_v57, %v1660_v20 }
 0x9f6   :  { %v5302_v17 = vpop.eup %5301  ;;  %v1687_v11 = vmul.f32 1.442695, %v1676_v5 }
 0x9f7   :  { %v1703_v6 = vsel %vm428_vm3, %v5302_v17, 0.0 }
 0x9f8   :  { %5303 = vpow2.f32 %v1687_v11  ;;  %1704 = vadd.xlane.f32.xlu2 %v1703_v6 }
 0x9fb   :  { %v1663_v32 = vpop.xlane.xlu2 %1662 }
 0x9fc   :  { %v1677_v19 = vsub.f32 %v1645_v34, %v1663_v32 }
 0x9fe   :  { %v5304_v1 = vpop.eup %5303  ;;  %v1689_v31 = vmul.f32 1.442695, %v1677_v19 }
 0x9ff   :  { %v1706_v49 = vsel %vm428_vm3, %v5304_v1, 0.0 }
 0xa00   :  { %5305 = vpow2.f32 %v1689_v31  ;;  %1707 = vadd.xlane.f32.xlu0 %v1706_v49 }
 0xa03   :  { %v1666_v4 = vpop.xlane.xlu0 %1665 }
 0xa04   :  { %v1678_v23 = vsub.f32 %v1646_v54, %v1666_v4 }
 0xa06   :  { %v5306_v41 = vpop.eup %5305  ;;  %v1691_v21 = vmul.f32 1.442695, %v1678_v23 }
 0xa07   :  { %v1709_v57 = vsel %vm428_vm3, %v5306_v41, 0.0 }
 0xa08   :  { %5307 = vpow2.f32 %v1691_v21  ;;  %1710 = vadd.xlane.f32.xlu1 %v1709_v57 }
 0xa0b   :  { %v1669_v36 = vpop.xlane.xlu1 %1668 }
 0xa0c   :  { %v1679_v62 = vsub.f32 %v1647_v13, %v1669_v36 }
 0xa0e   :  { %v5308_v44 = vpop.eup %5307  ;;  %v1693_v42 = vmul.f32 1.442695, %v1679_v62 }
 0xa0f   :  { %v1712_v34 = vsel %vm428_vm3, %v5308_v44, 0.0 }
 0xa10   :  { %5309 = vpow2.f32 %v1693_v42  ;;  %1713 = vadd.xlane.f32.xlu2 %v1712_v34 }
 0xa13   :  { %v1672_v16 = vpop.xlane.xlu2 %1671 }
 0xa14   :  { %v1680_v38 = vsub.f32 %v1648_v50, %v1672_v16 }
 0xa16   :  { %v5310_v51 = vpop.eup %5309  ;;  %v1695_v22 = vmul.f32 1.442695, %v1680_v38 }
 0xa17   :  { %v1715_v54 = vsel %vm428_vm3, %v5310_v51, 0.0 }
 0xa18   :  { %5311 = vpow2.f32 %v1695_v22  ;;  %1716 = vadd.xlane.f32.xlu0 %v1715_v54 }
 0xa1e   :  { %v5312_v37 = vpop.eup %5311 }
 0xa1f   :  { %v1718_v25 = vsel %vm428_vm3, %v5312_v37, 0.0 }
 0xa20   :  { %1719 = vadd.xlane.f32.xlu1 %v1718_v25 }
 0xa5b   :  { %v1699_v45 = vpop.xlane.xlu0 %1698 }
 0xa5c   :  { %5313 = vrcp.f32 %v1699_v45 }
 0xa62   :  { %v5314_v43 = vpop.eup %5313 }
 0xa63   :  { %v1702_v13 = vpop.xlane.xlu1 %1701  ;;  %v1729_v9 = vmul.f32 %v5314_v43, %v5298_v0  ;;  %v1442_v0 = vld [vmem:[%s7386_s1 + $0xe0] sm:$0xf]  ;;  %v6183_v43 = vld [vmem:[%s7387_s2 + $0x68] ss:$0 sm:$0xff] }
 0xa64   :  { %5315 = vrcp.f32 %v1702_v13 }
 0xa6a   :  { %v5316_v27 = vpop.eup %5315 }
 0xa6b   :  { %v1730_v63 = vmul.f32 %v5316_v27, %v5300_v8  ;;  %v1705_v50 = vpop.xlane.xlu2 %1704  ;;  %v1803_v8 = vsel %vm42_vm0, %v1442_v0, 0 }
 0xa6c   :  { %5317 = vrcp.f32 %v1705_v50  ;;  %1812 = vmatpush.bf16.msra.mxu3 %v1803_v8 }
 0xa6d   :  { %v1737_v59 = vpack.c.bf16 %v1730_v63, %v1729_v9 }
 0xa6f   :  { %4836 = vmatmul.msk.bf16.vlgmr.msra.gmra.mxu2 %vm428_vm3, %v1737_v59  ;;  %v1001_v59 = vadd.f32 %v5984_v35, %v5952_v55 }
 0xa72   :  { %v5318_v58 = vpop.eup %5317 }
 0xa73   :  { %v1708_v10 = vpop.xlane.xlu0 %1707  ;;  %v1731_v20 = vmul.f32 %v5318_v58, %v5302_v17 }
 0xa74   :  { %5319 = vrcp.f32 %v1708_v10  ;;  %v1423_v10 = vadd.f32 %v6108_v56, %v1001_v59 }
 0xa7a   :  { %v5320_v15 = vpop.eup %5319 }
 0xa7b   :  { %v1732_v5 = vmul.f32 %v5320_v15, %v5304_v1  ;;  %v1711_v6 = vpop.xlane.xlu1 %1710 }
 0xa7c   :  { %5321 = vrcp.f32 %v1711_v6 }
 0xa7d   :  { %v1738_v11 = vpack.c.bf16 %v1732_v5, %v1731_v20 }
 0xa7f   :  { %4837 = vmatmul.msk.bf16.gmra.mxu2 %vm428_vm3, %v1738_v11 }
 0xa82   :  { %v5322_v19 = vpop.eup %5321 }
 0xa83   :  { %v1714_v32 = vpop.xlane.xlu2 %1713  ;;  %v1733_v49 = vmul.f32 %v5322_v19, %v5306_v41 }
 0xa84   :  { %5323 = vrcp.f32 %v1714_v32 }
 0xa8a   :  { %v5324_v31 = vpop.eup %5323 }
 0xa8b   :  { %v1734_v4 = vmul.f32 %v5324_v31, %v5308_v44  ;;  %v1717_v1 = vpop.xlane.xlu0 %1716 }
 0xa8c   :  { %5325 = vrcp.f32 %v1717_v1 }
 0xa8d   :  { %v1739_v17 = vpack.c.bf16 %v1734_v4, %v1733_v49 }
 0xa8f   :  { %4838 = vmatmul.msk.bf16.gmra.mxu2 %vm428_vm3, %v1739_v17 }
 0xa92   :  { %v5326_v21 = vpop.eup %5325 }
 0xa93   :  { %v1720_v23 = vpop.xlane.xlu1 %1719  ;;  %v1735_v36 = vmul.f32 %v5326_v21, %v5310_v51 }
 0xa94   :  { %5327 = vrcp.f32 %v1720_v23 }
 0xa9a   :  { %v5328_v57 = vpop.eup %5327 }
 0xa9b   :  { %v1736_v62 = vmul.f32 %v5328_v57, %v5312_v37 }
 0xa9d   :  { %v1740_v42 = vpack.c.bf16 %v1736_v62, %v1735_v36 }
 0xa9f   :  { %4839 = vmatmul.msk.bf16.gmra.mxu2 %vm428_vm3, %v1740_v42 }
 0xaf2   :  { %v1766_v34 = vpop.f32.mrf.mxu2 }
 0xafa   :  { %v1768_v16 = vpop.f32.mrf.mxu2 }
 0xafb   :  { %v1786_v38 = vpack.c.bf16 %v1768_v16, %v1766_v34 }
 0xafd   :  { %4840 = vmatmul.msk.bf16.vlgmr.msra.gmra.mxu3 %vm38_vm1, %v1786_v38 }
 0xb02   :  { %v1771_v41 = vpop.f32.mrf.mxu2 }
 0xb0a   :  { %v1773_v44 = vpop.f32.mrf.mxu2 }
 0xb0b   :  { %v1787_v22 = vpack.c.bf16 %v1773_v44, %v1771_v41 }
 0xb0d   :  { %4841 = vmatmul.msk.bf16.gmra.mxu3 %vm38_vm1, %v1787_v22 }
 0xb12   :  { %v1776_v54 = vpop.f32.mrf.mxu2 }
 0xb1a   :  { %v1778_v25 = vpop.f32.mrf.mxu2 }
 0xb1b   :  { %v1788_v45 = vpack.c.bf16 %v1778_v25, %v1776_v54 }
 0xb1d   :  { %4842 = vmatmul.msk.bf16.gmra.mxu3 %vm38_vm1, %v1788_v45 }
 0xb22   :  { %v1781_v51 = vpop.f32.mrf.mxu2 }
 0xb2a   :  { %v1783_v37 = vpop.f32.mrf.mxu2 }
 0xb2b   :  { %v1789_v13 = vpack.c.bf16 %v1783_v37, %v1781_v51 }
 0xb2d   :  { %4843 = vmatmul.msk.bf16.gmra.mxu3 %vm38_vm1, %v1789_v13 }
 0xb80   :  { %v1814_v27 = vpop.f32.mrf.mxu3 }
 0xb81   :  { %v1834_v9 = vadd.f32 %v1814_v27, %v6106_v7 }
 0xb83   :  { %v1844_v63 = vadd.f32 %v6183_v43, %v1834_v9 }
 0xb85   :  { %v1852_v50 = vadd.f32 %v1844_v63, %v5615_v29  ;;  %v1006_v29 = vadd.f32 %v5992_v26, %v5959_v2 }
 0xb87   :  { %v1862_v58 = vsel %vm225_vm2, %v1852_v50, 0.0  ;;  %v1425_v56 = vadd.f32 %v6114_v47, %v1006_v29 }
 0xb88   :  { %v1816_v15 = vpop.f32.mrf.mxu3  ;;  %1863 = vadd.xlane.f32.xlu2 %v1862_v58 }
 0xb89   :  { %v1835_v20 = vadd.f32 %v1816_v15, %v1423_v10 }
 0xb8b   :  { %v1845_v5 = vadd.f32 %v6183_v43, %v1835_v20 }
 0xb8d   :  { %v1853_v11 = vadd.f32 %v1845_v5, %v5617_v30 }
 0xb8f   :  { %v1865_v7 = vsel %vm225_vm2, %v1853_v11, 0.0 }
 0xb90   :  { %1866 = vadd.xlane.f32.xlu0 %v1865_v7  ;;  %v1819_v6 = vpop.f32.mrf.mxu3 }
 0xb91   :  { %v1836_v0 = vadd.f32 %v1819_v6, %v6112_v12 }
 0xb93   :  { %v1846_v55 = vadd.f32 %v6183_v43, %v1836_v0 }
 0xb95   :  { %v1854_v35 = vadd.f32 %v1846_v55, %v5629_v39  ;;  %v1011_v39 = vadd.f32 %v5998_v48, %v5969_v14 }
 0xb97   :  { %v1868_v8 = vsel %vm225_vm2, %v1854_v35, 0.0  ;;  %v1427_v47 = vadd.f32 %v6120_v28, %v1011_v39  ;;  %v5547_v28 = vmov 32.0  }
 0xb98   :  { %1869 = vadd.xlane.f32.xlu1 %v1868_v8  ;;  %v1821_v32 = vpop.f32.mrf.mxu3  ;;  %5329 = vrcp.f32 %v5547_v28 }
 0xb99   :  { %v1837_v30 = vadd.f32 %v1821_v32, %v1425_v56 }
 0xb9b   :  { %v1847_v19 = vadd.f32 %v6183_v43, %v1837_v30 }
 0xb9d   :  { %v1855_v31 = vadd.f32 %v1847_v19, %v5631_v40 }
 0xb9e   :  { %v5330_v62 = vpop.eup %5329 }
 0xb9f   :  { %v1871_v12 = vsel %vm225_vm2, %v1855_v31, 0.0  ;;  %v1887_v42 = vmul.f32 32.0, %v5330_v62  ;;  %vm1891_vm4 = vweird.f32 %v5330_v62 }
 0xba0   :  { %1872 = vadd.xlane.f32.xlu2 %v1871_v12  ;;  %v1824_v49 = vpop.f32.mrf.mxu3 }
 0xba1   :  { %v1838_v4 = vadd.f32 %v1824_v49, %v6118_v46  ;;  %v1888_v34 = vsub.f32 1.0, %v1887_v42 }
 0xba3   :  { %v1848_v2 = vadd.f32 %v6183_v43, %v1838_v4  ;;  %v1889_v16 = vmul.f32 %v5330_v62, %v1888_v34 }
 0xba5   :  { %v1856_v26 = vadd.f32 %v1848_v2, %v5655_v52  ;;  %v5125_v2 = vld [vmem:[%s7386_s1 + $0xf0] sm:$0xff] }
 0xba6   :  { %2103 = vmatpush.bf16.msrb.mxu0 %v5125_v2 }
 0xba7   :  { %v1874_v17 = vsel %vm225_vm2, %v1856_v26, 0.0 }
 0xba8   :  { %1875 = vadd.xlane.f32.xlu0 %v1874_v17  ;;  %v1826_v1 = vpop.f32.mrf.mxu3  ;;  %v5124_v17 = vld [vmem:[%s7386_s1 + $0xe8] sm:$0xff] }
 0xba9   :  { %v1839_v40 = vadd.f32 %v1826_v1, %v1427_v47 }
 0xbaa   :  { %2104 = vmatpush.bf16.msrb.mxu0 %v5124_v17 }
 0xbab   :  { %v1849_v23 = vadd.f32 %v6183_v43, %v1839_v40 }
 0xbad   :  { %v1857_v21 = vadd.f32 %v1849_v23, %v5657_v53  ;;  %v1890_v53 = vadd.f32 %v5330_v62, %v1889_v16 }
 0xbaf   :  { %v1877_v46 = vsel %vm225_vm2, %v1857_v21, 0.0  ;;  %v6219_v38 = vsel %vm1891_vm4, %v5330_v62, %v1890_v53 }
 0xbb0   :  { %1878 = vadd.xlane.f32.xlu1 %v1877_v46  ;;  %v1829_v57 = vpop.f32.mrf.mxu3 }
 0xbb1   :  { %v1840_v36 = vadd.f32 %v1829_v57, %v6124_v33  ;;  %v1016_v33 = vadd.f32 %v6007_v18, %v5979_v24 }
 0xbb3   :  { %v1850_v14 = vadd.f32 %v6183_v43, %v1840_v36 }
 0xbb5   :  { %v1858_v52 = vadd.f32 %v1850_v14, %v5669_v60  ;;  %v1429_v60 = vadd.f32 %v6126_v3, %v1016_v33 }
 0xbb7   :  { %v1880_v48 = vsel %vm225_vm2, %v1858_v52, 0.0 }
 0xbb8   :  { %1881 = vadd.xlane.f32.xlu1 %v1880_v48  ;;  %v1831_v41 = vpop.f32.mrf.mxu3 }
 0xbb9   :  { %v1841_v54 = vadd.f32 %v1831_v41, %v1429_v60 }
 0xbbb   :  { %v1851_v51 = vadd.f32 %v6183_v43, %v1841_v54 }
 0xbbd   :  { %v1859_v3 = vadd.f32 %v1851_v51, %v5671_v61 }
 0xbbf   :  { %v1883_v63 = vsel %vm225_vm2, %v1859_v3, 0.0 }
 0xbfb   :  { %v1864_v44 = vpop.xlane.xlu2 %1863 }
 0xbfc   :  { %v1893_v22 = vmul.f32 %v6219_v38, %v1864_v44 }
 0xbfe   :  { %v6225_v25 = vsub.f32 %v1852_v50, %v1893_v22 }
 0xc00   :  { %v1909_v45 = vmul.f32 %v6225_v25, %v6225_v25 }
 0xc02   :  { %v1917_v37 = vsel %vm225_vm2, %v1909_v45, 0.0 }
 0xc03   :  { %v1867_v13 = vpop.xlane.xlu0 %1866  ;;  %1918 = vadd.xlane.f32.xlu2 %v1917_v37 }
 0xc04   :  { %v1894_v24 = vmul.f32 %v6219_v38, %v1867_v13 }
 0xc06   :  { %v6232_v18 = vsub.f32 %v1853_v11, %v1894_v24  ;;  %v6288_v24 = vld [vmem:[%s7387_s2 + $0x70] ss:$0 sm:$0xff] }
 0xc08   :  { %v1910_v27 = vmul.f32 %v6232_v18, %v6232_v18 }
 0xc0a   :  { %v1920_v9 = vsel %vm225_vm2, %v1910_v27, 0.0 }
 0xc0b   :  { %v1870_v59 = vpop.xlane.xlu1 %1869  ;;  %1921 = vadd.xlane.f32.xlu0 %v1920_v9  ;;  %1884 = vadd.xlane.f32.xlu2 %v1883_v63 }
 0xc0c   :  { %v1895_v43 = vmul.f32 %v6219_v38, %v1870_v59 }
 0xc0e   :  { %v6240_v50 = vsub.f32 %v1854_v35, %v1895_v43 }
 0xc10   :  { %v1911_v10 = vmul.f32 %v6240_v50, %v6240_v50 }
 0xc12   :  { %v1923_v58 = vsel %vm225_vm2, %v1911_v10, 0.0  ;;  %v6294_v10 = vld [vmem:[%s7387_s2 + $0x71] ss:$0 sm:$0xff] }
 0xc13   :  { %1924 = vadd.xlane.f32.xlu0 %v1923_v58  ;;  %v1873_v61 = vpop.xlane.xlu2 %1872 }
 0xc14   :  { %v1896_v15 = vmul.f32 %v6219_v38, %v1873_v61 }
 0xc16   :  { %v6246_v20 = vsub.f32 %v1855_v31, %v1896_v15 }
 0xc18   :  { %v1912_v5 = vmul.f32 %v6246_v20, %v6246_v20 }
 0xc1a   :  { %v1926_v11 = vsel %vm225_vm2, %v1912_v5, 0.0 }
 0xc1b   :  { %v1876_v7 = vpop.xlane.xlu0 %1875  ;;  %1927 = vadd.xlane.f32.xlu1 %v1926_v11 }
 0xc1c   :  { %v1897_v6 = vmul.f32 %v6219_v38, %v1876_v7 }
 0xc1e   :  { %v6252_v0 = vsub.f32 %v1856_v26, %v1897_v6 }
 0xc20   :  { %v1913_v55 = vmul.f32 %v6252_v0, %v6252_v0 }
 0xc22   :  { %v1929_v29 = vsel %vm225_vm2, %v1913_v55, 0.0 }
 0xc23   :  { %v1879_v35 = vpop.xlane.xlu1 %1878  ;;  %1930 = vadd.xlane.f32.xlu2 %v1929_v29 }
 0xc24   :  { %v1898_v56 = vmul.f32 %v6219_v38, %v1879_v35 }
 0xc26   :  { %v6258_v8 = vsub.f32 %v1857_v21, %v1898_v56 }
 0xc28   :  { %v1914_v32 = vmul.f32 %v6258_v8, %v6258_v8 }
 0xc2a   :  { %v1932_v30 = vsel %vm225_vm2, %v1914_v32, 0.0 }
 0xc2b   :  { %1933 = vadd.xlane.f32.xlu0 %v1932_v30  ;;  %v1882_v19 = vpop.xlane.xlu1 %1881 }
 0xc2c   :  { %v1899_v31 = vmul.f32 %v6219_v38, %v1882_v19 }
 0xc2e   :  { %v6264_v12 = vsub.f32 %v1858_v52, %v1899_v31 }
 0xc30   :  { %v1915_v49 = vmul.f32 %v6264_v12, %v6264_v12 }
 0xc32   :  { %v1935_v4 = vsel %vm225_vm2, %v1915_v49, 0.0 }
 0xc33   :  { %1936 = vadd.xlane.f32.xlu1 %v1935_v4 }
 0xc76   :  { %v1919_v39 = vpop.xlane.xlu2 %1918 }
 0xc77   :  { %v1941_v26 = vmul.f32 %v1919_v39, %v6219_v38 }
 0xc79   :  { %v1949_v47 = vadd.f32 1e-05, %v1941_v26 }
 0xc7b   :  { %5331 = vrsqrt.f32 %v1949_v47  ;;  %vm1963_vm6 = vweird.f32 %v1949_v47 }
 0xc7e   :  { %v1922_v1 = vpop.xlane.xlu0 %1921  ;;  %v1885_v40 = vpop.xlane.xlu2 %1884 }
 0xc7f   :  { %v1942_v23 = vmul.f32 %v1922_v1, %v6219_v38  ;;  %v1900_v21 = vmul.f32 %v6219_v38, %v1885_v40 }
 0xc81   :  { %v5332_v46 = vpop.eup %5331  ;;  %v1950_v57 = vadd.f32 1e-05, %v1942_v23  ;;  %v6278_v36 = vsub.f32 %v1859_v3, %v1900_v21 }
 0xc82   :  { %v1958_v14 = vmul.f32 %v5332_v46, %v1949_v47  ;;  %vm1964_vm5 = vweird.f32 %v5332_v46 }
 0xc83   :  { %5333 = vrsqrt.f32 %v1950_v57  ;;  %v1916_v52 = vmul.f32 %v6278_v36, %v6278_v36  ;;  %vm1965_vm7 = vmor %vm1963_vm6, %vm1964_vm5  ;;  %vm1973_vm9 = vweird.f32 %v1950_v57 }
 0xc84   :  { %v1959_v48 = vmul.f32 %v5332_v46, %v1958_v14 }
 0xc85   :  { %v1938_v28 = vsel %vm225_vm2, %v1916_v52, 0.0 }
 0xc86   :  { %v1960_v62 = vmul.f32 0.5, %v1959_v48  ;;  %v1925_v42 = vpop.xlane.xlu0 %1924  ;;  %1939 = vadd.xlane.f32.xlu2 %v1938_v28 }
 0xc87   :  { %v1943_v34 = vmul.f32 %v1925_v42, %v6219_v38 }
 0xc88   :  { %v1961_v16 = vsub.f32 1.5, %v1960_v62 }
 0xc89   :  { %v5334_v53 = vpop.eup %5333  ;;  %v1951_v33 = vadd.f32 1e-05, %v1943_v34 }
 0xc8a   :  { %v1962_v41 = vmul.f32 %v5332_v46, %v1961_v16  ;;  %v1968_v44 = vmul.f32 %v5334_v53, %v1950_v57  ;;  %vm1974_vm8 = vweird.f32 %v5334_v53 }
 0xc8b   :  { %5335 = vrsqrt.f32 %v1951_v33  ;;  %vm1975_vm10 = vmor %vm1973_vm9, %vm1974_vm8  ;;  %vm1983_vm12 = vweird.f32 %v1951_v33 }
 0xc8c   :  { %v1969_v60 = vmul.f32 %v5334_v53, %v1968_v44  ;;  %v1966_v22 = vsel %vm1965_vm7, %v5332_v46, %v1962_v41 }
 0xc8d   :  { %v2037_v3 = vmul.f32 %v1966_v22, %v6225_v25 }
 0xc8e   :  { %v1970_v54 = vmul.f32 0.5, %v1969_v60  ;;  %v1928_v45 = vpop.xlane.xlu1 %1927 }
 0xc8f   :  { %v1944_v51 = vmul.f32 %v1928_v45, %v6219_v38  ;;  %v2046_v58 = vmul.f32 %v6288_v24, %v2037_v3 }
 0xc90   :  { %v1971_v37 = vsub.f32 1.5, %v1970_v54 }
 0xc91   :  { %v5336_v13 = vpop.eup %5335  ;;  %v1952_v27 = vadd.f32 1e-05, %v1944_v51  ;;  %v6301_v55 = vadd.f32 %v6294_v10, %v2046_v58 }
 0xc92   :  { %v1972_v9 = vmul.f32 %v5334_v53, %v1971_v37  ;;  %v1978_v63 = vmul.f32 %v5336_v13, %v1951_v33  ;;  %vm1984_vm11 = vweird.f32 %v5336_v13 }
 0xc93   :  { %5337 = vrsqrt.f32 %v1952_v27  ;;  %vm1985_vm13 = vmor %vm1983_vm12, %vm1984_vm11  ;;  %vm1993_vm15 = vweird.f32 %v1952_v27 }
 0xc94   :  { %v1976_v59 = vsel %vm1975_vm10, %v5334_v53, %v1972_v9  ;;  %v1979_v43 = vmul.f32 %v5336_v13, %v1978_v63 }
 0xc95   :  { %v2038_v61 = vmul.f32 %v1976_v59, %v6232_v18 }
 0xc96   :  { %v1980_v15 = vmul.f32 0.5, %v1979_v43  ;;  %v1931_v5 = vpop.xlane.xlu2 %1930 }
 0xc97   :  { %v2047_v25 = vmul.f32 %v6288_v24, %v2038_v61  ;;  %v1945_v11 = vmul.f32 %v1931_v5, %v6219_v38  ;;  %v5128_v5 = vld [vmem:[%s7386_s1 + $0x108] sm:$0xff] }
 0xc98   :  { %v1981_v7 = vsub.f32 1.5, %v1980_v15 }
 0xc99   :  { %v5338_v6 = vpop.eup %5337  ;;  %v6304_v29 = vadd.f32 %v6294_v10, %v2047_v25  ;;  %v1953_v35 = vadd.f32 1e-05, %v1945_v11  ;;  %v5127_v11 = vld [vmem:[%s7386_s1 + $0x100] sm:$0xff] }
 0xc9a   :  { %v1982_v56 = vmul.f32 %v5336_v13, %v1981_v7  ;;  %v1988_v32 = vmul.f32 %v5338_v6, %v1952_v27  ;;  %vm1994_vm14 = vweird.f32 %v5338_v6 }
 0xc9b   :  { %v2063_v18 = vpack.c.bf16 %v6304_v29, %v6301_v55  ;;  %5339 = vrsqrt.f32 %v1953_v35  ;;  %vm1995_vm4 = vmor %vm1993_vm15, %vm1994_vm14  ;;  %vm2003_vm6 = vweird.f32 %v1953_v35 }
 0xc9c   :  { %v1989_v30 = vmul.f32 %v5338_v6, %v1988_v32  ;;  %v1986_v19 = vsel %vm1985_vm13, %v5336_v13, %v1982_v56  ;;  %v5126_v56 = vld [vmem:[%s7386_s1 + $0xf8] sm:$0xff] }
 0xc9d   :  { %4852 = vmatmul.msk.bf16.vlgmr.msrb.gmra.mxu0 %vm225_vm2, %v2063_v18  ;;  %v2039_v26 = vmul.f32 %v1986_v19, %v6240_v50 }
 0xc9e   :  { %v1990_v31 = vmul.f32 0.5, %v1989_v30  ;;  %v1934_v49 = vpop.xlane.xlu0 %1933 }
 0xc9f   :  { %v1946_v4 = vmul.f32 %v1934_v49, %v6219_v38  ;;  %v2048_v46 = vmul.f32 %v6288_v24, %v2039_v26 }
 0xca0   :  { %v1991_v2 = vsub.f32 1.5, %v1990_v31 }
 0xca1   :  { %v5340_v39 = vpop.eup %5339  ;;  %v1954_v47 = vadd.f32 1e-05, %v1946_v4  ;;  %v6315_v28 = vadd.f32 %v6294_v10, %v2048_v46 }
 0xca2   :  { %v1992_v17 = vmul.f32 %v5338_v6, %v1991_v2  ;;  %v1998_v1 = vmul.f32 %v5340_v39, %v1953_v35  ;;  %vm2004_vm5 = vweird.f32 %v5340_v39 }
 0xca3   :  { %5341 = vrsqrt.f32 %v1954_v47  ;;  %vm2005_vm7 = vmor %vm2003_vm6, %vm2004_vm5  ;;  %vm2013_vm9 = vweird.f32 %v1954_v47 }
 0xca4   :  { %v1996_v40 = vsel %vm1995_vm4, %v5338_v6, %v1992_v17  ;;  %v1999_v23 = vmul.f32 %v5340_v39, %v1998_v1 }
 0xca5   :  { %v2040_v21 = vmul.f32 %v1996_v40, %v6246_v20 }
 0xca6   :  { %v2000_v57 = vmul.f32 0.5, %v1999_v23 }
 0xca7   :  { %v2049_v14 = vmul.f32 %v6288_v24, %v2040_v21 }
 0xca8   :  { %v2001_v52 = vsub.f32 1.5, %v2000_v57 }
 0xca9   :  { %v5342_v48 = vpop.eup %5341  ;;  %v6318_v50 = vadd.f32 %v6294_v10, %v2049_v14 }
 0xcaa   :  { %v2002_v62 = vmul.f32 %v5340_v39, %v2001_v52  ;;  %v2008_v42 = vmul.f32 %v5342_v48, %v1954_v47  ;;  %vm2014_vm8 = vweird.f32 %v5342_v48 }
 0xcab   :  { %v2064_v34 = vpack.c.bf16 %v6318_v50, %v6315_v28  ;;  %vm2015_vm10 = vmor %vm2013_vm9, %vm2014_vm8 }
 0xcac   :  { %v2009_v20 = vmul.f32 %v5342_v48, %v2008_v42  ;;  %v2006_v16 = vsel %vm2005_vm7, %v5340_v39, %v2002_v62 }
 0xcad   :  { %4853 = vmatmul.msk.bf16.gmra.mxu0 %vm225_vm2, %v2064_v34  ;;  %v2041_v41 = vmul.f32 %v2006_v16, %v6252_v0  ;;  %v1937_v0 = vpop.xlane.xlu1 %1936 }
 0xcae   :  { %v2010_v53 = vmul.f32 0.5, %v2009_v20  ;;  %v1947_v3 = vmul.f32 %v1937_v0, %v6219_v38 }
 0xcaf   :  { %v2050_v54 = vmul.f32 %v6288_v24, %v2041_v41 }
 0xcb0   :  { %v2011_v33 = vsub.f32 1.5, %v2010_v53  ;;  %v1955_v27 = vadd.f32 1e-05, %v1947_v3 }
 0xcb1   :  { %v6328_v51 = vadd.f32 %v6294_v10, %v2050_v54 }
 0xcb2   :  { %v2012_v44 = vmul.f32 %v5342_v48, %v2011_v33  ;;  %5343 = vrsqrt.f32 %v1955_v27  ;;  %vm2023_vm12 = vweird.f32 %v1955_v27 }
 0xcb4   :  { %v2016_v60 = vsel %vm2015_vm10, %v5342_v48, %v2012_v44 }
 0xcb5   :  { %v2042_v22 = vmul.f32 %v2016_v60, %v6258_v8  ;;  %v5129_v8 = vld [vmem:[%s7386_s1 + $0x110] sm:$0xff] }
 0xcb6   :  { %2188 = vmatpush.bf16.msrb.mxu1 %v5129_v8  ;;  %v5179_v8 = vld [vmem:[%s7387_s2 + $0x80] ss:$0 sm:$0xff] }
 0xcb7   :  { %v2051_v45 = vmul.f32 %v6288_v24, %v2042_v22 }
 0xcb8   :  { %v5344_v9 = vpop.eup %5343 }
 0xcb9   :  { %v6331_v37 = vadd.f32 %v6294_v10, %v2051_v45  ;;  %v2018_v63 = vmul.f32 %v5344_v9, %v1955_v27  ;;  %vm2024_vm11 = vweird.f32 %v5344_v9 }
 0xcba   :  { %2189 = vmatpush.bf16.msrb.mxu1 %v5128_v5  ;;  %vm2025_vm13 = vmor %vm2023_vm12, %vm2024_vm11 }
 0xcbb   :  { %v2065_v13 = vpack.c.bf16 %v6331_v37, %v6328_v51  ;;  %v2019_v59 = vmul.f32 %v5344_v9, %v2018_v63 }
 0xcbd   :  { %4854 = vmatmul.msk.bf16.gmra.mxu0 %vm225_vm2, %v2065_v13  ;;  %v2020_v15 = vmul.f32 0.5, %v2019_v59 }
 0xcbe   :  { %2190 = vmatpush.bf16.msrb.mxu1 %v5127_v11 }
 0xcbf   :  { %v2021_v25 = vsub.f32 1.5, %v2020_v15 }
 0xcc1   :  { %v2022_v6 = vmul.f32 %v5344_v9, %v2021_v25 }
 0xcc2   :  { %2191 = vmatpush.bf16.msrb.mxu1 %v5126_v56 }
 0xcc3   :  { %v2026_v18 = vsel %vm2025_vm13, %v5344_v9, %v2022_v6 }
 0xcc4   :  { %v2043_v31 = vmul.f32 %v2026_v18, %v6264_v12 }
 0xcc6   :  { %v2052_v39 = vmul.f32 %v6288_v24, %v2043_v31 }
 0xcc8   :  { %v6355_v47 = vadd.f32 %v6294_v10, %v2052_v39 }
 0xcf9   :  { %v1940_v43 = vpop.xlane.xlu2 %1939 }
 0xcfa   :  { %v1948_v58 = vmul.f32 %v1940_v43, %v6219_v38 }
 0xcfc   :  { %v1956_v61 = vadd.f32 1e-05, %v1948_v58 }
 0xcfe   :  { %5345 = vrsqrt.f32 %v1956_v61  ;;  %vm2033_vm15 = vweird.f32 %v1956_v61 }
 0xd04   :  { %v5346_v7 = vpop.eup %5345 }
 0xd05   :  { %v2028_v35 = vmul.f32 %v5346_v7, %v1956_v61  ;;  %vm2034_vm14 = vweird.f32 %v5346_v7 }
 0xd06   :  { %vm2035_vm4 = vmor %vm2033_vm15, %vm2034_vm14 }
 0xd07   :  { %v2029_v32 = vmul.f32 %v5346_v7, %v2028_v35 }
 0xd09   :  { %v2030_v30 = vmul.f32 0.5, %v2029_v32 }
 0xd0b   :  { %v2031_v19 = vsub.f32 1.5, %v2030_v30 }
 0xd0d   :  { %v2032_v49 = vmul.f32 %v5346_v7, %v2031_v19 }
 0xd0f   :  { %v2036_v4 = vsel %vm2035_vm4, %v5346_v7, %v2032_v49 }
 0xd10   :  { %v2044_v2 = vmul.f32 %v2036_v4, %v6278_v36  ;;  %v5178_v36 = vld [vmem:[%s7387_s2 + $0x78] ss:$0 sm:$0xff] }
 0xd12   :  { %v2053_v26 = vmul.f32 %v6288_v24, %v2044_v2 }
 0xd14   :  { %v6358_v17 = vadd.f32 %v6294_v10, %v2053_v26 }
 0xd16   :  { %v2066_v1 = vpack.c.bf16 %v6358_v17, %v6355_v47 }
 0xd18   :  { %4855 = vmatmul.msk.bf16.gmra.mxu0 %vm225_vm2, %v2066_v1 }
 0xd1a   :  { %v2106_v12 = vpop.f32.mrf.mxu0 }
 0xd1b   :  { %v2107_v40 = vadd.f32 %v5178_v36, %v2106_v12 }
 0xd1d   :  { %v2126_v24 = vmax.f32 %v2107_v40, 0.0 }
 0xd22   :  { %v2108_v23 = vpop.f32.mrf.mxu0 }
 0xd23   :  { %v2109_v21 = vadd.f32 %v5178_v36, %v2108_v23 }
 0xd25   :  { %v2127_v46 = vmax.f32 %v2109_v21, 0.0 }
 0xd27   :  { %v2134_v57 = vpack.c.bf16 %v2127_v46, %v2126_v24 }
 0xd29   :  { %4872 = vmatmul.msk.bf16.vlgmr.msrb.gmra.mxu1 %vm428_vm3, %v2134_v57 }
 0xd2a   :  { %v2111_v10 = vpop.f32.mrf.mxu0 }
 0xd2b   :  { %v2112_v14 = vadd.f32 %v5178_v36, %v2111_v10 }
 0xd2d   :  { %v2128_v62 = vmax.f32 %v2112_v14, 0.0 }
 0xd32   :  { %v2113_v52 = vpop.f32.mrf.mxu0 }
 0xd33   :  { %v2114_v48 = vadd.f32 %v5178_v36, %v2113_v52 }
 0xd35   :  { %v2129_v42 = vmax.f32 %v2114_v48, 0.0 }
 0xd37   :  { %v2135_v34 = vpack.c.bf16 %v2129_v42, %v2128_v62 }
 0xd39   :  { %4873 = vmatmul.msk.bf16.gmra.mxu1 %vm428_vm3, %v2135_v34 }
 0xd3a   :  { %v2116_v20 = vpop.f32.mrf.mxu0 }
 0xd3b   :  { %v2117_v16 = vadd.f32 %v5178_v36, %v2116_v20 }
 0xd3d   :  { %v2130_v41 = vmax.f32 %v2117_v16, 0.0 }
 0xd42   :  { %v2118_v53 = vpop.f32.mrf.mxu0 }
 0xd43   :  { %v2119_v33 = vadd.f32 %v5178_v36, %v2118_v53 }
 0xd45   :  { %v2131_v44 = vmax.f32 %v2119_v33, 0.0 }
 0xd47   :  { %v2136_v60 = vpack.c.bf16 %v2131_v44, %v2130_v41 }
 0xd49   :  { %4874 = vmatmul.msk.bf16.gmra.mxu1 %vm428_vm3, %v2136_v60 }
 0xd95   :  { %v2121_v22 = vpop.f32.mrf.mxu0 }
 0xd96   :  { %v2122_v54 = vadd.f32 %v5178_v36, %v2121_v22 }
 0xd98   :  { %v2132_v0 = vmax.f32 %v2122_v54, 0.0 }
 0xd9d   :  { %v2123_v45 = vpop.f32.mrf.mxu0 }
 0xd9e   :  { %v2124_v13 = vadd.f32 %v5178_v36, %v2123_v45 }
 0xda0   :  { %v2133_v3 = vmax.f32 %v2124_v13, 0.0 }
 0xda2   :  { %v2137_v27 = vpack.c.bf16 %v2133_v3, %v2132_v0 }
 0xda4   :  { %4875 = vmatmul.msk.bf16.gmra.mxu1 %vm428_vm3, %v2137_v27 }
 0xda6   :  { %v2193_v9 = vpop.f32.mrf.mxu1 }
 0xda7   :  { %v2194_v63 = vadd.f32 %v5179_v8, %v2193_v9  ;;  %v5133_v9 = vld [vmem:[%s7386_s1 + $0x130] sm:$0xff] }
 0xda8   :  { %2510 = vmatpush.bf16.msrb.mxu3 %v5133_v9 }
 0xda9   :  { %v2213_v59 = vadd.f32 %v2194_v63, %v6301_v55  ;;  %v5135_v63 = vld [vmem:[%s7386_s1 + $0x140] sm:$0xff] }
 0xdaa   :  { %2552 = vmatpush.bf16.msra.mxu0 %v5135_v63 }
 0xdab   :  { %v2223_v43 = vsel %vm225_vm2, %v2213_v59, 0.0 }
 0xdac   :  { %2224 = vadd.xlane.f32.xlu0 %v2223_v43 }
 0xdae   :  { %v2195_v58 = vpop.f32.mrf.mxu1 }
 0xdaf   :  { %v2196_v61 = vadd.f32 %v5179_v8, %v2195_v58 }
 0xdb1   :  { %v2214_v15 = vadd.f32 %v2196_v61, %v6304_v29 }
 0xdb3   :  { %v2226_v5 = vsel %vm225_vm2, %v2214_v15, 0.0 }
 0xdb4   :  { %2227 = vadd.xlane.f32.xlu1 %v2226_v5 }
 0xdb6   :  { %v2198_v25 = vpop.f32.mrf.mxu1 }
 0xdb7   :  { %v2199_v11 = vadd.f32 %v5179_v8, %v2198_v25  ;;  %v5130_v25 = vld [vmem:[%s7386_s1 + $0x118] sm:$0xff] }
 0xdb9   :  { %v2215_v7 = vadd.f32 %v2199_v11, %v6315_v28  ;;  %v5132_v11 = vld [vmem:[%s7386_s1 + $0x128] sm:$0xff] }
 0xdba   :  { %2511 = vmatpush.bf16.msrb.mxu3 %v5132_v11 }
 0xdbb   :  { %v2229_v6 = vsel %vm225_vm2, %v2215_v7, 0.0 }
 0xdbc   :  { %2230 = vadd.xlane.f32.xlu2 %v2229_v6 }
 0xdbe   :  { %v2200_v35 = vpop.f32.mrf.mxu1 }
 0xdbf   :  { %v2201_v56 = vadd.f32 %v5179_v8, %v2200_v35 }
 0xdc1   :  { %v2216_v55 = vadd.f32 %v2201_v56, %v6318_v50 }
 0xdc3   :  { %v2232_v32 = vsel %vm225_vm2, %v2216_v55, 0.0 }
 0xdc4   :  { %2233 = vadd.xlane.f32.xlu0 %v2232_v32 }
 0xdc6   :  { %v2203_v18 = vpop.f32.mrf.mxu1 }
 0xdc7   :  { %v2204_v30 = vadd.f32 %v5179_v8, %v2203_v18 }
 0xdc9   :  { %v2217_v29 = vadd.f32 %v2204_v30, %v6328_v51 }
 0xdcb   :  { %v2235_v19 = vsel %vm225_vm2, %v2217_v29, 0.0 }
 0xdcc   :  { %2236 = vadd.xlane.f32.xlu1 %v2235_v19 }
 0xdce   :  { %v2205_v31 = vpop.f32.mrf.mxu1 }
 0xdcf   :  { %v2206_v49 = vadd.f32 %v5179_v8, %v2205_v31 }
 0xdd1   :  { %v2218_v28 = vadd.f32 %v2206_v49, %v6331_v37 }
 0xdd3   :  { %v2238_v4 = vsel %vm225_vm2, %v2218_v28, 0.0 }
 0xdd4   :  { %2239 = vadd.xlane.f32.xlu2 %v2238_v4 }
 0xe1f   :  { %v2225_v2 = vpop.xlane.xlu0 %2224 }
 0xe20   :  { %v2247_v50 = vmul.f32 %v2225_v2, %v6219_v38 }
 0xe21   :  { %v2208_v39 = vpop.f32.mrf.mxu1 }
 0xe22   :  { %v6386_v26 = vsub.f32 %v2213_v59, %v2247_v50  ;;  %v2209_v1 = vadd.f32 %v5179_v8, %v2208_v39 }
 0xe24   :  { %v2263_v51 = vmul.f32 %v6386_v26, %v6386_v26  ;;  %v2219_v12 = vadd.f32 %v2209_v1, %v6355_v47 }
 0xe26   :  { %v2271_v36 = vsel %vm225_vm2, %v2263_v51, 0.0  ;;  %v2241_v40 = vsel %vm225_vm2, %v2219_v12, 0.0 }
 0xe27   :  { %2272 = vadd.xlane.f32.xlu0 %v2271_v36  ;;  %2242 = vadd.xlane.f32.xlu2 %v2241_v40  ;;  %v2228_v37 = vpop.xlane.xlu1 %2227 }
 0xe28   :  { %v2248_v23 = vmul.f32 %v2228_v37, %v6219_v38 }
 0xe29   :  { %v2210_v21 = vpop.f32.mrf.mxu1 }
 0xe2a   :  { %v6394_v24 = vsub.f32 %v2214_v15, %v2248_v23  ;;  %v2211_v46 = vadd.f32 %v5179_v8, %v2210_v21  ;;  %v5131_v8 = vld [vmem:[%s7386_s1 + $0x120] sm:$0xff] }
 0xe2b   :  { %2468 = vmatpush.bf16.msrb.mxu2 %v5131_v8 }
 0xe2c   :  { %v2220_v57 = vadd.f32 %v2211_v46, %v6358_v17  ;;  %v2264_v10 = vmul.f32 %v6394_v24, %v6394_v24 }
 0xe2e   :  { %v2244_v47 = vsel %vm225_vm2, %v2220_v57, 0.0  ;;  %v2274_v14 = vsel %vm225_vm2, %v2264_v10, 0.0 }
 0xe2f   :  { %v2231_v52 = vpop.xlane.xlu2 %2230  ;;  %2245 = vadd.xlane.f32.xlu0 %v2244_v47  ;;  %2275 = vadd.xlane.f32.xlu1 %v2274_v14  ;;  %v6462_v14 = vld [vmem:[%s7387_s2 + $0x88] ss:$0 sm:$0xff] }
 0xe30   :  { %v2249_v48 = vmul.f32 %v2231_v52, %v6219_v38  ;;  %2469 = vmatpush.bf16.msrb.mxu2 %v5130_v25 }
 0xe32   :  { %v6402_v62 = vsub.f32 %v2215_v7, %v2249_v48  ;;  %v5134_v7 = vld [vmem:[%s7386_s1 + $0x138] sm:$0xff] }
 0xe33   :  { %2553 = vmatpush.bf16.msra.mxu0 %v5134_v7 }
 0xe34   :  { %v2265_v42 = vmul.f32 %v6402_v62, %v6402_v62 }
 0xe36   :  { %v2277_v34 = vsel %vm225_vm2, %v2265_v42, 0.0 }
 0xe37   :  { %v2234_v17 = vpop.xlane.xlu0 %2233  ;;  %2278 = vadd.xlane.f32.xlu1 %v2277_v34 }
 0xe38   :  { %v2250_v20 = vmul.f32 %v2234_v17, %v6219_v38 }
 0xe3a   :  { %v6408_v16 = vsub.f32 %v2216_v55, %v2250_v20 }
 0xe3c   :  { %v2266_v53 = vmul.f32 %v6408_v16, %v6408_v16 }
 0xe3e   :  { %v2280_v33 = vsel %vm225_vm2, %v2266_v53, 0.0  ;;  %v6468_v53 = vld [vmem:[%s7387_s2 + $0x89] ss:$0 sm:$0xff] }
 0xe3f   :  { %2281 = vadd.xlane.f32.xlu2 %v2280_v33  ;;  %v2237_v41 = vpop.xlane.xlu1 %2236 }
 0xe40   :  { %v2251_v44 = vmul.f32 %v2237_v41, %v6219_v38 }
 0xe42   :  { %v6414_v60 = vsub.f32 %v2217_v29, %v2251_v44 }
 0xe44   :  { %v2267_v22 = vmul.f32 %v6414_v60, %v6414_v60 }
 0xe46   :  { %v2283_v54 = vsel %vm225_vm2, %v2267_v22, 0.0 }
 0xe47   :  { %v2240_v45 = vpop.xlane.xlu2 %2239  ;;  %2284 = vadd.xlane.f32.xlu0 %v2283_v54 }
 0xe48   :  { %v2252_v13 = vmul.f32 %v2240_v45, %v6219_v38 }
 0xe4a   :  { %v6420_v0 = vsub.f32 %v2218_v28, %v2252_v13 }
 0xe4c   :  { %v2268_v3 = vmul.f32 %v6420_v0, %v6420_v0 }
 0xe4e   :  { %v2286_v27 = vsel %vm225_vm2, %v2268_v3, 0.0 }
 0xe4f   :  { %2287 = vadd.xlane.f32.xlu1 %v2286_v27 }
 0xe9a   :  { %v2273_v59 = vpop.xlane.xlu0 %2272  ;;  %v2243_v43 = vpop.xlane.xlu2 %2242 }
 0xe9b   :  { %v2295_v58 = vmul.f32 %v2273_v59, %v6219_v38  ;;  %v2253_v61 = vmul.f32 %v2243_v43, %v6219_v38 }
 0xe9d   :  { %v2303_v15 = vadd.f32 1e-05, %v2295_v58  ;;  %v6436_v5 = vsub.f32 %v2219_v12, %v2253_v61 }
 0xe9f   :  { %5347 = vrsqrt.f32 %v2303_v15  ;;  %v2269_v6 = vmul.f32 %v6436_v5, %v6436_v5  ;;  %vm2317_vm6 = vweird.f32 %v2303_v15 }
 0xea1   :  { %v2289_v35 = vsel %vm225_vm2, %v2269_v6, 0.0 }
 0xea2   :  { %v2246_v56 = vpop.xlane.xlu0 %2245  ;;  %2290 = vadd.xlane.f32.xlu2 %v2289_v35  ;;  %v2276_v55 = vpop.xlane.xlu1 %2275 }
 0xea3   :  { %v2254_v32 = vmul.f32 %v2246_v56, %v6219_v38  ;;  %v2296_v18 = vmul.f32 %v2276_v55, %v6219_v38 }
 0xea5   :  { %v5348_v30 = vpop.eup %5347  ;;  %v6452_v29 = vsub.f32 %v2220_v57, %v2254_v32  ;;  %v2304_v19 = vadd.f32 1e-05, %v2296_v18 }
 0xea6   :  { %v2312_v31 = vmul.f32 %v5348_v30, %v2303_v15  ;;  %vm2318_vm5 = vweird.f32 %v5348_v30 }
 0xea7   :  { %5349 = vrsqrt.f32 %v2304_v19  ;;  %v2270_v49 = vmul.f32 %v6452_v29, %v6452_v29  ;;  %vm2319_vm7 = vmor %vm2317_vm6, %vm2318_vm5  ;;  %vm2327_vm9 = vweird.f32 %v2304_v19 }
 0xea8   :  { %v2313_v28 = vmul.f32 %v5348_v30, %v2312_v31 }
 0xea9   :  { %v2292_v4 = vsel %vm225_vm2, %v2270_v49, 0.0 }
 0xeaa   :  { %v2314_v2 = vmul.f32 0.5, %v2313_v28  ;;  %2293 = vadd.xlane.f32.xlu0 %v2292_v4  ;;  %v2279_v50 = vpop.xlane.xlu1 %2278 }
 0xeab   :  { %v2297_v39 = vmul.f32 %v2279_v50, %v6219_v38 }
 0xeac   :  { %v2315_v1 = vsub.f32 1.5, %v2314_v2 }
 0xead   :  { %v5350_v51 = vpop.eup %5349  ;;  %v2305_v12 = vadd.f32 1e-05, %v2297_v39 }
 0xeae   :  { %v2316_v36 = vmul.f32 %v5348_v30, %v2315_v1  ;;  %v2322_v40 = vmul.f32 %v5350_v51, %v2304_v19  ;;  %vm2328_vm8 = vweird.f32 %v5350_v51 }
 0xeaf   :  { %5351 = vrsqrt.f32 %v2305_v12  ;;  %vm2329_vm10 = vmor %vm2327_vm9, %vm2328_vm8  ;;  %vm2337_vm12 = vweird.f32 %v2305_v12 }
 0xeb0   :  { %v2323_v37 = vmul.f32 %v5350_v51, %v2322_v40  ;;  %v2320_v23 = vsel %vm2319_vm7, %v5348_v30, %v2316_v36 }
 0xeb1   :  { %v2391_v52 = vmul.f32 %v2320_v23, %v6386_v26 }
 0xeb2   :  { %v2324_v21 = vmul.f32 0.5, %v2323_v37  ;;  %v2282_v46 = vpop.xlane.xlu2 %2281 }
 0xeb3   :  { %v2298_v57 = vmul.f32 %v2282_v46, %v6219_v38  ;;  %v2400_v33 = vmul.f32 %v6462_v14, %v2391_v52 }
 0xeb4   :  { %v2325_v10 = vsub.f32 1.5, %v2324_v21 }
 0xeb5   :  { %v5352_v47 = vpop.eup %5351  ;;  %v2306_v48 = vadd.f32 1e-05, %v2298_v57  ;;  %v6475_v3 = vadd.f32 %v6468_v53, %v2400_v33 }
 0xeb6   :  { %v2326_v42 = vmul.f32 %v5350_v51, %v2325_v10  ;;  %v2332_v34 = vmul.f32 %v5352_v47, %v2305_v12  ;;  %vm2338_vm11 = vweird.f32 %v5352_v47 }
 0xeb7   :  { %5353 = vrsqrt.f32 %v2306_v48  ;;  %vm2339_vm13 = vmor %vm2337_vm12, %vm2338_vm11  ;;  %vm2347_vm15 = vweird.f32 %v2306_v48 }
 0xeb8   :  { %v2330_v17 = vsel %vm2329_vm10, %v5350_v51, %v2326_v42  ;;  %v2333_v20 = vmul.f32 %v5352_v47, %v2332_v34 }
 0xeb9   :  { %v2392_v41 = vmul.f32 %v2330_v17, %v6394_v24 }
 0xeba   :  { %v2334_v44 = vmul.f32 0.5, %v2333_v20  ;;  %v2285_v22 = vpop.xlane.xlu0 %2284 }
 0xebb   :  { %v2401_v26 = vmul.f32 %v6462_v14, %v2392_v41  ;;  %v2299_v54 = vmul.f32 %v2285_v22, %v6219_v38  ;;  %v5137_v41 = vld [vmem:[%s7386_s1 + $0x150] sm:$0xff] }
 0xebc   :  { %v2335_v45 = vsub.f32 1.5, %v2334_v44  ;;  %v5139_v44 = vld [vmem:[%s7386_s1 + $0x160] sm:$0xff]  ;;  %2828 = vmatpush.bf16.msra.mxu3 %v5137_v41 }
 0xebd   :  { %v5354_v13 = vpop.eup %5353  ;;  %v6478_v27 = vadd.f32 %v6468_v53, %v2401_v26  ;;  %v2307_v8 = vadd.f32 1e-05, %v2299_v54  ;;  %2870 = vmatpush.bf16.msrb.mxu0 %v5139_v44 }
 0xebe   :  { %v2336_v9 = vmul.f32 %v5352_v47, %v2335_v45  ;;  %v2342_v63 = vmul.f32 %v5354_v13, %v2306_v48  ;;  %vm2348_vm14 = vweird.f32 %v5354_v13  ;;  %v5136_v45 = vld [vmem:[%s7386_s1 + $0x148] sm:$0xff] }
 0xebf   :  { %v6482_v24 = vpack.c.bf16 %v6478_v27, %v6475_v3  ;;  %5355 = vrsqrt.f32 %v2307_v8  ;;  %vm2349_vm4 = vmor %vm2347_vm15, %vm2348_vm14  ;;  %vm2357_vm6 = vweird.f32 %v2307_v8 }
 0xec0   :  { %v2343_v59 = vmul.f32 %v5354_v13, %v2342_v63  ;;  %v2340_v43 = vsel %vm2339_vm13, %v5352_v47, %v2336_v9  ;;  %2829 = vmatpush.bf16.msra.mxu3 %v5136_v45 }
 0xec1   :  { %4884 = vmatmul.msk.bf16.vlgmr.msrb.gmra.mxu2 %vm225_vm2, %v6482_v24  ;;  %4896 = vmatmul.msk.bf16.vlgmr.msrb.gmra.mxu3 %vm225_vm2, %v6482_v24  ;;  %v2393_v7 = vmul.f32 %v2340_v43, %v6402_v62 }
 0xec2   :  { %v2344_v58 = vmul.f32 0.5, %v2343_v59  ;;  %4908 = vmatmul.msk.bf16.vlgmr.msra.gmra.mxu0 %vm225_vm2, %v6482_v24  ;;  %v2288_v61 = vpop.xlane.xlu1 %2287 }
 0xec3   :  { %v2300_v15 = vmul.f32 %v2288_v61, %v6219_v38  ;;  %v2402_v18 = vmul.f32 %v6462_v14, %v2393_v7 }
 0xec4   :  { %v2345_v25 = vsub.f32 1.5, %v2344_v58 }
 0xec5   :  { %v5356_v11 = vpop.eup %5355  ;;  %v2308_v6 = vadd.f32 1e-05, %v2300_v15  ;;  %v6496_v4 = vadd.f32 %v6468_v53, %v2402_v18 }
 0xec6   :  { %v2346_v35 = vmul.f32 %v5354_v13, %v2345_v25  ;;  %v2352_v56 = vmul.f32 %v5356_v11, %v2307_v8  ;;  %vm2358_vm5 = vweird.f32 %v5356_v11 }
 0xec7   :  { %5357 = vrsqrt.f32 %v2308_v6  ;;  %vm2359_vm7 = vmor %vm2357_vm6, %vm2358_vm5  ;;  %vm2367_vm9 = vweird.f32 %v2308_v6 }
 0xec8   :  { %v2350_v55 = vsel %vm2349_vm4, %v5354_v13, %v2346_v35  ;;  %v2353_v32 = vmul.f32 %v5356_v11, %v2352_v56  ;;  %v5138_v13 = vld [vmem:[%s7386_s1 + $0x158] sm:$0xff] }
 0xec9   :  { %v2394_v30 = vmul.f32 %v2350_v55, %v6408_v16  ;;  %2871 = vmatpush.bf16.msrb.mxu0 %v5138_v13 }
 0xeca   :  { %v2354_v19 = vmul.f32 0.5, %v2353_v32 }
 0xecb   :  { %v2403_v31 = vmul.f32 %v6462_v14, %v2394_v30 }
 0xecc   :  { %v2355_v49 = vsub.f32 1.5, %v2354_v19 }
 0xecd   :  { %v5358_v28 = vpop.eup %5357  ;;  %v6499_v62 = vadd.f32 %v6468_v53, %v2403_v31 }
 0xece   :  { %v2356_v2 = vmul.f32 %v5356_v11, %v2355_v49  ;;  %v2362_v50 = vmul.f32 %v5358_v28, %v2308_v6  ;;  %vm2368_vm8 = vweird.f32 %v5358_v28 }
 0xecf   :  { %v6503_v39 = vpack.c.bf16 %v6499_v62, %v6496_v4  ;;  %vm2369_vm10 = vmor %vm2367_vm9, %vm2368_vm8 }
 0xed0   :  { %v2363_v16 = vmul.f32 %v5358_v28, %v2362_v50  ;;  %v2360_v1 = vsel %vm2359_vm7, %v5356_v11, %v2356_v2 }
 0xed1   :  { %4885 = vmatmul.msk.bf16.gmra.mxu2 %vm225_vm2, %v6503_v39  ;;  %4897 = vmatmul.msk.bf16.gmra.mxu3 %vm225_vm2, %v6503_v39  ;;  %v2395_v36 = vmul.f32 %v2360_v1, %v6414_v60  ;;  %v5182_v1 = vld [vmem:[%s7387_s2 + $0x98] ss:$0 sm:$0xff] }
 0xed2   :  { %v2364_v51 = vmul.f32 0.5, %v2363_v16  ;;  %4909 = vmatmul.msk.bf16.gmra.mxu0 %vm225_vm2, %v6503_v39 }
 0xed3   :  { %v2404_v23 = vmul.f32 %v6462_v14, %v2395_v36 }
 0xed4   :  { %v2365_v12 = vsub.f32 1.5, %v2364_v51 }
 0xed5   :  { %v6516_v57 = vadd.f32 %v6468_v53, %v2404_v23  ;;  %v5184_v23 = vld [vmem:[%s7387_s2 + $0x94] ss:$0 sm:$0xff] }
 0xed6   :  { %v2366_v40 = vmul.f32 %v5358_v28, %v2365_v12 }
 0xed8   :  { %v2370_v37 = vsel %vm2369_vm10, %v5358_v28, %v2366_v40 }
 0xed9   :  { %v2396_v21 = vmul.f32 %v2370_v37, %v6420_v0 }
 0xedb   :  { %v2405_v46 = vmul.f32 %v6462_v14, %v2396_v21 }
 0xedd   :  { %v6519_v10 = vadd.f32 %v6468_v53, %v2405_v46 }
 0xedf   :  { %v6523_v47 = vpack.c.bf16 %v6519_v10, %v6516_v57 }
 0xee1   :  { %4886 = vmatmul.msk.bf16.gmra.mxu2 %vm225_vm2, %v6523_v47  ;;  %4898 = vmatmul.msk.bf16.gmra.mxu3 %vm225_vm2, %v6523_v47 }
 0xee2   :  { %4910 = vmatmul.msk.bf16.gmra.mxu0 %vm225_vm2, %v6523_v47 }
 0xf15   :  { %v2291_v60 = vpop.xlane.xlu2 %2290 }
 0xf16   :  { %v2301_v0 = vmul.f32 %v2291_v60, %v6219_v38 }
 0xf18   :  { %v2309_v52 = vadd.f32 1e-05, %v2301_v0 }
 0xf1a   :  { %5359 = vrsqrt.f32 %v2309_v52  ;;  %vm2377_vm12 = vweird.f32 %v2309_v52 }
 0xf1d   :  { %v2294_v48 = vpop.xlane.xlu0 %2293 }
 0xf1e   :  { %v2302_v42 = vmul.f32 %v2294_v48, %v6219_v38 }
 0xf20   :  { %v5360_v34 = vpop.eup %5359  ;;  %v2310_v17 = vadd.f32 1e-05, %v2302_v42 }
 0xf21   :  { %v2372_v20 = vmul.f32 %v5360_v34, %v2309_v52  ;;  %vm2378_vm11 = vweird.f32 %v5360_v34 }
 0xf22   :  { %5361 = vrsqrt.f32 %v2310_v17  ;;  %vm2379_vm13 = vmor %vm2377_vm12, %vm2378_vm11  ;;  %vm2387_vm15 = vweird.f32 %v2310_v17 }
 0xf23   :  { %v2373_v33 = vmul.f32 %v5360_v34, %v2372_v20 }
 0xf25   :  { %v2374_v22 = vmul.f32 0.5, %v2373_v33 }
 0xf27   :  { %v2375_v26 = vsub.f32 1.5, %v2374_v22 }
 0xf28   :  { %v5362_v54 = vpop.eup %5361 }
 0xf29   :  { %v2376_v8 = vmul.f32 %v5360_v34, %v2375_v26  ;;  %v2382_v9 = vmul.f32 %v5362_v54, %v2310_v17  ;;  %vm2388_vm14 = vweird.f32 %v5362_v54 }
 0xf2a   :  { %vm2389_vm4 = vmor %vm2387_vm15, %vm2388_vm14 }
 0xf2b   :  { %v2383_v63 = vmul.f32 %v5362_v54, %v2382_v9  ;;  %v2380_v59 = vsel %vm2379_vm13, %v5360_v34, %v2376_v8 }
 0xf2c   :  { %v2397_v61 = vmul.f32 %v2380_v59, %v6436_v5 }
 0xf2d   :  { %v2384_v43 = vmul.f32 0.5, %v2383_v63 }
 0xf2e   :  { %v2406_v11 = vmul.f32 %v6462_v14, %v2397_v61 }
 0xf2f   :  { %v2385_v58 = vsub.f32 1.5, %v2384_v43 }
 0xf30   :  { %v6550_v35 = vadd.f32 %v6468_v53, %v2406_v11 }
 0xf31   :  { %v2386_v15 = vmul.f32 %v5362_v54, %v2385_v58 }
 0xf33   :  { %v2390_v25 = vsel %vm2389_vm4, %v5362_v54, %v2386_v15 }
 0xf34   :  { %v2398_v7 = vmul.f32 %v2390_v25, %v6452_v29 }
 0xf36   :  { %v2407_v6 = vmul.f32 %v6462_v14, %v2398_v7 }
 0xf38   :  { %v6553_v56 = vadd.f32 %v6468_v53, %v2407_v6 }
 0xf3a   :  { %v6557_v55 = vpack.c.bf16 %v6553_v56, %v6550_v35 }
 0xf3c   :  { %4887 = vmatmul.msk.bf16.gmra.mxu2 %vm225_vm2, %v6557_v55  ;;  %4899 = vmatmul.msk.bf16.gmra.mxu3 %vm225_vm2, %v6557_v55 }
 0xf3d   :  { %4911 = vmatmul.msk.bf16.gmra.mxu0 %vm225_vm2, %v6557_v55 }
 0xf3f   :  { %v2555_v5 = vpop.f32.mrf.mxu0 }
 0xf40   :  { %v2556_v26 = vadd.f32 %v5182_v1, %v2555_v5 }
 0xf44   :  { %v2513_v29 = vpop.f32.mrf.mxu3  ;;  %v2471_v54 = vpop.f32.mrf.mxu2 }
 0xf45   :  { %v2514_v11 = vadd.f32 %v5184_v23, %v2513_v29 }
 0xf47   :  { %v2557_v14 = vpop.f32.mrf.mxu0 }
 0xf48   :  { %v2558_v41 = vadd.f32 %v5182_v1, %v2557_v14  ;;  %v5183_v14 = vld [vmem:[%s7387_s2 + $0x90] ss:$0 sm:$0xff] }
 0xf4a   :  { %v2744_v13 = vpack.c.bf16 %v2558_v41, %v2556_v26 }
 0xf4c   :  { %4928 = vmatmul.msk.bf16.vlgmr.msra.gmra.mxu3 %vm225_vm2, %v6482_v24  ;;  %v2515_v53 = vpop.f32.mrf.mxu3  ;;  %v2473_v58 = vpop.f32.mrf.mxu2 }
 0xf4d   :  { %4940 = vmatmul.msk.bf16.vlgmr.msrb.gmra.mxu0 %vm225_vm2, %v6482_v24  ;;  %v2516_v15 = vadd.f32 %v5184_v23, %v2515_v53 }
 0xf4f   :  { %v2560_v32 = vpop.f32.mrf.mxu0  ;;  %v2579_v7 = vpack.c.bf16 %v2516_v15, %v2514_v11 }
 0xf50   :  { %v2561_v17 = vadd.f32 %v5182_v1, %v2560_v32 }
 0xf51   :  { %v2596_v32 = vsel %vm38_vm1, %v2579_v7, 0 }
 0xf54   :  { %v2518_v18 = vpop.f32.mrf.mxu3  ;;  %v2476_v5 = vpop.f32.mrf.mxu2 }
 0xf55   :  { %v2519_v59 = vadd.f32 %v5184_v23, %v2518_v18  ;;  %v2472_v18 = vadd.f32 %v5183_v14, %v2471_v54 }
 0xf57   :  { %v2562_v30 = vpop.f32.mrf.mxu0 }
 0xf58   :  { %v2563_v52 = vadd.f32 %v5182_v1, %v2562_v30  ;;  %v2474_v30 = vadd.f32 %v5183_v14, %v2473_v58 }
 0xf5a   :  { %v2745_v44 = vpack.c.bf16 %v2563_v52, %v2561_v17 }
 0xf5c   :  { %4929 = vmatmul.msk.bf16.gmra.mxu3 %vm225_vm2, %v6503_v39  ;;  %v2520_v19 = vpop.f32.mrf.mxu3  ;;  %v2478_v53 = vpop.f32.mrf.mxu2 }
 0xf5d   :  { %4941 = vmatmul.msk.bf16.gmra.mxu0 %vm225_vm2, %v6503_v39  ;;  %v2521_v9 = vadd.f32 %v5184_v23, %v2520_v19  ;;  %v2575_v19 = vpack.c.bf16 %v2474_v30, %v2472_v18  ;;  %v6642_v18 = vld [vmem:[%s7387_s2 + $0x20] sm:$0xff] }
 0xf5f   :  { %v2565_v31 = vpop.f32.mrf.mxu0  ;;  %v2580_v43 = vpack.c.bf16 %v2521_v9, %v2519_v59 }
 0xf60   :  { %v2566_v21 = vadd.f32 %v5182_v1, %v2565_v31 }
 0xf61   :  { %v2599_v25 = vsel %vm38_vm1, %v2580_v43, 0 }
 0xf64   :  { %v2523_v49 = vpop.f32.mrf.mxu3  ;;  %v2481_v29 = vpop.f32.mrf.mxu2 }
 0xf65   :  { %v2524_v22 = vadd.f32 %v5184_v23, %v2523_v49  ;;  %v2482_v52 = vadd.f32 %v5183_v14, %v2481_v29 }
 0xf67   :  { %v2567_v28 = vpop.f32.mrf.mxu0 }
 0xf68   :  { %v2568_v40 = vadd.f32 %v5182_v1, %v2567_v28  ;;  %v2479_v28 = vadd.f32 %v5183_v14, %v2478_v53 }
 0xf6a   :  { %v2746_v48 = vpack.c.bf16 %v2568_v40, %v2566_v21  ;;  %v5140_v40 = vld [vmem:[%s7386_s1 + $0x168] sm:$0xff] }
 0xf6c   :  { %4930 = vmatmul.msk.bf16.gmra.mxu3 %vm225_vm2, %v6523_v47  ;;  %v2525_v2 = vpop.f32.mrf.mxu3 }
 0xf6d   :  { %4942 = vmatmul.msk.bf16.gmra.mxu0 %vm225_vm2, %v6523_v47  ;;  %v2526_v20 = vadd.f32 %v5184_v23, %v2525_v2  ;;  %v2477_v2 = vadd.f32 %v5183_v14, %v2476_v5 }
 0xf6f   :  { %v2581_v45 = vpack.c.bf16 %v2526_v20, %v2524_v22 }
 0xf71   :  { %v2602_v63 = vsel %vm38_vm1, %v2581_v45, 0 }
 0xf7c   :  { %4931 = vmatmul.msk.bf16.gmra.mxu3 %vm225_vm2, %v6557_v55 }
 0xf7d   :  { %4943 = vmatmul.msk.bf16.gmra.mxu0 %vm225_vm2, %v6557_v55 }
 0xfba   :  { %v2570_v50 = vpop.f32.mrf.mxu0 }
 0xfbb   :  { %v2571_v12 = vadd.f32 %v5182_v1, %v2570_v50  ;;  %v2576_v50 = vpack.c.bf16 %v2479_v28, %v2477_v2  ;;  %v6652_v28 = vld [vmem:[%s7387_s2 + $0x28] sm:$0xff] }
 0xfbf   :  { %v2528_v16 = vpop.f32.mrf.mxu3 }
 0xfc0   :  { %v2529_v60 = vadd.f32 %v5184_v23, %v2528_v16 }
 0xfc2   :  { %v2572_v51 = vpop.f32.mrf.mxu0 }
 0xfc3   :  { %v2573_v36 = vadd.f32 %v5182_v1, %v2572_v51  ;;  %v5141_v1 = vld [vmem:[%s7386_s1 + $0x170] sm:$0xff]  ;;  %v2483_v51 = vpop.f32.mrf.mxu2 }
 0xfc5   :  { %v2747_v37 = vpack.c.bf16 %v2573_v36, %v2571_v12  ;;  %v5185_v12 = vld [vmem:[%s7387_s2 + $0x95] ss:$0 sm:$0xff] }
 0xfc7   :  { %2764 = vmatpush.bf16.msra.mxu2 %v2747_v37  ;;  %v2530_v46 = vpop.f32.mrf.mxu3 }
 0xfc8   :  { %v2531_v0 = vadd.f32 %v5184_v23, %v2530_v46  ;;  %v2484_v46 = vadd.f32 %v5183_v14, %v2483_v51 }
 0xfca   :  { %v2582_v42 = vpack.c.bf16 %v2531_v0, %v2529_v60  ;;  %v6587_v34 = vpop.f32.mrf.mxu0  ;;  %v2577_v17 = vpack.c.bf16 %v2484_v46, %v2482_v52 }
 0xfcb   :  { %2765 = vmatpush.bf16.msra.mxu2 %v2746_v48  ;;  %v2486_v48 = vpop.f32.mrf.mxu2 }
 0xfcc   :  { %v2605_v33 = vsel %vm38_vm1, %v2582_v42, 0  ;;  %v2487_v9 = vadd.f32 %v5183_v14, %v2486_v48 }
 0xfcd   :  { %2611 = vmatpush.bf16.xpose.msra.mxu1 %v2605_v33 }
 0xfcf   :  { %2766 = vmatpush.bf16.msra.mxu2 %v2745_v44 }
 0xfd2   :  { %v2875_v8 = vpop.f32.mrf.mxu0 }
 0xfd3   :  { %2767 = vmatpush.bf16.msra.mxu2 %v2744_v13  ;;  %v2488_v22 = vpop.f32.mrf.mxu2  ;;  %v2876_v45 = vadd.f32 %v5185_v12, %v2875_v8 }
 0xfd4   :  { %v2489_v54 = vadd.f32 %v5183_v14, %v2488_v22 }
 0xfd5   :  { %2612 = vmatpush.bf16.xpose.msra.mxu1 %v2602_v63  ;;  %v2874_v63 = vadd.f32 %v5185_v12, %v6587_v34 }
 0xfd6   :  { %v2578_v59 = vpack.c.bf16 %v2489_v54, %v2487_v9 }
 0xfd7   :  { %v2939_v43 = vpack.c.bf16 %v2876_v45, %v2874_v63  ;;  %v5187_v63 = vld [vmem:[%s7387_s2 + $0x99] ss:$0 sm:$0xff] }
 0xfd9   :  { %v2956_v58 = vsel %vm38_vm1, %v2939_v43, 0 }
 0xfda   :  { %v2878_v61 = vpop.f32.mrf.mxu0 }
 0xfdb   :  { %v2879_v44 = vadd.f32 %v5185_v12, %v2878_v61  ;;  %v6625_v61 = vld [vmem:[%s7387_s2 + $0x10] sm:$0xff] }
 0xfdd   :  { %2613 = vmatpush.bf16.xpose.msra.mxu1 %v2599_v25 }
 0xfe2   :  { %v2880_v6 = vpop.f32.mrf.mxu0 }
 0xfe3   :  { %v2881_v33 = vadd.f32 %v5185_v12, %v2880_v6  ;;  %v6632_v6 = vld [vmem:[%s7387_s2 + $0x18] sm:$0xff] }
 0xfe5   :  { %2614 = vmatpush.bf16.xpose.msra.mxu1 %v2596_v32  ;;  %v2940_v26 = vpack.c.bf16 %v2881_v33, %v2879_v44 }
 0xfe7   :  { %v2959_v13 = vsel %vm38_vm1, %v2940_v26, 0 }
 0xfea   :  { %v2883_v31 = vpop.f32.mrf.mxu0 }
 0xfeb   :  { %v2884_v42 = vadd.f32 %v5185_v12, %v2883_v31 }
 0xfec   :  { %4912 = vmatmul.msk.bf16.vlgmr.msra.gmra.mxu1 %vm38_vm1, %v2575_v19 }
 0xfed   :  { %2912 = vmatpush.bf16.msrb.mxu1 %v5141_v1  ;;  %v6662_v1 = vld [vmem:[%s7387_s2 + $0x30] sm:$0xff] }
 0xff1   :  { %2913 = vmatpush.bf16.msrb.mxu1 %v5140_v40 }
 0xff2   :  { %v2885_v49 = vpop.f32.mrf.mxu0 }
 0xff3   :  { %v2886_v60 = vadd.f32 %v5185_v12, %v2885_v49 }
 0xff5   :  { %v2941_v20 = vpack.c.bf16 %v2886_v60, %v2884_v42 }
 0xff7   :  { %v2962_v41 = vsel %vm38_vm1, %v2941_v20, 0  ;;  %v6692_v20 = vld [vmem:[%s7387_s2 + $0x48] sm:$0xff] }
 0xffa   :  { %v2888_v16 = vpop.f32.mrf.mxu0 }
 0xffb   :  { %v2889_v37 = vadd.f32 %v5185_v12, %v2888_v16 }
 0xffc   :  { %4913 = vmatmul.msk.bf16.gmra.mxu1 %vm38_vm1, %v2576_v50 }
0x1002   :  { %v2890_v36 = vpop.f32.mrf.mxu0 }
0x1003   :  { %v2891_v23 = vadd.f32 %v5185_v12, %v2890_v36 }
0x1005   :  { %v2942_v21 = vpack.c.bf16 %v2891_v23, %v2889_v37  ;;  %v6672_v37 = vld [vmem:[%s7387_s2 + $0x38] sm:$0xff] }
0x1007   :  { %v2965_v0 = vsel %vm38_vm1, %v2942_v21, 0 }
0x1008   :  { %2971 = vmatpush.bf16.xpose.msrb.mxu2 %v2965_v0  ;;  %v6682_v0 = vld [vmem:[%s7387_s2 + $0x40] sm:$0xff] }
0x100c   :  { %4914 = vmatmul.msk.bf16.gmra.mxu1 %vm38_vm1, %v2577_v17 }
0x1010   :  { %2972 = vmatpush.bf16.xpose.msrb.mxu2 %v2962_v41 }
0x1018   :  { %2973 = vmatpush.bf16.xpose.msrb.mxu2 %v2959_v13 }
0x101c   :  { %4915 = vmatmul.msk.bf16.gmra.mxu1 %vm38_vm1, %v2578_v59 }
0x1020   :  { %2974 = vmatpush.bf16.xpose.msrb.mxu2 %v2956_v58 }
0x102c   :  { %4952 = vmatmul.msk.bf16.vlgmr.msrb.gmra.mxu1 %vm225_vm2, %v6482_v24 }
0x103c   :  { %4953 = vmatmul.msk.bf16.gmra.mxu1 %vm225_vm2, %v6503_v39 }
0x104c   :  { %4954 = vmatmul.msk.bf16.gmra.mxu1 %vm225_vm2, %v6523_v47 }
0x105c   :  { %4955 = vmatmul.msk.bf16.gmra.mxu1 %vm225_vm2, %v6557_v55 }
0x1069   :  { %v2616_v34 = vpop.f32.mrf.mxu1 }
0x106a   :  { %v2636_v8 = vmul.f32 0.35355338, %v2616_v34 }
0x106c   :  { %v2644_v15 = vadd.f32 %v6625_v61, %v2636_v8 }
0x106e   :  { %v2652_v25 = vsel %vm428_vm3, %v2644_v15, -inf }
0x106f   :  { %2653 = vmax.xlane.f32.xlu1 %v2652_v25 }
0x1071   :  { %v2618_v11 = vpop.f32.mrf.mxu1 }
0x1072   :  { %v2637_v7 = vmul.f32 0.35355338, %v2618_v11 }
0x1074   :  { %v6635_v5 = vadd.f32 %v6632_v6, %v2637_v7 }
0x1076   :  { %v2655_v14 = vsel %vm428_vm3, %v6635_v5, -inf }
0x1077   :  { %2656 = vmax.xlane.f32.xlu2 %v2655_v14 }
0x1079   :  { %v2621_v32 = vpop.f32.mrf.mxu1 }
0x107a   :  { %v2638_v30 = vmul.f32 0.35355338, %v2621_v32 }
0x107c   :  { %v6645_v19 = vadd.f32 %v6642_v18, %v2638_v30 }
0x107e   :  { %v2658_v31 = vsel %vm428_vm3, %v6645_v19, -inf }
0x107f   :  { %2659 = vmax.xlane.f32.xlu0 %v2658_v31 }
0x1081   :  { %v2623_v53 = vpop.f32.mrf.mxu1 }
0x1082   :  { %v2639_v49 = vmul.f32 0.35355338, %v2623_v53 }
0x1084   :  { %v6655_v29 = vadd.f32 %v6652_v28, %v2639_v49 }
0x1086   :  { %v2661_v2 = vsel %vm428_vm3, %v6655_v29, -inf }
0x1087   :  { %2662 = vmax.xlane.f32.xlu1 %v2661_v2 }
0x1089   :  { %v2626_v50 = vpop.f32.mrf.mxu1 }
0x108a   :  { %v2640_v16 = vmul.f32 0.35355338, %v2626_v50 }
0x108c   :  { %v6665_v51 = vadd.f32 %v6662_v1, %v2640_v16 }
0x108e   :  { %v2664_v12 = vsel %vm428_vm3, %v6665_v51, -inf }
0x108f   :  { %2665 = vmax.xlane.f32.xlu2 %v2664_v12 }
0x1091   :  { %v2628_v36 = vpop.f32.mrf.mxu1 }
0x1092   :  { %v2641_v40 = vmul.f32 0.35355338, %v2628_v36 }
0x1094   :  { %v6675_v23 = vadd.f32 %v6672_v37, %v2641_v40 }
0x1096   :  { %v2667_v21 = vsel %vm428_vm3, %v6675_v23, -inf }
0x1097   :  { %2668 = vmax.xlane.f32.xlu0 %v2667_v21 }
0x1099   :  { %v2631_v46 = vpop.f32.mrf.mxu1 }
0x109a   :  { %v2642_v60 = vmul.f32 0.35355338, %v2631_v46 }
0x109c   :  { %v6685_v52 = vadd.f32 %v6682_v0, %v2642_v60 }
0x109e   :  { %v2670_v48 = vsel %vm428_vm3, %v6685_v52, -inf }
0x109f   :  { %2671 = vmax.xlane.f32.xlu1 %v2670_v48 }
0x10a1   :  { %v2633_v42 = vpop.f32.mrf.mxu1 }
0x10a2   :  { %v2643_v17 = vmul.f32 0.35355338, %v2633_v42 }
0x10a4   :  { %v6695_v33 = vadd.f32 %v6692_v20, %v2643_v17 }
0x10a6   :  { %v2673_v41 = vsel %vm428_vm3, %v6695_v33, -inf }
0x10a7   :  { %2674 = vmax.xlane.f32.xlu2 %v2673_v41 }
0x10a9   :  { %v2915_v44 = vpop.f32.mrf.mxu1 }
0x10aa   :  { %v2916_v36 = vadd.f32 %v5187_v63, %v2915_v44 }
0x10b1   :  { %v2917_v22 = vpop.f32.mrf.mxu1 }
0x10b2   :  { %v2918_v2 = vadd.f32 %v5187_v63, %v2917_v22 }
0x10b4   :  { %v3104_v40 = vpack.c.bf16 %v2918_v2, %v2916_v36 }
0x10b9   :  { %v2920_v26 = vpop.f32.mrf.mxu1 }
0x10ba   :  { %v2921_v31 = vadd.f32 %v5187_v63, %v2920_v26 }
0x10c1   :  { %v2922_v54 = vpop.f32.mrf.mxu1 }
0x10c2   :  { %v2923_v32 = vadd.f32 %v5187_v63, %v2922_v54 }
0x10c4   :  { %v3105_v50 = vpack.c.bf16 %v2923_v32, %v2921_v31 }
0x10c9   :  { %v2925_v45 = vpop.f32.mrf.mxu1 }
0x10ca   :  { %v2926_v14 = vadd.f32 %v5187_v63, %v2925_v45 }
0x10d1   :  { %v2927_v13 = vpop.f32.mrf.mxu1 }
0x10d2   :  { %v2928_v25 = vadd.f32 %v5187_v63, %v2927_v13 }
0x10d4   :  { %v3106_v30 = vpack.c.bf16 %v2928_v25, %v2926_v14 }
0x10d9   :  { %v2930_v9 = vpop.f32.mrf.mxu1 }
0x10da   :  { %v2931_v43 = vadd.f32 %v5187_v63, %v2930_v9 }
0x10e1   :  { %v2932_v59 = vpop.f32.mrf.mxu1 }
0x10e2   :  { %v2933_v58 = vadd.f32 %v5187_v63, %v2932_v59  ;;  %v2654_v34 = vpop.xlane.xlu1 %2653 }
0x10e3   :  { %v2676_v8 = vsub.f32 %v2644_v15, %v2654_v34 }
0x10e4   :  { %v3107_v11 = vpack.c.bf16 %v2933_v58, %v2931_v43 }
0x10e5   :  { %v2684_v7 = vmul.f32 1.442695, %v2676_v8 }
0x10e6   :  { %3124 = vmatpush.bf16.msrb.mxu3 %v3107_v11 }
0x10e7   :  { %5363 = vpow2.f32 %v2684_v7 }
0x10ea   :  { %v2657_v53 = vpop.xlane.xlu2 %2656  ;;  %3125 = vmatpush.bf16.msrb.mxu3 %v3106_v30 }
0x10eb   :  { %v2677_v49 = vsub.f32 %v6635_v5, %v2657_v53 }
0x10ed   :  { %v5364_v16 = vpop.eup %5363  ;;  %v2686_v12 = vmul.f32 1.442695, %v2677_v49 }
0x10ee   :  { %3126 = vmatpush.bf16.msrb.mxu3 %v3105_v50  ;;  %v2700_v15 = vsel %vm428_vm3, %v5364_v16, 0.0 }
0x10ef   :  { %5365 = vpow2.f32 %v2686_v12  ;;  %2701 = vadd.xlane.f32.xlu0 %v2700_v15 }
0x10f2   :  { %v2660_v21 = vpop.xlane.xlu0 %2659  ;;  %3127 = vmatpush.bf16.msrb.mxu3 %v3104_v40 }
0x10f3   :  { %v2678_v46 = vsub.f32 %v6645_v19, %v2660_v21 }
0x10f5   :  { %v5366_v60 = vpop.eup %5365  ;;  %v2688_v48 = vmul.f32 1.442695, %v2678_v46 }
0x10f6   :  { %v2703_v42 = vsel %vm428_vm3, %v5366_v60, 0.0 }
0x10f7   :  { %5367 = vpow2.f32 %v2688_v48  ;;  %2704 = vadd.xlane.f32.xlu1 %v2703_v42 }
0x10fa   :  { %v2663_v5 = vpop.xlane.xlu1 %2662 }
0x10fb   :  { %v2679_v17 = vsub.f32 %v6655_v29, %v2663_v5 }
0x10fd   :  { %v5368_v41 = vpop.eup %5367  ;;  %v2690_v44 = vmul.f32 1.442695, %v2679_v17 }
0x10fe   :  { %v2706_v22 = vsel %vm428_vm3, %v5368_v41, 0.0 }
0x10ff   :  { %5369 = vpow2.f32 %v2690_v44  ;;  %2707 = vadd.xlane.f32.xlu2 %v2706_v22 }
0x1102   :  { %v2666_v26 = vpop.xlane.xlu2 %2665 }
0x1103   :  { %v2680_v54 = vsub.f32 %v6665_v51, %v2666_v26 }
0x1105   :  { %v5370_v45 = vpop.eup %5369  ;;  %v2692_v19 = vmul.f32 1.442695, %v2680_v54 }
0x1106   :  { %v2709_v13 = vsel %vm428_vm3, %v5370_v45, 0.0 }
0x1107   :  { %5371 = vpow2.f32 %v2692_v19  ;;  %2710 = vadd.xlane.f32.xlu0 %v2709_v13  ;;  %v2831_v19 = vpop.f32.mrf.mxu3 }
0x110a   :  { %v2669_v9 = vpop.xlane.xlu0 %2668 }
0x110b   :  { %v2681_v63 = vsub.f32 %v6675_v23, %v2669_v9 }
0x110d   :  { %v5372_v59 = vpop.eup %5371  ;;  %v2694_v29 = vmul.f32 1.442695, %v2681_v63 }
0x110e   :  { %v2712_v43 = vsel %vm428_vm3, %v5372_v59, 0.0 }
0x110f   :  { %5373 = vpow2.f32 %v2694_v29  ;;  %2713 = vadd.xlane.f32.xlu1 %v2712_v43  ;;  %v2833_v9 = vpop.f32.mrf.mxu3 }
0x1112   :  { %v2672_v58 = vpop.xlane.xlu1 %2671 }
0x1113   :  { %v2682_v34 = vsub.f32 %v6685_v52, %v2672_v58 }
0x1115   :  { %v5374_v8 = vpop.eup %5373  ;;  %v2696_v51 = vmul.f32 1.442695, %v2682_v34 }
0x1116   :  { %v2715_v25 = vsel %vm428_vm3, %v5374_v8, 0.0 }
0x1117   :  { %5375 = vpow2.f32 %v2696_v51  ;;  %2716 = vadd.xlane.f32.xlu2 %v2715_v25  ;;  %v2836_v58 = vpop.f32.mrf.mxu3 }
0x111a   :  { %v2675_v11 = vpop.xlane.xlu2 %2674 }
0x111b   :  { %v2683_v7 = vsub.f32 %v6695_v33, %v2675_v11 }
0x111d   :  { %v5376_v14 = vpop.eup %5375  ;;  %v2698_v23 = vmul.f32 1.442695, %v2683_v7 }
0x111e   :  { %v2718_v32 = vsel %vm428_vm3, %v5376_v14, 0.0 }
0x111f   :  { %5377 = vpow2.f32 %v2698_v23  ;;  %2719 = vadd.xlane.f32.xlu0 %v2718_v32  ;;  %v2838_v25 = vpop.f32.mrf.mxu3 }
0x1125   :  { %v5378_v30 = vpop.eup %5377 }
0x1126   :  { %v2721_v31 = vsel %vm428_vm3, %v5378_v30, 0.0 }
0x1127   :  { %2722 = vadd.xlane.f32.xlu1 %v2721_v31  ;;  %v2841_v11 = vpop.f32.mrf.mxu3 }
0x112f   :  { %v2843_v31 = vpop.f32.mrf.mxu3 }
0x1162   :  { %v2702_v52 = vpop.xlane.xlu0 %2701 }
0x1163   :  { %5379 = vrcp.f32 %v2702_v52 }
0x1169   :  { %v5380_v49 = vpop.eup %5379 }
0x116a   :  { %v2705_v53 = vpop.xlane.xlu1 %2704  ;;  %v2732_v50 = vmul.f32 %v5380_v49, %v5364_v16  ;;  %v2846_v49 = vpop.f32.mrf.mxu3 }
0x116b   :  { %5381 = vrcp.f32 %v2705_v53 }
0x1171   :  { %v5382_v2 = vpop.eup %5381 }
0x1172   :  { %v2733_v12 = vmul.f32 %v5382_v2, %v5366_v60  ;;  %v2708_v33 = vpop.xlane.xlu2 %2707 }
0x1173   :  { %5383 = vrcp.f32 %v2708_v33 }
0x1174   :  { %v2740_v36 = vpack.c.bf16 %v2733_v12, %v2732_v50  ;;  %v2848_v50 = vpop.f32.mrf.mxu3 }
0x1176   :  { %4916 = vmatmul.msk.bf16.vlgmr.msra.gmra.mxu2 %vm428_vm3, %v2740_v36  ;;  %v2433_v36 = vld [vmem:[%s7386_s1 + $0x1d8] sm:$0xf] }
0x1177   :  { %v3210_v33 = vsel %vm42_vm0, %v2433_v36, 0 }
0x1178   :  { %3219 = vmatpush.bf16.msra.mxu1 %v3210_v33 }
0x1179   :  { %v5384_v40 = vpop.eup %5383 }
0x117a   :  { %v2711_v15 = vpop.xlane.xlu0 %2710  ;;  %v2734_v46 = vmul.f32 %v5384_v40, %v5368_v41 }
0x117b   :  { %5385 = vrcp.f32 %v2711_v15 }
0x1181   :  { %v5386_v21 = vpop.eup %5385 }
0x1182   :  { %v2735_v48 = vmul.f32 %v5386_v21, %v5370_v45  ;;  %v2714_v5 = vpop.xlane.xlu1 %2713 }
0x1183   :  { %5387 = vrcp.f32 %v2714_v5 }
0x1184   :  { %v2741_v42 = vpack.c.bf16 %v2735_v48, %v2734_v46 }
0x1186   :  { %4917 = vmatmul.msk.bf16.gmra.mxu2 %vm428_vm3, %v2741_v42 }
0x1189   :  { %v5388_v16 = vpop.eup %5387 }
0x118a   :  { %v2717_v17 = vpop.xlane.xlu2 %2716  ;;  %v2736_v44 = vmul.f32 %v5388_v16, %v5372_v59  ;;  %v5186_v59 = vld [vmem:[%s7387_s2 + $0x91] ss:$0 sm:$0xff] }
0x118b   :  { %5389 = vrcp.f32 %v2717_v17  ;;  %v2834_v34 = vadd.f32 %v5186_v59, %v2833_v9  ;;  %v2839_v7 = vadd.f32 %v5186_v59, %v2838_v25  ;;  %v2837_v23 = vadd.f32 %v5186_v59, %v2836_v58 }
0x118c   :  { %v2844_v52 = vadd.f32 %v5186_v59, %v2843_v31  ;;  %v2842_v53 = vadd.f32 %v5186_v59, %v2841_v11  ;;  %v2849_v12 = vadd.f32 %v5186_v59, %v2848_v50  ;;  %v2847_v15 = vadd.f32 %v5186_v59, %v2846_v49 }
0x118d   :  { %v2936_v32 = vpack.c.bf16 %v2839_v7, %v2837_v23 }
0x118e   :  { %v2937_v2 = vpack.c.bf16 %v2844_v52, %v2842_v53  ;;  %v2938_v40 = vpack.c.bf16 %v2849_v12, %v2847_v15 }
0x1191   :  { %v5390_v60 = vpop.eup %5389 }
0x1192   :  { %v2737_v22 = vmul.f32 %v5390_v60, %v5374_v8  ;;  %v2720_v54 = vpop.xlane.xlu0 %2719  ;;  %v2832_v8 = vadd.f32 %v5186_v59, %v2831_v19 }
0x1193   :  { %5391 = vrcp.f32 %v2720_v54 }
0x1194   :  { %v2742_v26 = vpack.c.bf16 %v2737_v22, %v2736_v44  ;;  %v2935_v51 = vpack.c.bf16 %v2834_v34, %v2832_v8 }
0x1196   :  { %4918 = vmatmul.msk.bf16.gmra.mxu2 %vm428_vm3, %v2742_v26 }
0x1199   :  { %v5392_v41 = vpop.eup %5391 }
0x119a   :  { %v2723_v13 = vpop.xlane.xlu1 %2722  ;;  %v2738_v63 = vmul.f32 %v5392_v41, %v5376_v14  ;;  %v5143_v14 = vld [vmem:[%s7386_s1 + $0x180] sm:$0xff] }
0x119b   :  { %5393 = vrcp.f32 %v2723_v13  ;;  %3276 = vmatpush.bf16.msra.mxu2 %v5143_v14 }
0x11a1   :  { %v5394_v45 = vpop.eup %5393 }
0x11a2   :  { %v2739_v29 = vmul.f32 %v5394_v45, %v5378_v30  ;;  %v5142_v30 = vld [vmem:[%s7386_s1 + $0x178] sm:$0xff] }
0x11a3   :  { %3277 = vmatpush.bf16.msra.mxu2 %v5142_v30 }
0x11a4   :  { %v2743_v43 = vpack.c.bf16 %v2739_v29, %v2738_v63 }
0x11a6   :  { %4919 = vmatmul.msk.bf16.gmra.mxu2 %vm428_vm3, %v2743_v43 }
0x11b6   :  { %4956 = vmatmul.msk.bf16.vlgmr.msrb.gmra.mxu2 %vm38_vm1, %v2935_v51 }
0x11c6   :  { %4957 = vmatmul.msk.bf16.gmra.mxu2 %vm38_vm1, %v2936_v32 }
0x11d6   :  { %4958 = vmatmul.msk.bf16.gmra.mxu2 %vm38_vm1, %v2937_v2 }
0x11e6   :  { %4959 = vmatmul.msk.bf16.gmra.mxu2 %vm38_vm1, %v2938_v40 }
0x11f6   :  { %4980 = vmatmul.msk.bf16.vlgmr.msra.gmra.mxu2 %vm225_vm2, %v6482_v24 }
0x11f9   :  { %v2769_v21 = vpop.f32.mrf.mxu2 }
0x1201   :  { %v2771_v46 = vpop.f32.mrf.mxu2 }
0x1202   :  { %v2789_v48 = vpack.c.bf16 %v2771_v46, %v2769_v21 }
0x1204   :  { %4968 = vmatmul.msk.bf16.vlgmr.msra.gmra.mxu1 %vm38_vm1, %v2789_v48 }
0x1206   :  { %4981 = vmatmul.msk.bf16.gmra.mxu2 %vm225_vm2, %v6503_v39 }
0x1209   :  { %v2774_v42 = vpop.f32.mrf.mxu2 }
0x1211   :  { %v2776_v5 = vpop.f32.mrf.mxu2 }
0x1212   :  { %v2790_v17 = vpack.c.bf16 %v2776_v5, %v2774_v42 }
0x1214   :  { %4969 = vmatmul.msk.bf16.gmra.mxu1 %vm38_vm1, %v2790_v17 }
0x1216   :  { %4982 = vmatmul.msk.bf16.gmra.mxu2 %vm225_vm2, %v6523_v47 }
0x1219   :  { %v2779_v16 = vpop.f32.mrf.mxu2 }
0x1221   :  { %v2781_v60 = vpop.f32.mrf.mxu2 }
0x1222   :  { %v2791_v44 = vpack.c.bf16 %v2781_v60, %v2779_v16 }
0x1224   :  { %4970 = vmatmul.msk.bf16.gmra.mxu1 %vm38_vm1, %v2791_v44 }
0x1226   :  { %4983 = vmatmul.msk.bf16.gmra.mxu2 %vm225_vm2, %v6557_v55 }
0x1229   :  { %v2784_v22 = vpop.f32.mrf.mxu2 }
0x1231   :  { %v2786_v26 = vpop.f32.mrf.mxu2 }
0x1232   :  { %v2792_v54 = vpack.c.bf16 %v2786_v26, %v2784_v22 }
0x1234   :  { %4971 = vmatmul.msk.bf16.gmra.mxu1 %vm38_vm1, %v2792_v54 }
0x1239   :  { %v2976_v19 = vpop.f32.mrf.mxu2 }
0x123a   :  { %v2996_v13 = vmul.f32 0.35355338, %v2976_v19 }
0x123c   :  { %v3004_v41 = vadd.f32 %v6625_v61, %v2996_v13 }
0x123e   :  { %v3012_v45 = vsel %vm428_vm3, %v3004_v41, -inf }
0x123f   :  { %3013 = vmax.xlane.f32.xlu2 %v3012_v45 }
0x1241   :  { %v2978_v9 = vpop.f32.mrf.mxu2 }
0x1242   :  { %v2997_v63 = vmul.f32 0.35355338, %v2978_v9 }
0x1244   :  { %v3005_v29 = vadd.f32 %v6632_v6, %v2997_v63 }
0x1246   :  { %v3015_v43 = vsel %vm428_vm3, %v3005_v29, -inf }
0x1247   :  { %3016 = vmax.xlane.f32.xlu0 %v3015_v43 }
0x1249   :  { %v2981_v58 = vpop.f32.mrf.mxu2 }
0x124a   :  { %v2998_v59 = vmul.f32 0.35355338, %v2981_v58 }
0x124c   :  { %v3006_v34 = vadd.f32 %v6642_v18, %v2998_v59 }
0x124e   :  { %v3018_v8 = vsel %vm428_vm3, %v3006_v34, -inf }
0x124f   :  { %3019 = vmax.xlane.f32.xlu1 %v3018_v8 }
0x1251   :  { %v2983_v51 = vpop.f32.mrf.mxu2 }
0x1252   :  { %v2999_v25 = vmul.f32 0.35355338, %v2983_v51 }
0x1254   :  { %v3007_v11 = vadd.f32 %v6652_v28, %v2999_v25 }
0x1256   :  { %v3021_v7 = vsel %vm428_vm3, %v3007_v11, -inf }
0x1257   :  { %3022 = vmax.xlane.f32.xlu2 %v3021_v7 }
0x1259   :  { %v2986_v23 = vpop.f32.mrf.mxu2 }
0x125a   :  { %v3000_v32 = vmul.f32 0.35355338, %v2986_v23 }
0x125c   :  { %v3008_v14 = vadd.f32 %v6662_v1, %v3000_v32 }
0x125e   :  { %v3024_v30 = vsel %vm428_vm3, %v3008_v14, -inf }
0x125f   :  { %3025 = vmax.xlane.f32.xlu0 %v3024_v30 }
0x1261   :  { %v2988_v31 = vpop.f32.mrf.mxu2 }
0x1262   :  { %v3001_v52 = vmul.f32 0.35355338, %v2988_v31 }
0x1264   :  { %v3009_v53 = vadd.f32 %v6672_v37, %v3001_v52 }
0x1266   :  { %v3027_v49 = vsel %vm428_vm3, %v3009_v53, -inf }
0x1267   :  { %3028 = vmax.xlane.f32.xlu1 %v3027_v49 }
0x1269   :  { %v2991_v2 = vpop.f32.mrf.mxu2 }
0x126a   :  { %v3002_v50 = vmul.f32 0.35355338, %v2991_v2 }
0x126c   :  { %v3010_v12 = vadd.f32 %v6682_v0, %v3002_v50 }
0x126e   :  { %v3030_v36 = vsel %vm428_vm3, %v3010_v12, -inf }
0x126f   :  { %3031 = vmax.xlane.f32.xlu2 %v3030_v36 }
0x1271   :  { %v2993_v33 = vpop.f32.mrf.mxu2 }
0x1272   :  { %v3003_v15 = vmul.f32 0.35355338, %v2993_v33 }
0x1274   :  { %v3011_v40 = vadd.f32 %v6692_v20, %v3003_v15 }
0x1276   :  { %v3033_v21 = vsel %vm428_vm3, %v3011_v40, -inf }
0x1277   :  { %3034 = vmax.xlane.f32.xlu0 %v3033_v21 }
0x12b2   :  { %v3014_v46 = vpop.xlane.xlu2 %3013 }
0x12b3   :  { %v3036_v48 = vsub.f32 %v3004_v41, %v3014_v46 }
0x12b5   :  { %v3044_v42 = vmul.f32 1.442695, %v3036_v48 }
0x12b7   :  { %5395 = vpow2.f32 %v3044_v42 }
0x12ba   :  { %v3017_v5 = vpop.xlane.xlu0 %3016 }
0x12bb   :  { %v3037_v17 = vsub.f32 %v3005_v29, %v3017_v5 }
0x12bd   :  { %v5396_v16 = vpop.eup %5395  ;;  %v3046_v60 = vmul.f32 1.442695, %v3037_v17 }
0x12be   :  { %v3060_v44 = vsel %vm428_vm3, %v5396_v16, 0.0 }
0x12bf   :  { %5397 = vpow2.f32 %v3046_v60  ;;  %3061 = vadd.xlane.f32.xlu1 %v3060_v44  ;;  %v5145_v44 = vld [vmem:[%s7386_s1 + $0x190] sm:$0xff] }
0x12c0   :  { %3318 = vmatpush.bf16.msra.mxu3 %v5145_v44  ;;  %v5148_v44 = vld [vmem:[%s7386_s1 + $0x1a8] sm:$0xff] }
0x12c2   :  { %v3020_v22 = vpop.xlane.xlu1 %3019 }
0x12c3   :  { %v3038_v26 = vsub.f32 %v3006_v34, %v3020_v22 }
0x12c5   :  { %v5398_v54 = vpop.eup %5397  ;;  %v3048_v19 = vmul.f32 1.442695, %v3038_v26 }
0x12c6   :  { %v3063_v13 = vsel %vm428_vm3, %v5398_v54, 0.0 }
0x12c7   :  { %5399 = vpow2.f32 %v3048_v19  ;;  %3064 = vadd.xlane.f32.xlu2 %v3063_v13 }
0x12ca   :  { %v3023_v45 = vpop.xlane.xlu2 %3022 }
0x12cb   :  { %v3039_v41 = vsub.f32 %v3007_v11, %v3023_v45 }
0x12cd   :  { %v5400_v9 = vpop.eup %5399  ;;  %v3050_v63 = vmul.f32 1.442695, %v3039_v41 }
0x12ce   :  { %v3066_v29 = vsel %vm428_vm3, %v5400_v9, 0.0 }
0x12cf   :  { %5401 = vpow2.f32 %v3050_v63  ;;  %3067 = vadd.xlane.f32.xlu0 %v3066_v29 }
0x12d2   :  { %v3026_v43 = vpop.xlane.xlu0 %3025 }
0x12d3   :  { %v3040_v58 = vsub.f32 %v3008_v14, %v3026_v43 }
0x12d5   :  { %v5402_v59 = vpop.eup %5401  ;;  %v3052_v8 = vmul.f32 1.442695, %v3040_v58 }
0x12d6   :  { %v3069_v34 = vsel %vm428_vm3, %v5402_v59, 0.0 }
0x12d7   :  { %5403 = vpow2.f32 %v3052_v8  ;;  %3070 = vadd.xlane.f32.xlu1 %v3069_v34 }
0x12da   :  { %v3029_v51 = vpop.xlane.xlu1 %3028 }
0x12db   :  { %v3041_v25 = vsub.f32 %v3009_v53, %v3029_v51 }
0x12dd   :  { %v5404_v7 = vpop.eup %5403  ;;  %v3054_v23 = vmul.f32 1.442695, %v3041_v25 }
0x12de   :  { %v3072_v11 = vsel %vm428_vm3, %v5404_v7, 0.0 }
0x12df   :  { %5405 = vpow2.f32 %v3054_v23  ;;  %3073 = vadd.xlane.f32.xlu2 %v3072_v11 }
0x12e2   :  { %v3032_v32 = vpop.xlane.xlu2 %3031 }
0x12e3   :  { %v3042_v30 = vsub.f32 %v3010_v12, %v3032_v32 }
0x12e5   :  { %v5406_v31 = vpop.eup %5405  ;;  %v3056_v52 = vmul.f32 1.442695, %v3042_v30 }
0x12e6   :  { %v3075_v14 = vsel %vm428_vm3, %v5406_v31, 0.0 }
0x12e7   :  { %5407 = vpow2.f32 %v3056_v52  ;;  %3076 = vadd.xlane.f32.xlu0 %v3075_v14 }
0x12ea   :  { %v3035_v49 = vpop.xlane.xlu0 %3034 }
0x12eb   :  { %v3043_v2 = vsub.f32 %v3011_v40, %v3035_v49 }
0x12ed   :  { %v5408_v50 = vpop.eup %5407  ;;  %v3058_v36 = vmul.f32 1.442695, %v3043_v2 }
0x12ee   :  { %v3078_v53 = vsel %vm428_vm3, %v5408_v50, 0.0 }
0x12ef   :  { %5409 = vpow2.f32 %v3058_v36  ;;  %3079 = vadd.xlane.f32.xlu1 %v3078_v53  ;;  %v5147_v36 = vld [vmem:[%s7386_s1 + $0x1a0] sm:$0xff]  ;;  %v5146_v53 = vld [vmem:[%s7386_s1 + $0x198] sm:$0xff] }
0x12f5   :  { %v5410_v33 = vpop.eup %5409 }
0x12f6   :  { %v3081_v15 = vsel %vm428_vm3, %v5410_v33, 0.0 }
0x12f7   :  { %3082 = vadd.xlane.f32.xlu2 %v3081_v15 }
0x1332   :  { %v3062_v21 = vpop.xlane.xlu1 %3061 }
0x1333   :  { %5411 = vrcp.f32 %v3062_v21 }
0x1339   :  { %v5412_v46 = vpop.eup %5411 }
0x133a   :  { %v3065_v12 = vpop.xlane.xlu2 %3064  ;;  %v3092_v42 = vmul.f32 %v5412_v46, %v5396_v16  ;;  %v5144_v16 = vld [vmem:[%s7386_s1 + $0x188] sm:$0xff] }
0x133b   :  { %5413 = vrcp.f32 %v3065_v12  ;;  %3319 = vmatpush.bf16.msra.mxu3 %v5144_v16 }
0x1341   :  { %v5414_v48 = vpop.eup %5413 }
0x1342   :  { %v3093_v5 = vmul.f32 %v5414_v48, %v5398_v54  ;;  %v3068_v40 = vpop.xlane.xlu0 %3067 }
0x1343   :  { %5415 = vrcp.f32 %v3068_v40  ;;  %v5149_v40 = vld [vmem:[%s7386_s1 + $0x1b0] sm:$0xff] }
0x1344   :  { %v3100_v17 = vpack.c.bf16 %v3093_v5, %v3092_v42 }
0x1346   :  { %4960 = vmatmul.msk.bf16.vlgmr.msrb.gmra.mxu3 %vm428_vm3, %v3100_v17 }
0x1349   :  { %v5416_v22 = vpop.eup %5415 }
0x134a   :  { %v3071_v60 = vpop.xlane.xlu1 %3070  ;;  %v3094_v19 = vmul.f32 %v5416_v22, %v5400_v9 }
0x134b   :  { %5417 = vrcp.f32 %v3071_v60 }
0x1351   :  { %v5418_v26 = vpop.eup %5417 }
0x1352   :  { %v3095_v13 = vmul.f32 %v5418_v26, %v5402_v59  ;;  %v3074_v41 = vpop.xlane.xlu2 %3073 }
0x1353   :  { %5419 = vrcp.f32 %v3074_v41 }
0x1354   :  { %v3101_v45 = vpack.c.bf16 %v3095_v13, %v3094_v19  ;;  %v5189_v19 = vld [vmem:[%s7387_s2 + $0x96] ss:$0 sm:$0xff] }
0x1356   :  { %4961 = vmatmul.msk.bf16.gmra.mxu3 %vm428_vm3, %v3101_v45 }
0x1359   :  { %v5420_v63 = vpop.eup %5419 }
0x135a   :  { %v3077_v54 = vpop.xlane.xlu0 %3076  ;;  %v3096_v43 = vmul.f32 %v5420_v63, %v5404_v7  ;;  %v2805_v7 = vld [vmem:[%s7386_s1 + $0x1e0] sm:$0xf] }
0x135b   :  { %5421 = vrcp.f32 %v3077_v54  ;;  %v3166_v32 = vsel %vm42_vm0, %v2805_v7, 0 }
0x135c   :  { %3175 = vmatpush.bf16.msra.mxu0 %v3166_v32 }
0x1360   :  { %3360 = vmatpush.bf16.msrb.mxu0 %v5147_v36 }
0x1361   :  { %v5422_v29 = vpop.eup %5421 }
0x1362   :  { %v3097_v58 = vmul.f32 %v5422_v29, %v5406_v31  ;;  %v3080_v34 = vpop.xlane.xlu1 %3079  ;;  %v3279_v29 = vpop.f32.mrf.mxu2 }
0x1363   :  { %5423 = vrcp.f32 %v3080_v34 }
0x1364   :  { %v3102_v8 = vpack.c.bf16 %v3097_v58, %v3096_v43  ;;  %3361 = vmatpush.bf16.msrb.mxu0 %v5146_v53 }
0x1366   :  { %4962 = vmatmul.msk.bf16.gmra.mxu3 %vm428_vm3, %v3102_v8 }
0x1369   :  { %v5424_v59 = vpop.eup %5423 }
0x136a   :  { %v3083_v9 = vpop.xlane.xlu2 %3082  ;;  %v3098_v25 = vmul.f32 %v5424_v59, %v5408_v50  ;;  %v3281_v59 = vpop.f32.mrf.mxu2 }
0x136b   :  { %5425 = vrcp.f32 %v3083_v9 }
0x1371   :  { %v5426_v51 = vpop.eup %5425 }
0x1372   :  { %v3099_v23 = vmul.f32 %v5426_v51, %v5410_v33 }
0x1374   :  { %v3103_v11 = vpack.c.bf16 %v3099_v23, %v3098_v25 }
0x1376   :  { %4963 = vmatmul.msk.bf16.gmra.mxu3 %vm428_vm3, %v3103_v11 }
0x1386   :  { %4992 = vmatmul.msk.bf16.vlgmr.msra.gmra.mxu3 %vm225_vm2, %v6482_v24 }
0x1396   :  { %4993 = vmatmul.msk.bf16.gmra.mxu3 %vm225_vm2, %v6503_v39 }
0x13a6   :  { %4994 = vmatmul.msk.bf16.gmra.mxu3 %vm225_vm2, %v6523_v47 }
0x13b6   :  { %4995 = vmatmul.msk.bf16.gmra.mxu3 %vm225_vm2, %v6557_v55 }
0x13c9   :  { %v3129_v30 = vpop.f32.mrf.mxu3 }
0x13d1   :  { %v3131_v31 = vpop.f32.mrf.mxu3 }
0x13d2   :  { %v3149_v52 = vpack.c.bf16 %v3131_v31, %v3129_v30  ;;  %v3284_v31 = vpop.f32.mrf.mxu2 }
0x13d4   :  { %4964 = vmatmul.msk.bf16.vlgmr.msra.gmra.mxu0 %vm38_vm1, %v3149_v52  ;;  %v5188_v52 = vld [vmem:[%s7387_s2 + $0x92] ss:$0 sm:$0xff] }
0x13d5   :  { %3688 = vmatpush.bf16.msra.mxu0 %v5149_v40 }
0x13d9   :  { %v3134_v14 = vpop.f32.mrf.mxu3  ;;  %3689 = vmatpush.bf16.msra.mxu0 %v5148_v44 }
0x13da   :  { %v3286_v53 = vpop.f32.mrf.mxu2 }
0x13e1   :  { %v3136_v49 = vpop.f32.mrf.mxu3 }
0x13e2   :  { %v3150_v2 = vpack.c.bf16 %v3136_v49, %v3134_v14  ;;  %v3282_v49 = vadd.f32 %v5188_v52, %v3281_v59 }
0x13e4   :  { %4965 = vmatmul.msk.bf16.gmra.mxu0 %vm38_vm1, %v3150_v2 }
0x13e9   :  { %v3139_v50 = vpop.f32.mrf.mxu3 }
0x13f1   :  { %v3141_v33 = vpop.f32.mrf.mxu3 }
0x13f2   :  { %v3151_v15 = vpack.c.bf16 %v3141_v33, %v3139_v50  ;;  %v3280_v50 = vadd.f32 %v5188_v52, %v3279_v29  ;;  %v6863_v29 = vpop.f32.mrf.mxu1 }
0x13f4   :  { %4966 = vmatmul.msk.bf16.gmra.mxu0 %vm38_vm1, %v3151_v15  ;;  %v3383_v36 = vpack.c.bf16 %v3282_v49, %v3280_v50  ;;  %v3289_v15 = vpop.f32.mrf.mxu2 }
0x13f5   :  { %v3290_v44 = vadd.f32 %v5188_v52, %v3289_v15 }
0x13f9   :  { %v3144_v21 = vpop.f32.mrf.mxu3 }
0x1401   :  { %v3146_v12 = vpop.f32.mrf.mxu3 }
0x1402   :  { %v3152_v46 = vpack.c.bf16 %v3146_v12, %v3144_v21  ;;  %v3287_v21 = vadd.f32 %v5188_v52, %v3286_v53 }
0x1404   :  { %4967 = vmatmul.msk.bf16.gmra.mxu0 %vm38_vm1, %v3152_v46  ;;  %v3285_v46 = vadd.f32 %v5188_v52, %v3284_v31  ;;  %v5190_v31 = vld [vmem:[%s7387_s2 + $0x9a] ss:$0 sm:$0xff] }
0x1409   :  { %v3321_v48 = vpop.f32.mrf.mxu3 }
0x140a   :  { %v3322_v7 = vadd.f32 %v5189_v19, %v3321_v48  ;;  %v3384_v48 = vpack.c.bf16 %v3287_v21, %v3285_v46 }
0x1411   :  { %v3323_v42 = vpop.f32.mrf.mxu3 }
0x1412   :  { %v3324_v23 = vadd.f32 %v5189_v19, %v3323_v42  ;;  %v3291_v42 = vpop.f32.mrf.mxu2 }
0x1413   :  { %v3292_v40 = vadd.f32 %v5188_v52, %v3291_v42 }
0x1414   :  { %5004 = vmatmul.msk.bf16.vlgmr.msrb.gmra.mxu0 %vm225_vm2, %v6482_v24  ;;  %v3387_v30 = vpack.c.bf16 %v3324_v23, %v3322_v7 }
0x1416   :  { %v3404_v14 = vsel %vm38_vm1, %v3387_v30, 0 }
0x1419   :  { %v3326_v5 = vpop.f32.mrf.mxu3 }
0x141a   :  { %v3327_v9 = vadd.f32 %v5189_v19, %v3326_v5 }
0x1421   :  { %v3328_v17 = vpop.f32.mrf.mxu3 }
0x1422   :  { %v3329_v8 = vadd.f32 %v5189_v19, %v3328_v17  ;;  %v5151_v17 = vld [vmem:[%s7386_s1 + $0x1c0] sm:$0xff] }
0x1424   :  { %5005 = vmatmul.msk.bf16.gmra.mxu0 %vm225_vm2, %v6503_v39  ;;  %v3388_v25 = vpack.c.bf16 %v3329_v8, %v3327_v9 }
0x1426   :  { %v3407_v11 = vsel %vm38_vm1, %v3388_v25, 0 }
0x1429   :  { %v3331_v60 = vpop.f32.mrf.mxu3 }
0x142a   :  { %v3332_v43 = vadd.f32 %v5189_v19, %v3331_v60 }
0x1431   :  { %v3333_v22 = vpop.f32.mrf.mxu3 }
0x1432   :  { %v3334_v54 = vadd.f32 %v5189_v19, %v3333_v22  ;;  %v5150_v22 = vld [vmem:[%s7386_s1 + $0x1b8] sm:$0xff] }
0x1434   :  { %5006 = vmatmul.msk.bf16.gmra.mxu0 %vm225_vm2, %v6523_v47  ;;  %v3389_v58 = vpack.c.bf16 %v3334_v54, %v3332_v43 }
0x1436   :  { %v3410_v34 = vsel %vm38_vm1, %v3389_v58, 0  ;;  %v6866_v58 = vpop.f32.mrf.mxu1 }
0x1439   :  { %v3336_v26 = vpop.f32.mrf.mxu3 }
0x143a   :  { %v3337_v45 = vadd.f32 %v5189_v19, %v3336_v26  ;;  %v3294_v26 = vpop.f32.mrf.mxu2 }
0x143b   :  { %v3295_v54 = vadd.f32 %v5188_v52, %v3294_v26 }
0x1441   :  { %v3338_v13 = vpop.f32.mrf.mxu3 }
0x1442   :  { %v3339_v41 = vadd.f32 %v5189_v19, %v3338_v13  ;;  %v3385_v19 = vpack.c.bf16 %v3292_v40, %v3290_v44 }
0x1444   :  { %v3390_v16 = vpack.c.bf16 %v3339_v41, %v3337_v45  ;;  %5007 = vmatmul.msk.bf16.gmra.mxu0 %vm225_vm2, %v6557_v55  ;;  %v3296_v45 = vpop.f32.mrf.mxu2 }
0x1445   :  { %v3297_v41 = vadd.f32 %v5188_v52, %v3296_v45 }
0x1446   :  { %v3413_v63 = vsel %vm38_vm1, %v3390_v16, 0 }
0x1447   :  { %3419 = vmatpush.bf16.xpose.msrb.mxu1 %v3413_v63  ;;  %v3386_v63 = vpack.c.bf16 %v3297_v41, %v3295_v54 }
0x144f   :  { %3420 = vmatpush.bf16.xpose.msrb.mxu1 %v3410_v34  ;;  %v6870_v34 = vpop.f32.mrf.mxu1 }
0x1451   :  { %v6825_v51 = vpop.f32.mrf.mxu0 }
0x1454   :  { %5028 = vmatmul.msk.bf16.vlgmr.msra.gmra.mxu0 %vm225_vm2, %v6482_v24 }
0x1457   :  { %3421 = vmatpush.bf16.xpose.msrb.mxu1 %v3407_v11  ;;  %v6872_v25 = vpop.f32.mrf.mxu1 }
0x1459   :  { %v6830_v32 = vpop.f32.mrf.mxu0 }
0x145f   :  { %3422 = vmatpush.bf16.xpose.msrb.mxu1 %v3404_v14  ;;  %v6876_v11 = vpop.f32.mrf.mxu1 }
0x1461   :  { %v6836_v2 = vpop.f32.mrf.mxu0 }
0x1464   :  { %5029 = vmatmul.msk.bf16.gmra.mxu0 %vm225_vm2, %v6503_v39 }
0x1466   :  { %5008 = vmatmul.msk.bf16.vlgmr.msrb.gmra.mxu1 %vm38_vm1, %v3383_v36 }
0x1467   :  { %3730 = vmatpush.bf16.msra.mxu1 %v5151_v17  ;;  %v6880_v30 = vpop.f32.mrf.mxu1 }
0x1469   :  { %v6841_v33 = vpop.f32.mrf.mxu0 }
0x146b   :  { %3731 = vmatpush.bf16.msra.mxu1 %v5150_v22 }
0x146f   :  { %v6885_v46 = vpop.f32.mrf.mxu1 }
0x1471   :  { %v6843_v12 = vpop.f32.mrf.mxu0 }
0x1474   :  { %5030 = vmatmul.msk.bf16.gmra.mxu0 %vm225_vm2, %v6523_v47 }
0x1476   :  { %5009 = vmatmul.msk.bf16.gmra.mxu1 %vm38_vm1, %v3384_v48 }
0x1477   :  { %v6889_v22 = vpop.f32.mrf.mxu1 }
0x1479   :  { %v6848_v5 = vpop.f32.mrf.mxu0 }
0x1481   :  { %v6853_v60 = vpop.f32.mrf.mxu0 }
0x1484   :  { %5031 = vmatmul.msk.bf16.gmra.mxu0 %vm225_vm2, %v6557_v55 }
0x1486   :  { %5010 = vmatmul.msk.bf16.gmra.mxu1 %vm38_vm1, %v3385_v19 }
0x1489   :  { %v6861_v13 = vpop.f32.mrf.mxu0 }
0x1491   :  { %v3363_v16 = vpop.f32.mrf.mxu0 }
0x1492   :  { %v3364_v40 = vadd.f32 %v5190_v31, %v3363_v16 }
0x1496   :  { %5011 = vmatmul.msk.bf16.gmra.mxu1 %vm38_vm1, %v3386_v63 }
0x1499   :  { %v3365_v43 = vpop.f32.mrf.mxu0 }
0x149a   :  { %v3366_v42 = vadd.f32 %v5190_v31, %v3365_v43 }
0x149c   :  { %v3552_v44 = vpack.c.bf16 %v3366_v42, %v3364_v40 }
0x14a1   :  { %v3368_v8 = vpop.f32.mrf.mxu0 }
0x14a2   :  { %v3369_v48 = vadd.f32 %v5190_v31, %v3368_v8 }
0x14a6   :  { %5040 = vmatmul.msk.bf16.vlgmr.msra.gmra.mxu1 %vm225_vm2, %v6482_v24 }
0x14a9   :  { %v3370_v9 = vpop.f32.mrf.mxu0 }
0x14aa   :  { %v3371_v15 = vadd.f32 %v5190_v31, %v3370_v9 }
0x14ac   :  { %v3553_v17 = vpack.c.bf16 %v3371_v15, %v3369_v48 }
0x14b1   :  { %v3373_v59 = vpop.f32.mrf.mxu0 }
0x14b2   :  { %v3374_v53 = vadd.f32 %v5190_v31, %v3373_v59 }
0x14b6   :  { %5041 = vmatmul.msk.bf16.gmra.mxu1 %vm225_vm2, %v6503_v39 }
0x14b9   :  { %v3375_v23 = vpop.f32.mrf.mxu0 }
0x14ba   :  { %v3376_v50 = vadd.f32 %v5190_v31, %v3375_v23 }
0x14bc   :  { %v3554_v21 = vpack.c.bf16 %v3376_v50, %v3374_v53 }
0x14c1   :  { %v3378_v7 = vpop.f32.mrf.mxu0 }
0x14c2   :  { %v3379_v14 = vadd.f32 %v5190_v31, %v3378_v7 }
0x14c6   :  { %5042 = vmatmul.msk.bf16.gmra.mxu1 %vm225_vm2, %v6523_v47 }
0x14c9   :  { %v3380_v52 = vpop.f32.mrf.mxu0 }
0x14ca   :  { %v3381_v49 = vadd.f32 %v5190_v31, %v3380_v52 }
0x14cc   :  { %v3555_v36 = vpack.c.bf16 %v3381_v49, %v3379_v14 }
0x14ce   :  { %3572 = vmatpush.bf16.msrb.mxu2 %v3555_v36 }
0x14d2   :  { %3573 = vmatpush.bf16.msrb.mxu2 %v3554_v21 }
0x14d6   :  { %3574 = vmatpush.bf16.msrb.mxu2 %v3553_v17  ;;  %5043 = vmatmul.msk.bf16.gmra.mxu1 %vm225_vm2, %v6557_v55 }
0x14da   :  { %3575 = vmatpush.bf16.msrb.mxu2 %v3552_v44 }
0x14e3   :  { %v3424_v26 = vpop.f32.mrf.mxu1 }
0x14e4   :  { %v3444_v19 = vmul.f32 0.35355338, %v3424_v26  ;;  %v5192_v26 = vld [vmem:[%s7387_s2 + $0x97] ss:$0 sm:$0xff] }
0x14e6   :  { %v3452_v45 = vadd.f32 %v6625_v61, %v3444_v19 }
0x14e8   :  { %v3460_v41 = vsel %vm428_vm3, %v3452_v45, -inf }
0x14e9   :  { %3461 = vmax.xlane.f32.xlu0 %v3460_v41 }
0x14eb   :  { %v3426_v54 = vpop.f32.mrf.mxu1 }
0x14ec   :  { %v3445_v63 = vmul.f32 0.35355338, %v3426_v54 }
0x14ee   :  { %v6894_v43 = vadd.f32 %v6632_v6, %v3445_v63 }
0x14f0   :  { %v3463_v16 = vsel %vm428_vm3, %v6894_v43, -inf }
0x14f1   :  { %3464 = vmax.xlane.f32.xlu1 %v3463_v16 }
0x14f3   :  { %v3429_v8 = vpop.f32.mrf.mxu1 }
0x14f4   :  { %v3446_v9 = vmul.f32 0.35355338, %v3429_v8 }
0x14f6   :  { %v6899_v59 = vadd.f32 %v6642_v18, %v3446_v9 }
0x14f8   :  { %v3466_v61 = vsel %vm428_vm3, %v6899_v59, -inf }
0x14f9   :  { %3467 = vmax.xlane.f32.xlu2 %v3466_v61 }
0x14fb   :  { %v3431_v23 = vpop.f32.mrf.mxu1 }
0x14fc   :  { %v3447_v7 = vmul.f32 0.35355338, %v3431_v23 }
0x14fe   :  { %v6904_v31 = vadd.f32 %v6652_v28, %v3447_v7 }
0x1500   :  { %v3469_v6 = vsel %vm428_vm3, %v6904_v31, -inf }
0x1501   :  { %3470 = vmax.xlane.f32.xlu0 %v3469_v6 }
0x1503   :  { %v3434_v52 = vpop.f32.mrf.mxu1 }
0x1504   :  { %v3448_v14 = vmul.f32 0.35355338, %v3434_v52 }
0x1506   :  { %v6909_v49 = vadd.f32 %v6662_v1, %v3448_v14 }
0x1508   :  { %v3472_v18 = vsel %vm428_vm3, %v6909_v49, -inf }
0x1509   :  { %3473 = vmax.xlane.f32.xlu1 %v3472_v18 }
0x150b   :  { %v3436_v50 = vpop.f32.mrf.mxu1 }
0x150c   :  { %v3449_v36 = vmul.f32 0.35355338, %v3436_v50 }
0x150e   :  { %v6914_v53 = vadd.f32 %v6672_v37, %v3449_v36 }
0x1510   :  { %v3475_v28 = vsel %vm428_vm3, %v6914_v53, -inf }
0x1511   :  { %3476 = vmax.xlane.f32.xlu2 %v3475_v28 }
0x1513   :  { %v3439_v15 = vpop.f32.mrf.mxu1 }
0x1514   :  { %v3450_v21 = vmul.f32 0.35355338, %v3439_v15 }
0x1516   :  { %v6919_v48 = vadd.f32 %v6682_v0, %v3450_v21 }
0x1518   :  { %v3478_v1 = vsel %vm428_vm3, %v6919_v48, -inf }
0x1519   :  { %3479 = vmax.xlane.f32.xlu0 %v3478_v1 }
0x151b   :  { %v3441_v42 = vpop.f32.mrf.mxu1 }
0x151c   :  { %v3451_v17 = vmul.f32 0.35355338, %v3441_v42 }
0x151e   :  { %v6924_v40 = vadd.f32 %v6692_v20, %v3451_v17  ;;  %v3253_v20 = vld [vmem:[%s7386_s1 + $0x1e8] sm:$0xf] }
0x151f   :  { %v3614_v8 = vsel %vm42_vm0, %v3253_v20, 0 }
0x1520   :  { %v3481_v37 = vsel %vm428_vm3, %v6924_v40, -inf  ;;  %3623 = vmatpush.bf16.msrb.mxu3 %v3614_v8 }
0x1521   :  { %3482 = vmax.xlane.f32.xlu1 %v3481_v37 }
0x1523   :  { %v3733_v44 = vpop.f32.mrf.mxu1 }
0x1524   :  { %v3734_v19 = vadd.f32 %v5192_v26, %v3733_v44 }
0x152b   :  { %v3735_v0 = vpop.f32.mrf.mxu1 }
0x152c   :  { %v3736_v41 = vadd.f32 %v5192_v26, %v3735_v0 }
0x152e   :  { %v3799_v54 = vpack.c.bf16 %v3736_v41, %v3734_v19 }
0x1533   :  { %v3738_v63 = vpop.f32.mrf.mxu1 }
0x1534   :  { %v3739_v41 = vadd.f32 %v5192_v26, %v3738_v63 }
0x153b   :  { %v3740_v16 = vpop.f32.mrf.mxu1 }
0x153c   :  { %v3741_v0 = vadd.f32 %v5192_v26, %v3740_v16 }
0x153e   :  { %v3800_v20 = vpack.c.bf16 %v3741_v0, %v3739_v41 }
0x1543   :  { %v3743_v9 = vpop.f32.mrf.mxu1 }
0x1544   :  { %v3744_v21 = vadd.f32 %v5192_v26, %v3743_v9 }
0x154b   :  { %v3745_v61 = vpop.f32.mrf.mxu1 }
0x154c   :  { %v3746_v28 = vadd.f32 %v5192_v26, %v3745_v61 }
0x154e   :  { %v3801_v1 = vpack.c.bf16 %v3746_v28, %v3744_v21 }
0x1553   :  { %v3748_v23 = vpop.f32.mrf.mxu1 }
0x1554   :  { %v3749_v6 = vadd.f32 %v5192_v26, %v3748_v23 }
0x155b   :  { %v3750_v7 = vpop.f32.mrf.mxu1 }
0x155c   :  { %v3751_v52 = vadd.f32 %v5192_v26, %v3750_v7  ;;  %v3462_v14 = vpop.xlane.xlu0 %3461  ;;  %v3819_v7 = vsel %vm38_vm1, %v3800_v20, 0  ;;  %v3816_v26 = vsel %vm38_vm1, %v3799_v54, 0 }
0x155d   :  { %v3484_v18 = vsub.f32 %v3452_v45, %v3462_v14  ;;  %v3822_v45 = vsel %vm38_vm1, %v3801_v1, 0 }
0x155e   :  { %v3802_v50 = vpack.c.bf16 %v3751_v52, %v3749_v6 }
0x155f   :  { %v3492_v36 = vmul.f32 1.442695, %v3484_v18 }
0x1560   :  { %v3825_v15 = vsel %vm38_vm1, %v3802_v50, 0 }
0x1561   :  { %5427 = vpow2.f32 %v3492_v36  ;;  %3831 = vmatpush.bf16.xpose.msra.mxu3 %v3825_v15 }
0x1564   :  { %v3465_v42 = vpop.xlane.xlu1 %3464 }
0x1565   :  { %v3485_v17 = vsub.f32 %v6894_v43, %v3465_v42 }
0x1567   :  { %v6937_v37 = vpop.eup %5427  ;;  %v3494_v44 = vmul.f32 1.442695, %v3485_v17 }
0x1568   :  { %v3508_v19 = vsel %vm428_vm3, %v6937_v37, 0.0 }
0x1569   :  { %5429 = vpow2.f32 %v3494_v44  ;;  %3509 = vadd.xlane.f32.xlu2 %v3508_v19  ;;  %3832 = vmatpush.bf16.xpose.msra.mxu3 %v3822_v45 }
0x156c   :  { %v3468_v8 = vpop.xlane.xlu2 %3467 }
0x156d   :  { %v3486_v9 = vsub.f32 %v6899_v59, %v3468_v8 }
0x156f   :  { %v5430_v61 = vpop.eup %5429  ;;  %v3496_v23 = vmul.f32 1.442695, %v3486_v9 }
0x1570   :  { %v3511_v43 = vsel %vm428_vm3, %v5430_v61, 0.0 }
0x1571   :  { %5431 = vpow2.f32 %v3496_v23  ;;  %3512 = vadd.xlane.f32.xlu0 %v3511_v43  ;;  %3833 = vmatpush.bf16.xpose.msra.mxu3 %v3819_v7 }
0x1574   :  { %v3471_v16 = vpop.xlane.xlu0 %3470 }
0x1575   :  { %v3487_v6 = vsub.f32 %v6904_v31, %v3471_v16 }
0x1577   :  { %v5432_v52 = vpop.eup %5431  ;;  %v3498_v14 = vmul.f32 1.442695, %v3487_v6 }
0x1578   :  { %v3514_v63 = vsel %vm428_vm3, %v5432_v52, 0.0 }
0x1579   :  { %5433 = vpow2.f32 %v3498_v14  ;;  %3834 = vmatpush.bf16.xpose.msra.mxu3 %v3816_v26  ;;  %3515 = vadd.xlane.f32.xlu1 %v3514_v63 }
0x157c   :  { %v3474_v59 = vpop.xlane.xlu1 %3473 }
0x157d   :  { %v3488_v18 = vsub.f32 %v6909_v49, %v3474_v59 }
0x157f   :  { %v5434_v50 = vpop.eup %5433  ;;  %v3500_v36 = vmul.f32 1.442695, %v3488_v18 }
0x1580   :  { %v3517_v28 = vsel %vm428_vm3, %v5434_v50, 0.0 }
0x1581   :  { %5435 = vpow2.f32 %v3500_v36  ;;  %3518 = vadd.xlane.f32.xlu2 %v3517_v28 }
0x1584   :  { %v3477_v15 = vpop.xlane.xlu2 %3476 }
0x1585   :  { %v3489_v31 = vsub.f32 %v6914_v53, %v3477_v15 }
0x1587   :  { %v5436_v21 = vpop.eup %5435  ;;  %v3502_v1 = vmul.f32 1.442695, %v3489_v31 }
0x1588   :  { %v3520_v54 = vsel %vm428_vm3, %v5436_v21, 0.0 }
0x1589   :  { %5437 = vpow2.f32 %v3502_v1  ;;  %3521 = vadd.xlane.f32.xlu0 %v3520_v54 }
0x158c   :  { %v3480_v42 = vpop.xlane.xlu0 %3479 }
0x158d   :  { %v3490_v17 = vsub.f32 %v6919_v48, %v3480_v42 }
0x158f   :  { %v5438_v44 = vpop.eup %5437  ;;  %v3504_v49 = vmul.f32 1.442695, %v3490_v17 }
0x1590   :  { %v3523_v0 = vsel %vm428_vm3, %v5438_v44, 0.0 }
0x1591   :  { %5439 = vpow2.f32 %v3504_v49  ;;  %3524 = vadd.xlane.f32.xlu1 %v3523_v0 }
0x1594   :  { %v3483_v19 = vpop.xlane.xlu1 %3482 }
0x1595   :  { %v3491_v45 = vsub.f32 %v6924_v40, %v3483_v19 }
0x1597   :  { %v5440_v41 = vpop.eup %5439  ;;  %v3506_v53 = vmul.f32 1.442695, %v3491_v45 }
0x1598   :  { %v3526_v20 = vsel %vm428_vm3, %v5440_v41, 0.0 }
0x1599   :  { %5441 = vpow2.f32 %v3506_v53  ;;  %3527 = vadd.xlane.f32.xlu2 %v3526_v20 }
0x159f   :  { %v5442_v8 = vpop.eup %5441 }
0x15a0   :  { %v3529_v9 = vsel %vm428_vm3, %v5442_v8, 0.0 }
0x15a1   :  { %3530 = vadd.xlane.f32.xlu0 %v3529_v9 }
0x15dc   :  { %v3510_v48 = vpop.xlane.xlu2 %3509 }
0x15dd   :  { %5443 = vrcp.f32 %v3510_v48 }
0x15e3   :  { %v5444_v43 = vpop.eup %5443 }
0x15e4   :  { %v3513_v23 = vpop.xlane.xlu0 %3512  ;;  %v3540_v16 = vmul.f32 %v5444_v43, %v6937_v37  ;;  %v5153_v37 = vld [vmem:[%s7386_s1 + $0x1d0] sm:$0xff] }
0x15e5   :  { %5445 = vrcp.f32 %v3513_v23  ;;  %3772 = vmatpush.bf16.msra.mxu2 %v5153_v37 }
0x15eb   :  { %v5446_v7 = vpop.eup %5445 }
0x15ec   :  { %v3541_v6 = vmul.f32 %v5446_v7, %v5430_v61  ;;  %v3516_v14 = vpop.xlane.xlu1 %3515  ;;  %v5152_v61 = vld [vmem:[%s7386_s1 + $0x1c8] sm:$0xff] }
0x15ed   :  { %5447 = vrcp.f32 %v3516_v14  ;;  %3773 = vmatpush.bf16.msra.mxu2 %v5152_v61  ;;  %v5191_v14 = vld [vmem:[%s7387_s2 + $0x93] ss:$0 sm:$0xff] }
0x15ee   :  { %v3548_v40 = vpack.c.bf16 %v3541_v6, %v3540_v16 }
0x15f0   :  { %5012 = vmatmul.msk.bf16.vlgmr.msrb.gmra.mxu2 %vm428_vm3, %v3548_v40 }
0x15f3   :  { %v5448_v63 = vpop.eup %5447 }
0x15f4   :  { %v3519_v26 = vpop.xlane.xlu2 %3518  ;;  %v3542_v18 = vmul.f32 %v5448_v63, %v5432_v52 }
0x15f5   :  { %5449 = vrcp.f32 %v3519_v26 }
0x15fb   :  { %v5450_v59 = vpop.eup %5449 }
0x15fc   :  { %v3543_v36 = vmul.f32 %v5450_v59, %v5434_v50  ;;  %v3522_v15 = vpop.xlane.xlu0 %3521 }
0x15fd   :  { %5451 = vrcp.f32 %v3522_v15 }
0x15fe   :  { %v3549_v28 = vpack.c.bf16 %v3543_v36, %v3542_v18 }
0x1600   :  { %5013 = vmatmul.msk.bf16.gmra.mxu2 %vm428_vm3, %v3549_v28 }
0x1603   :  { %v5452_v1 = vpop.eup %5451 }
0x1604   :  { %v3525_v31 = vpop.xlane.xlu1 %3524  ;;  %v3544_v50 = vmul.f32 %v5452_v1, %v5436_v21 }
0x1605   :  { %5453 = vrcp.f32 %v3525_v31 }
0x160b   :  { %v5454_v52 = vpop.eup %5453 }
0x160c   :  { %v3545_v54 = vmul.f32 %v5454_v52, %v5438_v44  ;;  %v3528_v17 = vpop.xlane.xlu2 %3527 }
0x160d   :  { %5455 = vrcp.f32 %v3528_v17 }
0x160e   :  { %v3550_v42 = vpack.c.bf16 %v3545_v54, %v3544_v50 }
0x1610   :  { %5014 = vmatmul.msk.bf16.gmra.mxu2 %vm428_vm3, %v3550_v42 }
0x1613   :  { %v5456_v0 = vpop.eup %5455 }
0x1614   :  { %v3531_v49 = vpop.xlane.xlu0 %3530  ;;  %v3546_v45 = vmul.f32 %v5456_v0, %v5440_v41 }
0x1615   :  { %5457 = vrcp.f32 %v3531_v49 }
0x161b   :  { %v5458_v19 = vpop.eup %5457 }
0x161c   :  { %v3547_v53 = vmul.f32 %v5458_v19, %v5442_v8 }
0x161e   :  { %v3551_v20 = vpack.c.bf16 %v3547_v53, %v3546_v45 }
0x1620   :  { %5015 = vmatmul.msk.bf16.gmra.mxu2 %vm428_vm3, %v3551_v20 }
0x1630   :  { %5052 = vmatmul.msk.bf16.vlgmr.msra.gmra.mxu2 %vm225_vm2, %v6482_v24 }
0x1640   :  { %5053 = vmatmul.msk.bf16.gmra.mxu2 %vm225_vm2, %v6503_v39  ;;  %v3691_v39 = vpop.f32.mrf.mxu0 }
0x1641   :  { %v3692_v63 = vadd.f32 %v5191_v14, %v3691_v39 }
0x1648   :  { %v3693_v7 = vpop.f32.mrf.mxu0 }
0x1649   :  { %v3694_v26 = vadd.f32 %v5191_v14, %v3693_v7 }
0x164b   :  { %v3795_v18 = vpack.c.bf16 %v3694_v26, %v3692_v63 }
0x1650   :  { %5054 = vmatmul.msk.bf16.gmra.mxu2 %vm225_vm2, %v6523_v47  ;;  %v3696_v6 = vpop.f32.mrf.mxu0 }
0x1651   :  { %v3697_v61 = vadd.f32 %v5191_v14, %v3696_v6 }
0x1658   :  { %v3698_v36 = vpop.f32.mrf.mxu0 }
0x1659   :  { %v3699_v37 = vadd.f32 %v5191_v14, %v3698_v36  ;;  %v3227_v36 = vadd.f32 %v6870_v34, %v6836_v2 }
0x165b   :  { %v3796_v1 = vpack.c.bf16 %v3699_v37, %v3697_v61 }
0x1660   :  { %5055 = vmatmul.msk.bf16.gmra.mxu2 %vm225_vm2, %v6557_v55  ;;  %v3701_v15 = vpop.f32.mrf.mxu0 }
0x1661   :  { %v3702_v42 = vadd.f32 %v5191_v14, %v3701_v15 }
0x1668   :  { %v3703_v52 = vpop.f32.mrf.mxu0 }
0x1669   :  { %v3704_v54 = vadd.f32 %v5191_v14, %v3703_v52 }
0x166b   :  { %v3797_v0 = vpack.c.bf16 %v3704_v54, %v3702_v42 }
0x1670   :  { %v3706_v17 = vpop.f32.mrf.mxu0 }
0x1671   :  { %v3707_v20 = vadd.f32 %v5191_v14, %v3706_v17 }
0x1673   :  { %v3577_v21 = vpop.f32.mrf.mxu2 }
0x1678   :  { %v3708_v45 = vpop.f32.mrf.mxu0 }
0x1679   :  { %v3709_v53 = vadd.f32 %v5191_v14, %v3708_v45  ;;  %v3222_v14 = vadd.f32 %v6863_v29, %v6825_v51  ;;  %v3237_v29 = vadd.f32 %v6885_v46, %v6853_v60  ;;  %v5540_v60 = vld [vmem:[%s7387_s2 + $0x18] sm:$0xff] }
0x167b   :  { %v3579_v44 = vpop.f32.mrf.mxu2 }
0x167c   :  { %v3597_v9 = vpack.c.bf16 %v3579_v44, %v3577_v21  ;;  %v5193_v21 = vld [vmem:[%s7387_s2 + $0x9b] ss:$0 sm:$0xff] }
0x167e   :  { %5016 = vmatmul.msk.bf16.vlgmr.msrb.gmra.mxu3 %vm38_vm1, %v3597_v9  ;;  %v3798_v9 = vpack.c.bf16 %v3709_v53, %v3707_v20 }
0x1683   :  { %v3582_v41 = vpop.f32.mrf.mxu2 }
0x168b   :  { %v3584_v8 = vpop.f32.mrf.mxu2 }
0x168c   :  { %v3598_v48 = vpack.c.bf16 %v3584_v8, %v3582_v41 }
0x168e   :  { %5017 = vmatmul.msk.bf16.gmra.mxu3 %vm38_vm1, %v3598_v48 }
0x1693   :  { %v3587_v24 = vpop.f32.mrf.mxu2 }
0x169b   :  { %v3589_v23 = vpop.f32.mrf.mxu2 }
0x169c   :  { %v3599_v43 = vpack.c.bf16 %v3589_v23, %v3587_v24 }
0x169e   :  { %5018 = vmatmul.msk.bf16.gmra.mxu3 %vm38_vm1, %v3599_v43 }
0x16a3   :  { %v3592_v47 = vpop.f32.mrf.mxu2 }
0x16ab   :  { %v3594_v16 = vpop.f32.mrf.mxu2 }
0x16ac   :  { %v3600_v55 = vpack.c.bf16 %v3594_v16, %v3592_v47 }
0x16ae   :  { %5019 = vmatmul.msk.bf16.gmra.mxu3 %vm38_vm1, %v3600_v55 }
0x16b3   :  { %v3775_v40 = vpop.f32.mrf.mxu2 }
0x16b4   :  { %v3776_v55 = vadd.f32 %v5193_v21, %v3775_v40  ;;  %v3232_v40 = vadd.f32 %v6876_v11, %v6843_v12 }
0x16bb   :  { %v3777_v59 = vpop.f32.mrf.mxu2 }
0x16bc   :  { %v3778_v7 = vadd.f32 %v5193_v21, %v3777_v59 }
0x16be   :  { %5056 = vmatmul.msk.bf16.vlgmr.msra.gmra.mxu3 %vm38_vm1, %v3795_v18  ;;  %v3964_v6 = vpack.c.bf16 %v3778_v7, %v3776_v55  ;;  %v5544_v7 = vld [vmem:[%s7387_s2 + $0x38] sm:$0xff] }
0x16c3   :  { %v3780_v28 = vpop.f32.mrf.mxu2 }
0x16c4   :  { %v3781_v47 = vadd.f32 %v5193_v21, %v3780_v28 }
0x16cb   :  { %v3782_v31 = vpop.f32.mrf.mxu2 }
0x16cc   :  { %v3783_v43 = vadd.f32 %v5193_v21, %v3782_v31 }
0x16ce   :  { %5057 = vmatmul.msk.bf16.gmra.mxu3 %vm38_vm1, %v3796_v1  ;;  %v3965_v16 = vpack.c.bf16 %v3783_v43, %v3781_v47 }
0x16d3   :  { %v3785_v50 = vpop.f32.mrf.mxu2 }
0x16d4   :  { %v3786_v23 = vadd.f32 %v5193_v21, %v3785_v50  ;;  %v5539_v50 = vld [vmem:[%s7387_s2 + $0x10] sm:$0xff] }
0x16db   :  { %v3787_v49 = vpop.f32.mrf.mxu2 }
0x16dc   :  { %v3788_v48 = vadd.f32 %v5193_v21, %v3787_v49 }
0x16de   :  { %5058 = vmatmul.msk.bf16.gmra.mxu3 %vm38_vm1, %v3797_v0  ;;  %v3966_v39 = vpack.c.bf16 %v3788_v48, %v3786_v23 }
0x16e3   :  { %v3790_v19 = vpop.f32.mrf.mxu2 }
0x16e4   :  { %v3791_v41 = vadd.f32 %v5193_v21, %v3790_v19  ;;  %v5541_v19 = vld [vmem:[%s7387_s2 + $0x20] sm:$0xff] }
0x16eb   :  { %v3792_v44 = vpop.f32.mrf.mxu2 }
0x16ec   :  { %v3793_v8 = vadd.f32 %v5193_v21, %v3792_v44  ;;  %v5542_v44 = vld [vmem:[%s7387_s2 + $0x28] sm:$0xff] }
0x16ee   :  { %v3967_v24 = vpack.c.bf16 %v3793_v8, %v3791_v41  ;;  %5059 = vmatmul.msk.bf16.gmra.mxu3 %vm38_vm1, %v3798_v9 }
0x16f0   :  { %3984 = vmatpush.bf16.msrb.mxu0 %v3967_v24  ;;  %v5543_v24 = vld [vmem:[%s7387_s2 + $0x30] sm:$0xff] }
0x16f4   :  { %3985 = vmatpush.bf16.msrb.mxu0 %v3966_v39 }
0x16f8   :  { %3986 = vmatpush.bf16.msrb.mxu0 %v3965_v16 }
0x16fc   :  { %3987 = vmatpush.bf16.msrb.mxu0 %v3964_v6 }
0x1701   :  { %v3625_v26 = vpop.f32.mrf.mxu3 }
0x1702   :  { %v6992_v63 = vadd.f32 %v3625_v26, %v3222_v14  ;;  %v5545_v26 = vld [vmem:[%s7387_s2 + $0x40] sm:$0xff] }
0x1709   :  { %v6994_v18 = vpop.f32.mrf.mxu3 }
0x1711   :  { %v3630_v15 = vpop.f32.mrf.mxu3 }
0x1712   :  { %v6998_v28 = vadd.f32 %v3630_v15, %v3227_v36 }
0x1719   :  { %v7000_v59 = vpop.f32.mrf.mxu3 }
0x1721   :  { %v3635_v37 = vpop.f32.mrf.mxu3 }
0x1722   :  { %v7004_v61 = vadd.f32 %v3635_v37, %v3232_v40 }
0x1729   :  { %v7006_v51 = vpop.f32.mrf.mxu3 }
0x1731   :  { %v3640_v31 = vpop.f32.mrf.mxu3 }
0x1732   :  { %v7010_v1 = vadd.f32 %v3640_v31, %v3237_v29  ;;  %v5546_v29 = vld [vmem:[%s7387_s2 + $0x48] sm:$0xff] }
0x1739   :  { %v7012_v2 = vpop.f32.mrf.mxu3 }
0x1741   :  { %v3836_v34 = vpop.f32.mrf.mxu3 }
0x1742   :  { %v3856_v52 = vmul.f32 0.35355338, %v3836_v34 }
0x1744   :  { %v3864_v12 = vadd.f32 %v5539_v50, %v3856_v52 }
0x1746   :  { %v3872_v11 = vsel %vm428_vm3, %v3864_v12, -inf }
0x1747   :  { %3873 = vmax.xlane.f32.xlu1 %v3872_v11 }
0x1749   :  { %v3838_v54 = vpop.f32.mrf.mxu3 }
0x174a   :  { %v3857_v42 = vmul.f32 0.35355338, %v3838_v54 }
0x174c   :  { %v3865_v46 = vadd.f32 %v5540_v60, %v3857_v42 }
0x174e   :  { %v3875_v17 = vsel %vm428_vm3, %v3865_v46, -inf }
0x174f   :  { %3876 = vmax.xlane.f32.xlu2 %v3875_v17 }
0x1751   :  { %v3841_v49 = vpop.f32.mrf.mxu3 }
0x1752   :  { %v3858_v0 = vmul.f32 0.35355338, %v3841_v49 }
0x1754   :  { %v3866_v45 = vadd.f32 %v5541_v19, %v3858_v0 }
0x1756   :  { %v3878_v53 = vsel %vm428_vm3, %v3866_v45, -inf }
0x1757   :  { %3879 = vmax.xlane.f32.xlu0 %v3878_v53 }
0x1759   :  { %v3843_v20 = vpop.f32.mrf.mxu3 }
0x175a   :  { %v3859_v21 = vmul.f32 0.35355338, %v3843_v20 }
0x175c   :  { %v3867_v9 = vadd.f32 %v5542_v44, %v3859_v21 }
0x175e   :  { %v3881_v41 = vsel %vm428_vm3, %v3867_v9, -inf }
0x175f   :  { %3882 = vmax.xlane.f32.xlu1 %v3881_v41 }
0x1761   :  { %v3846_v8 = vpop.f32.mrf.mxu3 }
0x1762   :  { %v3860_v48 = vmul.f32 0.35355338, %v3846_v8 }
0x1764   :  { %v3868_v23 = vadd.f32 %v5543_v24, %v3860_v48 }
0x1766   :  { %v3884_v43 = vsel %vm428_vm3, %v3868_v23, -inf }
0x1767   :  { %3885 = vmax.xlane.f32.xlu2 %v3884_v43 }
0x1769   :  { %v3848_v39 = vpop.f32.mrf.mxu3 }
0x176a   :  { %v3861_v47 = vmul.f32 0.35355338, %v3848_v39 }
0x176c   :  { %v3869_v16 = vadd.f32 %v5544_v7, %v3861_v47 }
0x176e   :  { %v3887_v55 = vsel %vm428_vm3, %v3869_v16, -inf }
0x176f   :  { %3888 = vmax.xlane.f32.xlu0 %v3887_v55 }
0x1771   :  { %v3851_v6 = vpop.f32.mrf.mxu3 }
0x1772   :  { %v3862_v14 = vmul.f32 0.35355338, %v3851_v6 }
0x1774   :  { %v3870_v36 = vadd.f32 %v5545_v26, %v3862_v14 }
0x1776   :  { %v3890_v15 = vsel %vm428_vm3, %v3870_v36, -inf }
0x1777   :  { %3891 = vmax.xlane.f32.xlu1 %v3890_v15 }
0x1779   :  { %v3853_v40 = vpop.f32.mrf.mxu3 }
0x177a   :  { %v3863_v37 = vmul.f32 0.35355338, %v3853_v40 }
0x177c   :  { %v3871_v31 = vadd.f32 %v5546_v29, %v3863_v37 }
0x177e   :  { %v3893_v34 = vsel %vm428_vm3, %v3871_v31, -inf }
0x177f   :  { %3894 = vmax.xlane.f32.xlu2 %v3893_v34 }
0x17ba   :  { %v3874_v52 = vpop.xlane.xlu1 %3873 }
0x17bb   :  { %v3896_v50 = vsub.f32 %v3864_v12, %v3874_v52 }
0x17bd   :  { %v3904_v11 = vmul.f32 1.442695, %v3896_v50 }
0x17bf   :  { %5459 = vpow2.f32 %v3904_v11 }
0x17c2   :  { %v3877_v54 = vpop.xlane.xlu2 %3876 }
0x17c3   :  { %v3897_v42 = vsub.f32 %v3865_v46, %v3877_v54 }
0x17c5   :  { %v5460_v60 = vpop.eup %5459  ;;  %v3906_v17 = vmul.f32 1.442695, %v3897_v42 }
0x17c6   :  { %v3920_v49 = vsel %vm428_vm3, %v5460_v60, 0.0 }
0x17c7   :  { %5461 = vpow2.f32 %v3906_v17  ;;  %3921 = vadd.xlane.f32.xlu0 %v3920_v49 }
0x17ca   :  { %v3880_v0 = vpop.xlane.xlu0 %3879 }
0x17cb   :  { %v3898_v19 = vsub.f32 %v3866_v45, %v3880_v0 }
0x17cd   :  { %v5462_v53 = vpop.eup %5461  ;;  %v3908_v20 = vmul.f32 1.442695, %v3898_v19 }
0x17ce   :  { %v3923_v21 = vsel %vm428_vm3, %v5462_v53, 0.0 }
0x17cf   :  { %5463 = vpow2.f32 %v3908_v20  ;;  %3924 = vadd.xlane.f32.xlu1 %v3923_v21 }
0x17d2   :  { %v3883_v44 = vpop.xlane.xlu1 %3882 }
0x17d3   :  { %v3899_v12 = vsub.f32 %v3867_v9, %v3883_v44 }
0x17d5   :  { %v5464_v41 = vpop.eup %5463  ;;  %v3910_v8 = vmul.f32 1.442695, %v3899_v12 }
0x17d6   :  { %v3926_v46 = vsel %vm428_vm3, %v5464_v41, 0.0 }
0x17d7   :  { %5465 = vpow2.f32 %v3910_v8  ;;  %3927 = vadd.xlane.f32.xlu2 %v3926_v46 }
0x17da   :  { %v3886_v48 = vpop.xlane.xlu2 %3885 }
0x17db   :  { %v3900_v24 = vsub.f32 %v3868_v23, %v3886_v48 }
0x17dd   :  { %v5466_v43 = vpop.eup %5465  ;;  %v3912_v39 = vmul.f32 1.442695, %v3900_v24 }
0x17de   :  { %v3929_v45 = vsel %vm428_vm3, %v5466_v43, 0.0 }
0x17df   :  { %5467 = vpow2.f32 %v3912_v39  ;;  %3930 = vadd.xlane.f32.xlu0 %v3929_v45 }
0x17e2   :  { %v3889_v47 = vpop.xlane.xlu0 %3888 }
0x17e3   :  { %v3901_v7 = vsub.f32 %v3869_v16, %v3889_v47 }
0x17e5   :  { %v5468_v55 = vpop.eup %5467  ;;  %v3914_v6 = vmul.f32 1.442695, %v3901_v7 }
0x17e6   :  { %v3932_v9 = vsel %vm428_vm3, %v5468_v55, 0.0 }
0x17e7   :  { %5469 = vpow2.f32 %v3914_v6  ;;  %3933 = vadd.xlane.f32.xlu1 %v3932_v9 }
0x17ea   :  { %v3892_v14 = vpop.xlane.xlu1 %3891 }
0x17eb   :  { %v3902_v26 = vsub.f32 %v3870_v36, %v3892_v14 }
0x17ed   :  { %v5470_v15 = vpop.eup %5469  ;;  %v3916_v40 = vmul.f32 1.442695, %v3902_v26 }
0x17ee   :  { %v3935_v23 = vsel %vm428_vm3, %v5470_v15, 0.0 }
0x17ef   :  { %5471 = vpow2.f32 %v3916_v40  ;;  %3936 = vadd.xlane.f32.xlu2 %v3935_v23 }
0x17f2   :  { %v3895_v37 = vpop.xlane.xlu2 %3894 }
0x17f3   :  { %v3903_v29 = vsub.f32 %v3871_v31, %v3895_v37 }
0x17f5   :  { %v5472_v34 = vpop.eup %5471  ;;  %v3918_v52 = vmul.f32 1.442695, %v3903_v29 }
0x17f6   :  { %v3938_v16 = vsel %vm428_vm3, %v5472_v34, 0.0 }
0x17f7   :  { %5473 = vpow2.f32 %v3918_v52  ;;  %3939 = vadd.xlane.f32.xlu0 %v3938_v16 }
0x17fd   :  { %v5474_v50 = vpop.eup %5473 }
0x17fe   :  { %v3941_v11 = vsel %vm428_vm3, %v5474_v50, 0.0 }
0x17ff   :  { %3942 = vadd.xlane.f32.xlu1 %v3941_v11 }
0x183a   :  { %v3922_v54 = vpop.xlane.xlu0 %3921 }
0x183b   :  { %5475 = vrcp.f32 %v3922_v54 }
0x1841   :  { %v5476_v42 = vpop.eup %5475 }
0x1842   :  { %v3925_v36 = vpop.xlane.xlu1 %3924  ;;  %v3952_v49 = vmul.f32 %v5476_v42, %v5460_v60  ;;  %v3665_v60 = vld [vmem:[%s7386_s1 + $0x1f0] sm:$0xf] }
0x1843   :  { %5477 = vrcp.f32 %v3925_v36 }
0x1849   :  { %v5478_v17 = vpop.eup %5477 }
0x184a   :  { %v3953_v0 = vmul.f32 %v5478_v17, %v5462_v53  ;;  %v3928_v31 = vpop.xlane.xlu2 %3927  ;;  %v4026_v53 = vsel %vm42_vm0, %v3665_v60, 0  ;;  %v5194_v17 = vld [vmem:[%s7387_s2 + $0xa0] ss:$0 sm:$0xff] }
0x184b   :  { %5479 = vrcp.f32 %v3928_v31  ;;  %4035 = vmatpush.bf16.msrb.mxu1 %v4026_v53  ;;  %v3224_v31 = vadd.f32 %v6866_v58, %v6830_v32 }
0x184c   :  { %v3960_v19 = vpack.c.bf16 %v3953_v0, %v3952_v49 }
0x184e   :  { %5060 = vmatmul.msk.bf16.vlgmr.msrb.gmra.mxu0 %vm428_vm3, %v3960_v19 }
0x1851   :  { %v5480_v21 = vpop.eup %5479 }
0x1852   :  { %v3931_v20 = vpop.xlane.xlu0 %3930  ;;  %v3954_v12 = vmul.f32 %v5480_v21, %v5464_v41  ;;  %v3646_v21 = vadd.f32 %v6994_v18, %v3224_v31 }
0x1853   :  { %5481 = vrcp.f32 %v3931_v20 }
0x1859   :  { %v5482_v44 = vpop.eup %5481 }
0x185a   :  { %v3955_v8 = vmul.f32 %v5482_v44, %v5466_v43  ;;  %v3934_v48 = vpop.xlane.xlu1 %3933 }
0x185b   :  { %5483 = vrcp.f32 %v3934_v48 }
0x185c   :  { %v3961_v46 = vpack.c.bf16 %v3955_v8, %v3954_v12 }
0x185e   :  { %5061 = vmatmul.msk.bf16.gmra.mxu0 %vm428_vm3, %v3961_v46 }
0x1861   :  { %v5484_v39 = vpop.eup %5483 }
0x1862   :  { %v3937_v24 = vpop.xlane.xlu2 %3936  ;;  %v3956_v47 = vmul.f32 %v5484_v39, %v5468_v55 }
0x1863   :  { %5485 = vrcp.f32 %v3937_v24 }
0x1869   :  { %v5486_v45 = vpop.eup %5485 }
0x186a   :  { %v3957_v7 = vmul.f32 %v5486_v45, %v5470_v15  ;;  %v3940_v43 = vpop.xlane.xlu0 %3939 }
0x186b   :  { %5487 = vrcp.f32 %v3940_v43 }
0x186c   :  { %v3962_v41 = vpack.c.bf16 %v3957_v7, %v3956_v47 }
0x186e   :  { %5062 = vmatmul.msk.bf16.gmra.mxu0 %vm428_vm3, %v3962_v41 }
0x1871   :  { %v5488_v9 = vpop.eup %5487 }
0x1872   :  { %v3943_v6 = vpop.xlane.xlu1 %3942  ;;  %v3958_v26 = vmul.f32 %v5488_v9, %v5472_v34 }
0x1873   :  { %5489 = vrcp.f32 %v3943_v6 }
0x1879   :  { %v5490_v14 = vpop.eup %5489 }
0x187a   :  { %v3959_v40 = vmul.f32 %v5490_v14, %v5474_v50 }
0x187c   :  { %v3963_v23 = vpack.c.bf16 %v3959_v40, %v3958_v26 }
0x187e   :  { %5063 = vmatmul.msk.bf16.gmra.mxu0 %vm428_vm3, %v3963_v23 }
0x18cb   :  { %v3989_v37 = vpop.f32.mrf.mxu0 }
0x18d3   :  { %v3991_v29 = vpop.f32.mrf.mxu0 }
0x18d4   :  { %v4009_v52 = vpack.c.bf16 %v3991_v29, %v3989_v37 }
0x18d6   :  { %5064 = vmatmul.msk.bf16.vlgmr.msrb.gmra.mxu1 %vm38_vm1, %v4009_v52 }
0x18db   :  { %v3994_v55 = vpop.f32.mrf.mxu0 }
0x18e3   :  { %v3996_v15 = vpop.f32.mrf.mxu0 }
0x18e4   :  { %v4010_v16 = vpack.c.bf16 %v3996_v15, %v3994_v55 }
0x18e6   :  { %5065 = vmatmul.msk.bf16.gmra.mxu1 %vm38_vm1, %v4010_v16 }
0x18eb   :  { %v3999_v11 = vpop.f32.mrf.mxu0 }
0x18f3   :  { %v4001_v54 = vpop.f32.mrf.mxu0 }
0x18f4   :  { %v4011_v36 = vpack.c.bf16 %v4001_v54, %v3999_v11 }
0x18f6   :  { %5066 = vmatmul.msk.bf16.gmra.mxu1 %vm38_vm1, %v4011_v36 }
0x18fb   :  { %v4004_v34 = vpop.f32.mrf.mxu0 }
0x1903   :  { %v4006_v50 = vpop.f32.mrf.mxu0 }
0x1904   :  { %v4012_v42 = vpack.c.bf16 %v4006_v50, %v4004_v34 }
0x1906   :  { %5067 = vmatmul.msk.bf16.gmra.mxu1 %vm38_vm1, %v4012_v42 }
0x1953   :  { %v4037_v49 = vpop.f32.mrf.mxu1 }
0x1954   :  { %v4057_v0 = vadd.f32 %v4037_v49, %v6992_v63 }
0x1956   :  { %v4067_v19 = vadd.f32 %v5194_v17, %v4057_v0 }
0x1958   :  { %v4075_v20 = vadd.f32 %v4067_v19, %v6475_v3  ;;  %v3229_v3 = vadd.f32 %v6872_v25, %v6841_v33 }
0x195a   :  { %v4085_v44 = vsel %vm225_vm2, %v4075_v20, 0.0  ;;  %v3648_v58 = vadd.f32 %v7000_v59, %v3229_v3 }
0x195b   :  { %v4039_v12 = vpop.f32.mrf.mxu1  ;;  %4086 = vadd.xlane.f32.xlu2 %v4085_v44 }
0x195c   :  { %v4058_v8 = vadd.f32 %v4039_v12, %v3646_v21 }
0x195e   :  { %v4068_v46 = vadd.f32 %v5194_v17, %v4058_v8 }
0x1960   :  { %v4076_v48 = vadd.f32 %v4068_v46, %v6478_v27 }
0x1962   :  { %v4088_v60 = vsel %vm225_vm2, %v4076_v48, 0.0 }
0x1963   :  { %4089 = vadd.xlane.f32.xlu0 %v4088_v60  ;;  %v4042_v63 = vpop.f32.mrf.mxu1 }
0x1964   :  { %v4059_v53 = vadd.f32 %v4042_v63, %v6998_v28 }
0x1966   :  { %v4069_v24 = vadd.f32 %v5194_v17, %v4059_v53 }
0x1968   :  { %v4077_v32 = vadd.f32 %v4069_v24, %v6496_v4  ;;  %v3234_v4 = vadd.f32 %v6880_v30, %v6848_v5 }
0x196a   :  { %v4091_v18 = vsel %vm225_vm2, %v4077_v32, 0.0  ;;  %v3650_v25 = vadd.f32 %v7006_v51, %v3234_v4 }
0x196b   :  { %4092 = vadd.xlane.f32.xlu1 %v4091_v18  ;;  %v4044_v39 = vpop.f32.mrf.mxu1 }
0x196c   :  { %v4060_v45 = vadd.f32 %v4044_v39, %v3648_v58 }
0x196e   :  { %v4070_v27 = vadd.f32 %v5194_v17, %v4060_v45  ;;  %v5155_v45 = vld [vmem:[%s7386_s1 + $0x200] sm:$0xff] }
0x196f   :  { %4319 = vmatpush.bf16.msrb.mxu2 %v5155_v45 }
0x1970   :  { %v4078_v47 = vadd.f32 %v4070_v27, %v6499_v62 }
0x1972   :  { %v4094_v7 = vsel %vm225_vm2, %v4078_v47, 0.0 }
0x1973   :  { %4095 = vadd.xlane.f32.xlu2 %v4094_v7  ;;  %v4047_v28 = vpop.f32.mrf.mxu1 }
0x1974   :  { %v4061_v41 = vadd.f32 %v4047_v28, %v7004_v61  ;;  %v5154_v28 = vld [vmem:[%s7386_s1 + $0x1f8] sm:$0xff] }
0x1975   :  { %4320 = vmatpush.bf16.msrb.mxu2 %v5154_v28 }
0x1976   :  { %v4071_v43 = vadd.f32 %v5194_v17, %v4061_v41 }
0x1978   :  { %v4079_v33 = vadd.f32 %v4071_v43, %v6516_v57  ;;  %v3239_v57 = vadd.f32 %v6889_v22, %v6861_v13 }
0x197a   :  { %v4097_v59 = vsel %vm225_vm2, %v4079_v33, 0.0  ;;  %v3652_v30 = vadd.f32 %v7012_v2, %v3239_v57 }
0x197b   :  { %4098 = vadd.xlane.f32.xlu0 %v4097_v59  ;;  %v4049_v6 = vpop.f32.mrf.mxu1 }
0x197c   :  { %v4062_v9 = vadd.f32 %v4049_v6, %v3650_v25 }
0x197e   :  { %v4072_v62 = vadd.f32 %v5194_v17, %v4062_v9 }
0x1980   :  { %v4080_v14 = vadd.f32 %v4072_v62, %v6519_v10 }
0x1982   :  { %v4100_v26 = vsel %vm225_vm2, %v4080_v14, 0.0 }
0x1983   :  { %4101 = vadd.xlane.f32.xlu1 %v4100_v26  ;;  %v4052_v61 = vpop.f32.mrf.mxu1 }
0x1984   :  { %v4063_v40 = vadd.f32 %v4052_v61, %v7010_v1 }
0x1986   :  { %v4073_v23 = vadd.f32 %v5194_v17, %v4063_v40 }
0x1988   :  { %v4081_v5 = vadd.f32 %v4073_v23, %v6550_v35 }
0x198a   :  { %v4103_v51 = vsel %vm225_vm2, %v4081_v5, 0.0 }
0x198b   :  { %v4054_v37 = vpop.f32.mrf.mxu1  ;;  %4104 = vadd.xlane.f32.xlu1 %v4103_v51 }
0x198c   :  { %v4064_v29 = vadd.f32 %v4054_v37, %v3652_v30 }
0x198e   :  { %v4074_v10 = vadd.f32 %v5194_v17, %v4064_v29 }
0x1990   :  { %v4082_v16 = vadd.f32 %v4074_v10, %v6553_v56 }
0x1992   :  { %v4106_v36 = vsel %vm225_vm2, %v4082_v16, 0.0 }
0x19ce   :  { %v4087_v52 = vpop.xlane.xlu2 %4086 }
0x19cf   :  { %v4109_v55 = vmul.f32 %v4087_v52, %v6219_v38 }
0x19d1   :  { %v7100_v15 = vsub.f32 %v4075_v20, %v4109_v55 }
0x19d3   :  { %v4125_v1 = vmul.f32 %v7100_v15, %v7100_v15 }
0x19d5   :  { %v4133_v13 = vsel %vm225_vm2, %v4125_v1, 0.0 }
0x19d6   :  { %v4090_v22 = vpop.xlane.xlu0 %4089  ;;  %4134 = vadd.xlane.f32.xlu2 %v4133_v13 }
0x19d7   :  { %v4110_v35 = vmul.f32 %v4090_v22, %v6219_v38 }
0x19d9   :  { %v7106_v2 = vsub.f32 %v4076_v48, %v4110_v35  ;;  %v7162_v35 = vld [vmem:[%s7387_s2 + $0xa8] ss:$0 sm:$0xff] }
0x19db   :  { %v4126_v11 = vmul.f32 %v7106_v2, %v7106_v2 }
0x19dd   :  { %v4136_v54 = vsel %vm225_vm2, %v4126_v11, 0.0 }
0x19de   :  { %v4093_v34 = vpop.xlane.xlu1 %4092  ;;  %4137 = vadd.xlane.f32.xlu0 %v4136_v54  ;;  %4107 = vadd.xlane.f32.xlu2 %v4106_v36 }
0x19df   :  { %v4111_v50 = vmul.f32 %v4093_v34, %v6219_v38 }
0x19e1   :  { %v7114_v42 = vsub.f32 %v4077_v32, %v4111_v50 }
0x19e3   :  { %v4127_v17 = vmul.f32 %v7114_v42, %v7114_v42 }
0x19e5   :  { %v4139_v49 = vsel %vm225_vm2, %v4127_v17, 0.0  ;;  %v7168_v17 = vld [vmem:[%s7387_s2 + $0xa9] ss:$0 sm:$0xff] }
0x19e6   :  { %4140 = vadd.xlane.f32.xlu0 %v4139_v49  ;;  %v4096_v56 = vpop.xlane.xlu2 %4095 }
0x19e7   :  { %v4112_v0 = vmul.f32 %v4096_v56, %v6219_v38 }
0x19e9   :  { %v7120_v19 = vsub.f32 %v4078_v47, %v4112_v0 }
0x19eb   :  { %v4128_v31 = vmul.f32 %v7120_v19, %v7120_v19 }
0x19ed   :  { %v4142_v20 = vsel %vm225_vm2, %v4128_v31, 0.0 }
0x19ee   :  { %v4099_v21 = vpop.xlane.xlu0 %4098  ;;  %4143 = vadd.xlane.f32.xlu1 %v4142_v20 }
0x19ef   :  { %v4113_v44 = vmul.f32 %v4099_v21, %v6219_v38 }
0x19f1   :  { %v7126_v12 = vsub.f32 %v4079_v33, %v4113_v44 }
0x19f3   :  { %v4129_v8 = vmul.f32 %v7126_v12, %v7126_v12 }
0x19f5   :  { %v4145_v46 = vsel %vm225_vm2, %v4129_v8, 0.0 }
0x19f6   :  { %v4102_v48 = vpop.xlane.xlu1 %4101  ;;  %4146 = vadd.xlane.f32.xlu2 %v4145_v46 }
0x19f7   :  { %v4114_v60 = vmul.f32 %v4102_v48, %v6219_v38 }
0x19f9   :  { %v7132_v63 = vsub.f32 %v4080_v14, %v4114_v60 }
0x19fb   :  { %v4130_v53 = vmul.f32 %v7132_v63, %v7132_v63 }
0x19fd   :  { %v4148_v24 = vsel %vm225_vm2, %v4130_v53, 0.0 }
0x19fe   :  { %4149 = vadd.xlane.f32.xlu0 %v4148_v24  ;;  %v4105_v3 = vpop.xlane.xlu1 %4104 }
0x19ff   :  { %v4115_v32 = vmul.f32 %v4105_v3, %v6219_v38 }
0x1a01   :  { %v7138_v58 = vsub.f32 %v4081_v5, %v4115_v32 }
0x1a03   :  { %v4131_v18 = vmul.f32 %v7138_v58, %v7138_v58 }
0x1a05   :  { %v4151_v39 = vsel %vm225_vm2, %v4131_v18, 0.0 }
0x1a06   :  { %4152 = vadd.xlane.f32.xlu1 %v4151_v39 }
0x1a49   :  { %v4135_v27 = vpop.xlane.xlu2 %4134 }
0x1a4a   :  { %v4157_v47 = vmul.f32 %v4135_v27, %v6219_v38 }
0x1a4c   :  { %v4165_v7 = vadd.f32 1e-05, %v4157_v47 }
0x1a4e   :  { %5491 = vrsqrt.f32 %v4165_v7  ;;  %vm4179_vm1 = vweird.f32 %v4165_v7 }
0x1a51   :  { %v4138_v41 = vpop.xlane.xlu0 %4137  ;;  %v4108_v43 = vpop.xlane.xlu2 %4107 }
0x1a52   :  { %v4158_v4 = vmul.f32 %v4138_v41, %v6219_v38  ;;  %v4116_v33 = vmul.f32 %v4108_v43, %v6219_v38 }
0x1a54   :  { %v5492_v25 = vpop.eup %5491  ;;  %v4166_v59 = vadd.f32 1e-05, %v4158_v4  ;;  %v7152_v6 = vsub.f32 %v4082_v16, %v4116_v33 }
0x1a55   :  { %v4174_v9 = vmul.f32 %v5492_v25, %v4165_v7  ;;  %vm4180_vm0 = vweird.f32 %v5492_v25 }
0x1a56   :  { %5493 = vrsqrt.f32 %v4166_v59  ;;  %v4132_v62 = vmul.f32 %v7152_v6, %v7152_v6  ;;  %vm4181_vm5 = vmor %vm4179_vm1, %vm4180_vm0  ;;  %vm4189_vm7 = vweird.f32 %v4166_v59 }
0x1a57   :  { %v4175_v14 = vmul.f32 %v5492_v25, %v4174_v9 }
0x1a58   :  { %v4154_v26 = vsel %vm225_vm2, %v4132_v62, 0.0 }
0x1a59   :  { %v4176_v61 = vmul.f32 0.5, %v4175_v14  ;;  %v4141_v40 = vpop.xlane.xlu0 %4140  ;;  %4155 = vadd.xlane.f32.xlu2 %v4154_v26 }
0x1a5a   :  { %v4159_v23 = vmul.f32 %v4141_v40, %v6219_v38 }
0x1a5b   :  { %v4177_v57 = vsub.f32 1.5, %v4176_v61 }
0x1a5c   :  { %v5494_v5 = vpop.eup %5493  ;;  %v4167_v30 = vadd.f32 1e-05, %v4159_v23 }
0x1a5d   :  { %v4178_v51 = vmul.f32 %v5492_v25, %v4177_v57  ;;  %v4184_v37 = vmul.f32 %v5494_v5, %v4166_v59  ;;  %vm4190_vm6 = vweird.f32 %v5494_v5 }
0x1a5e   :  { %5495 = vrsqrt.f32 %v4167_v30  ;;  %vm4191_vm8 = vmor %vm4189_vm7, %vm4190_vm6  ;;  %vm4199_vm10 = vweird.f32 %v4167_v30 }
0x1a5f   :  { %v4185_v29 = vmul.f32 %v5494_v5, %v4184_v37  ;;  %v4182_v10 = vsel %vm4181_vm5, %v5492_v25, %v4178_v51 }
0x1a60   :  { %v4253_v16 = vmul.f32 %v4182_v10, %v7100_v15 }
0x1a61   :  { %v4186_v52 = vmul.f32 0.5, %v4185_v29  ;;  %v4144_v55 = vpop.xlane.xlu1 %4143 }
0x1a62   :  { %v4160_v1 = vmul.f32 %v4144_v55, %v6219_v38  ;;  %v4262_v49 = vmul.f32 %v7162_v35, %v4253_v16 }
0x1a63   :  { %v4187_v13 = vsub.f32 1.5, %v4186_v52 }
0x1a64   :  { %v5496_v22 = vpop.eup %5495  ;;  %v4168_v11 = vadd.f32 1e-05, %v4160_v1  ;;  %v7175_v8 = vadd.f32 %v7168_v17, %v4262_v49 }
0x1a65   :  { %v4188_v54 = vmul.f32 %v5494_v5, %v4187_v13  ;;  %v4194_v36 = vmul.f32 %v5496_v22, %v4167_v30  ;;  %vm4200_vm9 = vweird.f32 %v5496_v22 }
0x1a66   :  { %5497 = vrsqrt.f32 %v4168_v11  ;;  %vm4201_vm11 = vmor %vm4199_vm10, %vm4200_vm9  ;;  %vm4209_vm13 = vweird.f32 %v4168_v11 }
0x1a67   :  { %v4192_v34 = vsel %vm4191_vm8, %v5494_v5, %v4188_v54  ;;  %v4195_v50 = vmul.f32 %v5496_v22, %v4194_v36 }
0x1a68   :  { %v4254_v56 = vmul.f32 %v4192_v34, %v7106_v2 }
0x1a69   :  { %v4196_v0 = vmul.f32 0.5, %v4195_v50  ;;  %v4147_v31 = vpop.xlane.xlu2 %4146 }
0x1a6a   :  { %v4263_v15 = vmul.f32 %v7162_v35, %v4254_v56  ;;  %v4161_v20 = vmul.f32 %v4147_v31, %v6219_v38 }
0x1a6b   :  { %v4197_v21 = vsub.f32 1.5, %v4196_v0  ;;  %v5159_v0 = vld [vmem:[%s7386_s1 + $0x220] sm:$0xff] }
0x1a6c   :  { %v5498_v44 = vpop.eup %5497  ;;  %v7178_v46 = vadd.f32 %v7168_v17, %v4263_v15  ;;  %v4169_v48 = vadd.f32 1e-05, %v4161_v20  ;;  %4404 = vmatpush.bf16.msrb.mxu3 %v5159_v0  ;;  %v5158_v15 = vld [vmem:[%s7386_s1 + $0x218] sm:$0xff] }
0x1a6d   :  { %v4198_v60 = vmul.f32 %v5496_v22, %v4197_v21  ;;  %v4204_v53 = vmul.f32 %v5498_v44, %v4168_v11  ;;  %vm4210_vm12 = vweird.f32 %v5498_v44 }
0x1a6e   :  { %v4279_v2 = vpack.c.bf16 %v7178_v46, %v7175_v8  ;;  %5499 = vrsqrt.f32 %v4169_v48  ;;  %vm4211_vm14 = vmor %vm4209_vm13, %vm4210_vm12  ;;  %vm4219_vm4 = vweird.f32 %v4169_v48 }
0x1a6f   :  { %v4205_v24 = vmul.f32 %v5498_v44, %v4204_v53  ;;  %v4202_v3 = vsel %vm4201_vm11, %v5496_v22, %v4198_v60  ;;  %v5157_v60 = vld [vmem:[%s7386_s1 + $0x210] sm:$0xff] }
0x1a70   :  { %5076 = vmatmul.msk.bf16.vlgmr.msrb.gmra.mxu2 %vm225_vm2, %v4279_v2  ;;  %v4255_v47 = vmul.f32 %v4202_v3, %v7114_v42  ;;  %4405 = vmatpush.bf16.msrb.mxu3 %v5158_v15  ;;  %v5156_v3 = vld [vmem:[%s7386_s1 + $0x208] sm:$0xff] }
0x1a71   :  { %v4206_v32 = vmul.f32 0.5, %v4205_v24  ;;  %v4150_v18 = vpop.xlane.xlu0 %4149 }
0x1a72   :  { %v4162_v39 = vmul.f32 %v4150_v18, %v6219_v38  ;;  %v4264_v25 = vmul.f32 %v7162_v35, %v4255_v47 }
0x1a73   :  { %v4207_v45 = vsub.f32 1.5, %v4206_v32 }
0x1a74   :  { %v5500_v27 = vpop.eup %5499  ;;  %v4170_v7 = vadd.f32 1e-05, %v4162_v39  ;;  %v7189_v26 = vadd.f32 %v7168_v17, %v4264_v25  ;;  %4406 = vmatpush.bf16.msrb.mxu3 %v5157_v60 }
0x1a75   :  { %v4208_v28 = vmul.f32 %v5498_v44, %v4207_v45  ;;  %v4214_v41 = vmul.f32 %v5500_v27, %v4169_v48  ;;  %vm4220_vm15 = vweird.f32 %v5500_v27 }
0x1a76   :  { %5501 = vrsqrt.f32 %v4170_v7  ;;  %vm4221_vm0 = vmor %vm4219_vm4, %vm4220_vm15  ;;  %vm4229_vm5 = vweird.f32 %v4170_v7 }
0x1a77   :  { %v4212_v43 = vsel %vm4211_vm14, %v5498_v44, %v4208_v28  ;;  %v4215_v4 = vmul.f32 %v5500_v27, %v4214_v41 }
0x1a78   :  { %v4256_v33 = vmul.f32 %v4212_v43, %v7120_v19  ;;  %4407 = vmatpush.bf16.msrb.mxu3 %v5156_v3 }
0x1a79   :  { %v4216_v59 = vmul.f32 0.5, %v4215_v4 }
0x1a7a   :  { %v4265_v9 = vmul.f32 %v7162_v35, %v4256_v33 }
0x1a7b   :  { %v4217_v62 = vsub.f32 1.5, %v4216_v59 }
0x1a7c   :  { %v5502_v14 = vpop.eup %5501  ;;  %v7192_v42 = vadd.f32 %v7168_v17, %v4265_v9 }
0x1a7d   :  { %v4218_v61 = vmul.f32 %v5500_v27, %v4217_v62  ;;  %v4224_v40 = vmul.f32 %v5502_v14, %v4170_v7  ;;  %vm4230_vm1 = vweird.f32 %v5502_v14 }
0x1a7e   :  { %v4280_v23 = vpack.c.bf16 %v7192_v42, %v7189_v26  ;;  %vm4231_vm6 = vmor %vm4229_vm5, %vm4230_vm1 }
0x1a7f   :  { %v4225_v19 = vmul.f32 %v5502_v14, %v4224_v40  ;;  %v4222_v57 = vsel %vm4221_vm0, %v5500_v27, %v4218_v61 }
0x1a80   :  { %5077 = vmatmul.msk.bf16.gmra.mxu2 %vm225_vm2, %v4280_v23  ;;  %v4257_v51 = vmul.f32 %v4222_v57, %v7126_v12  ;;  %v4153_v12 = vpop.xlane.xlu1 %4152 }
0x1a81   :  { %v4226_v5 = vmul.f32 0.5, %v4225_v19  ;;  %v4163_v16 = vmul.f32 %v4153_v12, %v6219_v38 }
0x1a82   :  { %v4266_v52 = vmul.f32 %v7162_v35, %v4257_v51 }
0x1a83   :  { %v4227_v30 = vsub.f32 1.5, %v4226_v5  ;;  %v4171_v11 = vadd.f32 1e-05, %v4163_v16 }
0x1a84   :  { %v7202_v1 = vadd.f32 %v7168_v17, %v4266_v52 }
0x1a85   :  { %v4228_v37 = vmul.f32 %v5502_v14, %v4227_v30  ;;  %5503 = vrsqrt.f32 %v4171_v11  ;;  %vm4239_vm8 = vweird.f32 %v4171_v11 }
0x1a87   :  { %v4232_v29 = vsel %vm4231_vm6, %v5502_v14, %v4228_v37 }
0x1a88   :  { %v4258_v10 = vmul.f32 %v4232_v29, %v7132_v63 }
0x1a8a   :  { %v4267_v55 = vmul.f32 %v7162_v35, %v4258_v10 }
0x1a8b   :  { %v5504_v63 = vpop.eup %5503 }
0x1a8c   :  { %v7205_v13 = vadd.f32 %v7168_v17, %v4267_v55  ;;  %v4234_v54 = vmul.f32 %v5504_v63, %v4171_v11  ;;  %vm4240_vm7 = vweird.f32 %v5504_v63 }
0x1a8d   :  { %vm4241_vm9 = vmor %vm4239_vm8, %vm4240_vm7 }
0x1a8e   :  { %v4281_v22 = vpack.c.bf16 %v7205_v13, %v7202_v1  ;;  %v4235_v36 = vmul.f32 %v5504_v63, %v4234_v54 }
0x1a90   :  { %5078 = vmatmul.msk.bf16.gmra.mxu2 %vm225_vm2, %v4281_v22  ;;  %v4236_v56 = vmul.f32 0.5, %v4235_v36 }
0x1a92   :  { %v4237_v31 = vsub.f32 1.5, %v4236_v56 }
0x1a94   :  { %v4238_v21 = vmul.f32 %v5504_v63, %v4237_v31 }
0x1a96   :  { %v4242_v53 = vsel %vm4241_vm9, %v5504_v63, %v4238_v21  ;;  %v5198_v63 = vld [vmem:[%s7387_s2 + $0xb8] ss:$0 sm:$0xff] }
0x1a97   :  { %v4259_v32 = vmul.f32 %v4242_v53, %v7138_v58 }
0x1a99   :  { %v4268_v27 = vmul.f32 %v7162_v35, %v4259_v32 }
0x1a9b   :  { %v7229_v7 = vadd.f32 %v7168_v17, %v4268_v27 }
0x1acc   :  { %v4156_v34 = vpop.xlane.xlu2 %4155 }
0x1acd   :  { %v4164_v50 = vmul.f32 %v4156_v34, %v6219_v38 }
0x1acf   :  { %v4172_v49 = vadd.f32 1e-05, %v4164_v50 }
0x1ad1   :  { %5505 = vrsqrt.f32 %v4172_v49  ;;  %vm4249_vm11 = vweird.f32 %v4172_v49 }
0x1ad7   :  { %v5506_v20 = vpop.eup %5505 }
0x1ad8   :  { %v4244_v44 = vmul.f32 %v5506_v20, %v4172_v49  ;;  %vm4250_vm10 = vweird.f32 %v5506_v20 }
0x1ad9   :  { %vm4251_vm12 = vmor %vm4249_vm11, %vm4250_vm10 }
0x1ada   :  { %v4245_v48 = vmul.f32 %v5506_v20, %v4244_v44 }
0x1adc   :  { %v4246_v2 = vmul.f32 0.5, %v4245_v48 }
0x1ade   :  { %v4247_v24 = vsub.f32 1.5, %v4246_v2 }
0x1ae0   :  { %v4248_v18 = vmul.f32 %v5506_v20, %v4247_v24 }
0x1ae2   :  { %v4252_v39 = vsel %vm4251_vm12, %v5506_v20, %v4248_v18 }
0x1ae3   :  { %v4260_v45 = vmul.f32 %v4252_v39, %v7152_v6  ;;  %v5197_v6 = vld [vmem:[%s7387_s2 + $0xb0] ss:$0 sm:$0xff] }
0x1ae5   :  { %v4269_v47 = vmul.f32 %v7162_v35, %v4260_v45 }
0x1ae7   :  { %v7232_v28 = vadd.f32 %v7168_v17, %v4269_v47 }
0x1ae9   :  { %v4282_v58 = vpack.c.bf16 %v7232_v28, %v7229_v7 }
0x1aeb   :  { %5079 = vmatmul.msk.bf16.gmra.mxu2 %vm225_vm2, %v4282_v58 }
0x1af3   :  { %v4322_v41 = vpop.f32.mrf.mxu2 }
0x1af4   :  { %v4323_v43 = vadd.f32 %v5197_v6, %v4322_v41 }
0x1af6   :  { %v4342_v35 = vmax.f32 %v4323_v43, 0.0 }
0x1afb   :  { %v4324_v4 = vpop.f32.mrf.mxu2 }
0x1afc   :  { %v4325_v33 = vadd.f32 %v5197_v6, %v4324_v4 }
0x1afe   :  { %v4343_v25 = vmax.f32 %v4325_v33, 0.0 }
0x1b00   :  { %v4350_v59 = vpack.c.bf16 %v4343_v25, %v4342_v35 }
0x1b02   :  { %5096 = vmatmul.msk.bf16.vlgmr.msrb.gmra.mxu3 %vm428_vm3, %v4350_v59 }
0x1b03   :  { %v4327_v17 = vpop.f32.mrf.mxu2 }
0x1b04   :  { %v4328_v9 = vadd.f32 %v5197_v6, %v4327_v17 }
0x1b06   :  { %v4344_v61 = vmax.f32 %v4328_v9, 0.0 }
0x1b0b   :  { %v4329_v62 = vpop.f32.mrf.mxu2 }
0x1b0c   :  { %v4330_v14 = vadd.f32 %v5197_v6, %v4329_v62 }
0x1b0e   :  { %v4345_v40 = vmax.f32 %v4330_v14, 0.0 }
0x1b10   :  { %v4351_v23 = vpack.c.bf16 %v4345_v40, %v4344_v61 }
0x1b12   :  { %5097 = vmatmul.msk.bf16.gmra.mxu3 %vm428_vm3, %v4351_v23 }
0x1b13   :  { %v4332_v19 = vpop.f32.mrf.mxu2 }
0x1b14   :  { %v4333_v57 = vadd.f32 %v5197_v6, %v4332_v19 }
0x1b16   :  { %v4346_v51 = vmax.f32 %v4333_v57, 0.0 }
0x1b1b   :  { %v4334_v5 = vpop.f32.mrf.mxu2 }
0x1b1c   :  { %v4335_v30 = vadd.f32 %v5197_v6, %v4334_v5 }
0x1b1e   :  { %v4347_v37 = vmax.f32 %v4335_v30, 0.0 }
0x1b20   :  { %v4352_v29 = vpack.c.bf16 %v4347_v37, %v4346_v51 }
0x1b22   :  { %5098 = vmatmul.msk.bf16.gmra.mxu3 %vm428_vm3, %v4352_v29 }
0x1b6e   :  { %v4337_v10 = vpop.f32.mrf.mxu2 }
0x1b6f   :  { %v4338_v52 = vadd.f32 %v5197_v6, %v4337_v10 }
0x1b71   :  { %v4348_v12 = vmax.f32 %v4338_v52, 0.0 }
0x1b76   :  { %v4339_v55 = vpop.f32.mrf.mxu2 }
0x1b77   :  { %v4340_v22 = vadd.f32 %v5197_v6, %v4339_v55 }
0x1b79   :  { %v4349_v16 = vmax.f32 %v4340_v22, 0.0 }
0x1b7b   :  { %v4353_v11 = vpack.c.bf16 %v4349_v16, %v4348_v12 }
0x1b7d   :  { %5099 = vmatmul.msk.bf16.gmra.mxu3 %vm428_vm3, %v4353_v11 }
0x1b85   :  { %v4409_v54 = vpop.f32.mrf.mxu3 }
0x1b86   :  { %v4410_v36 = vadd.f32 %v5198_v63, %v4409_v54 }
0x1b88   :  { %v4429_v34 = vadd.f32 %v4410_v36, %v7175_v8 }
0x1b8a   :  { %v4439_v50 = vsel %vm225_vm2, %v4429_v34, 0.0 }
0x1b8b   :  { %4440 = vadd.xlane.f32.xlu0 %v4439_v50 }
0x1b8d   :  { %v4411_v49 = vpop.f32.mrf.mxu3 }
0x1b8e   :  { %v4412_v56 = vadd.f32 %v5198_v63, %v4411_v49 }
0x1b90   :  { %v4430_v0 = vadd.f32 %v4412_v56, %v7178_v46 }
0x1b92   :  { %v4442_v31 = vsel %vm225_vm2, %v4430_v0, 0.0 }
0x1b93   :  { %4443 = vadd.xlane.f32.xlu1 %v4442_v31 }
0x1b95   :  { %v4414_v15 = vpop.f32.mrf.mxu3 }
0x1b96   :  { %v4415_v20 = vadd.f32 %v5198_v63, %v4414_v15 }
0x1b98   :  { %v4431_v21 = vadd.f32 %v4415_v20, %v7189_v26 }
0x1b9a   :  { %v4445_v44 = vsel %vm225_vm2, %v4431_v21, 0.0 }
0x1b9b   :  { %4446 = vadd.xlane.f32.xlu2 %v4445_v44 }
0x1b9d   :  { %v4416_v48 = vpop.f32.mrf.mxu3 }
0x1b9e   :  { %v4417_v60 = vadd.f32 %v5198_v63, %v4416_v48 }
0x1ba0   :  { %v4432_v8 = vadd.f32 %v4417_v60, %v7192_v42 }
0x1ba2   :  { %v4448_v53 = vsel %vm225_vm2, %v4432_v8, 0.0 }
0x1ba3   :  { %4449 = vadd.xlane.f32.xlu0 %v4448_v53 }
0x1ba5   :  { %v4419_v2 = vpop.f32.mrf.mxu3 }
0x1ba6   :  { %v4420_v24 = vadd.f32 %v5198_v63, %v4419_v2 }
0x1ba8   :  { %v4433_v46 = vadd.f32 %v4420_v24, %v7202_v1 }
0x1baa   :  { %v4451_v3 = vsel %vm225_vm2, %v4433_v46, 0.0 }
0x1bab   :  { %4452 = vadd.xlane.f32.xlu1 %v4451_v3 }
0x1bad   :  { %v4421_v32 = vpop.f32.mrf.mxu3 }
0x1bae   :  { %v4422_v18 = vadd.f32 %v5198_v63, %v4421_v32 }
0x1bb0   :  { %v4434_v26 = vadd.f32 %v4422_v18, %v7205_v13 }
0x1bb2   :  { %v4454_v39 = vsel %vm225_vm2, %v4434_v26, 0.0 }
0x1bb3   :  { %4455 = vadd.xlane.f32.xlu2 %v4454_v39 }
0x1bfe   :  { %v4441_v45 = vpop.xlane.xlu0 %4440 }
0x1bff   :  { %v4463_v42 = vmul.f32 %v4441_v45, %v6219_v38 }
0x1c00   :  { %v4424_v27 = vpop.f32.mrf.mxu3 }
0x1c01   :  { %v7260_v47 = vsub.f32 %v4429_v34, %v4463_v42  ;;  %v4425_v58 = vadd.f32 %v5198_v63, %v4424_v27  ;;  %v7317_v27 = vld [vmem:[%s7387_s2 + $0xc0] ss:$0 sm:$0xff] }
0x1c03   :  { %v4435_v41 = vadd.f32 %v4425_v58, %v7229_v7  ;;  %v4479_v1 = vmul.f32 %v7260_v47, %v7260_v47 }
0x1c05   :  { %v4487_v6 = vsel %vm225_vm2, %v4479_v1, 0.0  ;;  %v4457_v43 = vsel %vm225_vm2, %v4435_v41, 0.0  ;;  %v7322_v1 = vld [vmem:[%s7387_s2 + $0xc1] ss:$0 sm:$0xff] }
0x1c06   :  { %4488 = vadd.xlane.f32.xlu2 %v4487_v6  ;;  %4458 = vadd.xlane.f32.xlu0 %v4457_v43  ;;  %v4444_v13 = vpop.xlane.xlu1 %4443 }
0x1c07   :  { %v4464_v4 = vmul.f32 %v4444_v13, %v6219_v38 }
0x1c08   :  { %v4426_v33 = vpop.f32.mrf.mxu3 }
0x1c09   :  { %v7268_v35 = vsub.f32 %v4430_v0, %v4464_v4  ;;  %v4427_v25 = vadd.f32 %v5198_v63, %v4426_v33 }
0x1c0b   :  { %v4436_v59 = vadd.f32 %v4427_v25, %v7232_v28  ;;  %v4480_v7 = vmul.f32 %v7268_v35, %v7268_v35 }
0x1c0d   :  { %v4460_v17 = vsel %vm225_vm2, %v4436_v59, 0.0  ;;  %v4490_v9 = vsel %vm225_vm2, %v4480_v7, 0.0 }
0x1c0e   :  { %v4447_v62 = vpop.xlane.xlu2 %4446  ;;  %4461 = vadd.xlane.f32.xlu1 %v4460_v17  ;;  %4491 = vadd.xlane.f32.xlu0 %v4490_v9 }
0x1c0f   :  { %v4465_v14 = vmul.f32 %v4447_v62, %v6219_v38 }
0x1c11   :  { %v7276_v61 = vsub.f32 %v4431_v21, %v4465_v14 }
0x1c13   :  { %v4481_v40 = vmul.f32 %v7276_v61, %v7276_v61 }
0x1c15   :  { %v4493_v23 = vsel %vm225_vm2, %v4481_v40, 0.0 }
0x1c16   :  { %v4450_v28 = vpop.xlane.xlu0 %4449  ;;  %4494 = vadd.xlane.f32.xlu1 %v4493_v23 }
0x1c17   :  { %v4466_v19 = vmul.f32 %v4450_v28, %v6219_v38 }
0x1c19   :  { %v7282_v57 = vsub.f32 %v4432_v8, %v4466_v19 }
0x1c1b   :  { %v4482_v5 = vmul.f32 %v7282_v57, %v7282_v57 }
0x1c1d   :  { %v4496_v30 = vsel %vm225_vm2, %v4482_v5, 0.0 }
0x1c1e   :  { %4497 = vadd.xlane.f32.xlu2 %v4496_v30  ;;  %v4453_v51 = vpop.xlane.xlu1 %4452 }
0x1c1f   :  { %v4467_v37 = vmul.f32 %v4453_v51, %v6219_v38 }
0x1c21   :  { %v7288_v29 = vsub.f32 %v4433_v46, %v4467_v37 }
0x1c23   :  { %v4483_v10 = vmul.f32 %v7288_v29, %v7288_v29 }
0x1c25   :  { %v4499_v52 = vsel %vm225_vm2, %v4483_v10, 0.0 }
0x1c26   :  { %v4456_v55 = vpop.xlane.xlu2 %4455  ;;  %4500 = vadd.xlane.f32.xlu0 %v4499_v52 }
0x1c27   :  { %v4468_v22 = vmul.f32 %v4456_v55, %v6219_v38 }
0x1c29   :  { %v7294_v12 = vsub.f32 %v4434_v26, %v4468_v22 }
0x1c2b   :  { %v4484_v16 = vmul.f32 %v7294_v12, %v7294_v12 }
0x1c2d   :  { %v4502_v11 = vsel %vm225_vm2, %v4484_v16, 0.0 }
0x1c2e   :  { %4503 = vadd.xlane.f32.xlu1 %v4502_v11 }
0x1c79   :  { %v4489_v63 = vpop.xlane.xlu2 %4488  ;;  %v4459_v54 = vpop.xlane.xlu0 %4458 }
0x1c7a   :  { %v4511_v36 = vmul.f32 %v4489_v63, %v6219_v38  ;;  %v4469_v34 = vmul.f32 %v4459_v54, %v6219_v38 }
0x1c7c   :  { %v4519_v50 = vadd.f32 1e-05, %v4511_v36  ;;  %v7301_v49 = vsub.f32 %v4435_v41, %v4469_v34 }
0x1c7e   :  { %5507 = vrsqrt.f32 %v4519_v50  ;;  %v4485_v56 = vmul.f32 %v7301_v49, %v7301_v49  ;;  %vm4533_vm13 = vweird.f32 %v4519_v50 }
0x1c80   :  { %v4505_v0 = vsel %vm225_vm2, %v4485_v56, 0.0 }
0x1c81   :  { %4506 = vadd.xlane.f32.xlu2 %v4505_v0  ;;  %v4492_v31 = vpop.xlane.xlu0 %4491  ;;  %v4462_v15 = vpop.xlane.xlu1 %4461 }
0x1c82   :  { %v4512_v20 = vmul.f32 %v4492_v31, %v6219_v38  ;;  %v4470_v21 = vmul.f32 %v4462_v15, %v6219_v38 }
0x1c84   :  { %v5508_v44 = vpop.eup %5507  ;;  %v4520_v48 = vadd.f32 1e-05, %v4512_v20  ;;  %v7308_v60 = vsub.f32 %v4436_v59, %v4470_v21 }
0x1c85   :  { %v4528_v8 = vmul.f32 %v5508_v44, %v4519_v50  ;;  %vm4534_vm3 = vweird.f32 %v5508_v44 }
0x1c86   :  { %5509 = vrsqrt.f32 %v4520_v48  ;;  %v4486_v53 = vmul.f32 %v7308_v60, %v7308_v60  ;;  %vm4535_vm14 = vmor %vm4533_vm13, %vm4534_vm3  ;;  %vm4543_vm4 = vweird.f32 %v4520_v48 }
0x1c87   :  { %v4529_v2 = vmul.f32 %v5508_v44, %v4528_v8 }
0x1c88   :  { %v4508_v24 = vsel %vm225_vm2, %v4486_v53, 0.0 }
0x1c89   :  { %v4530_v46 = vmul.f32 0.5, %v4529_v2  ;;  %4509 = vadd.xlane.f32.xlu0 %v4508_v24  ;;  %v4495_v3 = vpop.xlane.xlu1 %4494 }
0x1c8a   :  { %v4513_v32 = vmul.f32 %v4495_v3, %v6219_v38 }
0x1c8b   :  { %v4531_v18 = vsub.f32 1.5, %v4530_v46 }
0x1c8c   :  { %v5510_v26 = vpop.eup %5509  ;;  %v4521_v39 = vadd.f32 1e-05, %v4513_v32 }
0x1c8d   :  { %v4532_v45 = vmul.f32 %v5508_v44, %v4531_v18  ;;  %v4538_v42 = vmul.f32 %v5510_v26, %v4520_v48  ;;  %vm4544_vm15 = vweird.f32 %v5510_v26 }
0x1c8e   :  { %5511 = vrsqrt.f32 %v4521_v39  ;;  %vm4545_vm0 = vmor %vm4543_vm4, %vm4544_vm15  ;;  %vm4553_vm5 = vweird.f32 %v4521_v39 }
0x1c8f   :  { %v4536_v58 = vsel %vm4535_vm14, %v5508_v44, %v4532_v45  ;;  %v4539_v41 = vmul.f32 %v5510_v26, %v4538_v42 }
0x1c90   :  { %v4607_v6 = vmul.f32 %v4536_v58, %v7260_v47 }
0x1c91   :  { %v4540_v43 = vmul.f32 0.5, %v4539_v41  ;;  %v4498_v13 = vpop.xlane.xlu2 %4497 }
0x1c92   :  { %v4616_v4 = vmul.f32 %v7317_v27, %v4607_v6  ;;  %v4514_v33 = vmul.f32 %v4498_v13, %v6219_v38 }
0x1c93   :  { %v4541_v25 = vsub.f32 1.5, %v4540_v43 }
0x1c94   :  { %v5512_v59 = vpop.eup %5511  ;;  %v4625_v7 = vadd.f32 %v7322_v1, %v4616_v4  ;;  %v4522_v17 = vadd.f32 1e-05, %v4514_v33 }
0x1c95   :  { %v4542_v9 = vmul.f32 %v5510_v26, %v4541_v25  ;;  %v4548_v62 = vmul.f32 %v5512_v59, %v4521_v39  ;;  %vm4554_vm1 = vweird.f32 %v5512_v59 }
0x1c96   :  { %4633 = vst.msk [vmem:[%s7388_s3] sm:$0xff] %vm225_vm2, %v4625_v7  ;;  %5513 = vrsqrt.f32 %v4522_v17  ;;  %vm4555_vm6 = vmor %vm4553_vm5, %vm4554_vm1  ;;  %vm4563_vm8 = vweird.f32 %v4522_v17 }
0x1c97   :  { %v4546_v47 = vsel %vm4545_vm0, %v5510_v26, %v4542_v9  ;;  %v4549_v14 = vmul.f32 %v5512_v59, %v4548_v62 }
0x1c98   :  { %v4608_v40 = vmul.f32 %v4546_v47, %v7268_v35 }
0x1c99   :  { %v4550_v23 = vmul.f32 0.5, %v4549_v14  ;;  %v4501_v28 = vpop.xlane.xlu0 %4500 }
0x1c9a   :  { %v4617_v19 = vmul.f32 %v7317_v27, %v4608_v40  ;;  %v4515_v5 = vmul.f32 %v4501_v28, %v6219_v38 }
0x1c9b   :  { %v4551_v30 = vsub.f32 1.5, %v4550_v23 }
0x1c9c   :  { %v5514_v51 = vpop.eup %5513  ;;  %v4626_v37 = vadd.f32 %v7322_v1, %v4617_v19  ;;  %v4523_v10 = vadd.f32 1e-05, %v4515_v5 }
0x1c9d   :  { %v4552_v52 = vmul.f32 %v5512_v59, %v4551_v30  ;;  %v4558_v55 = vmul.f32 %v5514_v51, %v4522_v17  ;;  %vm4564_vm7 = vweird.f32 %v5514_v51 }
0x1c9e   :  { %4634 = vst.msk [vmem:[%s7388_s3 + $0x8] sm:$0xff] %vm225_vm2, %v4626_v37  ;;  %5515 = vrsqrt.f32 %v4523_v10  ;;  %vm4565_vm9 = vmor %vm4563_vm8, %vm4564_vm7  ;;  %vm4573_vm11 = vweird.f32 %v4523_v10 }
0x1c9f   :  { %v4556_v35 = vsel %vm4555_vm6, %v5512_v59, %v4552_v52  ;;  %v4559_v22 = vmul.f32 %v5514_v51, %v4558_v55 }
0x1ca0   :  { %v4609_v16 = vmul.f32 %v4556_v35, %v7276_v61 }
0x1ca1   :  { %v4560_v11 = vmul.f32 0.5, %v4559_v22  ;;  %v4504_v63 = vpop.xlane.xlu1 %4503 }
0x1ca2   :  { %v4618_v54 = vmul.f32 %v7317_v27, %v4609_v16  ;;  %v4516_v36 = vmul.f32 %v4504_v63, %v6219_v38 }
0x1ca3   :  { %v4561_v34 = vsub.f32 1.5, %v4560_v11 }
0x1ca4   :  { %v5516_v50 = vpop.eup %5515  ;;  %v4627_v56 = vadd.f32 %v7322_v1, %v4618_v54  ;;  %v4524_v0 = vadd.f32 1e-05, %v4516_v36 }
0x1ca5   :  { %v4562_v31 = vmul.f32 %v5514_v51, %v4561_v34  ;;  %v4568_v15 = vmul.f32 %v5516_v50, %v4523_v10  ;;  %vm4574_vm10 = vweird.f32 %v5516_v50 }
0x1ca6   :  { %4635 = vst.msk [vmem:[%s7388_s3 + $0x10] sm:$0xff] %vm225_vm2, %v4627_v56  ;;  %5517 = vrsqrt.f32 %v4524_v0  ;;  %vm4575_vm12 = vmor %vm4573_vm11, %vm4574_vm10  ;;  %vm4583_vm13 = vweird.f32 %v4524_v0 }
0x1ca7   :  { %v4566_v61 = vsel %vm4565_vm9, %v5514_v51, %v4562_v31  ;;  %v4569_v20 = vmul.f32 %v5516_v50, %v4568_v15 }
0x1ca8   :  { %v4610_v21 = vmul.f32 %v4566_v61, %v7282_v57 }
0x1ca9   :  { %v4570_v44 = vmul.f32 0.5, %v4569_v20 }
0x1caa   :  { %v4619_v48 = vmul.f32 %v7317_v27, %v4610_v21 }
0x1cab   :  { %v4571_v8 = vsub.f32 1.5, %v4570_v44 }
0x1cac   :  { %v5518_v53 = vpop.eup %5517  ;;  %v4628_v2 = vadd.f32 %v7322_v1, %v4619_v48 }
0x1cad   :  { %v4572_v24 = vmul.f32 %v5516_v50, %v4571_v8  ;;  %v4578_v46 = vmul.f32 %v5518_v53, %v4524_v0  ;;  %vm4584_vm3 = vweird.f32 %v5518_v53 }
0x1cae   :  { %4636 = vst.msk [vmem:[%s7388_s3 + $0x18] sm:$0xff] %vm225_vm2, %v4628_v2  ;;  %vm4585_vm14 = vmor %vm4583_vm13, %vm4584_vm3 }
0x1caf   :  { %v4576_v3 = vsel %vm4575_vm12, %v5516_v50, %v4572_v24  ;;  %v4579_v32 = vmul.f32 %v5518_v53, %v4578_v46 }
0x1cb0   :  { %v4611_v57 = vmul.f32 %v4576_v3, %v7288_v29 }
0x1cb1   :  { %v4580_v18 = vmul.f32 0.5, %v4579_v32 }
0x1cb2   :  { %v4620_v26 = vmul.f32 %v7317_v27, %v4611_v57 }
0x1cb3   :  { %v4581_v39 = vsub.f32 1.5, %v4580_v18 }
0x1cb4   :  { %v4629_v45 = vadd.f32 %v7322_v1, %v4620_v26 }
0x1cb5   :  { %v4582_v42 = vmul.f32 %v5518_v53, %v4581_v39 }
0x1cb6   :  { %4637 = vst.msk [vmem:[%s7388_s3 + $0x20] sm:$0xff] %vm225_vm2, %v4629_v45 }
0x1cb7   :  { %v4586_v58 = vsel %vm4585_vm14, %v5518_v53, %v4582_v42 }
0x1cb8   :  { %v4612_v41 = vmul.f32 %v4586_v58, %v7294_v12 }
0x1cba   :  { %v4621_v29 = vmul.f32 %v7317_v27, %v4612_v41 }
0x1cbc   :  { %v4630_v6 = vadd.f32 %v7322_v1, %v4621_v29 }
0x1cbe   :  { %4638 = vst.msk [vmem:[%s7388_s3 + $0x28] sm:$0xff] %vm225_vm2, %v4630_v6 }
0x1cf4   :  { %v4507_v43 = vpop.xlane.xlu2 %4506 }
0x1cf5   :  { %v4517_v13 = vmul.f32 %v4507_v43, %v6219_v38 }
0x1cf7   :  { %v4525_v4 = vadd.f32 1e-05, %v4517_v13 }
0x1cf9   :  { %5519 = vrsqrt.f32 %v4525_v4  ;;  %vm4593_vm4 = vweird.f32 %v4525_v4 }
0x1cfc   :  { %v4510_v33 = vpop.xlane.xlu0 %4509 }
0x1cfd   :  { %v4518_v25 = vmul.f32 %v4510_v33, %v6219_v38 }
0x1cff   :  { %v5520_v59 = vpop.eup %5519  ;;  %v4526_v7 = vadd.f32 1e-05, %v4518_v25 }
0x1d00   :  { %v4588_v12 = vmul.f32 %v5520_v59, %v4525_v4  ;;  %vm4594_vm15 = vweird.f32 %v5520_v59 }
0x1d01   :  { %5521 = vrsqrt.f32 %v4526_v7  ;;  %vm4595_vm0 = vmor %vm4593_vm4, %vm4594_vm15  ;;  %vm4603_vm5 = vweird.f32 %v4526_v7 }
0x1d02   :  { %v4589_v17 = vmul.f32 %v5520_v59, %v4588_v12 }
0x1d04   :  { %v4590_v9 = vmul.f32 0.5, %v4589_v17 }
0x1d06   :  { %v4591_v62 = vsub.f32 1.5, %v4590_v9 }
0x1d07   :  { %v5522_v47 = vpop.eup %5521 }
0x1d08   :  { %v4592_v14 = vmul.f32 %v5520_v59, %v4591_v62  ;;  %v4598_v40 = vmul.f32 %v5522_v47, %v4526_v7  ;;  %vm4604_vm1 = vweird.f32 %v5522_v47 }
0x1d09   :  { %vm4605_vm6 = vmor %vm4603_vm5, %vm4604_vm1 }
0x1d0a   :  { %v4596_v23 = vsel %vm4595_vm0, %v5520_v59, %v4592_v14  ;;  %v4599_v28 = vmul.f32 %v5522_v47, %v4598_v40 }
0x1d0b   :  { %v4613_v19 = vmul.f32 %v4596_v23, %v7301_v49 }
0x1d0c   :  { %v4600_v5 = vmul.f32 0.5, %v4599_v28 }
0x1d0d   :  { %v4622_v38 = vmul.f32 %v7317_v27, %v4613_v19 }
0x1d0e   :  { %v4601_v30 = vsub.f32 1.5, %v4600_v5 }
0x1d0f   :  { %v4631_v51 = vadd.f32 %v7322_v1, %v4622_v38 }
0x1d10   :  { %v4602_v37 = vmul.f32 %v5522_v47, %v4601_v30 }
0x1d11   :  { %4639 = vst.msk [vmem:[%s7388_s3 + $0x30] sm:$0xff] %vm225_vm2, %v4631_v51 }
0x1d12   :  { %v4606_v10 = vsel %vm4605_vm6, %v5522_v47, %v4602_v37 }
0x1d13   :  { %v4614_v52 = vmul.f32 %v4606_v10, %v7308_v60 }
0x1d15   :  { %v4623_v49 = vmul.f32 %v7317_v27, %v4614_v52 }
0x1d17   :  { %v4632_v55 = vadd.f32 %v7322_v1, %v4623_v49 }
0x1d19   :  { %4640 = vst.msk [vmem:[%s7388_s3 + $0x38] sm:$0xff] %vm225_vm2, %v4632_v55 }

</bundles_post_ra>
